<compile_context>
chip_gen: v5e
topology: v5e:2x2
jax: 0.10.0
libtpu: 0.0.40
codegen_flags: <defaults>
</compile_context>

<pallas_src>
import functools

import jax
import jax.numpy as jnp
from jax import lax
from jax.experimental import pallas as pl
from jax.experimental.pallas import tpu as pltpu


def _lstm_chunk_kernel(x_ref, h0_ref, c0_ref, wih0_ref, whh0_ref,
                       wih1_ref, whh1_ref, b0_ref, b1_ref,
                       h2_ref, hn_ref, cn_ref,
                       h_st, c_st,
                       *, seq_len, chunk_len, mask_tail):
    """One time-chunk of the 2-layer LSTM; h/c carried in VMEM scratch."""
    Bp = x_ref.shape[1]
    H = whh0_ref.shape[0]
    chunk = pl.program_id(0)

    # First chunk: seed the carried state from (h0, c0).
    @pl.when(chunk == 0)
    def _():
        h_st[...] = h0_ref[...]
        c_st[...] = c0_ref[...]

    # Loop-invariant bias broadcasts (hoisted out of the time loop).
    b0 = jnp.broadcast_to(b0_ref[...], (Bp, 4 * H))
    b1 = jnp.broadcast_to(b1_ref[...], (Bp, 4 * H))

    def gates_to_hc(gates, c_prev):
        # sigmoid(x) = 0.5*tanh(0.5*x) + 0.5 : one EUP op; muls/adds ride the VPU.
        i = 0.5 * jnp.tanh(0.5 * gates[:, 0 * H:1 * H]) + 0.5
        f = 0.5 * jnp.tanh(0.5 * gates[:, 1 * H:2 * H]) + 0.5
        g = jnp.tanh(gates[:, 2 * H:3 * H])
        o = 0.5 * jnp.tanh(0.5 * gates[:, 3 * H:4 * H]) + 0.5
        c_new = f * c_prev + i * g
        h_new = o * jnp.tanh(c_new)
        return h_new, c_new

    def step(t, carry):
        h0p, c0p, h1p, c1p = carry

        # Layer 0: small fused input projection (K = padded I, off the recurrent
        # chain) + recurrent matmul.  bf16 operands, f32 accumulation.
        gates0 = (
            jnp.dot(x_ref[t].astype(jnp.bfloat16), wih0_ref[...],
                    preferred_element_type=jnp.float32)
            + jnp.dot(h0p.astype(jnp.bfloat16), whh0_ref[...],
                      preferred_element_type=jnp.float32)
            + b0)
        h0n, c0n = gates_to_hc(gates0, c0p)

        # Layer 1 (inter-layer dropout == identity at inference).
        gates1 = (
            jnp.dot(h0n.astype(jnp.bfloat16), wih1_ref[...],
                    preferred_element_type=jnp.float32)
            + jnp.dot(h1p.astype(jnp.bfloat16), whh1_ref[...],
                      preferred_element_type=jnp.float32)
            + b1)
        h1n, c1n = gates_to_hc(gates1, c1p)

        if mask_tail:  # static: only emitted when S was padded up to a chunk multiple
            valid = (chunk * chunk_len + t) < seq_len
            h0n = jnp.where(valid, h0n, h0p)
            c0n = jnp.where(valid, c0n, c0p)
            h1n = jnp.where(valid, h1n, h1p)
            c1n = jnp.where(valid, c1n, c1p)

        # Lane-dense (Bp, H) store of the top-layer hidden state for this step.
        h2_ref[t] = h1n
        return (h0n, c0n, h1n, c1n)

    init = (h_st[0], c_st[0], h_st[1], c_st[1])
    h0f, c0f, h1f, c1f = lax.fori_loop(0, chunk_len, step, init, unroll=True)

    # Persist the carried state for the next chunk.
    h_st[0] = h0f
    h_st[1] = h1f
    c_st[0] = c0f
    c_st[1] = c1f

    # Final chunk: emit (h_n, c_n).
    @pl.when(chunk == pl.num_programs(0) - 1)
    def _():
        hn_ref[...] = h_st[...]
        cn_ref[...] = c_st[...]


@jax.jit
def lstm_forward(x, h0, c0, params):
    """x: (B, S, I) batch_first; h0/c0: (2, B, H). Returns (out, (h_n, c_n))."""
    B, S, I = x.shape
    L, _, H = h0.shape
    assert L == 2

    # Static tiling decisions (shapes are static under jit).
    B_pad = max(8, -(-B // 8) * 8)          # sublane-dense batch
    I_pad = -(-I // 8) * 8                   # pad feature dim (7 -> 8)
    Ts = S if S <= 16 else 16                # unrolled steps per grid chunk
    S_pad = -(-S // Ts) * Ts
    n_chunks = S_pad // Ts
    mask_tail = (S_pad != S)

    # Time-major, zero-padded layouts.
    x_tm = jnp.transpose(x, (1, 0, 2))                                    # (S, B, I)
    x_tm = jnp.pad(x_tm, ((0, S_pad - S), (0, B_pad - B), (0, I_pad - I)))
    h0_p = jnp.pad(h0, ((0, 0), (0, B_pad - B), (0, 0)))
    c0_p = jnp.pad(c0, ((0, 0), (0, B_pad - B), (0, 0)))

    # bf16 weights (f32 accumulation & gate math stay f32).
    wih0 = jnp.pad(params["wih0_t"], ((0, I_pad - I), (0, 0))).astype(jnp.bfloat16)
    whh0 = params["whh0_t"].astype(jnp.bfloat16)
    wih1 = params["wih1_t"].astype(jnp.bfloat16)
    whh1 = params["whh1_t"].astype(jnp.bfloat16)
    b0 = params["b0"]
    b1 = params["b1"]

    kernel = functools.partial(_lstm_chunk_kernel, seq_len=S, chunk_len=Ts,
                               mask_tail=mask_tail)

    h2_tm, h_n, c_n = pl.pallas_call(
        kernel,
        out_shape=(
            jax.ShapeDtypeStruct((S_pad, B_pad, H), jnp.float32),         # top-layer h sequence
            jax.ShapeDtypeStruct((L, B_pad, H), jnp.float32),             # h_n
            jax.ShapeDtypeStruct((L, B_pad, H), jnp.float32),             # c_n
        ),
        grid=(n_chunks,),
        in_specs=[
            pl.BlockSpec((Ts, B_pad, I_pad), lambda t: (t, 0, 0)),        # x chunk
            pl.BlockSpec((L, B_pad, H), lambda t: (0, 0, 0)),             # h0
            pl.BlockSpec((L, B_pad, H), lambda t: (0, 0, 0)),             # c0
            pl.BlockSpec((I_pad, 4 * H), lambda t: (0, 0)),               # W_ih0^T (bf16)
            pl.BlockSpec((H, 4 * H), lambda t: (0, 0)),                   # W_hh0^T (bf16)
            pl.BlockSpec((H, 4 * H), lambda t: (0, 0)),                   # W_ih1^T (bf16)
            pl.BlockSpec((H, 4 * H), lambda t: (0, 0)),                   # W_hh1^T (bf16)
            pl.BlockSpec((1, 4 * H), lambda t: (0, 0)),                   # b0 (= b_ih0 + b_hh0)
            pl.BlockSpec((1, 4 * H), lambda t: (0, 0)),                   # b1 (= b_ih1 + b_hh1)
        ],
        out_specs=[
            pl.BlockSpec((Ts, B_pad, H), lambda t: (t, 0, 0)),
            pl.BlockSpec((L, B_pad, H), lambda t: (0, 0, 0)),
            pl.BlockSpec((L, B_pad, H), lambda t: (0, 0, 0)),
        ],
        scratch_shapes=[
            pltpu.VMEM((L, B_pad, H), jnp.float32),                       # carried h
            pltpu.VMEM((L, B_pad, H), jnp.float32),                       # carried c
        ],
        compiler_params=pltpu.CompilerParams(
            dimension_semantics=("arbitrary",),                           # sequential recurrence
        ),
    )(x_tm, h0_p, c0_p, wih0, whh0, wih1, whh1, b0, b1)

    # FC head outside the kernel: lane-dense (B*S, 128) x (128, 1) handled by XLA.
    h2 = jnp.transpose(h2_tm[:S, :B, :], (1, 0, 2))                       # (B, S, H)
    out = h2 @ params["wfc_t"] + params["bfc"]                            # (B, S, O)
    return out, (h_n[:, :B, :], c_n[:, :B, :])


def init_params(key, input_size=7, hidden_size=128, output_size=1):
    """Deterministic parameter init (uniform +-1/sqrt(H), like PyTorch default)."""
    H, I, O = hidden_size, input_size, output_size
    k = 1.0 / jnp.sqrt(jnp.float32(H))
    keys = jax.random.split(key, 10)
    u = lambda kk, shape: jax.random.uniform(kk, shape, jnp.float32, -k, k)

    w_ih0 = u(keys[0], (4 * H, I))
    w_hh0 = u(keys[1], (4 * H, H))
    b_ih0 = u(keys[2], (4 * H,))
    b_hh0 = u(keys[3], (4 * H,))
    w_ih1 = u(keys[4], (4 * H, H))
    w_hh1 = u(keys[5], (4 * H, H))
    b_ih1 = u(keys[6], (4 * H,))
    b_hh1 = u(keys[7], (4 * H,))
    w_fc = u(keys[8], (O, H))
    b_fc = u(keys[9], (O,))

    return {
        "wih0_t": w_ih0.T, "whh0_t": w_hh0.T, "b0": (b_ih0 + b_hh0)[None, :],
        "wih1_t": w_ih1.T, "whh1_t": w_hh1.T, "b1": (b_ih1 + b_hh1)[None, :],
        "wfc_t": w_fc.T, "bfc": b_fc[None, :],
    }


def _reference_forward(x, h0, c0, params, matmul_dtype=jnp.float32):
    """Pure-JAX reference.  matmul_dtype=f32 -> PyTorch semantics; bf16 -> matches
    the kernel's matmul numerics (bf16 operands, f32 accumulation)."""
    B, S, I = x.shape
    H = h0.shape[-1]

    def mm(a, w):
        return jnp.dot(a.astype(matmul_dtype), w.astype(matmul_dtype),
                       preferred_element_type=jnp.float32)

    def cell(x_in, h_prev, c_prev, wih_t, whh_t, b):
        g = mm(x_in, wih_t) + mm(h_prev, whh_t) + b
        i = jax.nn.sigmoid(g[:, :H])
        f = jax.nn.sigmoid(g[:, H:2 * H])
        gg = jnp.tanh(g[:, 2 * H:3 * H])
        o = jax.nn.sigmoid(g[:, 3 * H:])
        c_new = f * c_prev + i * gg
        return o * jnp.tanh(c_new), c_new

    h = [h0[0], h0[1]]
    c = [c0[0], c0[1]]
    outs = []
    for t in range(S):
        h[0], c[0] = cell(x[:, t, :], h[0], c[0],
                          params["wih0_t"], params["whh0_t"], params["b0"])
        h[1], c[1] = cell(h[0], h[1], c[1],
                          params["wih1_t"], params["whh1_t"], params["b1"])
        outs.append(h[1] @ params["wfc_t"] + params["bfc"])
    return jnp.stack(outs, axis=1), (jnp.stack(h), jnp.stack(c))


if __name__ == "__main__":
    B, S, I, H, L, O = 2, 8, 7, 128, 2, 1

    key = jax.random.PRNGKey(0)
    kx, kh, kc, kp = jax.random.split(key, 4)
    x = jax.random.normal(kx, (B, S, I), jnp.float32)
    h0 = jax.random.normal(kh, (L, B, H), jnp.float32)
    c0 = jax.random.normal(kc, (L, B, H), jnp.float32)
    params = init_params(kp, input_size=I, hidden_size=H, output_size=O)

    out, (h_n, c_n) = lstm_forward(x, h0, c0, params)
    jax.block_until_ready((out, h_n, c_n))

    assert out.shape == (B, S, O) and h_n.shape == (L, B, H) and c_n.shape == (L, B, H)

    # Tight check against a reference that mirrors the kernel's bf16 matmul numerics.
    mref_out, (mref_h, mref_c) = _reference_forward(x, h0, c0, params, jnp.bfloat16)
    assert jnp.max(jnp.abs(out - mref_out)) < 5e-3
    assert jnp.max(jnp.abs(h_n - mref_h)) < 5e-3
    assert jnp.max(jnp.abs(c_n - mref_c)) < 5e-3

    # Looser check against the full-f32 (PyTorch-equivalent) reference; the gap is
    # bf16 weight rounding accumulated over the recurrence.
    ref_out, (ref_h, ref_c) = _reference_forward(x, h0, c0, params)
    assert jnp.max(jnp.abs(out - ref_out)) < 1e-1
    assert jnp.max(jnp.abs(h_n - ref_h)) < 1e-1
    assert jnp.max(jnp.abs(c_n - ref_c)) < 1e-1

    print("KERNEL_OK")
</pallas_src>

<mosaic_0001>
module attributes {stable_mosaic.version = 11 : i64} {
  func.func @_lstm_chunk_kernel(%arg0: i32, %arg1: memref<8x8x8xf32, #tpu.memory_space<vmem>>, %arg2: memref<2x8x128xf32, #tpu.memory_space<vmem>>, %arg3: memref<2x8x128xf32, #tpu.memory_space<vmem>>, %arg4: memref<8x512xbf16, #tpu.memory_space<vmem>>, %arg5: memref<128x512xbf16, #tpu.memory_space<vmem>>, %arg6: memref<128x512xbf16, #tpu.memory_space<vmem>>, %arg7: memref<128x512xbf16, #tpu.memory_space<vmem>>, %arg8: memref<1x512xf32, #tpu.memory_space<vmem>>, %arg9: memref<1x512xf32, #tpu.memory_space<vmem>>, %arg10: memref<8x8x128xf32, #tpu.memory_space<vmem>>, %arg11: memref<2x8x128xf32, #tpu.memory_space<vmem>>, %arg12: memref<2x8x128xf32, #tpu.memory_space<vmem>>, %arg13: memref<2x8x128xf32, #tpu.memory_space<vmem>>, %arg14: memref<2x8x128xf32, #tpu.memory_space<vmem>>) attributes {dimension_semantics = [#tpu.dimension_semantics<arbitrary>], iteration_bounds = array<i64: 1>, scalar_prefetch = 0 : i64, scratch_operands = 2 : i64, tpu.core_type = #tpu.core_type<tc>, window_params = [{transform_indices = @transform_0, window_bounds = array<i64: 8, 8, 8>}, {pipeline_mode = #tpu.pipeline_mode<synchronous>, transform_indices = @transform_1, window_bounds = array<i64: 2, 8, 128>}, {pipeline_mode = #tpu.pipeline_mode<synchronous>, transform_indices = @transform_2, window_bounds = array<i64: 2, 8, 128>}, {pipeline_mode = #tpu.pipeline_mode<synchronous>, transform_indices = @transform_3, window_bounds = array<i64: 8, 512>}, {pipeline_mode = #tpu.pipeline_mode<synchronous>, transform_indices = @transform_4, window_bounds = array<i64: 128, 512>}, {pipeline_mode = #tpu.pipeline_mode<synchronous>, transform_indices = @transform_5, window_bounds = array<i64: 128, 512>}, {pipeline_mode = #tpu.pipeline_mode<synchronous>, transform_indices = @transform_6, window_bounds = array<i64: 128, 512>}, {pipeline_mode = #tpu.pipeline_mode<synchronous>, transform_indices = @transform_7, window_bounds = array<i64: 1, 512>}, {pipeline_mode = #tpu.pipeline_mode<synchronous>, transform_indices = @transform_8, window_bounds = array<i64: 1, 512>}, {transform_indices = @transform_9, window_bounds = array<i64: 8, 8, 128>}, {pipeline_mode = #tpu.pipeline_mode<synchronous>, transform_indices = @transform_10, window_bounds = array<i64: 2, 8, 128>}, {pipeline_mode = #tpu.pipeline_mode<synchronous>, transform_indices = @transform_11, window_bounds = array<i64: 2, 8, 128>}]} {
    %c0_i32 = arith.constant 0 : i32
    %0 = arith.cmpi eq, %arg0, %c0_i32 : i32
    %1 = arith.extui %0 : i1 to i32
    %c0_i32_0 = arith.constant 0 : i32
    %2 = arith.cmpi ne, %1, %c0_i32_0 : i32
    scf.if %2 {
      %c0_301 = arith.constant 0 : index
      %c0_302 = arith.constant 0 : index
      %c0_303 = arith.constant 0 : index
      %712 = vector.load %arg2[%c0_301, %c0_302, %c0_303] : memref<2x8x128xf32, #tpu.memory_space<vmem>>, vector<2x8x128xf32>
      %c0_304 = arith.constant 0 : index
      %c0_305 = arith.constant 0 : index
      %c0_306 = arith.constant 0 : index
      %713 = vector.load %arg13[%c0_304, %c0_305, %c0_306] : memref<2x8x128xf32, #tpu.memory_space<vmem>>, vector<2x8x128xf32>
      tpu.vector_store %arg13[%c0_304, %c0_305, %c0_306], %712 {strides = array<i32>} : memref<2x8x128xf32, #tpu.memory_space<vmem>>, vector<2x8x128xf32>,
      %c0_307 = arith.constant 0 : index
      %c0_308 = arith.constant 0 : index
      %c0_309 = arith.constant 0 : index
      %714 = vector.load %arg3[%c0_307, %c0_308, %c0_309] : memref<2x8x128xf32, #tpu.memory_space<vmem>>, vector<2x8x128xf32>
      %c0_310 = arith.constant 0 : index
      %c0_311 = arith.constant 0 : index
      %c0_312 = arith.constant 0 : index
      %715 = vector.load %arg14[%c0_310, %c0_311, %c0_312] : memref<2x8x128xf32, #tpu.memory_space<vmem>>, vector<2x8x128xf32>
      tpu.vector_store %arg14[%c0_310, %c0_311, %c0_312], %714 {strides = array<i32>} : memref<2x8x128xf32, #tpu.memory_space<vmem>>, vector<2x8x128xf32>,
    } else {
    }
    %c0 = arith.constant 0 : index
    %c0_1 = arith.constant 0 : index
    %3 = vector.load %arg8[%c0, %c0_1] : memref<1x512xf32, #tpu.memory_space<vmem>>, vector<1x512xf32>
    %4 = vector.shape_cast %3 : vector<1x512xf32> to vector<1x512xf32>
    %5 = vector.broadcast %4 : vector<1x512xf32> to vector<8x512xf32>
    %c0_2 = arith.constant 0 : index
    %c0_3 = arith.constant 0 : index
    %6 = vector.load %arg9[%c0_2, %c0_3] : memref<1x512xf32, #tpu.memory_space<vmem>>, vector<1x512xf32>
    %7 = vector.shape_cast %6 : vector<1x512xf32> to vector<1x512xf32>
    %8 = vector.broadcast %7 : vector<1x512xf32> to vector<8x512xf32>
    %c0_4 = arith.constant 0 : index
    %c0_5 = arith.constant 0 : index
    %c0_6 = arith.constant 0 : index
    %9 = vector.load %arg13[%c0_4, %c0_5, %c0_6] : memref<2x8x128xf32, #tpu.memory_space<vmem>>, vector<1x8x128xf32>
    %10 = vector.shape_cast %9 : vector<1x8x128xf32> to vector<8x128xf32>
    %c0_7 = arith.constant 0 : index
    %c0_8 = arith.constant 0 : index
    %c0_9 = arith.constant 0 : index
    %11 = vector.load %arg14[%c0_7, %c0_8, %c0_9] : memref<2x8x128xf32, #tpu.memory_space<vmem>>, vector<1x8x128xf32>
    %12 = vector.shape_cast %11 : vector<1x8x128xf32> to vector<8x128xf32>
    %c1 = arith.constant 1 : index
    %c0_10 = arith.constant 0 : index
    %c0_11 = arith.constant 0 : index
    %13 = vector.load %arg13[%c1, %c0_10, %c0_11] : memref<2x8x128xf32, #tpu.memory_space<vmem>>, vector<1x8x128xf32>
    %14 = vector.shape_cast %13 : vector<1x8x128xf32> to vector<8x128xf32>
    %c1_12 = arith.constant 1 : index
    %c0_13 = arith.constant 0 : index
    %c0_14 = arith.constant 0 : index
    %15 = vector.load %arg14[%c1_12, %c0_13, %c0_14] : memref<2x8x128xf32, #tpu.memory_space<vmem>>, vector<1x8x128xf32>
    %16 = vector.shape_cast %15 : vector<1x8x128xf32> to vector<8x128xf32>
    %c0_i32_15 = arith.constant 0 : i32
    %17 = arith.index_cast %c0_i32_15 : i32 to index
    %c0_16 = arith.constant 0 : index
    %c0_17 = arith.constant 0 : index
    %18 = vector.load %arg1[%17, %c0_16, %c0_17] : memref<8x8x8xf32, #tpu.memory_space<vmem>>, vector<1x8x8xf32>
    %19 = vector.shape_cast %18 : vector<1x8x8xf32> to vector<8x8xf32>
    %20 = arith.truncf %19 : vector<8x8xf32> to vector<8x8xbf16>
    %c0_18 = arith.constant 0 : index
    %c0_19 = arith.constant 0 : index
    %21 = vector.load %arg4[%c0_18, %c0_19] : memref<8x512xbf16, #tpu.memory_space<vmem>>, vector<8x512xbf16>
    %cst = arith.constant dense<0.000000e+00> : vector<8x512xf32>
    %22 = tpu.matmul %20, %21, %cst {dimension_numbers = #tpu.dot_dimension_numbers<[1], [0], [0], [1], [0, 0, 1, 1], [], []>} : vector<8x8xbf16>, vector<8x512xbf16>, vector<8x512xf32> -> vector<8x512xf32>
    %23 = arith.truncf %10 : vector<8x128xf32> to vector<8x128xbf16>
    %c0_20 = arith.constant 0 : index
    %c0_21 = arith.constant 0 : index
    %24 = vector.load %arg5[%c0_20, %c0_21] : memref<128x512xbf16, #tpu.memory_space<vmem>>, vector<128x512xbf16>
    %cst_22 = arith.constant dense<0.000000e+00> : vector<8x512xf32>
    %25 = tpu.matmul %23, %24, %cst_22 {dimension_numbers = #tpu.dot_dimension_numbers<[1], [0], [0], [1], [0, 0, 1, 1], [], []>} : vector<8x128xbf16>, vector<128x512xbf16>, vector<8x512xf32> -> vector<8x512xf32>
    %26 = arith.addf %22, %25 : vector<8x512xf32>
    %27 = arith.addf %26, %5 : vector<8x512xf32>
    %28 = vector.extract_strided_slice %27 {offsets = [0, 0], sizes = [8, 128], strides = [1, 1]} : vector<8x512xf32> to vector<8x128xf32>
    %cst_23 = arith.constant 5.000000e-01 : f32
    %29 = vector.broadcast %cst_23 : f32 to vector<8x128xf32>
    %30 = arith.mulf %29, %28 : vector<8x128xf32>
    %31 = math.tanh %30 : vector<8x128xf32>
    %cst_24 = arith.constant 5.000000e-01 : f32
    %32 = vector.broadcast %cst_24 : f32 to vector<8x128xf32>
    %33 = arith.mulf %32, %31 : vector<8x128xf32>
    %cst_25 = arith.constant 5.000000e-01 : f32
    %34 = vector.broadcast %cst_25 : f32 to vector<8x128xf32>
    %35 = arith.addf %33, %34 : vector<8x128xf32>
    %36 = vector.extract_strided_slice %27 {offsets = [0, 128], sizes = [8, 128], strides = [1, 1]} : vector<8x512xf32> to vector<8x128xf32>
    %cst_26 = arith.constant 5.000000e-01 : f32
    %37 = vector.broadcast %cst_26 : f32 to vector<8x128xf32>
    %38 = arith.mulf %37, %36 : vector<8x128xf32>
    %39 = math.tanh %38 : vector<8x128xf32>
    %cst_27 = arith.constant 5.000000e-01 : f32
    %40 = vector.broadcast %cst_27 : f32 to vector<8x128xf32>
    %41 = arith.mulf %40, %39 : vector<8x128xf32>
    %cst_28 = arith.constant 5.000000e-01 : f32
    %42 = vector.broadcast %cst_28 : f32 to vector<8x128xf32>
    %43 = arith.addf %41, %42 : vector<8x128xf32>
    %44 = vector.extract_strided_slice %27 {offsets = [0, 256], sizes = [8, 128], strides = [1, 1]} : vector<8x512xf32> to vector<8x128xf32>
    %45 = math.tanh %44 : vector<8x128xf32>
    %46 = vector.extract_strided_slice %27 {offsets = [0, 384], sizes = [8, 128], strides = [1, 1]} : vector<8x512xf32> to vector<8x128xf32>
    %cst_29 = arith.constant 5.000000e-01 : f32
    %47 = vector.broadcast %cst_29 : f32 to vector<8x128xf32>
    %48 = arith.mulf %47, %46 : vector<8x128xf32>
    %49 = math.tanh %48 : vector<8x128xf32>
    %cst_30 = arith.constant 5.000000e-01 : f32
    %50 = vector.broadcast %cst_30 : f32 to vector<8x128xf32>
    %51 = arith.mulf %50, %49 : vector<8x128xf32>
    %cst_31 = arith.constant 5.000000e-01 : f32
    %52 = vector.broadcast %cst_31 : f32 to vector<8x128xf32>
    %53 = arith.addf %51, %52 : vector<8x128xf32>
    %54 = arith.mulf %43, %12 : vector<8x128xf32>
    %55 = arith.mulf %35, %45 : vector<8x128xf32>
    %56 = arith.addf %54, %55 : vector<8x128xf32>
    %57 = math.tanh %56 : vector<8x128xf32>
    %58 = arith.mulf %53, %57 : vector<8x128xf32>
    %59 = arith.truncf %58 : vector<8x128xf32> to vector<8x128xbf16>
    %c0_32 = arith.constant 0 : index
    %c0_33 = arith.constant 0 : index
    %60 = vector.load %arg6[%c0_32, %c0_33] : memref<128x512xbf16, #tpu.memory_space<vmem>>, vector<128x512xbf16>
    %cst_34 = arith.constant dense<0.000000e+00> : vector<8x512xf32>
    %61 = tpu.matmul %59, %60, %cst_34 {dimension_numbers = #tpu.dot_dimension_numbers<[1], [0], [0], [1], [0, 0, 1, 1], [], []>} : vector<8x128xbf16>, vector<128x512xbf16>, vector<8x512xf32> -> vector<8x512xf32>
    %62 = arith.truncf %14 : vector<8x128xf32> to vector<8x128xbf16>
    %c0_35 = arith.constant 0 : index
    %c0_36 = arith.constant 0 : index
    %63 = vector.load %arg7[%c0_35, %c0_36] : memref<128x512xbf16, #tpu.memory_space<vmem>>, vector<128x512xbf16>
    %cst_37 = arith.constant dense<0.000000e+00> : vector<8x512xf32>
    %64 = tpu.matmul %62, %63, %cst_37 {dimension_numbers = #tpu.dot_dimension_numbers<[1], [0], [0], [1], [0, 0, 1, 1], [], []>} : vector<8x128xbf16>, vector<128x512xbf16>, vector<8x512xf32> -> vector<8x512xf32>
    %65 = arith.addf %61, %64 : vector<8x512xf32>
    %66 = arith.addf %65, %8 : vector<8x512xf32>
    %67 = vector.extract_strided_slice %66 {offsets = [0, 0], sizes = [8, 128], strides = [1, 1]} : vector<8x512xf32> to vector<8x128xf32>
    %cst_38 = arith.constant 5.000000e-01 : f32
    %68 = vector.broadcast %cst_38 : f32 to vector<8x128xf32>
    %69 = arith.mulf %68, %67 : vector<8x128xf32>
    %70 = math.tanh %69 : vector<8x128xf32>
    %cst_39 = arith.constant 5.000000e-01 : f32
    %71 = vector.broadcast %cst_39 : f32 to vector<8x128xf32>
    %72 = arith.mulf %71, %70 : vector<8x128xf32>
    %cst_40 = arith.constant 5.000000e-01 : f32
    %73 = vector.broadcast %cst_40 : f32 to vector<8x128xf32>
    %74 = arith.addf %72, %73 : vector<8x128xf32>
    %75 = vector.extract_strided_slice %66 {offsets = [0, 128], sizes = [8, 128], strides = [1, 1]} : vector<8x512xf32> to vector<8x128xf32>
    %cst_41 = arith.constant 5.000000e-01 : f32
    %76 = vector.broadcast %cst_41 : f32 to vector<8x128xf32>
    %77 = arith.mulf %76, %75 : vector<8x128xf32>
    %78 = math.tanh %77 : vector<8x128xf32>
    %cst_42 = arith.constant 5.000000e-01 : f32
    %79 = vector.broadcast %cst_42 : f32 to vector<8x128xf32>
    %80 = arith.mulf %79, %78 : vector<8x128xf32>
    %cst_43 = arith.constant 5.000000e-01 : f32
    %81 = vector.broadcast %cst_43 : f32 to vector<8x128xf32>
    %82 = arith.addf %80, %81 : vector<8x128xf32>
    %83 = vector.extract_strided_slice %66 {offsets = [0, 256], sizes = [8, 128], strides = [1, 1]} : vector<8x512xf32> to vector<8x128xf32>
    %84 = math.tanh %83 : vector<8x128xf32>
    %85 = vector.extract_strided_slice %66 {offsets = [0, 384], sizes = [8, 128], strides = [1, 1]} : vector<8x512xf32> to vector<8x128xf32>
    %cst_44 = arith.constant 5.000000e-01 : f32
    %86 = vector.broadcast %cst_44 : f32 to vector<8x128xf32>
    %87 = arith.mulf %86, %85 : vector<8x128xf32>
    %88 = math.tanh %87 : vector<8x128xf32>
    %cst_45 = arith.constant 5.000000e-01 : f32
    %89 = vector.broadcast %cst_45 : f32 to vector<8x128xf32>
    %90 = arith.mulf %89, %88 : vector<8x128xf32>
    %cst_46 = arith.constant 5.000000e-01 : f32
    %91 = vector.broadcast %cst_46 : f32 to vector<8x128xf32>
    %92 = arith.addf %90, %91 : vector<8x128xf32>
    %93 = arith.mulf %82, %16 : vector<8x128xf32>
    %94 = arith.mulf %74, %84 : vector<8x128xf32>
    %95 = arith.addf %93, %94 : vector<8x128xf32>
    %96 = math.tanh %95 : vector<8x128xf32>
    %97 = arith.mulf %92, %96 : vector<8x128xf32>
    %98 = arith.index_cast %c0_i32_15 : i32 to index
    %c0_47 = arith.constant 0 : index
    %c0_48 = arith.constant 0 : index
    %99 = vector.load %arg10[%98, %c0_47, %c0_48] : memref<8x8x128xf32, #tpu.memory_space<vmem>>, vector<1x8x128xf32>
    %100 = vector.shape_cast %99 : vector<1x8x128xf32> to vector<8x128xf32>
    %101 = vector.shape_cast %97 : vector<8x128xf32> to vector<1x8x128xf32>
    tpu.vector_store %arg10[%98, %c0_47, %c0_48], %101 {strides = array<i32>} : memref<8x8x128xf32, #tpu.memory_space<vmem>>, vector<1x8x128xf32>,
    %c1_i32 = arith.constant 1 : i32
    %102 = arith.index_cast %c1_i32 : i32 to index
    %c0_49 = arith.constant 0 : index
    %c0_50 = arith.constant 0 : index
    %103 = vector.load %arg1[%102, %c0_49, %c0_50] : memref<8x8x8xf32, #tpu.memory_space<vmem>>, vector<1x8x8xf32>
    %104 = vector.shape_cast %103 : vector<1x8x8xf32> to vector<8x8xf32>
    %105 = arith.truncf %104 : vector<8x8xf32> to vector<8x8xbf16>
    %c0_51 = arith.constant 0 : index
    %c0_52 = arith.constant 0 : index
    %106 = vector.load %arg4[%c0_51, %c0_52] : memref<8x512xbf16, #tpu.memory_space<vmem>>, vector<8x512xbf16>
    %cst_53 = arith.constant dense<0.000000e+00> : vector<8x512xf32>
    %107 = tpu.matmul %105, %106, %cst_53 {dimension_numbers = #tpu.dot_dimension_numbers<[1], [0], [0], [1], [0, 0, 1, 1], [], []>} : vector<8x8xbf16>, vector<8x512xbf16>, vector<8x512xf32> -> vector<8x512xf32>
    %108 = arith.truncf %58 : vector<8x128xf32> to vector<8x128xbf16>
    %c0_54 = arith.constant 0 : index
    %c0_55 = arith.constant 0 : index
    %109 = vector.load %arg5[%c0_54, %c0_55] : memref<128x512xbf16, #tpu.memory_space<vmem>>, vector<128x512xbf16>
    %cst_56 = arith.constant dense<0.000000e+00> : vector<8x512xf32>
    %110 = tpu.matmul %108, %109, %cst_56 {dimension_numbers = #tpu.dot_dimension_numbers<[1], [0], [0], [1], [0, 0, 1, 1], [], []>} : vector<8x128xbf16>, vector<128x512xbf16>, vector<8x512xf32> -> vector<8x512xf32>
    %111 = arith.addf %107, %110 : vector<8x512xf32>
    %112 = arith.addf %111, %5 : vector<8x512xf32>
    %113 = vector.extract_strided_slice %112 {offsets = [0, 0], sizes = [8, 128], strides = [1, 1]} : vector<8x512xf32> to vector<8x128xf32>
    %cst_57 = arith.constant 5.000000e-01 : f32
    %114 = vector.broadcast %cst_57 : f32 to vector<8x128xf32>
    %115 = arith.mulf %114, %113 : vector<8x128xf32>
    %116 = math.tanh %115 : vector<8x128xf32>
    %cst_58 = arith.constant 5.000000e-01 : f32
    %117 = vector.broadcast %cst_58 : f32 to vector<8x128xf32>
    %118 = arith.mulf %117, %116 : vector<8x128xf32>
    %cst_59 = arith.constant 5.000000e-01 : f32
    %119 = vector.broadcast %cst_59 : f32 to vector<8x128xf32>
    %120 = arith.addf %118, %119 : vector<8x128xf32>
    %121 = vector.extract_strided_slice %112 {offsets = [0, 128], sizes = [8, 128], strides = [1, 1]} : vector<8x512xf32> to vector<8x128xf32>
    %cst_60 = arith.constant 5.000000e-01 : f32
    %122 = vector.broadcast %cst_60 : f32 to vector<8x128xf32>
    %123 = arith.mulf %122, %121 : vector<8x128xf32>
    %124 = math.tanh %123 : vector<8x128xf32>
    %cst_61 = arith.constant 5.000000e-01 : f32
    %125 = vector.broadcast %cst_61 : f32 to vector<8x128xf32>
    %126 = arith.mulf %125, %124 : vector<8x128xf32>
    %cst_62 = arith.constant 5.000000e-01 : f32
    %127 = vector.broadcast %cst_62 : f32 to vector<8x128xf32>
    %128 = arith.addf %126, %127 : vector<8x128xf32>
    %129 = vector.extract_strided_slice %112 {offsets = [0, 256], sizes = [8, 128], strides = [1, 1]} : vector<8x512xf32> to vector<8x128xf32>
    %130 = math.tanh %129 : vector<8x128xf32>
    %131 = vector.extract_strided_slice %112 {offsets = [0, 384], sizes = [8, 128], strides = [1, 1]} : vector<8x512xf32> to vector<8x128xf32>
    %cst_63 = arith.constant 5.000000e-01 : f32
    %132 = vector.broadcast %cst_63 : f32 to vector<8x128xf32>
    %133 = arith.mulf %132, %131 : vector<8x128xf32>
    %134 = math.tanh %133 : vector<8x128xf32>
    %cst_64 = arith.constant 5.000000e-01 : f32
    %135 = vector.broadcast %cst_64 : f32 to vector<8x128xf32>
    %136 = arith.mulf %135, %134 : vector<8x128xf32>
    %cst_65 = arith.constant 5.000000e-01 : f32
    %137 = vector.broadcast %cst_65 : f32 to vector<8x128xf32>
    %138 = arith.addf %136, %137 : vector<8x128xf32>
    %139 = arith.mulf %128, %56 : vector<8x128xf32>
    %140 = arith.mulf %120, %130 : vector<8x128xf32>
    %141 = arith.addf %139, %140 : vector<8x128xf32>
    %142 = math.tanh %141 : vector<8x128xf32>
    %143 = arith.mulf %138, %142 : vector<8x128xf32>
    %144 = arith.truncf %143 : vector<8x128xf32> to vector<8x128xbf16>
    %c0_66 = arith.constant 0 : index
    %c0_67 = arith.constant 0 : index
    %145 = vector.load %arg6[%c0_66, %c0_67] : memref<128x512xbf16, #tpu.memory_space<vmem>>, vector<128x512xbf16>
    %cst_68 = arith.constant dense<0.000000e+00> : vector<8x512xf32>
    %146 = tpu.matmul %144, %145, %cst_68 {dimension_numbers = #tpu.dot_dimension_numbers<[1], [0], [0], [1], [0, 0, 1, 1], [], []>} : vector<8x128xbf16>, vector<128x512xbf16>, vector<8x512xf32> -> vector<8x512xf32>
    %147 = arith.truncf %97 : vector<8x128xf32> to vector<8x128xbf16>
    %c0_69 = arith.constant 0 : index
    %c0_70 = arith.constant 0 : index
    %148 = vector.load %arg7[%c0_69, %c0_70] : memref<128x512xbf16, #tpu.memory_space<vmem>>, vector<128x512xbf16>
    %cst_71 = arith.constant dense<0.000000e+00> : vector<8x512xf32>
    %149 = tpu.matmul %147, %148, %cst_71 {dimension_numbers = #tpu.dot_dimension_numbers<[1], [0], [0], [1], [0, 0, 1, 1], [], []>} : vector<8x128xbf16>, vector<128x512xbf16>, vector<8x512xf32> -> vector<8x512xf32>
    %150 = arith.addf %146, %149 : vector<8x512xf32>
    %151 = arith.addf %150, %8 : vector<8x512xf32>
    %152 = vector.extract_strided_slice %151 {offsets = [0, 0], sizes = [8, 128], strides = [1, 1]} : vector<8x512xf32> to vector<8x128xf32>
    %cst_72 = arith.constant 5.000000e-01 : f32
    %153 = vector.broadcast %cst_72 : f32 to vector<8x128xf32>
    %154 = arith.mulf %153, %152 : vector<8x128xf32>
    %155 = math.tanh %154 : vector<8x128xf32>
    %cst_73 = arith.constant 5.000000e-01 : f32
    %156 = vector.broadcast %cst_73 : f32 to vector<8x128xf32>
    %157 = arith.mulf %156, %155 : vector<8x128xf32>
    %cst_74 = arith.constant 5.000000e-01 : f32
    %158 = vector.broadcast %cst_74 : f32 to vector<8x128xf32>
    %159 = arith.addf %157, %158 : vector<8x128xf32>
    %160 = vector.extract_strided_slice %151 {offsets = [0, 128], sizes = [8, 128], strides = [1, 1]} : vector<8x512xf32> to vector<8x128xf32>
    %cst_75 = arith.constant 5.000000e-01 : f32
    %161 = vector.broadcast %cst_75 : f32 to vector<8x128xf32>
    %162 = arith.mulf %161, %160 : vector<8x128xf32>
    %163 = math.tanh %162 : vector<8x128xf32>
    %cst_76 = arith.constant 5.000000e-01 : f32
    %164 = vector.broadcast %cst_76 : f32 to vector<8x128xf32>
    %165 = arith.mulf %164, %163 : vector<8x128xf32>
    %cst_77 = arith.constant 5.000000e-01 : f32
    %166 = vector.broadcast %cst_77 : f32 to vector<8x128xf32>
    %167 = arith.addf %165, %166 : vector<8x128xf32>
    %168 = vector.extract_strided_slice %151 {offsets = [0, 256], sizes = [8, 128], strides = [1, 1]} : vector<8x512xf32> to vector<8x128xf32>
    %169 = math.tanh %168 : vector<8x128xf32>
    %170 = vector.extract_strided_slice %151 {offsets = [0, 384], sizes = [8, 128], strides = [1, 1]} : vector<8x512xf32> to vector<8x128xf32>
    %cst_78 = arith.constant 5.000000e-01 : f32
    %171 = vector.broadcast %cst_78 : f32 to vector<8x128xf32>
    %172 = arith.mulf %171, %170 : vector<8x128xf32>
    %173 = math.tanh %172 : vector<8x128xf32>
    %cst_79 = arith.constant 5.000000e-01 : f32
    %174 = vector.broadcast %cst_79 : f32 to vector<8x128xf32>
    %175 = arith.mulf %174, %173 : vector<8x128xf32>
    %cst_80 = arith.constant 5.000000e-01 : f32
    %176 = vector.broadcast %cst_80 : f32 to vector<8x128xf32>
    %177 = arith.addf %175, %176 : vector<8x128xf32>
    %178 = arith.mulf %167, %95 : vector<8x128xf32>
    %179 = arith.mulf %159, %169 : vector<8x128xf32>
    %180 = arith.addf %178, %179 : vector<8x128xf32>
    %181 = math.tanh %180 : vector<8x128xf32>
    %182 = arith.mulf %177, %181 : vector<8x128xf32>
    %183 = arith.index_cast %c1_i32 : i32 to index
    %c0_81 = arith.constant 0 : index
    %c0_82 = arith.constant 0 : index
    %184 = vector.load %arg10[%183, %c0_81, %c0_82] : memref<8x8x128xf32, #tpu.memory_space<vmem>>, vector<1x8x128xf32>
    %185 = vector.shape_cast %184 : vector<1x8x128xf32> to vector<8x128xf32>
    %186 = vector.shape_cast %182 : vector<8x128xf32> to vector<1x8x128xf32>
    tpu.vector_store %arg10[%183, %c0_81, %c0_82], %186 {strides = array<i32>} : memref<8x8x128xf32, #tpu.memory_space<vmem>>, vector<1x8x128xf32>,
    %c2_i32 = arith.constant 2 : i32
    %187 = arith.index_cast %c2_i32 : i32 to index
    %c0_83 = arith.constant 0 : index
    %c0_84 = arith.constant 0 : index
    %188 = vector.load %arg1[%187, %c0_83, %c0_84] : memref<8x8x8xf32, #tpu.memory_space<vmem>>, vector<1x8x8xf32>
    %189 = vector.shape_cast %188 : vector<1x8x8xf32> to vector<8x8xf32>
    %190 = arith.truncf %189 : vector<8x8xf32> to vector<8x8xbf16>
    %c0_85 = arith.constant 0 : index
    %c0_86 = arith.constant 0 : index
    %191 = vector.load %arg4[%c0_85, %c0_86] : memref<8x512xbf16, #tpu.memory_space<vmem>>, vector<8x512xbf16>
    %cst_87 = arith.constant dense<0.000000e+00> : vector<8x512xf32>
    %192 = tpu.matmul %190, %191, %cst_87 {dimension_numbers = #tpu.dot_dimension_numbers<[1], [0], [0], [1], [0, 0, 1, 1], [], []>} : vector<8x8xbf16>, vector<8x512xbf16>, vector<8x512xf32> -> vector<8x512xf32>
    %193 = arith.truncf %143 : vector<8x128xf32> to vector<8x128xbf16>
    %c0_88 = arith.constant 0 : index
    %c0_89 = arith.constant 0 : index
    %194 = vector.load %arg5[%c0_88, %c0_89] : memref<128x512xbf16, #tpu.memory_space<vmem>>, vector<128x512xbf16>
    %cst_90 = arith.constant dense<0.000000e+00> : vector<8x512xf32>
    %195 = tpu.matmul %193, %194, %cst_90 {dimension_numbers = #tpu.dot_dimension_numbers<[1], [0], [0], [1], [0, 0, 1, 1], [], []>} : vector<8x128xbf16>, vector<128x512xbf16>, vector<8x512xf32> -> vector<8x512xf32>
    %196 = arith.addf %192, %195 : vector<8x512xf32>
    %197 = arith.addf %196, %5 : vector<8x512xf32>
    %198 = vector.extract_strided_slice %197 {offsets = [0, 0], sizes = [8, 128], strides = [1, 1]} : vector<8x512xf32> to vector<8x128xf32>
    %cst_91 = arith.constant 5.000000e-01 : f32
    %199 = vector.broadcast %cst_91 : f32 to vector<8x128xf32>
    %200 = arith.mulf %199, %198 : vector<8x128xf32>
    %201 = math.tanh %200 : vector<8x128xf32>
    %cst_92 = arith.constant 5.000000e-01 : f32
    %202 = vector.broadcast %cst_92 : f32 to vector<8x128xf32>
    %203 = arith.mulf %202, %201 : vector<8x128xf32>
    %cst_93 = arith.constant 5.000000e-01 : f32
    %204 = vector.broadcast %cst_93 : f32 to vector<8x128xf32>
    %205 = arith.addf %203, %204 : vector<8x128xf32>
    %206 = vector.extract_strided_slice %197 {offsets = [0, 128], sizes = [8, 128], strides = [1, 1]} : vector<8x512xf32> to vector<8x128xf32>
    %cst_94 = arith.constant 5.000000e-01 : f32
    %207 = vector.broadcast %cst_94 : f32 to vector<8x128xf32>
    %208 = arith.mulf %207, %206 : vector<8x128xf32>
    %209 = math.tanh %208 : vector<8x128xf32>
    %cst_95 = arith.constant 5.000000e-01 : f32
    %210 = vector.broadcast %cst_95 : f32 to vector<8x128xf32>
    %211 = arith.mulf %210, %209 : vector<8x128xf32>
    %cst_96 = arith.constant 5.000000e-01 : f32
    %212 = vector.broadcast %cst_96 : f32 to vector<8x128xf32>
    %213 = arith.addf %211, %212 : vector<8x128xf32>
    %214 = vector.extract_strided_slice %197 {offsets = [0, 256], sizes = [8, 128], strides = [1, 1]} : vector<8x512xf32> to vector<8x128xf32>
    %215 = math.tanh %214 : vector<8x128xf32>
    %216 = vector.extract_strided_slice %197 {offsets = [0, 384], sizes = [8, 128], strides = [1, 1]} : vector<8x512xf32> to vector<8x128xf32>
    %cst_97 = arith.constant 5.000000e-01 : f32
    %217 = vector.broadcast %cst_97 : f32 to vector<8x128xf32>
    %218 = arith.mulf %217, %216 : vector<8x128xf32>
    %219 = math.tanh %218 : vector<8x128xf32>
    %cst_98 = arith.constant 5.000000e-01 : f32
    %220 = vector.broadcast %cst_98 : f32 to vector<8x128xf32>
    %221 = arith.mulf %220, %219 : vector<8x128xf32>
    %cst_99 = arith.constant 5.000000e-01 : f32
    %222 = vector.broadcast %cst_99 : f32 to vector<8x128xf32>
    %223 = arith.addf %221, %222 : vector<8x128xf32>
    %224 = arith.mulf %213, %141 : vector<8x128xf32>
    %225 = arith.mulf %205, %215 : vector<8x128xf32>
    %226 = arith.addf %224, %225 : vector<8x128xf32>
    %227 = math.tanh %226 : vector<8x128xf32>
    %228 = arith.mulf %223, %227 : vector<8x128xf32>
    %229 = arith.truncf %228 : vector<8x128xf32> to vector<8x128xbf16>
    %c0_100 = arith.constant 0 : index
    %c0_101 = arith.constant 0 : index
    %230 = vector.load %arg6[%c0_100, %c0_101] : memref<128x512xbf16, #tpu.memory_space<vmem>>, vector<128x512xbf16>
    %cst_102 = arith.constant dense<0.000000e+00> : vector<8x512xf32>
    %231 = tpu.matmul %229, %230, %cst_102 {dimension_numbers = #tpu.dot_dimension_numbers<[1], [0], [0], [1], [0, 0, 1, 1], [], []>} : vector<8x128xbf16>, vector<128x512xbf16>, vector<8x512xf32> -> vector<8x512xf32>
    %232 = arith.truncf %182 : vector<8x128xf32> to vector<8x128xbf16>
    %c0_103 = arith.constant 0 : index
    %c0_104 = arith.constant 0 : index
    %233 = vector.load %arg7[%c0_103, %c0_104] : memref<128x512xbf16, #tpu.memory_space<vmem>>, vector<128x512xbf16>
    %cst_105 = arith.constant dense<0.000000e+00> : vector<8x512xf32>
    %234 = tpu.matmul %232, %233, %cst_105 {dimension_numbers = #tpu.dot_dimension_numbers<[1], [0], [0], [1], [0, 0, 1, 1], [], []>} : vector<8x128xbf16>, vector<128x512xbf16>, vector<8x512xf32> -> vector<8x512xf32>
    %235 = arith.addf %231, %234 : vector<8x512xf32>
    %236 = arith.addf %235, %8 : vector<8x512xf32>
    %237 = vector.extract_strided_slice %236 {offsets = [0, 0], sizes = [8, 128], strides = [1, 1]} : vector<8x512xf32> to vector<8x128xf32>
    %cst_106 = arith.constant 5.000000e-01 : f32
    %238 = vector.broadcast %cst_106 : f32 to vector<8x128xf32>
    %239 = arith.mulf %238, %237 : vector<8x128xf32>
    %240 = math.tanh %239 : vector<8x128xf32>
    %cst_107 = arith.constant 5.000000e-01 : f32
    %241 = vector.broadcast %cst_107 : f32 to vector<8x128xf32>
    %242 = arith.mulf %241, %240 : vector<8x128xf32>
    %cst_108 = arith.constant 5.000000e-01 : f32
    %243 = vector.broadcast %cst_108 : f32 to vector<8x128xf32>
    %244 = arith.addf %242, %243 : vector<8x128xf32>
    %245 = vector.extract_strided_slice %236 {offsets = [0, 128], sizes = [8, 128], strides = [1, 1]} : vector<8x512xf32> to vector<8x128xf32>
    %cst_109 = arith.constant 5.000000e-01 : f32
    %246 = vector.broadcast %cst_109 : f32 to vector<8x128xf32>
    %247 = arith.mulf %246, %245 : vector<8x128xf32>
    %248 = math.tanh %247 : vector<8x128xf32>
    %cst_110 = arith.constant 5.000000e-01 : f32
    %249 = vector.broadcast %cst_110 : f32 to vector<8x128xf32>
    %250 = arith.mulf %249, %248 : vector<8x128xf32>
    %cst_111 = arith.constant 5.000000e-01 : f32
    %251 = vector.broadcast %cst_111 : f32 to vector<8x128xf32>
    %252 = arith.addf %250, %251 : vector<8x128xf32>
    %253 = vector.extract_strided_slice %236 {offsets = [0, 256], sizes = [8, 128], strides = [1, 1]} : vector<8x512xf32> to vector<8x128xf32>
    %254 = math.tanh %253 : vector<8x128xf32>
    %255 = vector.extract_strided_slice %236 {offsets = [0, 384], sizes = [8, 128], strides = [1, 1]} : vector<8x512xf32> to vector<8x128xf32>
    %cst_112 = arith.constant 5.000000e-01 : f32
    %256 = vector.broadcast %cst_112 : f32 to vector<8x128xf32>
    %257 = arith.mulf %256, %255 : vector<8x128xf32>
    %258 = math.tanh %257 : vector<8x128xf32>
    %cst_113 = arith.constant 5.000000e-01 : f32
    %259 = vector.broadcast %cst_113 : f32 to vector<8x128xf32>
    %260 = arith.mulf %259, %258 : vector<8x128xf32>
    %cst_114 = arith.constant 5.000000e-01 : f32
    %261 = vector.broadcast %cst_114 : f32 to vector<8x128xf32>
    %262 = arith.addf %260, %261 : vector<8x128xf32>
    %263 = arith.mulf %252, %180 : vector<8x128xf32>
    %264 = arith.mulf %244, %254 : vector<8x128xf32>
    %265 = arith.addf %263, %264 : vector<8x128xf32>
    %266 = math.tanh %265 : vector<8x128xf32>
    %267 = arith.mulf %262, %266 : vector<8x128xf32>
    %268 = arith.index_cast %c2_i32 : i32 to index
    %c0_115 = arith.constant 0 : index
    %c0_116 = arith.constant 0 : index
    %269 = vector.load %arg10[%268, %c0_115, %c0_116] : memref<8x8x128xf32, #tpu.memory_space<vmem>>, vector<1x8x128xf32>
    %270 = vector.shape_cast %269 : vector<1x8x128xf32> to vector<8x128xf32>
    %271 = vector.shape_cast %267 : vector<8x128xf32> to vector<1x8x128xf32>
    tpu.vector_store %arg10[%268, %c0_115, %c0_116], %271 {strides = array<i32>} : memref<8x8x128xf32, #tpu.memory_space<vmem>>, vector<1x8x128xf32>,
    %c3_i32 = arith.constant 3 : i32
    %272 = arith.index_cast %c3_i32 : i32 to index
    %c0_117 = arith.constant 0 : index
    %c0_118 = arith.constant 0 : index
    %273 = vector.load %arg1[%272, %c0_117, %c0_118] : memref<8x8x8xf32, #tpu.memory_space<vmem>>, vector<1x8x8xf32>
    %274 = vector.shape_cast %273 : vector<1x8x8xf32> to vector<8x8xf32>
    %275 = arith.truncf %274 : vector<8x8xf32> to vector<8x8xbf16>
    %c0_119 = arith.constant 0 : index
    %c0_120 = arith.constant 0 : index
    %276 = vector.load %arg4[%c0_119, %c0_120] : memref<8x512xbf16, #tpu.memory_space<vmem>>, vector<8x512xbf16>
    %cst_121 = arith.constant dense<0.000000e+00> : vector<8x512xf32>
    %277 = tpu.matmul %275, %276, %cst_121 {dimension_numbers = #tpu.dot_dimension_numbers<[1], [0], [0], [1], [0, 0, 1, 1], [], []>} : vector<8x8xbf16>, vector<8x512xbf16>, vector<8x512xf32> -> vector<8x512xf32>
    %278 = arith.truncf %228 : vector<8x128xf32> to vector<8x128xbf16>
    %c0_122 = arith.constant 0 : index
    %c0_123 = arith.constant 0 : index
    %279 = vector.load %arg5[%c0_122, %c0_123] : memref<128x512xbf16, #tpu.memory_space<vmem>>, vector<128x512xbf16>
    %cst_124 = arith.constant dense<0.000000e+00> : vector<8x512xf32>
    %280 = tpu.matmul %278, %279, %cst_124 {dimension_numbers = #tpu.dot_dimension_numbers<[1], [0], [0], [1], [0, 0, 1, 1], [], []>} : vector<8x128xbf16>, vector<128x512xbf16>, vector<8x512xf32> -> vector<8x512xf32>
    %281 = arith.addf %277, %280 : vector<8x512xf32>
    %282 = arith.addf %281, %5 : vector<8x512xf32>
    %283 = vector.extract_strided_slice %282 {offsets = [0, 0], sizes = [8, 128], strides = [1, 1]} : vector<8x512xf32> to vector<8x128xf32>
    %cst_125 = arith.constant 5.000000e-01 : f32
    %284 = vector.broadcast %cst_125 : f32 to vector<8x128xf32>
    %285 = arith.mulf %284, %283 : vector<8x128xf32>
    %286 = math.tanh %285 : vector<8x128xf32>
    %cst_126 = arith.constant 5.000000e-01 : f32
    %287 = vector.broadcast %cst_126 : f32 to vector<8x128xf32>
    %288 = arith.mulf %287, %286 : vector<8x128xf32>
    %cst_127 = arith.constant 5.000000e-01 : f32
    %289 = vector.broadcast %cst_127 : f32 to vector<8x128xf32>
    %290 = arith.addf %288, %289 : vector<8x128xf32>
    %291 = vector.extract_strided_slice %282 {offsets = [0, 128], sizes = [8, 128], strides = [1, 1]} : vector<8x512xf32> to vector<8x128xf32>
    %cst_128 = arith.constant 5.000000e-01 : f32
    %292 = vector.broadcast %cst_128 : f32 to vector<8x128xf32>
    %293 = arith.mulf %292, %291 : vector<8x128xf32>
    %294 = math.tanh %293 : vector<8x128xf32>
    %cst_129 = arith.constant 5.000000e-01 : f32
    %295 = vector.broadcast %cst_129 : f32 to vector<8x128xf32>
    %296 = arith.mulf %295, %294 : vector<8x128xf32>
    %cst_130 = arith.constant 5.000000e-01 : f32
    %297 = vector.broadcast %cst_130 : f32 to vector<8x128xf32>
    %298 = arith.addf %296, %297 : vector<8x128xf32>
    %299 = vector.extract_strided_slice %282 {offsets = [0, 256], sizes = [8, 128], strides = [1, 1]} : vector<8x512xf32> to vector<8x128xf32>
    %300 = math.tanh %299 : vector<8x128xf32>
    %301 = vector.extract_strided_slice %282 {offsets = [0, 384], sizes = [8, 128], strides = [1, 1]} : vector<8x512xf32> to vector<8x128xf32>
    %cst_131 = arith.constant 5.000000e-01 : f32
    %302 = vector.broadcast %cst_131 : f32 to vector<8x128xf32>
    %303 = arith.mulf %302, %301 : vector<8x128xf32>
    %304 = math.tanh %303 : vector<8x128xf32>
    %cst_132 = arith.constant 5.000000e-01 : f32
    %305 = vector.broadcast %cst_132 : f32 to vector<8x128xf32>
    %306 = arith.mulf %305, %304 : vector<8x128xf32>
    %cst_133 = arith.constant 5.000000e-01 : f32
    %307 = vector.broadcast %cst_133 : f32 to vector<8x128xf32>
    %308 = arith.addf %306, %307 : vector<8x128xf32>
    %309 = arith.mulf %298, %226 : vector<8x128xf32>
    %310 = arith.mulf %290, %300 : vector<8x128xf32>
    %311 = arith.addf %309, %310 : vector<8x128xf32>
    %312 = math.tanh %311 : vector<8x128xf32>
    %313 = arith.mulf %308, %312 : vector<8x128xf32>
    %314 = arith.truncf %313 : vector<8x128xf32> to vector<8x128xbf16>
    %c0_134 = arith.constant 0 : index
    %c0_135 = arith.constant 0 : index
    %315 = vector.load %arg6[%c0_134, %c0_135] : memref<128x512xbf16, #tpu.memory_space<vmem>>, vector<128x512xbf16>
    %cst_136 = arith.constant dense<0.000000e+00> : vector<8x512xf32>
    %316 = tpu.matmul %314, %315, %cst_136 {dimension_numbers = #tpu.dot_dimension_numbers<[1], [0], [0], [1], [0, 0, 1, 1], [], []>} : vector<8x128xbf16>, vector<128x512xbf16>, vector<8x512xf32> -> vector<8x512xf32>
    %317 = arith.truncf %267 : vector<8x128xf32> to vector<8x128xbf16>
    %c0_137 = arith.constant 0 : index
    %c0_138 = arith.constant 0 : index
    %318 = vector.load %arg7[%c0_137, %c0_138] : memref<128x512xbf16, #tpu.memory_space<vmem>>, vector<128x512xbf16>
    %cst_139 = arith.constant dense<0.000000e+00> : vector<8x512xf32>
    %319 = tpu.matmul %317, %318, %cst_139 {dimension_numbers = #tpu.dot_dimension_numbers<[1], [0], [0], [1], [0, 0, 1, 1], [], []>} : vector<8x128xbf16>, vector<128x512xbf16>, vector<8x512xf32> -> vector<8x512xf32>
    %320 = arith.addf %316, %319 : vector<8x512xf32>
    %321 = arith.addf %320, %8 : vector<8x512xf32>
    %322 = vector.extract_strided_slice %321 {offsets = [0, 0], sizes = [8, 128], strides = [1, 1]} : vector<8x512xf32> to vector<8x128xf32>
    %cst_140 = arith.constant 5.000000e-01 : f32
    %323 = vector.broadcast %cst_140 : f32 to vector<8x128xf32>
    %324 = arith.mulf %323, %322 : vector<8x128xf32>
    %325 = math.tanh %324 : vector<8x128xf32>
    %cst_141 = arith.constant 5.000000e-01 : f32
    %326 = vector.broadcast %cst_141 : f32 to vector<8x128xf32>
    %327 = arith.mulf %326, %325 : vector<8x128xf32>
    %cst_142 = arith.constant 5.000000e-01 : f32
    %328 = vector.broadcast %cst_142 : f32 to vector<8x128xf32>
    %329 = arith.addf %327, %328 : vector<8x128xf32>
    %330 = vector.extract_strided_slice %321 {offsets = [0, 128], sizes = [8, 128], strides = [1, 1]} : vector<8x512xf32> to vector<8x128xf32>
    %cst_143 = arith.constant 5.000000e-01 : f32
    %331 = vector.broadcast %cst_143 : f32 to vector<8x128xf32>
    %332 = arith.mulf %331, %330 : vector<8x128xf32>
    %333 = math.tanh %332 : vector<8x128xf32>
    %cst_144 = arith.constant 5.000000e-01 : f32
    %334 = vector.broadcast %cst_144 : f32 to vector<8x128xf32>
    %335 = arith.mulf %334, %333 : vector<8x128xf32>
    %cst_145 = arith.constant 5.000000e-01 : f32
    %336 = vector.broadcast %cst_145 : f32 to vector<8x128xf32>
    %337 = arith.addf %335, %336 : vector<8x128xf32>
    %338 = vector.extract_strided_slice %321 {offsets = [0, 256], sizes = [8, 128], strides = [1, 1]} : vector<8x512xf32> to vector<8x128xf32>
    %339 = math.tanh %338 : vector<8x128xf32>
    %340 = vector.extract_strided_slice %321 {offsets = [0, 384], sizes = [8, 128], strides = [1, 1]} : vector<8x512xf32> to vector<8x128xf32>
    %cst_146 = arith.constant 5.000000e-01 : f32
    %341 = vector.broadcast %cst_146 : f32 to vector<8x128xf32>
    %342 = arith.mulf %341, %340 : vector<8x128xf32>
    %343 = math.tanh %342 : vector<8x128xf32>
    %cst_147 = arith.constant 5.000000e-01 : f32
    %344 = vector.broadcast %cst_147 : f32 to vector<8x128xf32>
    %345 = arith.mulf %344, %343 : vector<8x128xf32>
    %cst_148 = arith.constant 5.000000e-01 : f32
    %346 = vector.broadcast %cst_148 : f32 to vector<8x128xf32>
    %347 = arith.addf %345, %346 : vector<8x128xf32>
    %348 = arith.mulf %337, %265 : vector<8x128xf32>
    %349 = arith.mulf %329, %339 : vector<8x128xf32>
    %350 = arith.addf %348, %349 : vector<8x128xf32>
    %351 = math.tanh %350 : vector<8x128xf32>
    %352 = arith.mulf %347, %351 : vector<8x128xf32>
    %353 = arith.index_cast %c3_i32 : i32 to index
    %c0_149 = arith.constant 0 : index
    %c0_150 = arith.constant 0 : index
    %354 = vector.load %arg10[%353, %c0_149, %c0_150] : memref<8x8x128xf32, #tpu.memory_space<vmem>>, vector<1x8x128xf32>
    %355 = vector.shape_cast %354 : vector<1x8x128xf32> to vector<8x128xf32>
    %356 = vector.shape_cast %352 : vector<8x128xf32> to vector<1x8x128xf32>
    tpu.vector_store %arg10[%353, %c0_149, %c0_150], %356 {strides = array<i32>} : memref<8x8x128xf32, #tpu.memory_space<vmem>>, vector<1x8x128xf32>,
    %c4_i32 = arith.constant 4 : i32
    %357 = arith.index_cast %c4_i32 : i32 to index
    %c0_151 = arith.constant 0 : index
    %c0_152 = arith.constant 0 : index
    %358 = vector.load %arg1[%357, %c0_151, %c0_152] : memref<8x8x8xf32, #tpu.memory_space<vmem>>, vector<1x8x8xf32>
    %359 = vector.shape_cast %358 : vector<1x8x8xf32> to vector<8x8xf32>
    %360 = arith.truncf %359 : vector<8x8xf32> to vector<8x8xbf16>
    %c0_153 = arith.constant 0 : index
    %c0_154 = arith.constant 0 : index
    %361 = vector.load %arg4[%c0_153, %c0_154] : memref<8x512xbf16, #tpu.memory_space<vmem>>, vector<8x512xbf16>
    %cst_155 = arith.constant dense<0.000000e+00> : vector<8x512xf32>
    %362 = tpu.matmul %360, %361, %cst_155 {dimension_numbers = #tpu.dot_dimension_numbers<[1], [0], [0], [1], [0, 0, 1, 1], [], []>} : vector<8x8xbf16>, vector<8x512xbf16>, vector<8x512xf32> -> vector<8x512xf32>
    %363 = arith.truncf %313 : vector<8x128xf32> to vector<8x128xbf16>
    %c0_156 = arith.constant 0 : index
    %c0_157 = arith.constant 0 : index
    %364 = vector.load %arg5[%c0_156, %c0_157] : memref<128x512xbf16, #tpu.memory_space<vmem>>, vector<128x512xbf16>
    %cst_158 = arith.constant dense<0.000000e+00> : vector<8x512xf32>
    %365 = tpu.matmul %363, %364, %cst_158 {dimension_numbers = #tpu.dot_dimension_numbers<[1], [0], [0], [1], [0, 0, 1, 1], [], []>} : vector<8x128xbf16>, vector<128x512xbf16>, vector<8x512xf32> -> vector<8x512xf32>
    %366 = arith.addf %362, %365 : vector<8x512xf32>
    %367 = arith.addf %366, %5 : vector<8x512xf32>
    %368 = vector.extract_strided_slice %367 {offsets = [0, 0], sizes = [8, 128], strides = [1, 1]} : vector<8x512xf32> to vector<8x128xf32>
    %cst_159 = arith.constant 5.000000e-01 : f32
    %369 = vector.broadcast %cst_159 : f32 to vector<8x128xf32>
    %370 = arith.mulf %369, %368 : vector<8x128xf32>
    %371 = math.tanh %370 : vector<8x128xf32>
    %cst_160 = arith.constant 5.000000e-01 : f32
    %372 = vector.broadcast %cst_160 : f32 to vector<8x128xf32>
    %373 = arith.mulf %372, %371 : vector<8x128xf32>
    %cst_161 = arith.constant 5.000000e-01 : f32
    %374 = vector.broadcast %cst_161 : f32 to vector<8x128xf32>
    %375 = arith.addf %373, %374 : vector<8x128xf32>
    %376 = vector.extract_strided_slice %367 {offsets = [0, 128], sizes = [8, 128], strides = [1, 1]} : vector<8x512xf32> to vector<8x128xf32>
    %cst_162 = arith.constant 5.000000e-01 : f32
    %377 = vector.broadcast %cst_162 : f32 to vector<8x128xf32>
    %378 = arith.mulf %377, %376 : vector<8x128xf32>
    %379 = math.tanh %378 : vector<8x128xf32>
    %cst_163 = arith.constant 5.000000e-01 : f32
    %380 = vector.broadcast %cst_163 : f32 to vector<8x128xf32>
    %381 = arith.mulf %380, %379 : vector<8x128xf32>
    %cst_164 = arith.constant 5.000000e-01 : f32
    %382 = vector.broadcast %cst_164 : f32 to vector<8x128xf32>
    %383 = arith.addf %381, %382 : vector<8x128xf32>
    %384 = vector.extract_strided_slice %367 {offsets = [0, 256], sizes = [8, 128], strides = [1, 1]} : vector<8x512xf32> to vector<8x128xf32>
    %385 = math.tanh %384 : vector<8x128xf32>
    %386 = vector.extract_strided_slice %367 {offsets = [0, 384], sizes = [8, 128], strides = [1, 1]} : vector<8x512xf32> to vector<8x128xf32>
    %cst_165 = arith.constant 5.000000e-01 : f32
    %387 = vector.broadcast %cst_165 : f32 to vector<8x128xf32>
    %388 = arith.mulf %387, %386 : vector<8x128xf32>
    %389 = math.tanh %388 : vector<8x128xf32>
    %cst_166 = arith.constant 5.000000e-01 : f32
    %390 = vector.broadcast %cst_166 : f32 to vector<8x128xf32>
    %391 = arith.mulf %390, %389 : vector<8x128xf32>
    %cst_167 = arith.constant 5.000000e-01 : f32
    %392 = vector.broadcast %cst_167 : f32 to vector<8x128xf32>
    %393 = arith.addf %391, %392 : vector<8x128xf32>
    %394 = arith.mulf %383, %311 : vector<8x128xf32>
    %395 = arith.mulf %375, %385 : vector<8x128xf32>
    %396 = arith.addf %394, %395 : vector<8x128xf32>
    %397 = math.tanh %396 : vector<8x128xf32>
    %398 = arith.mulf %393, %397 : vector<8x128xf32>
    %399 = arith.truncf %398 : vector<8x128xf32> to vector<8x128xbf16>
    %c0_168 = arith.constant 0 : index
    %c0_169 = arith.constant 0 : index
    %400 = vector.load %arg6[%c0_168, %c0_169] : memref<128x512xbf16, #tpu.memory_space<vmem>>, vector<128x512xbf16>
    %cst_170 = arith.constant dense<0.000000e+00> : vector<8x512xf32>
    %401 = tpu.matmul %399, %400, %cst_170 {dimension_numbers = #tpu.dot_dimension_numbers<[1], [0], [0], [1], [0, 0, 1, 1], [], []>} : vector<8x128xbf16>, vector<128x512xbf16>, vector<8x512xf32> -> vector<8x512xf32>
    %402 = arith.truncf %352 : vector<8x128xf32> to vector<8x128xbf16>
    %c0_171 = arith.constant 0 : index
    %c0_172 = arith.constant 0 : index
    %403 = vector.load %arg7[%c0_171, %c0_172] : memref<128x512xbf16, #tpu.memory_space<vmem>>, vector<128x512xbf16>
    %cst_173 = arith.constant dense<0.000000e+00> : vector<8x512xf32>
    %404 = tpu.matmul %402, %403, %cst_173 {dimension_numbers = #tpu.dot_dimension_numbers<[1], [0], [0], [1], [0, 0, 1, 1], [], []>} : vector<8x128xbf16>, vector<128x512xbf16>, vector<8x512xf32> -> vector<8x512xf32>
    %405 = arith.addf %401, %404 : vector<8x512xf32>
    %406 = arith.addf %405, %8 : vector<8x512xf32>
    %407 = vector.extract_strided_slice %406 {offsets = [0, 0], sizes = [8, 128], strides = [1, 1]} : vector<8x512xf32> to vector<8x128xf32>
    %cst_174 = arith.constant 5.000000e-01 : f32
    %408 = vector.broadcast %cst_174 : f32 to vector<8x128xf32>
    %409 = arith.mulf %408, %407 : vector<8x128xf32>
    %410 = math.tanh %409 : vector<8x128xf32>
    %cst_175 = arith.constant 5.000000e-01 : f32
    %411 = vector.broadcast %cst_175 : f32 to vector<8x128xf32>
    %412 = arith.mulf %411, %410 : vector<8x128xf32>
    %cst_176 = arith.constant 5.000000e-01 : f32
    %413 = vector.broadcast %cst_176 : f32 to vector<8x128xf32>
    %414 = arith.addf %412, %413 : vector<8x128xf32>
    %415 = vector.extract_strided_slice %406 {offsets = [0, 128], sizes = [8, 128], strides = [1, 1]} : vector<8x512xf32> to vector<8x128xf32>
    %cst_177 = arith.constant 5.000000e-01 : f32
    %416 = vector.broadcast %cst_177 : f32 to vector<8x128xf32>
    %417 = arith.mulf %416, %415 : vector<8x128xf32>
    %418 = math.tanh %417 : vector<8x128xf32>
    %cst_178 = arith.constant 5.000000e-01 : f32
    %419 = vector.broadcast %cst_178 : f32 to vector<8x128xf32>
    %420 = arith.mulf %419, %418 : vector<8x128xf32>
    %cst_179 = arith.constant 5.000000e-01 : f32
    %421 = vector.broadcast %cst_179 : f32 to vector<8x128xf32>
    %422 = arith.addf %420, %421 : vector<8x128xf32>
    %423 = vector.extract_strided_slice %406 {offsets = [0, 256], sizes = [8, 128], strides = [1, 1]} : vector<8x512xf32> to vector<8x128xf32>
    %424 = math.tanh %423 : vector<8x128xf32>
    %425 = vector.extract_strided_slice %406 {offsets = [0, 384], sizes = [8, 128], strides = [1, 1]} : vector<8x512xf32> to vector<8x128xf32>
    %cst_180 = arith.constant 5.000000e-01 : f32
    %426 = vector.broadcast %cst_180 : f32 to vector<8x128xf32>
    %427 = arith.mulf %426, %425 : vector<8x128xf32>
    %428 = math.tanh %427 : vector<8x128xf32>
    %cst_181 = arith.constant 5.000000e-01 : f32
    %429 = vector.broadcast %cst_181 : f32 to vector<8x128xf32>
    %430 = arith.mulf %429, %428 : vector<8x128xf32>
    %cst_182 = arith.constant 5.000000e-01 : f32
    %431 = vector.broadcast %cst_182 : f32 to vector<8x128xf32>
    %432 = arith.addf %430, %431 : vector<8x128xf32>
    %433 = arith.mulf %422, %350 : vector<8x128xf32>
    %434 = arith.mulf %414, %424 : vector<8x128xf32>
    %435 = arith.addf %433, %434 : vector<8x128xf32>
    %436 = math.tanh %435 : vector<8x128xf32>
    %437 = arith.mulf %432, %436 : vector<8x128xf32>
    %438 = arith.index_cast %c4_i32 : i32 to index
    %c0_183 = arith.constant 0 : index
    %c0_184 = arith.constant 0 : index
    %439 = vector.load %arg10[%438, %c0_183, %c0_184] : memref<8x8x128xf32, #tpu.memory_space<vmem>>, vector<1x8x128xf32>
    %440 = vector.shape_cast %439 : vector<1x8x128xf32> to vector<8x128xf32>
    %441 = vector.shape_cast %437 : vector<8x128xf32> to vector<1x8x128xf32>
    tpu.vector_store %arg10[%438, %c0_183, %c0_184], %441 {strides = array<i32>} : memref<8x8x128xf32, #tpu.memory_space<vmem>>, vector<1x8x128xf32>,
    %c5_i32 = arith.constant 5 : i32
    %442 = arith.index_cast %c5_i32 : i32 to index
    %c0_185 = arith.constant 0 : index
    %c0_186 = arith.constant 0 : index
    %443 = vector.load %arg1[%442, %c0_185, %c0_186] : memref<8x8x8xf32, #tpu.memory_space<vmem>>, vector<1x8x8xf32>
    %444 = vector.shape_cast %443 : vector<1x8x8xf32> to vector<8x8xf32>
    %445 = arith.truncf %444 : vector<8x8xf32> to vector<8x8xbf16>
    %c0_187 = arith.constant 0 : index
    %c0_188 = arith.constant 0 : index
    %446 = vector.load %arg4[%c0_187, %c0_188] : memref<8x512xbf16, #tpu.memory_space<vmem>>, vector<8x512xbf16>
    %cst_189 = arith.constant dense<0.000000e+00> : vector<8x512xf32>
    %447 = tpu.matmul %445, %446, %cst_189 {dimension_numbers = #tpu.dot_dimension_numbers<[1], [0], [0], [1], [0, 0, 1, 1], [], []>} : vector<8x8xbf16>, vector<8x512xbf16>, vector<8x512xf32> -> vector<8x512xf32>
    %448 = arith.truncf %398 : vector<8x128xf32> to vector<8x128xbf16>
    %c0_190 = arith.constant 0 : index
    %c0_191 = arith.constant 0 : index
    %449 = vector.load %arg5[%c0_190, %c0_191] : memref<128x512xbf16, #tpu.memory_space<vmem>>, vector<128x512xbf16>
    %cst_192 = arith.constant dense<0.000000e+00> : vector<8x512xf32>
    %450 = tpu.matmul %448, %449, %cst_192 {dimension_numbers = #tpu.dot_dimension_numbers<[1], [0], [0], [1], [0, 0, 1, 1], [], []>} : vector<8x128xbf16>, vector<128x512xbf16>, vector<8x512xf32> -> vector<8x512xf32>
    %451 = arith.addf %447, %450 : vector<8x512xf32>
    %452 = arith.addf %451, %5 : vector<8x512xf32>
    %453 = vector.extract_strided_slice %452 {offsets = [0, 0], sizes = [8, 128], strides = [1, 1]} : vector<8x512xf32> to vector<8x128xf32>
    %cst_193 = arith.constant 5.000000e-01 : f32
    %454 = vector.broadcast %cst_193 : f32 to vector<8x128xf32>
    %455 = arith.mulf %454, %453 : vector<8x128xf32>
    %456 = math.tanh %455 : vector<8x128xf32>
    %cst_194 = arith.constant 5.000000e-01 : f32
    %457 = vector.broadcast %cst_194 : f32 to vector<8x128xf32>
    %458 = arith.mulf %457, %456 : vector<8x128xf32>
    %cst_195 = arith.constant 5.000000e-01 : f32
    %459 = vector.broadcast %cst_195 : f32 to vector<8x128xf32>
    %460 = arith.addf %458, %459 : vector<8x128xf32>
    %461 = vector.extract_strided_slice %452 {offsets = [0, 128], sizes = [8, 128], strides = [1, 1]} : vector<8x512xf32> to vector<8x128xf32>
    %cst_196 = arith.constant 5.000000e-01 : f32
    %462 = vector.broadcast %cst_196 : f32 to vector<8x128xf32>
    %463 = arith.mulf %462, %461 : vector<8x128xf32>
    %464 = math.tanh %463 : vector<8x128xf32>
    %cst_197 = arith.constant 5.000000e-01 : f32
    %465 = vector.broadcast %cst_197 : f32 to vector<8x128xf32>
    %466 = arith.mulf %465, %464 : vector<8x128xf32>
    %cst_198 = arith.constant 5.000000e-01 : f32
    %467 = vector.broadcast %cst_198 : f32 to vector<8x128xf32>
    %468 = arith.addf %466, %467 : vector<8x128xf32>
    %469 = vector.extract_strided_slice %452 {offsets = [0, 256], sizes = [8, 128], strides = [1, 1]} : vector<8x512xf32> to vector<8x128xf32>
    %470 = math.tanh %469 : vector<8x128xf32>
    %471 = vector.extract_strided_slice %452 {offsets = [0, 384], sizes = [8, 128], strides = [1, 1]} : vector<8x512xf32> to vector<8x128xf32>
    %cst_199 = arith.constant 5.000000e-01 : f32
    %472 = vector.broadcast %cst_199 : f32 to vector<8x128xf32>
    %473 = arith.mulf %472, %471 : vector<8x128xf32>
    %474 = math.tanh %473 : vector<8x128xf32>
    %cst_200 = arith.constant 5.000000e-01 : f32
    %475 = vector.broadcast %cst_200 : f32 to vector<8x128xf32>
    %476 = arith.mulf %475, %474 : vector<8x128xf32>
    %cst_201 = arith.constant 5.000000e-01 : f32
    %477 = vector.broadcast %cst_201 : f32 to vector<8x128xf32>
    %478 = arith.addf %476, %477 : vector<8x128xf32>
    %479 = arith.mulf %468, %396 : vector<8x128xf32>
    %480 = arith.mulf %460, %470 : vector<8x128xf32>
    %481 = arith.addf %479, %480 : vector<8x128xf32>
    %482 = math.tanh %481 : vector<8x128xf32>
    %483 = arith.mulf %478, %482 : vector<8x128xf32>
    %484 = arith.truncf %483 : vector<8x128xf32> to vector<8x128xbf16>
    %c0_202 = arith.constant 0 : index
    %c0_203 = arith.constant 0 : index
    %485 = vector.load %arg6[%c0_202, %c0_203] : memref<128x512xbf16, #tpu.memory_space<vmem>>, vector<128x512xbf16>
    %cst_204 = arith.constant dense<0.000000e+00> : vector<8x512xf32>
    %486 = tpu.matmul %484, %485, %cst_204 {dimension_numbers = #tpu.dot_dimension_numbers<[1], [0], [0], [1], [0, 0, 1, 1], [], []>} : vector<8x128xbf16>, vector<128x512xbf16>, vector<8x512xf32> -> vector<8x512xf32>
    %487 = arith.truncf %437 : vector<8x128xf32> to vector<8x128xbf16>
    %c0_205 = arith.constant 0 : index
    %c0_206 = arith.constant 0 : index
    %488 = vector.load %arg7[%c0_205, %c0_206] : memref<128x512xbf16, #tpu.memory_space<vmem>>, vector<128x512xbf16>
    %cst_207 = arith.constant dense<0.000000e+00> : vector<8x512xf32>
    %489 = tpu.matmul %487, %488, %cst_207 {dimension_numbers = #tpu.dot_dimension_numbers<[1], [0], [0], [1], [0, 0, 1, 1], [], []>} : vector<8x128xbf16>, vector<128x512xbf16>, vector<8x512xf32> -> vector<8x512xf32>
    %490 = arith.addf %486, %489 : vector<8x512xf32>
    %491 = arith.addf %490, %8 : vector<8x512xf32>
    %492 = vector.extract_strided_slice %491 {offsets = [0, 0], sizes = [8, 128], strides = [1, 1]} : vector<8x512xf32> to vector<8x128xf32>
    %cst_208 = arith.constant 5.000000e-01 : f32
    %493 = vector.broadcast %cst_208 : f32 to vector<8x128xf32>
    %494 = arith.mulf %493, %492 : vector<8x128xf32>
    %495 = math.tanh %494 : vector<8x128xf32>
    %cst_209 = arith.constant 5.000000e-01 : f32
    %496 = vector.broadcast %cst_209 : f32 to vector<8x128xf32>
    %497 = arith.mulf %496, %495 : vector<8x128xf32>
    %cst_210 = arith.constant 5.000000e-01 : f32
    %498 = vector.broadcast %cst_210 : f32 to vector<8x128xf32>
    %499 = arith.addf %497, %498 : vector<8x128xf32>
    %500 = vector.extract_strided_slice %491 {offsets = [0, 128], sizes = [8, 128], strides = [1, 1]} : vector<8x512xf32> to vector<8x128xf32>
    %cst_211 = arith.constant 5.000000e-01 : f32
    %501 = vector.broadcast %cst_211 : f32 to vector<8x128xf32>
    %502 = arith.mulf %501, %500 : vector<8x128xf32>
    %503 = math.tanh %502 : vector<8x128xf32>
    %cst_212 = arith.constant 5.000000e-01 : f32
    %504 = vector.broadcast %cst_212 : f32 to vector<8x128xf32>
    %505 = arith.mulf %504, %503 : vector<8x128xf32>
    %cst_213 = arith.constant 5.000000e-01 : f32
    %506 = vector.broadcast %cst_213 : f32 to vector<8x128xf32>
    %507 = arith.addf %505, %506 : vector<8x128xf32>
    %508 = vector.extract_strided_slice %491 {offsets = [0, 256], sizes = [8, 128], strides = [1, 1]} : vector<8x512xf32> to vector<8x128xf32>
    %509 = math.tanh %508 : vector<8x128xf32>
    %510 = vector.extract_strided_slice %491 {offsets = [0, 384], sizes = [8, 128], strides = [1, 1]} : vector<8x512xf32> to vector<8x128xf32>
    %cst_214 = arith.constant 5.000000e-01 : f32
    %511 = vector.broadcast %cst_214 : f32 to vector<8x128xf32>
    %512 = arith.mulf %511, %510 : vector<8x128xf32>
    %513 = math.tanh %512 : vector<8x128xf32>
    %cst_215 = arith.constant 5.000000e-01 : f32
    %514 = vector.broadcast %cst_215 : f32 to vector<8x128xf32>
    %515 = arith.mulf %514, %513 : vector<8x128xf32>
    %cst_216 = arith.constant 5.000000e-01 : f32
    %516 = vector.broadcast %cst_216 : f32 to vector<8x128xf32>
    %517 = arith.addf %515, %516 : vector<8x128xf32>
    %518 = arith.mulf %507, %435 : vector<8x128xf32>
    %519 = arith.mulf %499, %509 : vector<8x128xf32>
    %520 = arith.addf %518, %519 : vector<8x128xf32>
    %521 = math.tanh %520 : vector<8x128xf32>
    %522 = arith.mulf %517, %521 : vector<8x128xf32>
    %523 = arith.index_cast %c5_i32 : i32 to index
    %c0_217 = arith.constant 0 : index
    %c0_218 = arith.constant 0 : index
    %524 = vector.load %arg10[%523, %c0_217, %c0_218] : memref<8x8x128xf32, #tpu.memory_space<vmem>>, vector<1x8x128xf32>
    %525 = vector.shape_cast %524 : vector<1x8x128xf32> to vector<8x128xf32>
    %526 = vector.shape_cast %522 : vector<8x128xf32> to vector<1x8x128xf32>
    tpu.vector_store %arg10[%523, %c0_217, %c0_218], %526 {strides = array<i32>} : memref<8x8x128xf32, #tpu.memory_space<vmem>>, vector<1x8x128xf32>,
    %c6_i32 = arith.constant 6 : i32
    %527 = arith.index_cast %c6_i32 : i32 to index
    %c0_219 = arith.constant 0 : index
    %c0_220 = arith.constant 0 : index
    %528 = vector.load %arg1[%527, %c0_219, %c0_220] : memref<8x8x8xf32, #tpu.memory_space<vmem>>, vector<1x8x8xf32>
    %529 = vector.shape_cast %528 : vector<1x8x8xf32> to vector<8x8xf32>
    %530 = arith.truncf %529 : vector<8x8xf32> to vector<8x8xbf16>
    %c0_221 = arith.constant 0 : index
    %c0_222 = arith.constant 0 : index
    %531 = vector.load %arg4[%c0_221, %c0_222] : memref<8x512xbf16, #tpu.memory_space<vmem>>, vector<8x512xbf16>
    %cst_223 = arith.constant dense<0.000000e+00> : vector<8x512xf32>
    %532 = tpu.matmul %530, %531, %cst_223 {dimension_numbers = #tpu.dot_dimension_numbers<[1], [0], [0], [1], [0, 0, 1, 1], [], []>} : vector<8x8xbf16>, vector<8x512xbf16>, vector<8x512xf32> -> vector<8x512xf32>
    %533 = arith.truncf %483 : vector<8x128xf32> to vector<8x128xbf16>
    %c0_224 = arith.constant 0 : index
    %c0_225 = arith.constant 0 : index
    %534 = vector.load %arg5[%c0_224, %c0_225] : memref<128x512xbf16, #tpu.memory_space<vmem>>, vector<128x512xbf16>
    %cst_226 = arith.constant dense<0.000000e+00> : vector<8x512xf32>
    %535 = tpu.matmul %533, %534, %cst_226 {dimension_numbers = #tpu.dot_dimension_numbers<[1], [0], [0], [1], [0, 0, 1, 1], [], []>} : vector<8x128xbf16>, vector<128x512xbf16>, vector<8x512xf32> -> vector<8x512xf32>
    %536 = arith.addf %532, %535 : vector<8x512xf32>
    %537 = arith.addf %536, %5 : vector<8x512xf32>
    %538 = vector.extract_strided_slice %537 {offsets = [0, 0], sizes = [8, 128], strides = [1, 1]} : vector<8x512xf32> to vector<8x128xf32>
    %cst_227 = arith.constant 5.000000e-01 : f32
    %539 = vector.broadcast %cst_227 : f32 to vector<8x128xf32>
    %540 = arith.mulf %539, %538 : vector<8x128xf32>
    %541 = math.tanh %540 : vector<8x128xf32>
    %cst_228 = arith.constant 5.000000e-01 : f32
    %542 = vector.broadcast %cst_228 : f32 to vector<8x128xf32>
    %543 = arith.mulf %542, %541 : vector<8x128xf32>
    %cst_229 = arith.constant 5.000000e-01 : f32
    %544 = vector.broadcast %cst_229 : f32 to vector<8x128xf32>
    %545 = arith.addf %543, %544 : vector<8x128xf32>
    %546 = vector.extract_strided_slice %537 {offsets = [0, 128], sizes = [8, 128], strides = [1, 1]} : vector<8x512xf32> to vector<8x128xf32>
    %cst_230 = arith.constant 5.000000e-01 : f32
    %547 = vector.broadcast %cst_230 : f32 to vector<8x128xf32>
    %548 = arith.mulf %547, %546 : vector<8x128xf32>
    %549 = math.tanh %548 : vector<8x128xf32>
    %cst_231 = arith.constant 5.000000e-01 : f32
    %550 = vector.broadcast %cst_231 : f32 to vector<8x128xf32>
    %551 = arith.mulf %550, %549 : vector<8x128xf32>
    %cst_232 = arith.constant 5.000000e-01 : f32
    %552 = vector.broadcast %cst_232 : f32 to vector<8x128xf32>
    %553 = arith.addf %551, %552 : vector<8x128xf32>
    %554 = vector.extract_strided_slice %537 {offsets = [0, 256], sizes = [8, 128], strides = [1, 1]} : vector<8x512xf32> to vector<8x128xf32>
    %555 = math.tanh %554 : vector<8x128xf32>
    %556 = vector.extract_strided_slice %537 {offsets = [0, 384], sizes = [8, 128], strides = [1, 1]} : vector<8x512xf32> to vector<8x128xf32>
    %cst_233 = arith.constant 5.000000e-01 : f32
    %557 = vector.broadcast %cst_233 : f32 to vector<8x128xf32>
    %558 = arith.mulf %557, %556 : vector<8x128xf32>
    %559 = math.tanh %558 : vector<8x128xf32>
    %cst_234 = arith.constant 5.000000e-01 : f32
    %560 = vector.broadcast %cst_234 : f32 to vector<8x128xf32>
    %561 = arith.mulf %560, %559 : vector<8x128xf32>
    %cst_235 = arith.constant 5.000000e-01 : f32
    %562 = vector.broadcast %cst_235 : f32 to vector<8x128xf32>
    %563 = arith.addf %561, %562 : vector<8x128xf32>
    %564 = arith.mulf %553, %481 : vector<8x128xf32>
    %565 = arith.mulf %545, %555 : vector<8x128xf32>
    %566 = arith.addf %564, %565 : vector<8x128xf32>
    %567 = math.tanh %566 : vector<8x128xf32>
    %568 = arith.mulf %563, %567 : vector<8x128xf32>
    %569 = arith.truncf %568 : vector<8x128xf32> to vector<8x128xbf16>
    %c0_236 = arith.constant 0 : index
    %c0_237 = arith.constant 0 : index
    %570 = vector.load %arg6[%c0_236, %c0_237] : memref<128x512xbf16, #tpu.memory_space<vmem>>, vector<128x512xbf16>
    %cst_238 = arith.constant dense<0.000000e+00> : vector<8x512xf32>
    %571 = tpu.matmul %569, %570, %cst_238 {dimension_numbers = #tpu.dot_dimension_numbers<[1], [0], [0], [1], [0, 0, 1, 1], [], []>} : vector<8x128xbf16>, vector<128x512xbf16>, vector<8x512xf32> -> vector<8x512xf32>
    %572 = arith.truncf %522 : vector<8x128xf32> to vector<8x128xbf16>
    %c0_239 = arith.constant 0 : index
    %c0_240 = arith.constant 0 : index
    %573 = vector.load %arg7[%c0_239, %c0_240] : memref<128x512xbf16, #tpu.memory_space<vmem>>, vector<128x512xbf16>
    %cst_241 = arith.constant dense<0.000000e+00> : vector<8x512xf32>
    %574 = tpu.matmul %572, %573, %cst_241 {dimension_numbers = #tpu.dot_dimension_numbers<[1], [0], [0], [1], [0, 0, 1, 1], [], []>} : vector<8x128xbf16>, vector<128x512xbf16>, vector<8x512xf32> -> vector<8x512xf32>
    %575 = arith.addf %571, %574 : vector<8x512xf32>
    %576 = arith.addf %575, %8 : vector<8x512xf32>
    %577 = vector.extract_strided_slice %576 {offsets = [0, 0], sizes = [8, 128], strides = [1, 1]} : vector<8x512xf32> to vector<8x128xf32>
    %cst_242 = arith.constant 5.000000e-01 : f32
    %578 = vector.broadcast %cst_242 : f32 to vector<8x128xf32>
    %579 = arith.mulf %578, %577 : vector<8x128xf32>
    %580 = math.tanh %579 : vector<8x128xf32>
    %cst_243 = arith.constant 5.000000e-01 : f32
    %581 = vector.broadcast %cst_243 : f32 to vector<8x128xf32>
    %582 = arith.mulf %581, %580 : vector<8x128xf32>
    %cst_244 = arith.constant 5.000000e-01 : f32
    %583 = vector.broadcast %cst_244 : f32 to vector<8x128xf32>
    %584 = arith.addf %582, %583 : vector<8x128xf32>
    %585 = vector.extract_strided_slice %576 {offsets = [0, 128], sizes = [8, 128], strides = [1, 1]} : vector<8x512xf32> to vector<8x128xf32>
    %cst_245 = arith.constant 5.000000e-01 : f32
    %586 = vector.broadcast %cst_245 : f32 to vector<8x128xf32>
    %587 = arith.mulf %586, %585 : vector<8x128xf32>
    %588 = math.tanh %587 : vector<8x128xf32>
    %cst_246 = arith.constant 5.000000e-01 : f32
    %589 = vector.broadcast %cst_246 : f32 to vector<8x128xf32>
    %590 = arith.mulf %589, %588 : vector<8x128xf32>
    %cst_247 = arith.constant 5.000000e-01 : f32
    %591 = vector.broadcast %cst_247 : f32 to vector<8x128xf32>
    %592 = arith.addf %590, %591 : vector<8x128xf32>
    %593 = vector.extract_strided_slice %576 {offsets = [0, 256], sizes = [8, 128], strides = [1, 1]} : vector<8x512xf32> to vector<8x128xf32>
    %594 = math.tanh %593 : vector<8x128xf32>
    %595 = vector.extract_strided_slice %576 {offsets = [0, 384], sizes = [8, 128], strides = [1, 1]} : vector<8x512xf32> to vector<8x128xf32>
    %cst_248 = arith.constant 5.000000e-01 : f32
    %596 = vector.broadcast %cst_248 : f32 to vector<8x128xf32>
    %597 = arith.mulf %596, %595 : vector<8x128xf32>
    %598 = math.tanh %597 : vector<8x128xf32>
    %cst_249 = arith.constant 5.000000e-01 : f32
    %599 = vector.broadcast %cst_249 : f32 to vector<8x128xf32>
    %600 = arith.mulf %599, %598 : vector<8x128xf32>
    %cst_250 = arith.constant 5.000000e-01 : f32
    %601 = vector.broadcast %cst_250 : f32 to vector<8x128xf32>
    %602 = arith.addf %600, %601 : vector<8x128xf32>
    %603 = arith.mulf %592, %520 : vector<8x128xf32>
    %604 = arith.mulf %584, %594 : vector<8x128xf32>
    %605 = arith.addf %603, %604 : vector<8x128xf32>
    %606 = math.tanh %605 : vector<8x128xf32>
    %607 = arith.mulf %602, %606 : vector<8x128xf32>
    %608 = arith.index_cast %c6_i32 : i32 to index
    %c0_251 = arith.constant 0 : index
    %c0_252 = arith.constant 0 : index
    %609 = vector.load %arg10[%608, %c0_251, %c0_252] : memref<8x8x128xf32, #tpu.memory_space<vmem>>, vector<1x8x128xf32>
    %610 = vector.shape_cast %609 : vector<1x8x128xf32> to vector<8x128xf32>
    %611 = vector.shape_cast %607 : vector<8x128xf32> to vector<1x8x128xf32>
    tpu.vector_store %arg10[%608, %c0_251, %c0_252], %611 {strides = array<i32>} : memref<8x8x128xf32, #tpu.memory_space<vmem>>, vector<1x8x128xf32>,
    %c7_i32 = arith.constant 7 : i32
    %612 = arith.index_cast %c7_i32 : i32 to index
    %c0_253 = arith.constant 0 : index
    %c0_254 = arith.constant 0 : index
    %613 = vector.load %arg1[%612, %c0_253, %c0_254] : memref<8x8x8xf32, #tpu.memory_space<vmem>>, vector<1x8x8xf32>
    %614 = vector.shape_cast %613 : vector<1x8x8xf32> to vector<8x8xf32>
    %615 = arith.truncf %614 : vector<8x8xf32> to vector<8x8xbf16>
    %c0_255 = arith.constant 0 : index
    %c0_256 = arith.constant 0 : index
    %616 = vector.load %arg4[%c0_255, %c0_256] : memref<8x512xbf16, #tpu.memory_space<vmem>>, vector<8x512xbf16>
    %cst_257 = arith.constant dense<0.000000e+00> : vector<8x512xf32>
    %617 = tpu.matmul %615, %616, %cst_257 {dimension_numbers = #tpu.dot_dimension_numbers<[1], [0], [0], [1], [0, 0, 1, 1], [], []>} : vector<8x8xbf16>, vector<8x512xbf16>, vector<8x512xf32> -> vector<8x512xf32>
    %618 = arith.truncf %568 : vector<8x128xf32> to vector<8x128xbf16>
    %c0_258 = arith.constant 0 : index
    %c0_259 = arith.constant 0 : index
    %619 = vector.load %arg5[%c0_258, %c0_259] : memref<128x512xbf16, #tpu.memory_space<vmem>>, vector<128x512xbf16>
    %cst_260 = arith.constant dense<0.000000e+00> : vector<8x512xf32>
    %620 = tpu.matmul %618, %619, %cst_260 {dimension_numbers = #tpu.dot_dimension_numbers<[1], [0], [0], [1], [0, 0, 1, 1], [], []>} : vector<8x128xbf16>, vector<128x512xbf16>, vector<8x512xf32> -> vector<8x512xf32>
    %621 = arith.addf %617, %620 : vector<8x512xf32>
    %622 = arith.addf %621, %5 : vector<8x512xf32>
    %623 = vector.extract_strided_slice %622 {offsets = [0, 0], sizes = [8, 128], strides = [1, 1]} : vector<8x512xf32> to vector<8x128xf32>
    %cst_261 = arith.constant 5.000000e-01 : f32
    %624 = vector.broadcast %cst_261 : f32 to vector<8x128xf32>
    %625 = arith.mulf %624, %623 : vector<8x128xf32>
    %626 = math.tanh %625 : vector<8x128xf32>
    %cst_262 = arith.constant 5.000000e-01 : f32
    %627 = vector.broadcast %cst_262 : f32 to vector<8x128xf32>
    %628 = arith.mulf %627, %626 : vector<8x128xf32>
    %cst_263 = arith.constant 5.000000e-01 : f32
    %629 = vector.broadcast %cst_263 : f32 to vector<8x128xf32>
    %630 = arith.addf %628, %629 : vector<8x128xf32>
    %631 = vector.extract_strided_slice %622 {offsets = [0, 128], sizes = [8, 128], strides = [1, 1]} : vector<8x512xf32> to vector<8x128xf32>
    %cst_264 = arith.constant 5.000000e-01 : f32
    %632 = vector.broadcast %cst_264 : f32 to vector<8x128xf32>
    %633 = arith.mulf %632, %631 : vector<8x128xf32>
    %634 = math.tanh %633 : vector<8x128xf32>
    %cst_265 = arith.constant 5.000000e-01 : f32
    %635 = vector.broadcast %cst_265 : f32 to vector<8x128xf32>
    %636 = arith.mulf %635, %634 : vector<8x128xf32>
    %cst_266 = arith.constant 5.000000e-01 : f32
    %637 = vector.broadcast %cst_266 : f32 to vector<8x128xf32>
    %638 = arith.addf %636, %637 : vector<8x128xf32>
    %639 = vector.extract_strided_slice %622 {offsets = [0, 256], sizes = [8, 128], strides = [1, 1]} : vector<8x512xf32> to vector<8x128xf32>
    %640 = math.tanh %639 : vector<8x128xf32>
    %641 = vector.extract_strided_slice %622 {offsets = [0, 384], sizes = [8, 128], strides = [1, 1]} : vector<8x512xf32> to vector<8x128xf32>
    %cst_267 = arith.constant 5.000000e-01 : f32
    %642 = vector.broadcast %cst_267 : f32 to vector<8x128xf32>
    %643 = arith.mulf %642, %641 : vector<8x128xf32>
    %644 = math.tanh %643 : vector<8x128xf32>
    %cst_268 = arith.constant 5.000000e-01 : f32
    %645 = vector.broadcast %cst_268 : f32 to vector<8x128xf32>
    %646 = arith.mulf %645, %644 : vector<8x128xf32>
    %cst_269 = arith.constant 5.000000e-01 : f32
    %647 = vector.broadcast %cst_269 : f32 to vector<8x128xf32>
    %648 = arith.addf %646, %647 : vector<8x128xf32>
    %649 = arith.mulf %638, %566 : vector<8x128xf32>
    %650 = arith.mulf %630, %640 : vector<8x128xf32>
    %651 = arith.addf %649, %650 : vector<8x128xf32>
    %652 = math.tanh %651 : vector<8x128xf32>
    %653 = arith.mulf %648, %652 : vector<8x128xf32>
    %654 = arith.truncf %653 : vector<8x128xf32> to vector<8x128xbf16>
    %c0_270 = arith.constant 0 : index
    %c0_271 = arith.constant 0 : index
    %655 = vector.load %arg6[%c0_270, %c0_271] : memref<128x512xbf16, #tpu.memory_space<vmem>>, vector<128x512xbf16>
    %cst_272 = arith.constant dense<0.000000e+00> : vector<8x512xf32>
    %656 = tpu.matmul %654, %655, %cst_272 {dimension_numbers = #tpu.dot_dimension_numbers<[1], [0], [0], [1], [0, 0, 1, 1], [], []>} : vector<8x128xbf16>, vector<128x512xbf16>, vector<8x512xf32> -> vector<8x512xf32>
    %657 = arith.truncf %607 : vector<8x128xf32> to vector<8x128xbf16>
    %c0_273 = arith.constant 0 : index
    %c0_274 = arith.constant 0 : index
    %658 = vector.load %arg7[%c0_273, %c0_274] : memref<128x512xbf16, #tpu.memory_space<vmem>>, vector<128x512xbf16>
    %cst_275 = arith.constant dense<0.000000e+00> : vector<8x512xf32>
    %659 = tpu.matmul %657, %658, %cst_275 {dimension_numbers = #tpu.dot_dimension_numbers<[1], [0], [0], [1], [0, 0, 1, 1], [], []>} : vector<8x128xbf16>, vector<128x512xbf16>, vector<8x512xf32> -> vector<8x512xf32>
    %660 = arith.addf %656, %659 : vector<8x512xf32>
    %661 = arith.addf %660, %8 : vector<8x512xf32>
    %662 = vector.extract_strided_slice %661 {offsets = [0, 0], sizes = [8, 128], strides = [1, 1]} : vector<8x512xf32> to vector<8x128xf32>
    %cst_276 = arith.constant 5.000000e-01 : f32
    %663 = vector.broadcast %cst_276 : f32 to vector<8x128xf32>
    %664 = arith.mulf %663, %662 : vector<8x128xf32>
    %665 = math.tanh %664 : vector<8x128xf32>
    %cst_277 = arith.constant 5.000000e-01 : f32
    %666 = vector.broadcast %cst_277 : f32 to vector<8x128xf32>
    %667 = arith.mulf %666, %665 : vector<8x128xf32>
    %cst_278 = arith.constant 5.000000e-01 : f32
    %668 = vector.broadcast %cst_278 : f32 to vector<8x128xf32>
    %669 = arith.addf %667, %668 : vector<8x128xf32>
    %670 = vector.extract_strided_slice %661 {offsets = [0, 128], sizes = [8, 128], strides = [1, 1]} : vector<8x512xf32> to vector<8x128xf32>
    %cst_279 = arith.constant 5.000000e-01 : f32
    %671 = vector.broadcast %cst_279 : f32 to vector<8x128xf32>
    %672 = arith.mulf %671, %670 : vector<8x128xf32>
    %673 = math.tanh %672 : vector<8x128xf32>
    %cst_280 = arith.constant 5.000000e-01 : f32
    %674 = vector.broadcast %cst_280 : f32 to vector<8x128xf32>
    %675 = arith.mulf %674, %673 : vector<8x128xf32>
    %cst_281 = arith.constant 5.000000e-01 : f32
    %676 = vector.broadcast %cst_281 : f32 to vector<8x128xf32>
    %677 = arith.addf %675, %676 : vector<8x128xf32>
    %678 = vector.extract_strided_slice %661 {offsets = [0, 256], sizes = [8, 128], strides = [1, 1]} : vector<8x512xf32> to vector<8x128xf32>
    %679 = math.tanh %678 : vector<8x128xf32>
    %680 = vector.extract_strided_slice %661 {offsets = [0, 384], sizes = [8, 128], strides = [1, 1]} : vector<8x512xf32> to vector<8x128xf32>
    %cst_282 = arith.constant 5.000000e-01 : f32
    %681 = vector.broadcast %cst_282 : f32 to vector<8x128xf32>
    %682 = arith.mulf %681, %680 : vector<8x128xf32>
    %683 = math.tanh %682 : vector<8x128xf32>
    %cst_283 = arith.constant 5.000000e-01 : f32
    %684 = vector.broadcast %cst_283 : f32 to vector<8x128xf32>
    %685 = arith.mulf %684, %683 : vector<8x128xf32>
    %cst_284 = arith.constant 5.000000e-01 : f32
    %686 = vector.broadcast %cst_284 : f32 to vector<8x128xf32>
    %687 = arith.addf %685, %686 : vector<8x128xf32>
    %688 = arith.mulf %677, %605 : vector<8x128xf32>
    %689 = arith.mulf %669, %679 : vector<8x128xf32>
    %690 = arith.addf %688, %689 : vector<8x128xf32>
    %691 = math.tanh %690 : vector<8x128xf32>
    %692 = arith.mulf %687, %691 : vector<8x128xf32>
    %693 = arith.index_cast %c7_i32 : i32 to index
    %c0_285 = arith.constant 0 : index
    %c0_286 = arith.constant 0 : index
    %694 = vector.load %arg10[%693, %c0_285, %c0_286] : memref<8x8x128xf32, #tpu.memory_space<vmem>>, vector<1x8x128xf32>
    %695 = vector.shape_cast %694 : vector<1x8x128xf32> to vector<8x128xf32>
    %696 = vector.shape_cast %692 : vector<8x128xf32> to vector<1x8x128xf32>
    tpu.vector_store %arg10[%693, %c0_285, %c0_286], %696 {strides = array<i32>} : memref<8x8x128xf32, #tpu.memory_space<vmem>>, vector<1x8x128xf32>,
    %c8_i32 = arith.constant 8 : i32
    %c0_287 = arith.constant 0 : index
    %c0_288 = arith.constant 0 : index
    %c0_289 = arith.constant 0 : index
    %697 = vector.load %arg13[%c0_287, %c0_288, %c0_289] : memref<2x8x128xf32, #tpu.memory_space<vmem>>, vector<1x8x128xf32>
    %698 = vector.shape_cast %697 : vector<1x8x128xf32> to vector<8x128xf32>
    %699 = vector.shape_cast %653 : vector<8x128xf32> to vector<1x8x128xf32>
    tpu.vector_store %arg13[%c0_287, %c0_288, %c0_289], %699 {strides = array<i32>} : memref<2x8x128xf32, #tpu.memory_space<vmem>>, vector<1x8x128xf32>,
    %c1_290 = arith.constant 1 : index
    %c0_291 = arith.constant 0 : index
    %c0_292 = arith.constant 0 : index
    %700 = vector.load %arg13[%c1_290, %c0_291, %c0_292] : memref<2x8x128xf32, #tpu.memory_space<vmem>>, vector<1x8x128xf32>
    %701 = vector.shape_cast %700 : vector<1x8x128xf32> to vector<8x128xf32>
    %702 = vector.shape_cast %692 : vector<8x128xf32> to vector<1x8x128xf32>
    tpu.vector_store %arg13[%c1_290, %c0_291, %c0_292], %702 {strides = array<i32>} : memref<2x8x128xf32, #tpu.memory_space<vmem>>, vector<1x8x128xf32>,
    %c0_293 = arith.constant 0 : index
    %c0_294 = arith.constant 0 : index
    %c0_295 = arith.constant 0 : index
    %703 = vector.load %arg14[%c0_293, %c0_294, %c0_295] : memref<2x8x128xf32, #tpu.memory_space<vmem>>, vector<1x8x128xf32>
    %704 = vector.shape_cast %703 : vector<1x8x128xf32> to vector<8x128xf32>
    %705 = vector.shape_cast %651 : vector<8x128xf32> to vector<1x8x128xf32>
    tpu.vector_store %arg14[%c0_293, %c0_294, %c0_295], %705 {strides = array<i32>} : memref<2x8x128xf32, #tpu.memory_space<vmem>>, vector<1x8x128xf32>,
    %c1_296 = arith.constant 1 : index
    %c0_297 = arith.constant 0 : index
    %c0_298 = arith.constant 0 : index
    %706 = vector.load %arg14[%c1_296, %c0_297, %c0_298] : memref<2x8x128xf32, #tpu.memory_space<vmem>>, vector<1x8x128xf32>
    %707 = vector.shape_cast %706 : vector<1x8x128xf32> to vector<8x128xf32>
    %708 = vector.shape_cast %690 : vector<8x128xf32> to vector<1x8x128xf32>
    tpu.vector_store %arg14[%c1_296, %c0_297, %c0_298], %708 {strides = array<i32>} : memref<2x8x128xf32, #tpu.memory_space<vmem>>, vector<1x8x128xf32>,
    %c0_i32_299 = arith.constant 0 : i32
    %709 = arith.cmpi eq, %arg0, %c0_i32_299 : i32
    %710 = arith.extui %709 : i1 to i32
    %c0_i32_300 = arith.constant 0 : i32
    %711 = arith.cmpi ne, %710, %c0_i32_300 : i32
    scf.if %711 {
      %c0_301 = arith.constant 0 : index
      %c0_302 = arith.constant 0 : index
      %c0_303 = arith.constant 0 : index
      %712 = vector.load %arg13[%c0_301, %c0_302, %c0_303] : memref<2x8x128xf32, #tpu.memory_space<vmem>>, vector<2x8x128xf32>
      %c0_304 = arith.constant 0 : index
      %c0_305 = arith.constant 0 : index
      %c0_306 = arith.constant 0 : index
      %713 = vector.load %arg11[%c0_304, %c0_305, %c0_306] : memref<2x8x128xf32, #tpu.memory_space<vmem>>, vector<2x8x128xf32>
      tpu.vector_store %arg11[%c0_304, %c0_305, %c0_306], %712 {strides = array<i32>} : memref<2x8x128xf32, #tpu.memory_space<vmem>>, vector<2x8x128xf32>,
      %c0_307 = arith.constant 0 : index
      %c0_308 = arith.constant 0 : index
      %c0_309 = arith.constant 0 : index
      %714 = vector.load %arg14[%c0_307, %c0_308, %c0_309] : memref<2x8x128xf32, #tpu.memory_space<vmem>>, vector<2x8x128xf32>
      %c0_310 = arith.constant 0 : index
      %c0_311 = arith.constant 0 : index
      %c0_312 = arith.constant 0 : index
      %715 = vector.load %arg12[%c0_310, %c0_311, %c0_312] : memref<2x8x128xf32, #tpu.memory_space<vmem>>, vector<2x8x128xf32>
      tpu.vector_store %arg12[%c0_310, %c0_311, %c0_312], %714 {strides = array<i32>} : memref<2x8x128xf32, #tpu.memory_space<vmem>>, vector<2x8x128xf32>,
    } else {
    }
    return
  }
  func.func @transform_0(%arg0: i32) -> (i32, i32, i32) {
    %c0_i32 = arith.constant 0 : i32
    %c0_i32_0 = arith.constant 0 : i32
    %c0_i32_1 = arith.constant 0 : i32
    return %arg0, %c0_i32, %c0_i32_0 : i32, i32, i32
  }
  func.func @transform_1(%arg0: i32) -> (i32, i32, i32) {
    %c0_i32 = arith.constant 0 : i32
    %c0_i32_0 = arith.constant 0 : i32
    %c0_i32_1 = arith.constant 0 : i32
    %c0_i32_2 = arith.constant 0 : i32
    return %c0_i32, %c0_i32_0, %c0_i32_1 : i32, i32, i32
  }
  func.func @transform_2(%arg0: i32) -> (i32, i32, i32) {
    %c0_i32 = arith.constant 0 : i32
    %c0_i32_0 = arith.constant 0 : i32
    %c0_i32_1 = arith.constant 0 : i32
    %c0_i32_2 = arith.constant 0 : i32
    return %c0_i32, %c0_i32_0, %c0_i32_1 : i32, i32, i32
  }
  func.func @transform_3(%arg0: i32) -> (i32, i32) {
    %c0_i32 = arith.constant 0 : i32
    %c0_i32_0 = arith.constant 0 : i32
    %c0_i32_1 = arith.constant 0 : i32
    return %c0_i32, %c0_i32_0 : i32, i32
  }
  func.func @transform_4(%arg0: i32) -> (i32, i32) {
    %c0_i32 = arith.constant 0 : i32
    %c0_i32_0 = arith.constant 0 : i32
    %c0_i32_1 = arith.constant 0 : i32
    return %c0_i32, %c0_i32_0 : i32, i32
  }
  func.func @transform_5(%arg0: i32) -> (i32, i32) {
    %c0_i32 = arith.constant 0 : i32
    %c0_i32_0 = arith.constant 0 : i32
    %c0_i32_1 = arith.constant 0 : i32
    return %c0_i32, %c0_i32_0 : i32, i32
  }
  func.func @transform_6(%arg0: i32) -> (i32, i32) {
    %c0_i32 = arith.constant 0 : i32
    %c0_i32_0 = arith.constant 0 : i32
    %c0_i32_1 = arith.constant 0 : i32
    return %c0_i32, %c0_i32_0 : i32, i32
  }
  func.func @transform_7(%arg0: i32) -> (i32, i32) {
    %c0_i32 = arith.constant 0 : i32
    %c0_i32_0 = arith.constant 0 : i32
    %c0_i32_1 = arith.constant 0 : i32
    return %c0_i32, %c0_i32_0 : i32, i32
  }
  func.func @transform_8(%arg0: i32) -> (i32, i32) {
    %c0_i32 = arith.constant 0 : i32
    %c0_i32_0 = arith.constant 0 : i32
    %c0_i32_1 = arith.constant 0 : i32
    return %c0_i32, %c0_i32_0 : i32, i32
  }
  func.func @transform_9(%arg0: i32) -> (i32, i32, i32) {
    %c0_i32 = arith.constant 0 : i32
    %c0_i32_0 = arith.constant 0 : i32
    %c0_i32_1 = arith.constant 0 : i32
    return %arg0, %c0_i32, %c0_i32_0 : i32, i32, i32
  }
  func.func @transform_10(%arg0: i32) -> (i32, i32, i32) {
    %c0_i32 = arith.constant 0 : i32
    %c0_i32_0 = arith.constant 0 : i32
    %c0_i32_1 = arith.constant 0 : i32
    %c0_i32_2 = arith.constant 0 : i32
    return %c0_i32, %c0_i32_0, %c0_i32_1 : i32, i32, i32
  }
  func.func @transform_11(%arg0: i32) -> (i32, i32, i32) {
    %c0_i32 = arith.constant 0 : i32
    %c0_i32_0 = arith.constant 0 : i32
    %c0_i32_1 = arith.constant 0 : i32
    %c0_i32_2 = arith.constant 0 : i32
    return %c0_i32, %c0_i32_0, %c0_i32_1 : i32, i32, i32
  }
}

</mosaic_0001>

<bundles_post_ra>
// kernel: lstm_forward.1
= control target key start
LH: loop header
LB: loop body
LE: loop exit
PB: predicated region body
PF: predicated region fallthrough
CT: control target
= control target key end

     0   :  { %vm337_vm0 = vcmask 1043456   ;;  %vm333_vm1 = vcmask 64512   ;;  %s16206_s4 = inlined_call_operand.vmem [shape: bf16[128,512], index: 4, kind: input, shape index: {}]   ;;  %s16207_s3 = inlined_call_operand.vmem [shape: bf16[8,512], index: 3, kind: input, shape index: {}]   ;;  %s16208_s1 = inlined_call_operand.vmem [shape: f32[2,8,128], index: 1, kind: input, shape index: {}]   ;;  %s16209_s6 = inlined_call_operand.vmem [shape: bf16[128,512], index: 6, kind: input, shape index: {}]   ;;  %s16210_s0 = inlined_call_operand.vmem [shape: f32[8,8,8], index: 0, kind: input, shape index: {}]   ;;  %s16211_s5 = inlined_call_operand.vmem [shape: bf16[128,512], index: 5, kind: input, shape index: {}]   ;;  %s16212_s7 = inlined_call_operand.vmem [shape: f32[1,512], index: 7, kind: input, shape index: {}]   ;;  %s16213_s2 = inlined_call_operand.vmem [shape: f32[2,8,128], index: 2, kind: input, shape index: {}]   ;;  %s16214_s8 = inlined_call_operand.vmem [shape: f32[1,512], index: 8, kind: input, shape index: {}]   ;;  %s16215_s9 = inlined_call_operand.vmem [shape: f32[8,8,128], index: 9, kind: output, shape index: {0}]   ;;  %s16216_s11 = inlined_call_operand.vmem [shape: f32[2,8,128], index: 11, kind: output, shape index: {2}]   ;;  %s16217_s10 = inlined_call_operand.vmem [shape: f32[2,8,128], index: 10, kind: output, shape index: {1}]  }
   0x1   :  { %v7112_v0 = vld [vmem:[%s16206_s4 + $0xe0] sm:$0xf]  ;;  %v10146_v1 = vld [vmem:[%s16206_s4 + $0xec] sm:$0xf0]  ;;  %v10144_v2 = vld [vmem:[%s16206_s4 + $0xe4] sm:$0xf] }
   0x2   :  { %v7113_v3 = vor.u32 %v10146_v1, %v7112_v0  ;;  %v7114_v4 = vld [vmem:[%s16206_s4 + $0xf0] sm:$0xf0]  ;;  %v7120_v5 = vld [vmem:[%s16206_s4 + $0xe8] sm:$0xf]  ;;  %v10147_v6 = vld [vmem:[%s16206_s4 + $0xf4] sm:$0xf0] }
   0x3   :  { %v7117_v7 = vor.u32 %v10144_v2, %v7114_v4  ;;  %v7121_v8 = vor.u32 %v10147_v6, %v7120_v5  ;;  %v10145_v9 = vld [vmem:[%s16206_s4 + $0xec] sm:$0xf]  ;;  %v7122_v10 = vld [vmem:[%s16206_s4 + $0xf8] sm:$0xf0]  ;;  %v7096_v11 = vld [vmem:[%s16206_s4 + $0xc0] sm:$0xf] }
   0x4   :  { %271 = vmatpush.bf16.msra.mxu0 %v7113_v3  ;;  %v7125_v12 = vor.u32 %v10145_v9, %v7122_v10  ;;  %v10142_v13 = vld [vmem:[%s16206_s4 + $0xcc] sm:$0xf0]  ;;  %v10140_v14 = vld [vmem:[%s16206_s4 + $0xc4] sm:$0xf]  ;;  %v7098_v15 = vld [vmem:[%s16206_s4 + $0xd0] sm:$0xf0] }
   0x5   :  { %284 = vmatpush.bf16.msra.mxu1 %v7117_v7  ;;  %297 = vmatpush.bf16.msra.mxu2 %v7121_v8  ;;  %v7097_v16 = vor.u32 %v10142_v13, %v7096_v11  ;;  %v7101_v17 = vor.u32 %v10140_v14, %v7098_v15  ;;  %v7104_v18 = vld [vmem:[%s16206_s4 + $0xc8] sm:$0xf]  ;;  %v10143_v19 = vld [vmem:[%s16206_s4 + $0xd4] sm:$0xf0]  ;;  %v10141_v20 = vld [vmem:[%s16206_s4 + $0xcc] sm:$0xf] }
   0x6   :  { %310 = vmatpush.bf16.msra.mxu3 %v7125_v12  ;;  %v7105_v21 = vor.u32 %v10143_v19, %v7104_v18  ;;  %v7106_v22 = vld [vmem:[%s16206_s4 + $0xd8] sm:$0xf0]  ;;  %v7080_v23 = vld [vmem:[%s16206_s4 + $0xa0] sm:$0xf]  ;;  %v10138_v24 = vld [vmem:[%s16206_s4 + $0xac] sm:$0xf0] }
   0x7   :  { %v7109_v25 = vor.u32 %v10141_v20, %v7106_v22  ;;  %v10136_v26 = vld [vmem:[%s16206_s4 + $0xa4] sm:$0xf]  ;;  %v7082_v27 = vld [vmem:[%s16206_s4 + $0xb0] sm:$0xf0]  ;;  %v7088_v28 = vld [vmem:[%s16206_s4 + $0xa8] sm:$0xf]  ;;  %v7081_v29 = vor.u32 %v10138_v24, %v7080_v23 }
   0x8   :  { %272 = vmatpush.bf16.msra.mxu0 %v7097_v16  ;;  %v10139_v30 = vld [vmem:[%s16206_s4 + $0xb4] sm:$0xf0]  ;;  %v10137_v31 = vld [vmem:[%s16206_s4 + $0xac] sm:$0xf]  ;;  %v7090_v32 = vld [vmem:[%s16206_s4 + $0xb8] sm:$0xf0]  ;;  %v7085_v33 = vor.u32 %v10136_v26, %v7082_v27 }
   0x9   :  { %285 = vmatpush.bf16.msra.mxu1 %v7101_v17  ;;  %298 = vmatpush.bf16.msra.mxu2 %v7105_v21  ;;  %v7089_v34 = vor.u32 %v10139_v30, %v7088_v28  ;;  %v7064_v35 = vld [vmem:[%s16206_s4 + $0x80] sm:$0xf]  ;;  %v10134_v36 = vld [vmem:[%s16206_s4 + $0x8c] sm:$0xf0]  ;;  %v10132_v37 = vld [vmem:[%s16206_s4 + $0x84] sm:$0xf]  ;;  %v7093_v38 = vor.u32 %v10137_v31, %v7090_v32 }
   0xa   :  { %311 = vmatpush.bf16.msra.mxu3 %v7109_v25  ;;  %v7066_v39 = vld [vmem:[%s16206_s4 + $0x90] sm:$0xf0]  ;;  %v7072_v40 = vld [vmem:[%s16206_s4 + $0x88] sm:$0xf]  ;;  %v10135_v41 = vld [vmem:[%s16206_s4 + $0x94] sm:$0xf0]  ;;  %v7065_v44 = vor.u32 %v10134_v36, %v7064_v35 }
   0xb   :  { %v10133_v42 = vld [vmem:[%s16206_s4 + $0x8c] sm:$0xf]  ;;  %v7074_v43 = vld [vmem:[%s16206_s4 + $0x98] sm:$0xf0]  ;;  %v7069_v45 = vor.u32 %v10132_v37, %v7066_v39  ;;  %v7073_v46 = vor.u32 %v10135_v41, %v7072_v40  ;;  %v7048_v47 = vld [vmem:[%s16206_s4 + $0x60] sm:$0xf] }
   0xc   :  { %273 = vmatpush.bf16.msra.mxu0 %v7081_v29  ;;  %v10130_v48 = vld [vmem:[%s16206_s4 + $0x6c] sm:$0xf0]  ;;  %v10128_v49 = vld [vmem:[%s16206_s4 + $0x64] sm:$0xf]  ;;  %v7077_v50 = vor.u32 %v10133_v42, %v7074_v43  ;;  %v7050_v51 = vld [vmem:[%s16206_s4 + $0x70] sm:$0xf0] }
   0xd   :  { %286 = vmatpush.bf16.msra.mxu1 %v7085_v33  ;;  %299 = vmatpush.bf16.msra.mxu2 %v7089_v34  ;;  %v7056_v52 = vld [vmem:[%s16206_s4 + $0x68] sm:$0xf]  ;;  %v10131_v53 = vld [vmem:[%s16206_s4 + $0x74] sm:$0xf0]  ;;  %v10129_v54 = vld [vmem:[%s16206_s4 + $0x6c] sm:$0xf]  ;;  %v7049_v56 = vor.u32 %v10130_v48, %v7048_v47  ;;  %v7053_v57 = vor.u32 %v10128_v49, %v7050_v51 }
   0xe   :  { %312 = vmatpush.bf16.msra.mxu3 %v7093_v38  ;;  %v7058_v55 = vld [vmem:[%s16206_s4 + $0x78] sm:$0xf0]  ;;  %v7057_v58 = vor.u32 %v10131_v53, %v7056_v52  ;;  %v7032_v59 = vld [vmem:[%s16206_s4 + $0x40] sm:$0xf]  ;;  %v10126_v60 = vld [vmem:[%s16206_s4 + $0x4c] sm:$0xf0] }
   0xf   :  { %v10124_v61 = vld [vmem:[%s16206_s4 + $0x44] sm:$0xf]  ;;  %v7061_v62 = vor.u32 %v10129_v54, %v7058_v55  ;;  %v7034_v63 = vld [vmem:[%s16206_s4 + $0x50] sm:$0xf0]  ;;  %v7040_v0 = vld [vmem:[%s16206_s4 + $0x48] sm:$0xf]  ;;  %v7033_v4 = vor.u32 %v10126_v60, %v7032_v59 }
  0x10   :  { %274 = vmatpush.bf16.msra.mxu0 %v7065_v44  ;;  %v10127_v1 = vld [vmem:[%s16206_s4 + $0x54] sm:$0xf0]  ;;  %v10125_v2 = vld [vmem:[%s16206_s4 + $0x4c] sm:$0xf]  ;;  %v7042_v3 = vld [vmem:[%s16206_s4 + $0x58] sm:$0xf0]  ;;  %v7037_v6 = vor.u32 %v10124_v61, %v7034_v63 }
  0x11   :  { %287 = vmatpush.bf16.msra.mxu1 %v7069_v45  ;;  %300 = vmatpush.bf16.msra.mxu2 %v7073_v46  ;;  %v7016_v5 = vld [vmem:[%s16206_s4 + $0x20] sm:$0xf]  ;;  %v7041_v7 = vor.u32 %v10127_v1, %v7040_v0  ;;  %v10122_v8 = vld [vmem:[%s16206_s4 + $0x2c] sm:$0xf0]  ;;  %v10120_v9 = vld [vmem:[%s16206_s4 + $0x24] sm:$0xf]  ;;  %v7045_v11 = vor.u32 %v10125_v2, %v7042_v3 }
  0x12   :  { %313 = vmatpush.bf16.msra.mxu3 %v7077_v50  ;;  %v7018_v10 = vld [vmem:[%s16206_s4 + $0x30] sm:$0xf0]  ;;  %v7024_v12 = vld [vmem:[%s16206_s4 + $0x28] sm:$0xf]  ;;  %v10123_v13 = vld [vmem:[%s16206_s4 + $0x34] sm:$0xf0]  ;;  %v7017_v19 = vor.u32 %v10122_v8, %v7016_v5 }
  0x13   :  { %v76_v14 = vld [vmem:[%s16207_s3] sm:$0xff]  ;;  %v10121_v15 = vld [vmem:[%s16206_s4 + $0x2c] sm:$0xf]  ;;  %v7026_v16 = vld [vmem:[%s16206_s4 + $0x38] sm:$0xf0]  ;;  %v7021_v21 = vor.u32 %v10120_v9, %v7018_v10  ;;  %v7025_v22 = vor.u32 %v10123_v13, %v7024_v12 }
  0x14   :  { %275 = vmatpush.bf16.msra.mxu0 %v7049_v56  ;;  %v325_v17 = vunpack.c.l.b16 %v76_v14  ;;  %v77_v18 = vld [vmem:[%s16207_s3 + $0x8] sm:$0xff]  ;;  %v326_v20 = vunpack.c.h.b16 %v76_v14  ;;  %v7000_v23 = vld [vmem:[%s16206_s4] sm:$0xf]  ;;  %v10118_v24 = vld [vmem:[%s16206_s4 + $0xc] sm:$0xf0]  ;;  %v7029_v26 = vor.u32 %v10121_v15, %v7026_v16 }
  0x15   :  { %288 = vmatpush.bf16.msra.mxu1 %v7053_v57  ;;  %301 = vmatpush.bf16.msra.mxu2 %v7057_v58  ;;  %v10116_v25 = vld [vmem:[%s16206_s4 + $0x4] sm:$0xf]  ;;  %v7002_v27 = vld [vmem:[%s16206_s4 + $0x10] sm:$0xf0]  ;;  %v7008_v28 = vld [vmem:[%s16206_s4 + $0x8] sm:$0xf]  ;;  %v327_v30 = vunpack.c.l.b16 %v77_v18  ;;  %v328_v34 = vunpack.c.h.b16 %v77_v18  ;;  %v7001_v35 = vor.u32 %v10118_v24, %v7000_v23 }
  0x16   :  { %314 = vmatpush.bf16.msra.mxu3 %v7061_v62  ;;  %v10119_v29 = vld [vmem:[%s16206_s4 + $0x14] sm:$0xf0]  ;;  %v10117_v31 = vld [vmem:[%s16206_s4 + $0xc] sm:$0xf]  ;;  %v7010_v32 = vld [vmem:[%s16206_s4 + $0x18] sm:$0xf0]  ;;  %v329_v33 = vpack.c.b16 %v325_v17, %v325_v17  ;;  %v330_v37 = vpack.c.b16 %v326_v20, %v326_v20  ;;  %v7005_v38 = vor.u32 %v10116_v25, %v7002_v27 }
  0x17   :  { %v40_v36 = vld [vmem:[%s16208_s1] sm:$0xff]  ;;  %v7009_v39 = vor.u32 %v10119_v29, %v7008_v28  ;;  %v7013_v40 = vor.u32 %v10117_v31, %v7010_v32  ;;  %v331_v41 = vpack.c.b16 %v327_v30, %v327_v30  ;;  %v10210_v43 = vld [vmem:[%s16209_s6 + $0xec] sm:$0xf0]  ;;  %v332_v46 = vpack.c.b16 %v328_v34, %v328_v34  ;;  %v7246_v48 = vld [vmem:[%s16209_s6 + $0xf0] sm:$0xf0] }
  0x18   :  { %276 = vmatpush.bf16.msra.mxu0 %v7033_v4  ;;  %v7244_v42 = vld [vmem:[%s16209_s6 + $0xe0] sm:$0xf]  ;;  %v78_v44 = vpack.c.bf16 %v40_v36, %v40_v36  ;;  %v11312_v45 = vsel %vm337_vm0, %v329_v33, 0  ;;  %v10208_v47 = vld [vmem:[%s16209_s6 + $0xe4] sm:$0xf]  ;;  %v11321_v49 = vsel %vm337_vm0, %v330_v37, 0 }
  0x19   :  { %289 = vmatpush.bf16.msra.mxu1 %v7037_v6  ;;  %302 = vmatpush.bf16.msra.mxu2 %v7041_v7  ;;  %v7252_v50 = vld [vmem:[%s16209_s6 + $0xe8] sm:$0xf]  ;;  %v10211_v51 = vld [vmem:[%s16209_s6 + $0xf4] sm:$0xf0]  ;;  %v10209_v52 = vld [vmem:[%s16209_s6 + $0xec] sm:$0xf]  ;;  %v7245_v55 = vor.u32 %v10210_v43, %v7244_v42  ;;  %v7249_v58 = vor.u32 %v10208_v47, %v7246_v48 }
  0x1a   :  { %315 = vmatpush.bf16.msra.mxu3 %v7045_v11  ;;  %v7254_v53 = vld [vmem:[%s16209_s6 + $0xf8] sm:$0xf0]  ;;  %v11337_v54 = vsel %vm337_vm0, %v331_v41, 0  ;;  %v7228_v56 = vld [vmem:[%s16209_s6 + $0xc0] sm:$0xf]  ;;  %v11344_v57 = vsel %vm337_vm0, %v332_v46, 0  ;;  %v7253_v59 = vor.u32 %v10211_v51, %v7252_v50 }
  0x1b   :  { %v10206_v60 = vld [vmem:[%s16209_s6 + $0xcc] sm:$0xf0]  ;;  %v10204_v61 = vld [vmem:[%s16209_s6 + $0xc4] sm:$0xf]  ;;  %v7257_v62 = vor.u32 %v10209_v52, %v7254_v53  ;;  %v7230_v63 = vld [vmem:[%s16209_s6 + $0xd0] sm:$0xf0] }
  0x1c   :  { %277 = vmatpush.bf16.msra.mxu0 %v7017_v19  ;;  %v7236_v0 = vld [vmem:[%s16209_s6 + $0xc8] sm:$0xf]  ;;  %v10207_v1 = vld [vmem:[%s16209_s6 + $0xd4] sm:$0xf0]  ;;  %v10205_v2 = vld [vmem:[%s16209_s6 + $0xcc] sm:$0xf]  ;;  %v7229_v4 = vor.u32 %v10206_v60, %v7228_v56  ;;  %v7233_v5 = vor.u32 %v10204_v61, %v7230_v63 }
  0x1d   :  { %290 = vmatpush.bf16.msra.mxu1 %v7021_v21  ;;  %303 = vmatpush.bf16.msra.mxu2 %v7025_v22  ;;  %v7238_v3 = vld [vmem:[%s16209_s6 + $0xd8] sm:$0xf0]  ;;  %v7237_v6 = vor.u32 %v10207_v1, %v7236_v0  ;;  %v7212_v7 = vld [vmem:[%s16209_s6 + $0xa0] sm:$0xf]  ;;  %v10202_v8 = vld [vmem:[%s16209_s6 + $0xac] sm:$0xf0] }
  0x1e   :  { %316 = vmatpush.bf16.msra.mxu3 %v7029_v26  ;;  %v10200_v9 = vld [vmem:[%s16209_s6 + $0xa4] sm:$0xf]  ;;  %v7241_v10 = vor.u32 %v10205_v2, %v7238_v3  ;;  %v7214_v11 = vld [vmem:[%s16209_s6 + $0xb0] sm:$0xf0]  ;;  %v7220_v12 = vld [vmem:[%s16209_s6 + $0xa8] sm:$0xf]  ;;  %v7213_v16 = vor.u32 %v10202_v8, %v7212_v7 }
  0x1f   :  { %v10203_v13 = vld [vmem:[%s16209_s6 + $0xb4] sm:$0xf0]  ;;  %v10201_v14 = vld [vmem:[%s16209_s6 + $0xac] sm:$0xf]  ;;  %v7222_v15 = vld [vmem:[%s16209_s6 + $0xb8] sm:$0xf0]  ;;  %v7217_v17 = vor.u32 %v10200_v9, %v7214_v11 }
  0x20   :  { %278 = vmatpush.bf16.msra.mxu0 %v7001_v35  ;;  %v7221_v18 = vor.u32 %v10203_v13, %v7220_v12  ;;  %v7196_v19 = vld [vmem:[%s16209_s6 + $0x80] sm:$0xf]  ;;  %v10198_v20 = vld [vmem:[%s16209_s6 + $0x8c] sm:$0xf0]  ;;  %v7225_v22 = vor.u32 %v10201_v14, %v7222_v15  ;;  %v10196_v23 = vld [vmem:[%s16209_s6 + $0x84] sm:$0xf] }
  0x21   :  { %291 = vmatpush.bf16.msra.mxu1 %v7005_v38  ;;  %304 = vmatpush.bf16.msra.mxu2 %v7009_v39  ;;  %v74_v21 = vld [vmem:[%s16210_s0] sm:$0xff]  ;;  %v7198_v24 = vld [vmem:[%s16209_s6 + $0x90] sm:$0xf0]  ;;  %v7197_v25 = vor.u32 %v10198_v20, %v7196_v19  ;;  %v7204_v26 = vld [vmem:[%s16209_s6 + $0x88] sm:$0xf] }
  0x22   :  { %317 = vmatpush.bf16.msra.mxu3 %v7013_v40  ;;  %v10199_v27 = vld [vmem:[%s16209_s6 + $0x94] sm:$0xf0]  ;;  %v10197_v28 = vld [vmem:[%s16209_s6 + $0x8c] sm:$0xf]  ;;  %v75_v29 = vpack.c.bf16 %v74_v21, %v74_v21  ;;  %v7201_v30 = vor.u32 %v10196_v23, %v7198_v24  ;;  %v7206_v31 = vld [vmem:[%s16209_s6 + $0x98] sm:$0xf0] }
  0x23   :  { %279 = vmatmul.bf16.vlgmr.msra.gmra.mxu0 %v78_v44  ;;  %v7180_v32 = vld [vmem:[%s16209_s6 + $0x60] sm:$0xf]  ;;  %v10194_v33 = vld [vmem:[%s16209_s6 + $0x6c] sm:$0xf0]  ;;  %v10192_v34 = vld [vmem:[%s16209_s6 + $0x64] sm:$0xf]  ;;  %v7205_v36 = vor.u32 %v10199_v27, %v7204_v26  ;;  %v7209_v37 = vor.u32 %v10197_v28, %v7206_v31 }
  0x24   :  { %357 = vmatpush.bf16.msrb.mxu0 %v11312_v45  ;;  %292 = vmatmul.bf16.vlgmr.msra.gmra.mxu1 %v78_v44  ;;  %v7182_v35 = vld [vmem:[%s16209_s6 + $0x70] sm:$0xf0]  ;;  %v7181_v38 = vor.u32 %v10194_v33, %v7180_v32  ;;  %v7188_v39 = vld [vmem:[%s16209_s6 + $0x68] sm:$0xf]  ;;  %v10195_v40 = vld [vmem:[%s16209_s6 + $0x74] sm:$0xf0] }
  0x25   :  { %370 = vmatpush.bf16.msrb.mxu1 %v11321_v49  ;;  %305 = vmatmul.bf16.vlgmr.msra.gmra.mxu2 %v78_v44  ;;  %v10193_v41 = vld [vmem:[%s16209_s6 + $0x6c] sm:$0xf]  ;;  %v7185_v42 = vor.u32 %v10192_v34, %v7182_v35  ;;  %v7190_v43 = vld [vmem:[%s16209_s6 + $0x78] sm:$0xf0]  ;;  %v10190_v46 = vld [vmem:[%s16209_s6 + $0x4c] sm:$0xf0]  ;;  %v7189_v50 = vor.u32 %v10195_v40, %v7188_v39 }
  0x26   :  { %318 = vmatmul.bf16.vlgmr.msra.gmra.mxu3 %v78_v44  ;;  %383 = vmatpush.bf16.msrb.mxu2 %v11337_v54  ;;  %v7164_v44 = vld [vmem:[%s16209_s6 + $0x40] sm:$0xf]  ;;  %v10188_v47 = vld [vmem:[%s16209_s6 + $0x44] sm:$0xf]  ;;  %v7166_v48 = vld [vmem:[%s16209_s6 + $0x50] sm:$0xf0]  ;;  %v7193_v51 = vor.u32 %v10193_v41, %v7190_v43 }
  0x27   :  { %396 = vmatpush.bf16.msrb.mxu3 %v11344_v57  ;;  %v7165_v52 = vor.u32 %v10190_v46, %v7164_v44  ;;  %v7172_v53 = vld [vmem:[%s16209_s6 + $0x48] sm:$0xf]  ;;  %v7169_v56 = vor.u32 %v10188_v47, %v7166_v48  ;;  %v10186_v63 = vld [vmem:[%s16209_s6 + $0x2c] sm:$0xf0]  ;;  %v10184_v0 = vld [vmem:[%s16209_s6 + $0x24] sm:$0xf] }
  0x28   :  { %650 = vmatpush.bf16.msra.mxu0 %v7245_v55  ;;  %v10191_v55 = vld [vmem:[%s16209_s6 + $0x54] sm:$0xf0]  ;;  %v7150_v2 = vld [vmem:[%s16209_s6 + $0x30] sm:$0xf0]  ;;  %v7156_v3 = vld [vmem:[%s16209_s6 + $0x28] sm:$0xf] }
  0x29   :  { %663 = vmatpush.bf16.msra.mxu1 %v7249_v58  ;;  %v10189_v58 = vld [vmem:[%s16209_s6 + $0x4c] sm:$0xf]  ;;  %v7173_v60 = vor.u32 %v10191_v55, %v7172_v53  ;;  %v7158_v8 = vld [vmem:[%s16209_s6 + $0x38] sm:$0xf0]  ;;  %v7132_v9 = vld [vmem:[%s16209_s6] sm:$0xf] }
  0x2a   :  { %676 = vmatpush.bf16.msra.mxu2 %v7253_v59  ;;  %v7174_v59 = vld [vmem:[%s16209_s6 + $0x58] sm:$0xf0]  ;;  %v10185_v7 = vld [vmem:[%s16209_s6 + $0x2c] sm:$0xf]  ;;  %v10182_v11 = vld [vmem:[%s16209_s6 + $0xc] sm:$0xf0] }
  0x2b   :  { %689 = vmatpush.bf16.msra.mxu3 %v7257_v62  ;;  %v7177_v61 = vor.u32 %v10189_v58, %v7174_v59  ;;  %v7148_v62 = vld [vmem:[%s16209_s6 + $0x20] sm:$0xf]  ;;  %v10180_v12 = vld [vmem:[%s16209_s6 + $0x4] sm:$0xf]  ;;  %v7134_v13 = vld [vmem:[%s16209_s6 + $0x10] sm:$0xf0]  ;;  %v7133_v14 = vor.u32 %v10182_v11, %v7132_v9 }
  0x2c   :  { %651 = vmatpush.bf16.msra.mxu0 %v7229_v4  ;;  %v7149_v1 = vor.u32 %v10186_v63, %v7148_v62  ;;  %v10187_v4 = vld [vmem:[%s16209_s6 + $0x34] sm:$0xf0]  ;;  %v7137_v15 = vor.u32 %v10180_v12, %v7134_v13  ;;  %v7142_v20 = vld [vmem:[%s16209_s6 + $0x18] sm:$0xf0]  ;;  %v7372_v21 = vld [vmem:[%s16211_s5 + $0xe0] sm:$0xf] }
  0x2d   :  { %664 = vmatpush.bf16.msra.mxu1 %v7233_v5  ;;  %v7153_v5 = vor.u32 %v10184_v0, %v7150_v2  ;;  %v7374_v26 = vld [vmem:[%s16211_s5 + $0xf0] sm:$0xf0]  ;;  %v7380_v27 = vld [vmem:[%s16211_s5 + $0xe8] sm:$0xf]  ;;  %v7382_v31 = vld [vmem:[%s16211_s5 + $0xf8] sm:$0xf0] }
  0x2e   :  { %677 = vmatpush.bf16.msra.mxu2 %v7237_v6  ;;  %v7157_v6 = vor.u32 %v10187_v4, %v7156_v3  ;;  %v7356_v34 = vld [vmem:[%s16211_s5 + $0xc0] sm:$0xf]  ;;  %v10174_v35 = vld [vmem:[%s16211_s5 + $0xcc] sm:$0xf0]  ;;  %v7364_v39 = vld [vmem:[%s16211_s5 + $0xc8] sm:$0xf] }
  0x2f   :  { %690 = vmatpush.bf16.msra.mxu3 %v7241_v10  ;;  %v7161_v10 = vor.u32 %v10185_v7, %v7158_v8  ;;  %v10175_v40 = vld [vmem:[%s16211_s5 + $0xd4] sm:$0xf0]  ;;  %v10173_v43 = vld [vmem:[%s16211_s5 + $0xcc] sm:$0xf]  ;;  %v7366_v44 = vld [vmem:[%s16211_s5 + $0xd8] sm:$0xf0] }
  0x30   :  { %652 = vmatpush.bf16.msra.mxu0 %v7213_v16  ;;  %v7140_v16 = vld [vmem:[%s16209_s6 + $0x8] sm:$0xf]  ;;  %v7340_v46 = vld [vmem:[%s16211_s5 + $0xa0] sm:$0xf]  ;;  %v7369_v47 = vor.u32 %v10173_v43, %v7366_v44  ;;  %v10170_v48 = vld [vmem:[%s16211_s5 + $0xac] sm:$0xf0] }
  0x31   :  { %665 = vmatpush.bf16.msra.mxu1 %v7217_v17  ;;  %v10183_v17 = vld [vmem:[%s16209_s6 + $0x14] sm:$0xf0]  ;;  %v7348_v53 = vld [vmem:[%s16211_s5 + $0xa8] sm:$0xf]  ;;  %v7324_v62 = vld [vmem:[%s16211_s5 + $0x80] sm:$0xf] }
  0x32   :  { %678 = vmatpush.bf16.msra.mxu2 %v7221_v18  ;;  %v10181_v18 = vld [vmem:[%s16209_s6 + $0xc] sm:$0xf]  ;;  %v7141_v19 = vor.u32 %v10183_v17, %v7140_v16  ;;  %v10171_v55 = vld [vmem:[%s16211_s5 + $0xb4] sm:$0xf0]  ;;  %v10166_v63 = vld [vmem:[%s16211_s5 + $0x8c] sm:$0xf0] }
  0x33   :  { %691 = vmatpush.bf16.msra.mxu3 %v7225_v22  ;;  %7126 = vmatmul.msk.bf16.vlgmr.msrb.gmra.mxu0 %vm333_vm1, %v75_v29  ;;  %v10178_v22 = vld [vmem:[%s16211_s5 + $0xec] sm:$0xf0]  ;;  %v7145_v23 = vor.u32 %v10181_v18, %v7142_v20  ;;  %v7349_v59 = vor.u32 %v10171_v55, %v7348_v53  ;;  %v7325_v0 = vor.u32 %v10166_v63, %v7324_v62  ;;  %v7326_v2 = vld [vmem:[%s16211_s5 + $0x90] sm:$0xf0]  ;;  %v7332_v4 = vld [vmem:[%s16211_s5 + $0x88] sm:$0xf] }
  0x34   :  { %653 = vmatpush.bf16.msra.mxu0 %v7197_v25  ;;  %7127 = vmatmul.msk.bf16.vlgmr.msrb.gmra.mxu1 %vm333_vm1, %v75_v29  ;;  %v7373_v24 = vor.u32 %v10178_v22, %v7372_v21  ;;  %v10176_v25 = vld [vmem:[%s16211_s5 + $0xe4] sm:$0xf]  ;;  %v7334_v8 = vld [vmem:[%s16211_s5 + $0x98] sm:$0xf0]  ;;  %v10162_v11 = vld [vmem:[%s16211_s5 + $0x6c] sm:$0xf0] }
  0x35   :  { %666 = vmatpush.bf16.msra.mxu1 %v7201_v30  ;;  %7128 = vmatmul.msk.bf16.vlgmr.msrb.gmra.mxu2 %vm333_vm1, %v75_v29  ;;  %v7377_v28 = vor.u32 %v10176_v25, %v7374_v26  ;;  %v10177_v30 = vld [vmem:[%s16211_s5 + $0xec] sm:$0xf]  ;;  %v10160_v12 = vld [vmem:[%s16211_s5 + $0x64] sm:$0xf]  ;;  %v10163_v16 = vld [vmem:[%s16211_s5 + $0x74] sm:$0xf0] }
  0x36   :  { %7129 = vmatmul.msk.bf16.vlgmr.msrb.gmra.mxu3 %vm333_vm1, %v75_v29  ;;  %679 = vmatpush.bf16.msra.mxu2 %v7205_v36  ;;  %v10179_v29 = vld [vmem:[%s16211_s5 + $0xf4] sm:$0xf0]  ;;  %v7385_v33 = vor.u32 %v10177_v30, %v7382_v31  ;;  %v10172_v36 = vld [vmem:[%s16211_s5 + $0xc4] sm:$0xf]  ;;  %v7318_v20 = vld [vmem:[%s16211_s5 + $0x78] sm:$0xf0] }
  0x37   :  { %692 = vmatpush.bf16.msra.mxu3 %v7209_v37  ;;  %v7381_v32 = vor.u32 %v10179_v29, %v7380_v27  ;;  %v7357_v37 = vor.u32 %v10174_v35, %v7356_v34  ;;  %v41_v22 = vld [vmem:[%s16208_s1 + $0x8] sm:$0xff]  ;;  %v10156_v27 = vld [vmem:[%s16211_s5 + $0x44] sm:$0xf]  ;;  %v10159_v31 = vld [vmem:[%s16211_s5 + $0x54] sm:$0xf0] }
  0x38   :  { %654 = vmatpush.bf16.msra.mxu0 %v7181_v38  ;;  %v7358_v38 = vld [vmem:[%s16211_s5 + $0xd0] sm:$0xf0]  ;;  %v457_v25 = vpack.c.bf16 %v41_v22, %v41_v22  ;;  %v7300_v30 = vld [vmem:[%s16211_s5 + $0x48] sm:$0xf]  ;;  %v7302_v34 = vld [vmem:[%s16211_s5 + $0x58] sm:$0xf0] }
  0x39   :  { %667 = vmatpush.bf16.msra.mxu1 %v7185_v42  ;;  %v7361_v41 = vor.u32 %v10172_v36, %v7358_v38  ;;  %v7365_v42 = vor.u32 %v10175_v40, %v7364_v39  ;;  %v7276_v36 = vld [vmem:[%s16211_s5 + $0x20] sm:$0xf]  ;;  %v10152_v38 = vld [vmem:[%s16211_s5 + $0x24] sm:$0xf]  ;;  %v7278_v40 = vld [vmem:[%s16211_s5 + $0x30] sm:$0xf0] }
  0x3a   :  { %680 = vmatpush.bf16.msra.mxu2 %v7189_v50  ;;  %v10168_v50 = vld [vmem:[%s16211_s5 + $0xa4] sm:$0xf]  ;;  %v7281_v43 = vor.u32 %v10152_v38, %v7278_v40  ;;  %v10149_v62 = vld [vmem:[%s16211_s5 + $0xc] sm:$0xf]  ;;  %v7270_v63 = vld [vmem:[%s16211_s5 + $0x18] sm:$0xf0] }
  0x3b   :  { %693 = vmatpush.bf16.msra.mxu3 %v7193_v51  ;;  %v7342_v51 = vld [vmem:[%s16211_s5 + $0xb0] sm:$0xf0]  ;;  %v10239_v22 = vld [vmem:[%s16206_s4 + $0xd4] sm:$0xf0]  ;;  %v7479_v40 = vld [vmem:[%s16206_s4 + $0xb8] sm:$0xf0] }
  0x3c   :  { %655 = vmatpush.bf16.msra.mxu0 %v7165_v52  ;;  %v7341_v52 = vor.u32 %v10170_v48, %v7340_v46  ;;  %v7345_v58 = vor.u32 %v10168_v50, %v7342_v51  ;;  %v10153_v46 = vld [vmem:[%s16211_s5 + $0x2c] sm:$0xf]  ;;  %v7260_v51 = vld [vmem:[%s16211_s5] sm:$0xf] }
  0x3d   :  { %668 = vmatpush.bf16.msra.mxu1 %v7169_v56  ;;  %v10169_v56 = vld [vmem:[%s16211_s5 + $0xac] sm:$0xf] }
  0x3e   :  { %681 = vmatpush.bf16.msra.mxu2 %v7173_v60  ;;  %v7350_v60 = vld [vmem:[%s16211_s5 + $0xb8] sm:$0xf0] }
  0x3f   :  { %694 = vmatpush.bf16.msra.mxu3 %v7177_v61  ;;  %v7353_v61 = vor.u32 %v10169_v56, %v7350_v60  ;;  %v10148_v56 = vld [vmem:[%s16211_s5 + $0x4] sm:$0xf] }
  0x40   :  { %656 = vmatpush.bf16.msra.mxu0 %v7149_v1  ;;  %v10164_v1 = vld [vmem:[%s16211_s5 + $0x84] sm:$0xf] }
  0x41   :  { %669 = vmatpush.bf16.msra.mxu1 %v7153_v5  ;;  %v7329_v3 = vor.u32 %v10164_v1, %v7326_v2  ;;  %v10167_v5 = vld [vmem:[%s16211_s5 + $0x94] sm:$0xf0]  ;;  %v7273_v1 = vor.u32 %v10149_v62, %v7270_v63  ;;  %v7501_v2 = vld [vmem:[%s16206_s4 + $0xe0] sm:$0xf] }
  0x42   :  { %682 = vmatpush.bf16.msra.mxu2 %v7157_v6  ;;  %v10165_v6 = vld [vmem:[%s16211_s5 + $0x8c] sm:$0xf]  ;;  %v7333_v7 = vor.u32 %v10167_v5, %v7332_v4  ;;  %v10240_v4 = vld [vmem:[%s16206_s4 + $0xe4] sm:$0xf] }
  0x43   :  { %695 = vmatpush.bf16.msra.mxu3 %v7161_v10  ;;  %v7337_v9 = vor.u32 %v10165_v6, %v7334_v8  ;;  %v7308_v10 = vld [vmem:[%s16211_s5 + $0x60] sm:$0xf]  ;;  %v7503_v6 = vld [vmem:[%s16206_s4 + $0xf0] sm:$0xf0]  ;;  %v10243_v8 = vld [vmem:[%s16206_s4 + $0xf4] sm:$0xf0] }
  0x44   :  { %657 = vmatpush.bf16.msra.mxu0 %v7133_v14  ;;  %v7309_v13 = vor.u32 %v10162_v11, %v7308_v10  ;;  %v7310_v14 = vld [vmem:[%s16211_s5 + $0x70] sm:$0xf0]  ;;  %v10241_v11 = vld [vmem:[%s16206_s4 + $0xec] sm:$0xf] }
  0x45   :  { %670 = vmatpush.bf16.msra.mxu1 %v7137_v15  ;;  %v7316_v15 = vld [vmem:[%s16211_s5 + $0x68] sm:$0xf]  ;;  %v7313_v17 = vor.u32 %v10160_v12, %v7310_v14  ;;  %v7511_v12 = vld [vmem:[%s16206_s4 + $0xf8] sm:$0xf0] }
  0x46   :  { %683 = vmatpush.bf16.msra.mxu2 %v7141_v19  ;;  %v7317_v18 = vor.u32 %v10163_v16, %v7316_v15  ;;  %v10161_v19 = vld [vmem:[%s16211_s5 + $0x6c] sm:$0xf]  ;;  %v7514_v14 = vor.u32 %v10241_v11, %v7511_v12  ;;  %v10238_v15 = vld [vmem:[%s16206_s4 + $0xcc] sm:$0xf0]  ;;  %v10236_v16 = vld [vmem:[%s16206_s4 + $0xc4] sm:$0xf] }
  0x47   :  { %696 = vmatpush.bf16.msra.mxu3 %v7145_v23  ;;  %v7321_v21 = vor.u32 %v10161_v19, %v7318_v20  ;;  %v7292_v23 = vld [vmem:[%s16211_s5 + $0x40] sm:$0xf]  ;;  %658 = vmatmul.bf16.vlgmr.msra.gmra.mxu0 %v457_v25 }
  0x48   :  { %862 = vmatpush.bf16.msrb.mxu0 %v7373_v24  ;;  %v10158_v24 = vld [vmem:[%s16211_s5 + $0x4c] sm:$0xf0]  ;;  %671 = vmatmul.bf16.vlgmr.msra.gmra.mxu1 %v457_v25 }
  0x49   :  { %875 = vmatpush.bf16.msrb.mxu1 %v7377_v28  ;;  %v7293_v26 = vor.u32 %v10158_v24, %v7292_v23  ;;  %v7294_v28 = vld [vmem:[%s16211_s5 + $0x50] sm:$0xf0]  ;;  %684 = vmatmul.bf16.vlgmr.msra.gmra.mxu2 %v457_v25  ;;  %v10237_v23 = vld [vmem:[%s16206_s4 + $0xcc] sm:$0xf] }
  0x4a   :  { %888 = vmatpush.bf16.msrb.mxu2 %v7381_v32  ;;  %v7297_v29 = vor.u32 %v10156_v27, %v7294_v28  ;;  %v10157_v32 = vld [vmem:[%s16211_s5 + $0x4c] sm:$0xf]  ;;  %697 = vmatmul.bf16.vlgmr.msra.gmra.mxu3 %v457_v25  ;;  %v7495_v27 = vld [vmem:[%s16206_s4 + $0xd8] sm:$0xf0] }
  0x4b   :  { %901 = vmatpush.bf16.msrb.mxu3 %v7385_v33  ;;  %v7301_v33 = vor.u32 %v10159_v31, %v7300_v30  ;;  %v7305_v35 = vor.u32 %v10157_v32, %v7302_v34  ;;  %v7469_v30 = vld [vmem:[%s16206_s4 + $0xa0] sm:$0xf]  ;;  %v10234_v31 = vld [vmem:[%s16206_s4 + $0xac] sm:$0xf0]  ;;  %v10232_v32 = vld [vmem:[%s16206_s4 + $0xa4] sm:$0xf] }
  0x4c   :  { %863 = vmatpush.bf16.msrb.mxu0 %v7357_v37  ;;  %v10154_v37 = vld [vmem:[%s16211_s5 + $0x2c] sm:$0xf0]  ;;  %v7471_v34 = vld [vmem:[%s16206_s4 + $0xb0] sm:$0xf0] }
  0x4d   :  { %876 = vmatpush.bf16.msrb.mxu1 %v7361_v41  ;;  %v7277_v39 = vor.u32 %v10154_v37, %v7276_v36  ;;  %v7284_v41 = vld [vmem:[%s16211_s5 + $0x28] sm:$0xf]  ;;  %v10235_v36 = vld [vmem:[%s16206_s4 + $0xb4] sm:$0xf0]  ;;  %v7474_v37 = vor.u32 %v10232_v32, %v7471_v34 }
  0x4e   :  { %889 = vmatpush.bf16.msrb.mxu2 %v7365_v42  ;;  %v10155_v42 = vld [vmem:[%s16211_s5 + $0x34] sm:$0xf0] }
  0x4f   :  { %902 = vmatpush.bf16.msrb.mxu3 %v7369_v47  ;;  %v7285_v44 = vor.u32 %v10155_v42, %v7284_v41  ;;  %v7286_v47 = vld [vmem:[%s16211_s5 + $0x38] sm:$0xf0]  ;;  %v48_v41 = vld [vmem:[%s16212_s7] sm:$0xf] }
  0x50   :  { %864 = vmatpush.bf16.msrb.mxu0 %v7341_v52  ;;  %v7289_v48 = vor.u32 %v10153_v46, %v7286_v47  ;;  %v10150_v52 = vld [vmem:[%s16211_s5 + $0xc] sm:$0xf0]  ;;  %v10228_v46 = vld [vmem:[%s16206_s4 + $0x84] sm:$0xf] }
  0x51   :  { %877 = vmatpush.bf16.msrb.mxu1 %v7345_v58  ;;  %v7261_v55 = vor.u32 %v10150_v52, %v7260_v51  ;;  %v7262_v58 = vld [vmem:[%s16211_s5 + $0x10] sm:$0xf0]  ;;  %v7461_v51 = vld [vmem:[%s16206_s4 + $0x88] sm:$0xf]  ;;  %v10231_v52 = vld [vmem:[%s16206_s4 + $0x94] sm:$0xf0] }
  0x52   :  { %890 = vmatpush.bf16.msrb.mxu2 %v7349_v59  ;;  %v7268_v59 = vld [vmem:[%s16211_s5 + $0x8] sm:$0xf]  ;;  %v7265_v60 = vor.u32 %v10148_v56, %v7262_v58  ;;  %v11816_v56 = vperm.slane %v48_v41, 0 }
  0x53   :  { %903 = vmatpush.bf16.msrb.mxu3 %v7353_v61  ;;  %v10151_v61 = vld [vmem:[%s16211_s5 + $0x14] sm:$0xf0] }
  0x54   :  { %865 = vmatpush.bf16.msrb.mxu0 %v7325_v0  ;;  %v7269_v0 = vor.u32 %v10151_v61, %v7268_v59  ;;  %v7462_v59 = vor.u32 %v10231_v52, %v7461_v51  ;;  %v7463_v61 = vld [vmem:[%s16206_s4 + $0x98] sm:$0xf0] }
  0x55   :  { %878 = vmatpush.bf16.msrb.mxu1 %v7329_v3  ;;  %v10242_v3 = vld [vmem:[%s16206_s4 + $0xec] sm:$0xf0] }
  0x56   :  { %891 = vmatpush.bf16.msrb.mxu2 %v7333_v7  ;;  %v7502_v5 = vor.u32 %v10242_v3, %v7501_v2  ;;  %v7509_v7 = vld [vmem:[%s16206_s4 + $0xe8] sm:$0xf] }
  0x57   :  { %904 = vmatpush.bf16.msrb.mxu3 %v7337_v9  ;;  %v7506_v9 = vor.u32 %v10240_v4, %v7503_v6  ;;  %v7510_v10 = vor.u32 %v10243_v8, %v7509_v7  ;;  %v7437_v4 = vld [vmem:[%s16206_s4 + $0x60] sm:$0xf]  ;;  %v10224_v6 = vld [vmem:[%s16206_s4 + $0x64] sm:$0xf] }
  0x58   :  { %866 = vmatpush.bf16.msrb.mxu0 %v7309_v13  ;;  %v7485_v13 = vld [vmem:[%s16206_s4 + $0xc0] sm:$0xf] }
  0x59   :  { %879 = vmatpush.bf16.msrb.mxu1 %v7313_v17  ;;  %v7487_v17 = vld [vmem:[%s16206_s4 + $0xd0] sm:$0xf0]  ;;  %v7486_v19 = vor.u32 %v10238_v15, %v7485_v13  ;;  %v10225_v13 = vld [vmem:[%s16206_s4 + $0x6c] sm:$0xf]  ;;  %v7421_v15 = vld [vmem:[%s16206_s4 + $0x40] sm:$0xf] }
  0x5a   :  { %892 = vmatpush.bf16.msrb.mxu2 %v7317_v18  ;;  %v7490_v20 = vor.u32 %v10236_v16, %v7487_v17 }
  0x5b   :  { %905 = vmatpush.bf16.msrb.mxu3 %v7321_v21  ;;  %v7493_v21 = vld [vmem:[%s16206_s4 + $0xc8] sm:$0xf] }
  0x5c   :  { %867 = vmatpush.bf16.msrb.mxu0 %v7293_v26  ;;  %v7494_v26 = vor.u32 %v10239_v22, %v7493_v21  ;;  %v7423_v21 = vld [vmem:[%s16206_s4 + $0x50] sm:$0xf0] }
  0x5d   :  { %880 = vmatpush.bf16.msrb.mxu1 %v7297_v29  ;;  %v7498_v29 = vor.u32 %v10237_v23, %v7495_v27  ;;  %v11866_v23 = vperm.slane %v48_v41, 2 }
  0x5e   :  { %893 = vmatpush.bf16.msrb.mxu2 %v7301_v33  ;;  %v7470_v33 = vor.u32 %v10234_v31, %v7469_v30  ;;  %v10221_v30 = vld [vmem:[%s16206_s4 + $0x4c] sm:$0xf]  ;;  %v7431_v31 = vld [vmem:[%s16206_s4 + $0x58] sm:$0xf0] }
  0x5f   :  { %906 = vmatpush.bf16.msrb.mxu3 %v7305_v35  ;;  %v7477_v35 = vld [vmem:[%s16206_s4 + $0xa8] sm:$0xf] }
  0x60   :  { %868 = vmatpush.bf16.msrb.mxu0 %v7277_v39  ;;  %v7478_v38 = vor.u32 %v10235_v36, %v7477_v35  ;;  %v10233_v39 = vld [vmem:[%s16206_s4 + $0xac] sm:$0xf]  ;;  %v7405_v35 = vld [vmem:[%s16206_s4 + $0x20] sm:$0xf]  ;;  %v10218_v36 = vld [vmem:[%s16206_s4 + $0x2c] sm:$0xf0] }
  0x61   :  { %881 = vmatpush.bf16.msrb.mxu1 %v7281_v43  ;;  %v7482_v42 = vor.u32 %v10233_v39, %v7479_v40  ;;  %v7453_v43 = vld [vmem:[%s16206_s4 + $0x80] sm:$0xf]  ;;  %v7406_v52 = vor.u32 %v10218_v36, %v7405_v35  ;;  %v10307_v35 = vld [vmem:[%s16209_s6 + $0xf4] sm:$0xf0] }
  0x62   :  { %894 = vmatpush.bf16.msrb.mxu2 %v7285_v44  ;;  %v10230_v44 = vld [vmem:[%s16206_s4 + $0x8c] sm:$0xf0] }
  0x63   :  { %907 = vmatpush.bf16.msrb.mxu3 %v7289_v48  ;;  %v7454_v47 = vor.u32 %v10230_v44, %v7453_v43  ;;  %v7455_v48 = vld [vmem:[%s16206_s4 + $0x90] sm:$0xf0]  ;;  %v7413_v43 = vld [vmem:[%s16206_s4 + $0x28] sm:$0xf]  ;;  %v10219_v44 = vld [vmem:[%s16206_s4 + $0x34] sm:$0xf0] }
  0x64   :  { %869 = vmatpush.bf16.msrb.mxu0 %v7261_v55  ;;  %v7458_v58 = vor.u32 %v10228_v46, %v7455_v48  ;;  %v7415_v48 = vld [vmem:[%s16206_s4 + $0x38] sm:$0xf0] }
  0x65   :  { %882 = vmatpush.bf16.msrb.mxu1 %v7265_v60  ;;  %v10229_v60 = vld [vmem:[%s16206_s4 + $0x8c] sm:$0xf] }
  0x66   :  { %895 = vmatpush.bf16.msrb.mxu2 %v7269_v0  ;;  %v11824_v0 = vperm.slane %v48_v41, 1 }
  0x67   :  { %908 = vmatpush.bf16.msrb.mxu3 %v7273_v1  ;;  %v7466_v1 = vor.u32 %v10229_v60, %v7463_v61  ;;  %v10214_v60 = vld [vmem:[%s16206_s4 + $0xc] sm:$0xf0]  ;;  %v10212_v61 = vld [vmem:[%s16206_s4 + $0x4] sm:$0xf] }
  0x68   :  { %1134 = vmatpush.bf16.msra.mxu0 %v7502_v5  ;;  %v10226_v5 = vld [vmem:[%s16206_s4 + $0x6c] sm:$0xf0] }
  0x69   :  { %1147 = vmatpush.bf16.msra.mxu1 %v7506_v9  ;;  %v7438_v8 = vor.u32 %v10226_v5, %v7437_v4  ;;  %v7445_v9 = vld [vmem:[%s16206_s4 + $0x68] sm:$0xf]  ;;  %v10213_v5 = vld [vmem:[%s16206_s4 + $0xc] sm:$0xf] }
  0x6a   :  { %1160 = vmatpush.bf16.msra.mxu2 %v7510_v10  ;;  %v10227_v10 = vld [vmem:[%s16206_s4 + $0x74] sm:$0xf0] }
  0x6b   :  { %1173 = vmatpush.bf16.msra.mxu3 %v7514_v14  ;;  %v7447_v14 = vld [vmem:[%s16206_s4 + $0x78] sm:$0xf0] }
  0x6c   :  { %1135 = vmatpush.bf16.msra.mxu0 %v7486_v19  ;;  %v7450_v17 = vor.u32 %v10225_v13, %v7447_v14  ;;  %v10222_v19 = vld [vmem:[%s16206_s4 + $0x4c] sm:$0xf0]  ;;  %v44_v13 = vld [vmem:[%s16213_s2] sm:$0xff] }
  0x6d   :  { %1148 = vmatpush.bf16.msra.mxu1 %v7490_v20  ;;  %v10220_v20 = vld [vmem:[%s16206_s4 + $0x44] sm:$0xf] }
  0x6e   :  { %1161 = vmatpush.bf16.msra.mxu2 %v7494_v26  ;;  %v10223_v26 = vld [vmem:[%s16206_s4 + $0x54] sm:$0xf0] }
  0x6f   :  { %1174 = vmatpush.bf16.msra.mxu3 %v7498_v29  ;;  %v7422_v29 = vor.u32 %v10222_v19, %v7421_v15 }
  0x70   :  { %1136 = vmatpush.bf16.msra.mxu0 %v7470_v33  ;;  %v7426_v33 = vor.u32 %v10220_v20, %v7423_v21 }
  0x71   :  { %1149 = vmatpush.bf16.msra.mxu1 %v7474_v37  ;;  %v10216_v37 = vld [vmem:[%s16206_s4 + $0x24] sm:$0xf] }
  0x72   :  { %1162 = vmatpush.bf16.msra.mxu2 %v7478_v38 }
  0x73   :  { %1175 = vmatpush.bf16.msra.mxu3 %v7482_v42  ;;  %v7407_v42 = vld [vmem:[%s16206_s4 + $0x30] sm:$0xf0] }
  0x74   :  { %1137 = vmatpush.bf16.msra.mxu0 %v7454_v47 }
  0x75   :  { %1150 = vmatpush.bf16.msra.mxu1 %v7458_v58  ;;  %v7410_v58 = vor.u32 %v10216_v37, %v7407_v42  ;;  %v10302_v42 = vld [vmem:[%s16209_s6 + $0xcc] sm:$0xf0] }
  0x76   :  { %1163 = vmatpush.bf16.msra.mxu2 %v7462_v59  ;;  %v7414_v59 = vor.u32 %v10219_v44, %v7413_v43  ;;  %v10300_v43 = vld [vmem:[%s16209_s6 + $0xc4] sm:$0xf] }
  0x77   :  { %1176 = vmatpush.bf16.msra.mxu3 %v7466_v1  ;;  %v7397_v1 = vld [vmem:[%s16206_s4 + $0x8] sm:$0xf] }
  0x78   :  { %1138 = vmatpush.bf16.msra.mxu0 %v7438_v8 }
  0x7b   :  { %1177 = vmatpush.bf16.msra.mxu3 %v7450_v17 }
  0x7c   :  { %1139 = vmatpush.bf16.msra.mxu0 %v7422_v29 }
  0x80   :  { %1140 = vmatpush.bf16.msra.mxu0 %v7406_v52  ;;  %v10301_v52 = vld [vmem:[%s16209_s6 + $0xcc] sm:$0xf] }
  0xa0   :  { %v11691_v50 = vpop.f32.mrf.mxu0 }
  0xa1   :  { %v11699_v53 = vpop.f32.mrf.mxu1 }
  0xa8   :  { %v11755_v18 = vpop.f32.mrf.mxu2  ;;  %v282_v25 = vpop.f32.mrf.mxu0 }
  0xa9   :  { %v11766_v24 = vpop.f32.mrf.mxu3  ;;  %v295_v28 = vpop.f32.mrf.mxu1  ;;  %v7429_v25 = vld [vmem:[%s16206_s4 + $0x48] sm:$0xf] }
  0xaa   :  { %v11874_v28 = vperm.slane %v48_v41, 3  ;;  %v7430_v34 = vor.u32 %v10223_v26, %v7429_v25  ;;  %v7434_v41 = vor.u32 %v10221_v30, %v7431_v31  ;;  %v7386_v31 = vld [vmem:[%s16210_s0 + $0x8] sm:$0xff] }
  0xac   :  { %1178 = vmatpush.bf16.msra.mxu3 %v7434_v41  ;;  %v7617_v41 = vld [vmem:[%s16209_s6 + $0xc0] sm:$0xf] }
  0xad   :  { %v7618_v44 = vor.u32 %v10302_v42, %v7617_v41  ;;  %v7555_v42 = vld [vmem:[%s16209_s6 + $0x50] sm:$0xf0] }
  0xb0   :  { %v308_v55 = vpop.f32.mrf.mxu2  ;;  %v359_v63 = vpop.f32.mrf.mxu0 }
  0xb1   :  { %v321_v62 = vpop.f32.mrf.mxu3  ;;  %v360_v2 = vadd.f32 %v359_v63, %v11691_v50  ;;  %v372_v3 = vpop.f32.mrf.mxu1  ;;  %v7439_v50 = vld [vmem:[%s16206_s4 + $0x70] sm:$0xf0] }
  0xb2   :  { %v373_v7 = vadd.f32 %v372_v3, %v11699_v53  ;;  %v7442_v12 = vor.u32 %v10224_v6, %v7439_v50  ;;  %v7446_v53 = vor.u32 %v10227_v10, %v7445_v9  ;;  %v7391_v63 = vld [vmem:[%s16206_s4 + $0x10] sm:$0xf0]  ;;  %v7399_v6 = vld [vmem:[%s16206_s4 + $0x18] sm:$0xf0] }
  0xb3   :  { %v402_v11 = vadd.f32 %v360_v2, %v11816_v56  ;;  %v10215_v2 = vld [vmem:[%s16206_s4 + $0x14] sm:$0xf0]  ;;  %v7402_v15 = vor.u32 %v10213_v5, %v7399_v6  ;;  %v10296_v5 = vld [vmem:[%s16209_s6 + $0xa4] sm:$0xf] }
  0xb4   :  { %v403_v16 = vadd.f32 %v373_v7, %v11824_v0  ;;  %1151 = vmatpush.bf16.msra.mxu1 %v7442_v12  ;;  %1164 = vmatpush.bf16.msra.mxu2 %v7446_v53  ;;  %v7398_v12 = vor.u32 %v10215_v2, %v7397_v1 }
  0xb5   :  { %v406_v22 = vmul.f32 0.5, %v402_v11  ;;  %v7394_v11 = vor.u32 %v10212_v61, %v7391_v63 }
  0xb6   :  { %v410_v27 = vmul.f32 0.5, %v403_v16 }
  0xb7   :  { %10884 = vtanh.f32 %v406_v22 }
  0xb8   :  { %v385_v32 = vpop.f32.mrf.mxu2  ;;  %10886 = vtanh.f32 %v410_v27  ;;  %v361_v40 = vpop.f32.mrf.mxu0  ;;  %1152 = vmatpush.bf16.msra.mxu1 %v7426_v33  ;;  %1165 = vmatpush.bf16.msra.mxu2 %v7430_v34  ;;  %v7635_v33 = vld [vmem:[%s16209_s6 + $0xf0] sm:$0xf0]  ;;  %v7641_v34 = vld [vmem:[%s16209_s6 + $0xe8] sm:$0xf] }
  0xb9   :  { %v386_v38 = vadd.f32 %v385_v32, %v11755_v18  ;;  %v398_v39 = vpop.f32.mrf.mxu3  ;;  %v374_v47 = vpop.f32.mrf.mxu1  ;;  %v10217_v18 = vld [vmem:[%s16206_s4 + $0x2c] sm:$0xf]  ;;  %v939_v32 = vpack.c.bf16 %v7386_v31, %v7386_v31  ;;  %v7642_v37 = vor.u32 %v10307_v35, %v7641_v34  ;;  %v10290_v31 = vld [vmem:[%s16209_s6 + $0x6c] sm:$0xf0] }
  0xba   :  { %v399_v46 = vadd.f32 %v398_v39, %v11766_v24  ;;  %v7389_v24 = vld [vmem:[%s16206_s4] sm:$0xf]  ;;  %v7418_v62 = vor.u32 %v10217_v18, %v7415_v48  ;;  %v7643_v39 = vld [vmem:[%s16209_s6 + $0xf8] sm:$0xf0]  ;;  %v7625_v47 = vld [vmem:[%s16209_s6 + $0xc8] sm:$0xf] }
  0xbb   :  { %v404_v51 = vadd.f32 %v386_v38, %v11866_v23  ;;  %v7390_v50 = vor.u32 %v10214_v60, %v7389_v24  ;;  %v10305_v38 = vld [vmem:[%s16209_s6 + $0xec] sm:$0xf]  ;;  %v10303_v18 = vld [vmem:[%s16209_s6 + $0xd4] sm:$0xf0] }
  0xbc   :  { %v405_v55 = vadd.f32 %v399_v46, %v11874_v28  ;;  %1153 = vmatpush.bf16.msra.mxu1 %v7410_v58  ;;  %1166 = vmatpush.bf16.msra.mxu2 %v7414_v59  ;;  %v7646_v40 = vor.u32 %v10305_v38, %v7643_v39  ;;  %v7619_v46 = vld [vmem:[%s16209_s6 + $0xd0] sm:$0xf0]  ;;  %v10289_v35 = vld [vmem:[%s16209_s6 + $0x6c] sm:$0xf]  ;;  %v7553_v38 = vld [vmem:[%s16209_s6 + $0x40] sm:$0xf] }
  0xbd   :  { %10888 = vtanh.f32 %v404_v51  ;;  %v10885_v3 = vpop.eup %10884  ;;  %1179 = vmatpush.bf16.msra.mxu3 %v7418_v62  ;;  %1141 = vmatpush.bf16.msra.mxu0 %v7390_v50  ;;  %v7622_v48 = vor.u32 %v10300_v43, %v7619_v46  ;;  %v7626_v51 = vor.u32 %v10303_v18, %v7625_v47  ;;  %v10299_v50 = vld [vmem:[%s16209_s6 + $0xb4] sm:$0xf0]  ;;  %v10286_v39 = vld [vmem:[%s16209_s6 + $0x4c] sm:$0xf0]  ;;  %v7561_v43 = vld [vmem:[%s16209_s6 + $0x48] sm:$0xf] }
  0xbe   :  { %v415_v4 = vmul.f32 0.5, %v405_v55  ;;  %v10887_v7 = vpop.eup %10886  ;;  %v408_v8 = vmul.f32 0.5, %v10885_v3  ;;  %v7627_v55 = vld [vmem:[%s16209_s6 + $0xd8] sm:$0xf0]  ;;  %v7601_v3 = vld [vmem:[%s16209_s6 + $0xa0] sm:$0xf]  ;;  %v7554_v41 = vor.u32 %v10286_v39, %v7553_v38 }
  0xbf   :  { %v412_v9 = vmul.f32 0.5, %v10887_v7  ;;  %v7630_v58 = vor.u32 %v10301_v52, %v7627_v55  ;;  %v7603_v7 = vld [vmem:[%s16209_s6 + $0xb0] sm:$0xf0]  ;;  %v10285_v18 = vld [vmem:[%s16209_s6 + $0x4c] sm:$0xf] }
  0xc0   :  { %10890 = vtanh.f32 %v415_v4  ;;  %v387_v10 = vpop.f32.mrf.mxu2  ;;  %v409_v53 = vadd.f32 0.5, %v408_v8  ;;  %1154 = vmatpush.bf16.msra.mxu1 %v7394_v11  ;;  %1167 = vmatpush.bf16.msra.mxu2 %v7398_v12  ;;  %v10298_v4 = vld [vmem:[%s16209_s6 + $0xac] sm:$0xf0]  ;;  %v7609_v8 = vld [vmem:[%s16209_s6 + $0xa8] sm:$0xf] }
  0xc1   :  { %v400_v14 = vpop.f32.mrf.mxu3  ;;  %v413_v16 = vadd.f32 0.5, %v412_v9  ;;  %1180 = vmatpush.bf16.msra.mxu3 %v7402_v15  ;;  %v7602_v6 = vor.u32 %v10298_v4, %v7601_v3  ;;  %v7606_v9 = vor.u32 %v10296_v5, %v7603_v7  ;;  %v7610_v10 = vor.u32 %v10299_v50, %v7609_v8  ;;  %v10297_v11 = vld [vmem:[%s16209_s6 + $0xac] sm:$0xf]  ;;  %v7611_v12 = vld [vmem:[%s16209_s6 + $0xb8] sm:$0xf0] }
  0xc2   :  { %v10294_v14 = vld [vmem:[%s16209_s6 + $0x8c] sm:$0xf0]  ;;  %v7537_v52 = vld [vmem:[%s16209_s6 + $0x20] sm:$0xf]  ;;  %v10281_v5 = vld [vmem:[%s16209_s6 + $0x2c] sm:$0xf] }
  0xc3   :  { %v10889_v17 = vpop.eup %10888  ;;  %v419_v19 = vmul.f32 %v413_v16, %v44_v13  ;;  %v7585_v13 = vld [vmem:[%s16209_s6 + $0x80] sm:$0xf]  ;;  %v10292_v16 = vld [vmem:[%s16209_s6 + $0x84] sm:$0xf]  ;;  %v10282_v55 = vld [vmem:[%s16209_s6 + $0x2c] sm:$0xf0] }
  0xc4   :  { %v420_v20 = vmul.f32 %v10889_v17, %v409_v53  ;;  %v11999_v59 = vpop.f32.mrf.mxu0  ;;  %v7614_v53 = vor.u32 %v10297_v11, %v7611_v12  ;;  %v7586_v15 = vor.u32 %v10294_v14, %v7585_v13  ;;  %v7587_v17 = vld [vmem:[%s16209_s6 + $0x90] sm:$0xf0]  ;;  %v7521_v8 = vld [vmem:[%s16209_s6] sm:$0xf]  ;;  %v10278_v50 = vld [vmem:[%s16209_s6 + $0xc] sm:$0xf0] }
  0xc5   :  { %v12001_v24 = vpop.f32.mrf.mxu1  ;;  %v7523_v11 = vld [vmem:[%s16209_s6 + $0x10] sm:$0xf0]  ;;  %v7529_v12 = vld [vmem:[%s16209_s6 + $0x8] sm:$0xf]  ;;  %v10271_v38 = vld [vmem:[%s16211_s5 + $0xd4] sm:$0xf0] }
  0xc6   :  { %v10891_v21 = vpop.eup %10890  ;;  %v11937_v22 = vadd.f32 %v420_v20, %v419_v19  ;;  %v7593_v19 = vld [vmem:[%s16209_s6 + $0x88] sm:$0xf]  ;;  %v7590_v20 = vor.u32 %v10292_v16, %v7587_v17  ;;  %v7531_v16 = vld [vmem:[%s16209_s6 + $0x18] sm:$0xf0]  ;;  %v7761_v17 = vld [vmem:[%s16211_s5 + $0xe0] sm:$0xf] }
  0xc7   :  { %v417_v25 = vmul.f32 0.5, %v10891_v21  ;;  %v10295_v21 = vld [vmem:[%s16209_s6 + $0x94] sm:$0xf0]  ;;  %v10269_v39 = vld [vmem:[%s16211_s5 + $0xcc] sm:$0xf] }
  0xc8   :  { %10892 = vtanh.f32 %v11937_v22 }
  0xc9   :  { %v418_v26 = vadd.f32 0.5, %v417_v25  ;;  %v10293_v25 = vld [vmem:[%s16209_s6 + $0x8c] sm:$0xf] }
  0xcc   :  { %v12003_v60 = vpop.f32.mrf.mxu2  ;;  %v661_v61 = vpop.f32.mrf.mxu0 }
  0xcd   :  { %v674_v62 = vpop.f32.mrf.mxu1  ;;  %v12005_v63 = vpop.f32.mrf.mxu3  ;;  %v7538_v61 = vor.u32 %v10282_v55, %v7537_v52  ;;  %v10267_v52 = vld [vmem:[%s16211_s5 + $0xb4] sm:$0xf0] }
  0xce   :  { %v10893_v27 = vpop.eup %10892  ;;  %v7539_v62 = vld [vmem:[%s16209_s6 + $0x30] sm:$0xf0] }
  0xcf   :  { %v423_v29 = vmul.f32 %v10893_v27, %v418_v26  ;;  %v7595_v26 = vld [vmem:[%s16209_s6 + $0x98] sm:$0xf0]  ;;  %v7594_v27 = vor.u32 %v10295_v21, %v7593_v19  ;;  %v10272_v21 = vld [vmem:[%s16211_s5 + $0xe4] sm:$0xf] }
  0xd1   :  { %v424_v30 = vpack.c.bf16 %v423_v29, %v423_v29  ;;  %v7598_v29 = vor.u32 %v10293_v25, %v7595_v26  ;;  %v7763_v25 = vld [vmem:[%s16211_s5 + $0xf0] sm:$0xf0] }
  0xd3   :  { %870 = vmatmul.bf16.vlgmr.msrb.gmra.mxu0 %v424_v30  ;;  %883 = vmatmul.bf16.vlgmr.msrb.gmra.mxu1 %v424_v30 }
  0xd4   :  { %896 = vmatmul.bf16.vlgmr.msrb.gmra.mxu2 %v424_v30  ;;  %909 = vmatmul.bf16.vlgmr.msrb.gmra.mxu3 %v424_v30  ;;  %v687_v1 = vpop.f32.mrf.mxu2 }
  0xd5   :  { %1218 = vmatpush.bf16.msrb.mxu0 %v11312_v45  ;;  %1231 = vmatpush.bf16.msrb.mxu1 %v11321_v49  ;;  %v7633_v45 = vld [vmem:[%s16209_s6 + $0xe0] sm:$0xf]  ;;  %v10306_v49 = vld [vmem:[%s16209_s6 + $0xec] sm:$0xf0]  ;;  %v700_v2 = vpop.f32.mrf.mxu3  ;;  %v7545_v1 = vld [vmem:[%s16209_s6 + $0x28] sm:$0xf] }
  0xd6   :  { %1244 = vmatpush.bf16.msrb.mxu2 %v11337_v54  ;;  %1257 = vmatpush.bf16.msrb.mxu3 %v11344_v57  ;;  %v10304_v54 = vld [vmem:[%s16209_s6 + $0xe4] sm:$0xf]  ;;  %v7634_v57 = vor.u32 %v10306_v49, %v7633_v45  ;;  %v7571_v49 = vld [vmem:[%s16209_s6 + $0x70] sm:$0xf0]  ;;  %v10283_v2 = vld [vmem:[%s16209_s6 + $0x34] sm:$0xf0] }
  0xd7   :  { %v7638_v36 = vor.u32 %v10304_v54, %v7635_v33  ;;  %v7577_v54 = vld [vmem:[%s16209_s6 + $0x68] sm:$0xf]  ;;  %v7546_v4 = vor.u32 %v10283_v2, %v7545_v1 }
  0xe3   :  { %1142 = vmatmul.bf16.vlgmr.msra.gmra.mxu0 %v424_v30  ;;  %1155 = vmatmul.bf16.vlgmr.msra.gmra.mxu1 %v424_v30 }
  0xe4   :  { %1168 = vmatmul.bf16.vlgmr.msra.gmra.mxu2 %v424_v30  ;;  %1181 = vmatmul.bf16.vlgmr.msra.gmra.mxu3 %v424_v30  ;;  %v7569_v30 = vld [vmem:[%s16209_s6 + $0x60] sm:$0xf] }
  0xe5   :  { %1511 = vmatpush.bf16.msra.mxu0 %v7634_v57  ;;  %1524 = vmatpush.bf16.msra.mxu1 %v7638_v36  ;;  %v7570_v45 = vor.u32 %v10290_v31, %v7569_v30  ;;  %v10291_v57 = vld [vmem:[%s16209_s6 + $0x74] sm:$0xf0]  ;;  %v7579_v36 = vld [vmem:[%s16209_s6 + $0x78] sm:$0xf0]  ;;  %v10273_v31 = vld [vmem:[%s16211_s5 + $0xec] sm:$0xf] }
  0xe6   :  { %1537 = vmatpush.bf16.msra.mxu2 %v7642_v37  ;;  %1550 = vmatpush.bf16.msra.mxu3 %v7646_v40  ;;  %v7578_v34 = vor.u32 %v10291_v57, %v7577_v54  ;;  %v7582_v37 = vor.u32 %v10289_v35, %v7579_v36  ;;  %v10284_v40 = vld [vmem:[%s16209_s6 + $0x44] sm:$0xf]  ;;  %v10275_v30 = vld [vmem:[%s16211_s5 + $0xf4] sm:$0xf0]  ;;  %v10270_v54 = vld [vmem:[%s16211_s5 + $0xcc] sm:$0xf0] }
  0xe7   :  { %v7558_v46 = vor.u32 %v10284_v40, %v7555_v42  ;;  %v7747_v35 = vld [vmem:[%s16211_s5 + $0xd0] sm:$0xf0]  ;;  %v7753_v36 = vld [vmem:[%s16211_s5 + $0xc8] sm:$0xf]  ;;  %v7755_v40 = vld [vmem:[%s16211_s5 + $0xd8] sm:$0xf0] }
  0xe8   :  { %v7754_v42 = vor.u32 %v10271_v38, %v7753_v36 }
  0xe9   :  { %1512 = vmatpush.bf16.msra.mxu0 %v7618_v44  ;;  %1525 = vmatpush.bf16.msra.mxu1 %v7622_v48  ;;  %v10287_v44 = vld [vmem:[%s16209_s6 + $0x54] sm:$0xf0]  ;;  %v7563_v48 = vld [vmem:[%s16209_s6 + $0x58] sm:$0xf0] }
  0xea   :  { %1538 = vmatpush.bf16.msra.mxu2 %v7626_v51  ;;  %1551 = vmatpush.bf16.msra.mxu3 %v7630_v58  ;;  %v7562_v47 = vor.u32 %v10287_v44, %v7561_v43  ;;  %v7566_v51 = vor.u32 %v10285_v18, %v7563_v48  ;;  %v10280_v58 = vld [vmem:[%s16209_s6 + $0x24] sm:$0xf]  ;;  %v7758_v43 = vor.u32 %v10269_v39, %v7755_v40  ;;  %v7729_v44 = vld [vmem:[%s16211_s5 + $0xa0] sm:$0xf]  ;;  %v7731_v48 = vld [vmem:[%s16211_s5 + $0xb0] sm:$0xf0] }
  0xeb   :  { %v7542_v3 = vor.u32 %v10280_v58, %v7539_v62  ;;  %v7739_v62 = vld [vmem:[%s16211_s5 + $0xb8] sm:$0xf0] }
  0xed   :  { %1513 = vmatpush.bf16.msra.mxu0 %v7602_v6  ;;  %1526 = vmatpush.bf16.msra.mxu1 %v7606_v9  ;;  %v7547_v6 = vld [vmem:[%s16209_s6 + $0x38] sm:$0xf0]  ;;  %v10276_v9 = vld [vmem:[%s16209_s6 + $0x4] sm:$0xf] }
  0xee   :  { %1539 = vmatpush.bf16.msra.mxu2 %v7610_v10  ;;  %1552 = vmatpush.bf16.msra.mxu3 %v7614_v53  ;;  %v7550_v7 = vor.u32 %v10281_v5, %v7547_v6  ;;  %v7522_v10 = vor.u32 %v10278_v50, %v7521_v8  ;;  %v10279_v53 = vld [vmem:[%s16209_s6 + $0x14] sm:$0xf0]  ;;  %v7526_v13 = vor.u32 %v10276_v9, %v7523_v11  ;;  %v7713_v6 = vld [vmem:[%s16211_s5 + $0x80] sm:$0xf]  ;;  %v10260_v8 = vld [vmem:[%s16211_s5 + $0x84] sm:$0xf] }
  0xef   :  { %v7530_v14 = vor.u32 %v10279_v53, %v7529_v12  ;;  %v7715_v11 = vld [vmem:[%s16211_s5 + $0x90] sm:$0xf0]  ;;  %v7721_v12 = vld [vmem:[%s16211_s5 + $0x88] sm:$0xf]  ;;  %v10263_v53 = vld [vmem:[%s16211_s5 + $0x94] sm:$0xf0] }
  0xf1   :  { %1514 = vmatpush.bf16.msra.mxu0 %v7586_v15  ;;  %1527 = vmatpush.bf16.msra.mxu1 %v7590_v20  ;;  %v10277_v15 = vld [vmem:[%s16209_s6 + $0xc] sm:$0xf]  ;;  %v10274_v20 = vld [vmem:[%s16211_s5 + $0xec] sm:$0xf0] }
  0xf2   :  { %1540 = vmatpush.bf16.msra.mxu2 %v7594_v27  ;;  %1553 = vmatpush.bf16.msra.mxu3 %v7598_v29  ;;  %v7534_v19 = vor.u32 %v10277_v15, %v7531_v16  ;;  %v7762_v26 = vor.u32 %v10274_v20, %v7761_v17  ;;  %v7766_v27 = vor.u32 %v10272_v21, %v7763_v25  ;;  %v7769_v29 = vld [vmem:[%s16211_s5 + $0xe8] sm:$0xf]  ;;  %v7723_v15 = vld [vmem:[%s16211_s5 + $0x98] sm:$0xf0]  ;;  %v7697_v21 = vld [vmem:[%s16211_s5 + $0x60] sm:$0xf] }
  0xf3   :  { %7515 = vmatmul.msk.bf16.vlgmr.msrb.gmra.mxu0 %vm333_vm1, %v939_v32  ;;  %7516 = vmatmul.msk.bf16.vlgmr.msrb.gmra.mxu1 %vm333_vm1, %v939_v32  ;;  %v10258_v25 = vld [vmem:[%s16211_s5 + $0x6c] sm:$0xf0] }
  0xf4   :  { %7517 = vmatmul.msk.bf16.vlgmr.msrb.gmra.mxu2 %vm333_vm1, %v939_v32  ;;  %7518 = vmatmul.msk.bf16.vlgmr.msrb.gmra.mxu3 %vm333_vm1, %v939_v32  ;;  %v10288_v32 = vld [vmem:[%s16209_s6 + $0x64] sm:$0xf] }
  0xf5   :  { %v7574_v33 = vor.u32 %v10288_v32, %v7571_v49  ;;  %1515 = vmatpush.bf16.msra.mxu0 %v7570_v45  ;;  %v7770_v32 = vor.u32 %v10275_v30, %v7769_v29  ;;  %v7771_v45 = vld [vmem:[%s16211_s5 + $0xf8] sm:$0xf0]  ;;  %v7745_v49 = vld [vmem:[%s16211_s5 + $0xc0] sm:$0xf]  ;;  %v7698_v30 = vor.u32 %v10258_v25, %v7697_v21 }
  0xf6   :  { %1541 = vmatpush.bf16.msra.mxu2 %v7578_v34  ;;  %1554 = vmatpush.bf16.msra.mxu3 %v7582_v37  ;;  %v7774_v57 = vor.u32 %v10273_v31, %v7771_v45  ;;  %v10268_v34 = vld [vmem:[%s16211_s5 + $0xc4] sm:$0xf]  ;;  %v7699_v31 = vld [vmem:[%s16211_s5 + $0x70] sm:$0xf0] }
  0xf7   :  { %1528 = vmatpush.bf16.msra.mxu1 %v7574_v33  ;;  %v7746_v33 = vor.u32 %v10270_v54, %v7745_v49  ;;  %v7750_v37 = vor.u32 %v10268_v34, %v7747_v35  ;;  %v10259_v49 = vld [vmem:[%s16211_s5 + $0x74] sm:$0xf0]  ;;  %v10257_v54 = vld [vmem:[%s16211_s5 + $0x6c] sm:$0xf] }
  0xf9   :  { %1516 = vmatpush.bf16.msra.mxu0 %v7554_v41  ;;  %v58_v41 = vld [vmem:[%s16214_s8] sm:$0xf] }
  0xfa   :  { %1542 = vmatpush.bf16.msra.mxu2 %v7562_v47  ;;  %1555 = vmatpush.bf16.msra.mxu3 %v7566_v51  ;;  %v10264_v47 = vld [vmem:[%s16211_s5 + $0xa4] sm:$0xf]  ;;  %v7737_v51 = vld [vmem:[%s16211_s5 + $0xa8] sm:$0xf]  ;;  %v12226_v2 = vperm.slane %v58_v41, 0 }
  0xfb   :  { %1529 = vmatpush.bf16.msra.mxu1 %v7558_v46  ;;  %v10266_v46 = vld [vmem:[%s16211_s5 + $0xac] sm:$0xf0]  ;;  %v7734_v55 = vor.u32 %v10264_v47, %v7731_v48  ;;  %v7738_v58 = vor.u32 %v10267_v52, %v7737_v51  ;;  %v10253_v52 = vld [vmem:[%s16211_s5 + $0x4c] sm:$0xf] }
  0xfc   :  { %v7730_v18 = vor.u32 %v10266_v46, %v7729_v44  ;;  %v7689_v44 = vld [vmem:[%s16211_s5 + $0x48] sm:$0xf]  ;;  %v10255_v46 = vld [vmem:[%s16211_s5 + $0x54] sm:$0xf0] }
  0xfd   :  { %1517 = vmatpush.bf16.msra.mxu0 %v7538_v61  ;;  %v10265_v61 = vld [vmem:[%s16211_s5 + $0xac] sm:$0xf]  ;;  %v7690_v51 = vor.u32 %v10255_v46, %v7689_v44  ;;  %v7891_v46 = vld [vmem:[%s16206_s4 + $0xe0] sm:$0xf] }
  0xfe   :  { %1543 = vmatpush.bf16.msra.mxu2 %v7546_v4  ;;  %1556 = vmatpush.bf16.msra.mxu3 %v7550_v7  ;;  %v7742_v1 = vor.u32 %v10265_v61, %v7739_v62  ;;  %v10262_v7 = vld [vmem:[%s16211_s5 + $0x8c] sm:$0xf0]  ;;  %v7665_v62 = vld [vmem:[%s16211_s5 + $0x20] sm:$0xf] }
  0xff   :  { %1530 = vmatpush.bf16.msra.mxu1 %v7542_v3  ;;  %v12228_v3 = vperm.slane %v58_v41, 1 }
 0x101   :  { %1518 = vmatpush.bf16.msra.mxu0 %v7522_v10  ;;  %v7714_v10 = vor.u32 %v10262_v7, %v7713_v6  ;;  %v10248_v6 = vld [vmem:[%s16211_s5 + $0x24] sm:$0xf]  ;;  %v7667_v7 = vld [vmem:[%s16211_s5 + $0x30] sm:$0xf0] }
 0x102   :  { %1544 = vmatpush.bf16.msra.mxu2 %v7530_v14  ;;  %1557 = vmatpush.bf16.msra.mxu3 %v7534_v19  ;;  %v7722_v14 = vor.u32 %v10263_v53, %v7721_v12  ;;  %v12260_v19 = vperm.slane %v58_v41, 3  ;;  %v10249_v12 = vld [vmem:[%s16211_s5 + $0x2c] sm:$0xf] }
 0x103   :  { %1531 = vmatpush.bf16.msra.mxu1 %v7526_v13  ;;  %v12250_v13 = vperm.slane %v58_v41, 2  ;;  %v7681_v41 = vld [vmem:[%s16211_s5 + $0x40] sm:$0xf] }
 0x105   :  { %1723 = vmatpush.bf16.msrb.mxu0 %v7762_v26  ;;  %v10256_v26 = vld [vmem:[%s16211_s5 + $0x64] sm:$0xf] }
 0x106   :  { %1749 = vmatpush.bf16.msrb.mxu2 %v7770_v32  ;;  %1762 = vmatpush.bf16.msrb.mxu3 %v7774_v57  ;;  %v7705_v32 = vld [vmem:[%s16211_s5 + $0x68] sm:$0xf]  ;;  %v7702_v45 = vor.u32 %v10256_v26, %v7699_v31  ;;  %v7707_v57 = vld [vmem:[%s16211_s5 + $0x78] sm:$0xf0]  ;;  %v7649_v26 = vld [vmem:[%s16211_s5] sm:$0xf] }
 0x107   :  { %1736 = vmatpush.bf16.msrb.mxu1 %v7766_v27  ;;  %v7706_v35 = vor.u32 %v10259_v49, %v7705_v32  ;;  %v7710_v36 = vor.u32 %v10257_v54, %v7707_v57  ;;  %v10244_v31 = vld [vmem:[%s16211_s5 + $0x4] sm:$0xf]  ;;  %v7651_v32 = vld [vmem:[%s16211_s5 + $0x10] sm:$0xf0]  ;;  %v7657_v54 = vld [vmem:[%s16211_s5 + $0x8] sm:$0xf] }
 0x108   :  { %v7654_v49 = vor.u32 %v10244_v31, %v7651_v32  ;;  %v10247_v57 = vld [vmem:[%s16211_s5 + $0x14] sm:$0xf0]  ;;  %v10328_v31 = vld [vmem:[%s16206_s4 + $0xa4] sm:$0xf] }
 0x109   :  { %1724 = vmatpush.bf16.msrb.mxu0 %v7746_v33 }
 0x10a   :  { %1750 = vmatpush.bf16.msrb.mxu2 %v7754_v42  ;;  %1763 = vmatpush.bf16.msrb.mxu3 %v7758_v43  ;;  %v10254_v42 = vld [vmem:[%s16211_s5 + $0x4c] sm:$0xf0]  ;;  %v10252_v43 = vld [vmem:[%s16211_s5 + $0x44] sm:$0xf] }
 0x10b   :  { %1737 = vmatpush.bf16.msrb.mxu1 %v7750_v37 }
 0x10d   :  { %1725 = vmatpush.bf16.msrb.mxu0 %v7730_v18 }
 0x10e   :  { %1751 = vmatpush.bf16.msrb.mxu2 %v7738_v58  ;;  %1764 = vmatpush.bf16.msrb.mxu3 %v7742_v1  ;;  %v10250_v1 = vld [vmem:[%s16211_s5 + $0x2c] sm:$0xf0] }
 0x10f   :  { %1738 = vmatpush.bf16.msrb.mxu1 %v7734_v55  ;;  %v7691_v55 = vld [vmem:[%s16211_s5 + $0x58] sm:$0xf0] }
 0x110   :  { %v7694_v58 = vor.u32 %v10253_v52, %v7691_v55  ;;  %v7899_v52 = vld [vmem:[%s16206_s4 + $0xe8] sm:$0xf] }
 0x111   :  { %1726 = vmatpush.bf16.msrb.mxu0 %v7714_v10  ;;  %v7670_v10 = vor.u32 %v10248_v6, %v7667_v7 }
 0x112   :  { %1752 = vmatpush.bf16.msrb.mxu2 %v7722_v14 }
 0x115   :  { %1727 = vmatpush.bf16.msrb.mxu0 %v7698_v30 }
 0x116   :  { %1753 = vmatpush.bf16.msrb.mxu2 %v7706_v35 }
 0x11a   :  { %1754 = vmatpush.bf16.msrb.mxu2 %v7690_v51  ;;  %v7893_v51 = vld [vmem:[%s16206_s4 + $0xf0] sm:$0xf0] }
 0x150   :  { %v871_v4 = vpop.f32.mrf.mxu0  ;;  %v884_v5 = vpop.f32.mrf.mxu1 }
 0x151   :  { %v872_v50 = vadd.f32 %v871_v4, %v11999_v59  ;;  %v885_v9 = vadd.f32 %v884_v5, %v12001_v24  ;;  %v7718_v59 = vor.u32 %v10260_v8, %v7715_v11  ;;  %v10261_v24 = vld [vmem:[%s16211_s5 + $0x8c] sm:$0xf]  ;;  %v7666_v5 = vor.u32 %v10250_v1, %v7665_v62  ;;  %v7673_v8 = vld [vmem:[%s16211_s5 + $0x28] sm:$0xf]  ;;  %v10251_v11 = vld [vmem:[%s16211_s5 + $0x34] sm:$0xf0] }
 0x152   :  { %v7726_v20 = vor.u32 %v10261_v24, %v7723_v15  ;;  %v7674_v24 = vor.u32 %v10251_v11, %v7673_v8  ;;  %v7675_v15 = vld [vmem:[%s16211_s5 + $0x38] sm:$0xf0] }
 0x153   :  { %v914_v16 = vadd.f32 %v872_v50, %v12226_v2  ;;  %v915_v17 = vadd.f32 %v885_v9, %v12228_v3  ;;  %1739 = vmatpush.bf16.msrb.mxu1 %v7718_v59  ;;  %v7678_v25 = vor.u32 %v10249_v12, %v7675_v15  ;;  %v7901_v62 = vld [vmem:[%s16206_s4 + $0xf8] sm:$0xf0]  ;;  %v7883_v15 = vld [vmem:[%s16206_s4 + $0xc8] sm:$0xf] }
 0x154   :  { %1765 = vmatpush.bf16.msrb.mxu3 %v7726_v20  ;;  %1755 = vmatpush.bf16.msrb.mxu2 %v7674_v24  ;;  %v7877_v24 = vld [vmem:[%s16206_s4 + $0xd0] sm:$0xf0] }
 0x155   :  { %v918_v27 = vmul.f32 0.5, %v914_v16  ;;  %v922_v29 = vmul.f32 0.5, %v915_v17  ;;  %v45_v17 = vld [vmem:[%s16213_s2 + $0x8] sm:$0xff] }
 0x157   :  { %10894 = vtanh.f32 %v918_v27  ;;  %v897_v33 = vpop.f32.mrf.mxu2  ;;  %v910_v34 = vpop.f32.mrf.mxu3  ;;  %1740 = vmatpush.bf16.msrb.mxu1 %v7702_v45  ;;  %v10246_v27 = vld [vmem:[%s16211_s5 + $0xc] sm:$0xf0] }
 0x158   :  { %10896 = vtanh.f32 %v922_v29  ;;  %v898_v37 = vadd.f32 %v897_v33, %v12003_v60  ;;  %v911_v38 = vadd.f32 %v910_v34, %v12005_v63  ;;  %v873_v39 = vpop.f32.mrf.mxu0  ;;  %v886_v40 = vpop.f32.mrf.mxu1  ;;  %v7682_v60 = vor.u32 %v10254_v42, %v7681_v41  ;;  %v7683_v63 = vld [vmem:[%s16211_s5 + $0x50] sm:$0xf0]  ;;  %1766 = vmatpush.bf16.msrb.mxu3 %v7710_v36  ;;  %v10245_v33 = vld [vmem:[%s16211_s5 + $0xc] sm:$0xf] }
 0x159   :  { %v7686_v48 = vor.u32 %v10252_v43, %v7683_v63  ;;  %v7650_v30 = vor.u32 %v10246_v27, %v7649_v26  ;;  %v7658_v36 = vor.u32 %v10247_v57, %v7657_v54  ;;  %v7861_v57 = vld [vmem:[%s16206_s4 + $0xb0] sm:$0xf0] }
 0x15a   :  { %v916_v47 = vadd.f32 %v898_v37, %v12250_v13  ;;  %v917_v18 = vadd.f32 %v911_v38, %v12260_v19  ;;  %1728 = vmatpush.bf16.msrb.mxu0 %v7682_v60  ;;  %v7659_v37 = vld [vmem:[%s16211_s5 + $0x18] sm:$0xf0] }
 0x15b   :  { %1741 = vmatpush.bf16.msrb.mxu1 %v7686_v48  ;;  %v7662_v38 = vor.u32 %v10245_v33, %v7659_v37  ;;  %1756 = vmatpush.bf16.msrb.mxu2 %v7658_v36  ;;  %v10336_v48 = vld [vmem:[%s16206_s4 + $0xe4] sm:$0xf]  ;;  %v7867_v33 = vld [vmem:[%s16206_s4 + $0xa8] sm:$0xf]  ;;  %v7869_v36 = vld [vmem:[%s16206_s4 + $0xb8] sm:$0xf0] }
 0x15c   :  { %10898 = vtanh.f32 %v916_v47  ;;  %v927_v61 = vmul.f32 0.5, %v917_v18  ;;  %1767 = vmatpush.bf16.msrb.mxu3 %v7694_v58  ;;  %v10338_v47 = vld [vmem:[%s16206_s4 + $0xec] sm:$0xf0]  ;;  %v10339_v58 = vld [vmem:[%s16206_s4 + $0xf4] sm:$0xf0] }
 0x15d   :  { %v10895_v4 = vpop.eup %10894  ;;  %v7892_v8 = vor.u32 %v10338_v47, %v7891_v46  ;;  %v7864_v46 = vor.u32 %v10328_v31, %v7861_v57  ;;  %v7843_v47 = vld [vmem:[%s16206_s4 + $0x80] sm:$0xf]  ;;  %v10316_v31 = vld [vmem:[%s16206_s4 + $0x44] sm:$0xf]  ;;  %v7819_v57 = vld [vmem:[%s16206_s4 + $0x48] sm:$0xf] }
 0x15e   :  { %v10897_v50 = vpop.eup %10896  ;;  %v920_v9 = vmul.f32 0.5, %v10895_v4  ;;  %10900 = vtanh.f32 %v927_v61  ;;  %1729 = vmatpush.bf16.msrb.mxu0 %v7666_v5  ;;  %v10337_v61 = vld [vmem:[%s16206_s4 + $0xec] sm:$0xf] }
 0x15f   :  { %v924_v53 = vmul.f32 0.5, %v10897_v50  ;;  %v899_v59 = vpop.f32.mrf.mxu2  ;;  %v912_v14 = vpop.f32.mrf.mxu3  ;;  %1742 = vmatpush.bf16.msrb.mxu1 %v7670_v10  ;;  %v7896_v50 = vor.u32 %v10336_v48, %v7893_v51  ;;  %v10334_v10 = vld [vmem:[%s16206_s4 + $0xcc] sm:$0xf0] }
 0x160   :  { %v921_v16 = vadd.f32 0.5, %v920_v9  ;;  %v1143_v20 = vpop.f32.mrf.mxu0  ;;  %v1156_v21 = vpop.f32.mrf.mxu1  ;;  %1768 = vmatpush.bf16.msrb.mxu3 %v7678_v25  ;;  %v7875_v9 = vld [vmem:[%s16206_s4 + $0xc0] sm:$0xf]  ;;  %v7904_v59 = vor.u32 %v10337_v61, %v7901_v62  ;;  %v10332_v14 = vld [vmem:[%s16206_s4 + $0xc4] sm:$0xf] }
 0x161   :  { %v925_v29 = vadd.f32 0.5, %v924_v53  ;;  %v7900_v53 = vor.u32 %v10339_v58, %v7899_v52  ;;  %v7876_v26 = vor.u32 %v10334_v10, %v7875_v9  ;;  %v7880_v27 = vor.u32 %v10332_v14, %v7877_v24  ;;  %v7851_v52 = vld [vmem:[%s16206_s4 + $0x88] sm:$0xf]  ;;  %v10327_v61 = vld [vmem:[%s16206_s4 + $0x94] sm:$0xf0] }
 0x162   :  { %v10899_v45 = vpop.eup %10898  ;;  %1730 = vmatpush.bf16.msrb.mxu0 %v7650_v30  ;;  %v10330_v30 = vld [vmem:[%s16206_s4 + $0xac] sm:$0xf0]  ;;  %v10325_v62 = vld [vmem:[%s16206_s4 + $0x8c] sm:$0xf]  ;;  %v7852_v10 = vor.u32 %v10327_v61, %v7851_v52  ;;  %v7805_v52 = vld [vmem:[%s16206_s4 + $0x38] sm:$0xf0] }
 0x163   :  { %v931_v34 = vmul.f32 %v925_v29, %v45_v17  ;;  %v932_v35 = vmul.f32 %v10899_v45, %v921_v16  ;;  %1743 = vmatpush.bf16.msrb.mxu1 %v7654_v49  ;;  %v10335_v16 = vld [vmem:[%s16206_s4 + $0xd4] sm:$0xf0]  ;;  %v10333_v17 = vld [vmem:[%s16206_s4 + $0xcc] sm:$0xf]  ;;  %v7859_v29 = vld [vmem:[%s16206_s4 + $0xa0] sm:$0xf] }
 0x164   :  { %v10901_v39 = vpop.eup %10900  ;;  %1769 = vmatpush.bf16.msrb.mxu3 %v7662_v38  ;;  %v7884_v49 = vor.u32 %v10335_v16, %v7883_v15  ;;  %v10321_v15 = vld [vmem:[%s16206_s4 + $0x6c] sm:$0xf]  ;;  %v7837_v16 = vld [vmem:[%s16206_s4 + $0x78] sm:$0xf0] }
 0x165   :  { %v12365_v40 = vadd.f32 %v932_v35, %v931_v34  ;;  %v929_v43 = vmul.f32 0.5, %v10901_v39  ;;  %v10331_v34 = vld [vmem:[%s16206_s4 + $0xb4] sm:$0xf0]  ;;  %v10329_v35 = vld [vmem:[%s16206_s4 + $0xac] sm:$0xf]  ;;  %v7860_v39 = vor.u32 %v10330_v30, %v7859_v29 }
 0x166   :  { %v7868_v48 = vor.u32 %v10331_v34, %v7867_v33  ;;  %v7872_v51 = vor.u32 %v10329_v35, %v7869_v36  ;;  %v10318_v30 = vld [vmem:[%s16206_s4 + $0x4c] sm:$0xf0]  ;;  %v10319_v34 = vld [vmem:[%s16206_s4 + $0x54] sm:$0xf0]  ;;  %v10317_v35 = vld [vmem:[%s16206_s4 + $0x4c] sm:$0xf] }
 0x167   :  { %10902 = vtanh.f32 %v12365_v40  ;;  %v12368_v41 = vpop.f32.mrf.mxu2  ;;  %v12370_v42 = vpop.f32.mrf.mxu3  ;;  %v930_v44 = vadd.f32 0.5, %v929_v43  ;;  %v7821_v36 = vld [vmem:[%s16206_s4 + $0x58] sm:$0xf0]  ;;  %v1803_v61 = vld [vmem:[%s16207_s3 + $0x8] sm:$0xff] }
 0x168   :  { %v1145_v60 = vpop.f32.mrf.mxu0  ;;  %v1158_v63 = vpop.f32.mrf.mxu1 }
 0x16d   :  { %v10903_v18 = vpop.eup %10902 }
 0x16e   :  { %v935_v55 = vmul.f32 %v10903_v18, %v930_v44  ;;  %v10326_v18 = vld [vmem:[%s16206_s4 + $0x8c] sm:$0xf0] }
 0x16f   :  { %v1171_v1 = vpop.f32.mrf.mxu2  ;;  %v1184_v4 = vpop.f32.mrf.mxu3 }
 0x170   :  { %936 = vst [vmem:[%s16215_s9] sm:$0xff] %v935_v55  ;;  %v1220_v5 = vpop.f32.mrf.mxu0  ;;  %v1233_v6 = vpop.f32.mrf.mxu1  ;;  %v1318_v7 = vpack.c.bf16 %v935_v55, %v935_v55  ;;  %v7853_v1 = vld [vmem:[%s16206_s4 + $0x98] sm:$0xf0]  ;;  %v7827_v4 = vld [vmem:[%s16206_s4 + $0x60] sm:$0xf] }
 0x171   :  { %v1221_v11 = vadd.f32 %v1220_v5, %v1143_v20  ;;  %v1234_v12 = vadd.f32 %v1233_v6, %v1156_v21  ;;  %v7885_v20 = vld [vmem:[%s16206_s4 + $0xd8] sm:$0xf0]  ;;  %v7844_v6 = vor.u32 %v10326_v18, %v7843_v47  ;;  %v7824_v18 = vor.u32 %v10317_v35, %v7821_v36  ;;  %v8023_v35 = vld [vmem:[%s16209_s6 + $0xe0] sm:$0xf]  ;;  %v10402_v36 = vld [vmem:[%s16209_s6 + $0xec] sm:$0xf0] }
 0x172   :  { %1519 = vmatmul.bf16.vlgmr.msra.gmra.mxu0 %v1318_v7  ;;  %1532 = vmatmul.bf16.vlgmr.msra.gmra.mxu1 %v1318_v7  ;;  %v7888_v54 = vor.u32 %v10333_v17, %v7885_v20 }
 0x173   :  { %v1263_v21 = vadd.f32 %v1221_v11, %v11816_v56  ;;  %v1264_v25 = vadd.f32 %v1234_v12, %v11824_v0  ;;  %1545 = vmatmul.bf16.vlgmr.msra.gmra.mxu2 %v1318_v7  ;;  %1558 = vmatmul.bf16.vlgmr.msra.gmra.mxu3 %v1318_v7  ;;  %v7856_v11 = vor.u32 %v10325_v62, %v7853_v1  ;;  %v7829_v12 = vld [vmem:[%s16206_s4 + $0x70] sm:$0xf0] }
 0x174   :  { %1996 = vmatpush.bf16.msra.mxu0 %v7892_v8  ;;  %2009 = vmatpush.bf16.msra.mxu1 %v7896_v50  ;;  %v10322_v8 = vld [vmem:[%s16206_s4 + $0x6c] sm:$0xf0]  ;;  %v10320_v50 = vld [vmem:[%s16206_s4 + $0x64] sm:$0xf] }
 0x175   :  { %v1267_v32 = vmul.f32 0.5, %v1263_v21  ;;  %v1271_v45 = vmul.f32 0.5, %v1264_v25  ;;  %2022 = vmatpush.bf16.msra.mxu2 %v7900_v53  ;;  %2035 = vmatpush.bf16.msra.mxu3 %v7904_v59  ;;  %v7835_v53 = vld [vmem:[%s16206_s4 + $0x68] sm:$0xf]  ;;  %v10323_v59 = vld [vmem:[%s16206_s4 + $0x74] sm:$0xf0]  ;;  %v7832_v29 = vor.u32 %v10320_v50, %v7829_v12 }
 0x176   :  { %v7811_v25 = vld [vmem:[%s16206_s4 + $0x40] sm:$0xf]  ;;  %v7781_v50 = vld [vmem:[%s16206_s4 + $0x10] sm:$0xf0] }
 0x177   :  { %10904 = vtanh.f32 %v1267_v32  ;;  %v1246_v37 = vpop.f32.mrf.mxu2  ;;  %v1259_v38 = vpop.f32.mrf.mxu3 }
 0x178   :  { %10906 = vtanh.f32 %v1271_v45  ;;  %v1247_v43 = vadd.f32 %v1246_v37, %v12368_v41  ;;  %v1260_v60 = vadd.f32 %v1259_v38, %v12370_v42  ;;  %v1222_v63 = vpop.f32.mrf.mxu0  ;;  %v1235_v44 = vpop.f32.mrf.mxu1  ;;  %1997 = vmatpush.bf16.msra.mxu0 %v7876_v26  ;;  %2010 = vmatpush.bf16.msra.mxu1 %v7880_v27  ;;  %v10324_v41 = vld [vmem:[%s16206_s4 + $0x84] sm:$0xf]  ;;  %v7845_v42 = vld [vmem:[%s16206_s4 + $0x90] sm:$0xf0]  ;;  %v7828_v27 = vor.u32 %v10322_v8, %v7827_v4 }
 0x179   :  { %2023 = vmatpush.bf16.msra.mxu2 %v7884_v49  ;;  %2036 = vmatpush.bf16.msra.mxu3 %v7888_v54  ;;  %v7848_v7 = vor.u32 %v10324_v41, %v7845_v42  ;;  %v7836_v45 = vor.u32 %v10323_v59, %v7835_v53  ;;  %v7840_v49 = vor.u32 %v10321_v15, %v7837_v16  ;;  %v7813_v54 = vld [vmem:[%s16206_s4 + $0x50] sm:$0xf0]  ;;  %v10314_v63 = vld [vmem:[%s16206_s4 + $0x2c] sm:$0xf0]  ;;  %v10312_v44 = vld [vmem:[%s16206_s4 + $0x24] sm:$0xf] }
 0x17a   :  { %v1265_v55 = vadd.f32 %v1247_v43, %v11866_v23  ;;  %v1266_v58 = vadd.f32 %v1260_v60, %v11874_v28  ;;  %v7816_v43 = vor.u32 %v10316_v31, %v7813_v54  ;;  %v7795_v60 = vld [vmem:[%s16206_s4 + $0x20] sm:$0xf]  ;;  %v10315_v41 = vld [vmem:[%s16206_s4 + $0x34] sm:$0xf0]  ;;  %v10313_v42 = vld [vmem:[%s16206_s4 + $0x2c] sm:$0xf] }
 0x17b   :  { %v7796_v1 = vor.u32 %v10314_v63, %v7795_v60  ;;  %v7808_v8 = vor.u32 %v10313_v42, %v7805_v52  ;;  %v10309_v53 = vld [vmem:[%s16206_s4 + $0xc] sm:$0xf]  ;;  %v7789_v59 = vld [vmem:[%s16206_s4 + $0x18] sm:$0xf0]  ;;  %v10403_v60 = vld [vmem:[%s16209_s6 + $0xf4] sm:$0xf0] }
 0x17c   :  { %10908 = vtanh.f32 %v1265_v55  ;;  %v1276_v5 = vmul.f32 0.5, %v1266_v58  ;;  %1998 = vmatpush.bf16.msra.mxu0 %v7860_v39  ;;  %2011 = vmatpush.bf16.msra.mxu1 %v7864_v46  ;;  %v7812_v39 = vor.u32 %v10318_v30, %v7811_v25  ;;  %v1802_v55 = vld [vmem:[%s16207_s3] sm:$0xff]  ;;  %v7792_v25 = vor.u32 %v10309_v53, %v7789_v59  ;;  %v8009_v42 = vld [vmem:[%s16209_s6 + $0xd0] sm:$0xf0] }
 0x17d   :  { %v10905_v9 = vpop.eup %10904  ;;  %2024 = vmatpush.bf16.msra.mxu2 %v7868_v48  ;;  %2037 = vmatpush.bf16.msra.mxu3 %v7872_v51  ;;  %v7797_v48 = vld [vmem:[%s16206_s4 + $0x30] sm:$0xf0]  ;;  %v7803_v51 = vld [vmem:[%s16206_s4 + $0x28] sm:$0xf]  ;;  %v7779_v58 = vld [vmem:[%s16206_s4] sm:$0xf]  ;;  %v2051_v12 = vunpack.c.h.b16 %v1802_v55 }
 0x17e   :  { %v10907_v14 = vpop.eup %10906  ;;  %v1269_v24 = vmul.f32 0.5, %v10905_v9  ;;  %10910 = vtanh.f32 %v1276_v5  ;;  %v7800_v4 = vor.u32 %v10312_v44, %v7797_v48  ;;  %v10310_v5 = vld [vmem:[%s16206_s4 + $0xc] sm:$0xf0]  ;;  %v7787_v9 = vld [vmem:[%s16206_s4 + $0x8] sm:$0xf] }
 0x17f   :  { %v1273_v17 = vmul.f32 0.5, %v10907_v14  ;;  %v1248_v20 = vpop.f32.mrf.mxu2  ;;  %v1261_v21 = vpop.f32.mrf.mxu3  ;;  %v2052_v14 = vunpack.c.l.b16 %v1803_v61  ;;  %v7780_v16 = vor.u32 %v10310_v5, %v7779_v58  ;;  %v8015_v58 = vld [vmem:[%s16209_s6 + $0xc8] sm:$0xf] }
 0x180   :  { %v1270_v26 = vadd.f32 0.5, %v1269_v24  ;;  %1999 = vmatpush.bf16.msra.mxu0 %v7844_v6  ;;  %2012 = vmatpush.bf16.msra.mxu1 %v7848_v7  ;;  %v10308_v6 = vld [vmem:[%s16206_s4 + $0x4] sm:$0xf]  ;;  %v7804_v7 = vor.u32 %v10315_v41, %v7803_v51  ;;  %v2053_v24 = vunpack.c.h.b16 %v1803_v61  ;;  %v10398_v51 = vld [vmem:[%s16209_s6 + $0xcc] sm:$0xf0] }
 0x181   :  { %v1274_v32 = vadd.f32 0.5, %v1273_v17  ;;  %2025 = vmatpush.bf16.msra.mxu2 %v7852_v10  ;;  %2038 = vmatpush.bf16.msra.mxu3 %v7856_v11  ;;  %v10311_v10 = vld [vmem:[%s16206_s4 + $0x14] sm:$0xf0]  ;;  %v2050_v11 = vunpack.c.l.b16 %v1802_v55  ;;  %v7784_v17 = vor.u32 %v10308_v6, %v7781_v50  ;;  %v2056_v30 = vpack.c.b16 %v2052_v14, %v2052_v14  ;;  %v10396_v41 = vld [vmem:[%s16209_s6 + $0xc4] sm:$0xf] }
 0x182   :  { %v10909_v33 = vpop.eup %10908  ;;  %v7788_v20 = vor.u32 %v10311_v10, %v7787_v9  ;;  %v2057_v31 = vpack.c.b16 %v2053_v24, %v2053_v24  ;;  %v8012_v55 = vor.u32 %v10396_v41, %v8009_v42  ;;  %v10399_v61 = vld [vmem:[%s16209_s6 + $0xd4] sm:$0xf0]  ;;  %v7991_v6 = vld [vmem:[%s16209_s6 + $0xa0] sm:$0xf]  ;;  %v7993_v9 = vld [vmem:[%s16209_s6 + $0xb0] sm:$0xf0] }
 0x183   :  { %v1280_v37 = vmul.f32 %v1274_v32, %v11937_v22  ;;  %v1281_v38 = vmul.f32 %v10909_v33, %v1270_v26  ;;  %v7820_v22 = vor.u32 %v10319_v34, %v7819_v57  ;;  %v2054_v26 = vpack.c.b16 %v2050_v11, %v2050_v11  ;;  %v7776_v33 = vld [vmem:[%s16210_s0 + $0x10] sm:$0xff]  ;;  %v7999_v10 = vld [vmem:[%s16209_s6 + $0xa8] sm:$0xf]  ;;  %v10395_v11 = vld [vmem:[%s16209_s6 + $0xb4] sm:$0xf0] }
 0x184   :  { %2000 = vmatpush.bf16.msra.mxu0 %v7828_v27  ;;  %2013 = vmatpush.bf16.msra.mxu1 %v7832_v29  ;;  %v10911_v46 = vpop.eup %10910  ;;  %v2055_v27 = vpack.c.b16 %v2051_v12, %v2051_v12  ;;  %v12590_v54 = vsel %vm337_vm0, %v2056_v30, 0  ;;  %v12593_v57 = vsel %vm337_vm0, %v2057_v31, 0  ;;  %v1801_v34 = vpack.c.bf16 %v7776_v33, %v7776_v33  ;;  %v10393_v24 = vld [vmem:[%s16209_s6 + $0xac] sm:$0xf]  ;;  %v7985_v33 = vld [vmem:[%s16209_s6 + $0x98] sm:$0xf0] }
 0x185   :  { %v12535_v47 = vadd.f32 %v1281_v38, %v1280_v37  ;;  %2026 = vmatpush.bf16.msra.mxu2 %v7836_v45  ;;  %2039 = vmatpush.bf16.msra.mxu3 %v7840_v49  ;;  %v1278_v62 = vmul.f32 0.5, %v10911_v46  ;;  %v12584_v45 = vsel %vm337_vm0, %v2054_v26, 0  ;;  %v10400_v37 = vld [vmem:[%s16209_s6 + $0xe4] sm:$0xf]  ;;  %v8024_v38 = vor.u32 %v10402_v36, %v8023_v35  ;;  %v10401_v46 = vld [vmem:[%s16209_s6 + $0xec] sm:$0xf] }
 0x186   :  { %v12587_v49 = vsel %vm337_vm0, %v2055_v27, 0  ;;  %v8000_v14 = vor.u32 %v10395_v11, %v7999_v10  ;;  %v7977_v26 = vld [vmem:[%s16209_s6 + $0x90] sm:$0xf0]  ;;  %v7983_v27 = vld [vmem:[%s16209_s6 + $0x88] sm:$0xf] }
 0x187   :  { %10912 = vtanh.f32 %v12535_v47  ;;  %v1279_v15 = vadd.f32 0.5, %v1278_v62  ;;  %v10397_v62 = vld [vmem:[%s16209_s6 + $0xcc] sm:$0xf]  ;;  %v7959_v35 = vld [vmem:[%s16209_s6 + $0x60] sm:$0xf] }
 0x188   :  { %2001 = vmatpush.bf16.msra.mxu0 %v7812_v39  ;;  %2014 = vmatpush.bf16.msra.mxu1 %v7816_v43  ;;  %v8025_v39 = vld [vmem:[%s16209_s6 + $0xf0] sm:$0xf0]  ;;  %v8031_v43 = vld [vmem:[%s16209_s6 + $0xe8] sm:$0xf]  ;;  %v10386_v36 = vld [vmem:[%s16209_s6 + $0x6c] sm:$0xf0] }
 0x189   :  { %2027 = vmatpush.bf16.msra.mxu2 %v7820_v22  ;;  %2040 = vmatpush.bf16.msra.mxu3 %v7824_v18  ;;  %v8028_v63 = vor.u32 %v10400_v37, %v8025_v39  ;;  %v8032_v44 = vor.u32 %v10403_v60, %v8031_v43  ;;  %v8033_v22 = vld [vmem:[%s16209_s6 + $0xf8] sm:$0xf0]  ;;  %v8007_v18 = vld [vmem:[%s16209_s6 + $0xc0] sm:$0xf]  ;;  %v10384_v37 = vld [vmem:[%s16209_s6 + $0x64] sm:$0xf]  ;;  %v7960_v43 = vor.u32 %v10386_v36, %v7959_v35 }
 0x18a   :  { %v8036_v48 = vor.u32 %v10401_v46, %v8033_v22  ;;  %v8008_v52 = vor.u32 %v10398_v51, %v8007_v18  ;;  %v7961_v60 = vld [vmem:[%s16209_s6 + $0x70] sm:$0xf0]  ;;  %v10385_v51 = vld [vmem:[%s16209_s6 + $0x6c] sm:$0xf]  ;;  %v7969_v41 = vld [vmem:[%s16209_s6 + $0x78] sm:$0xf0] }
 0x18b   :  { %v7964_v18 = vor.u32 %v10384_v37, %v7961_v60  ;;  %v7972_v42 = vor.u32 %v10385_v51, %v7969_v41  ;;  %v10378_v10 = vld [vmem:[%s16209_s6 + $0x2c] sm:$0xf0]  ;;  %v10376_v11 = vld [vmem:[%s16209_s6 + $0x24] sm:$0xf]  ;;  %v10375_v35 = vld [vmem:[%s16209_s6 + $0x14] sm:$0xf0] }
 0x18c   :  { %2002 = vmatpush.bf16.msra.mxu0 %v7796_v1  ;;  %2015 = vmatpush.bf16.msra.mxu1 %v7800_v4  ;;  %v8016_v1 = vor.u32 %v10399_v61, %v8015_v58  ;;  %v8017_v4 = vld [vmem:[%s16209_s6 + $0xd8] sm:$0xf0]  ;;  %v10380_v58 = vld [vmem:[%s16209_s6 + $0x44] sm:$0xf]  ;;  %v8159_v41 = vld [vmem:[%s16211_s5 + $0xe8] sm:$0xf] }
 0x18d   :  { %v10913_v21 = vpop.eup %10912  ;;  %2028 = vmatpush.bf16.msra.mxu2 %v7804_v7  ;;  %2041 = vmatpush.bf16.msra.mxu3 %v7808_v8  ;;  %v8020_v5 = vor.u32 %v10397_v62, %v8017_v4  ;;  %v10394_v7 = vld [vmem:[%s16209_s6 + $0xac] sm:$0xf0]  ;;  %v10392_v8 = vld [vmem:[%s16209_s6 + $0xa4] sm:$0xf]  ;;  %v7945_v62 = vld [vmem:[%s16209_s6 + $0x50] sm:$0xf0] }
 0x18e   :  { %v1284_v29 = vmul.f32 %v10913_v21, %v1279_v15  ;;  %v7992_v50 = vor.u32 %v10394_v7, %v7991_v6  ;;  %v7996_v59 = vor.u32 %v10392_v8, %v7993_v9  ;;  %v8001_v15 = vld [vmem:[%s16209_s6 + $0xb8] sm:$0xf0]  ;;  %v10388_v21 = vld [vmem:[%s16209_s6 + $0x84] sm:$0xf]  ;;  %v10383_v4 = vld [vmem:[%s16209_s6 + $0x54] sm:$0xf0] }
 0x18f   :  { %v7980_v30 = vor.u32 %v10388_v21, %v7977_v26  ;;  %v10381_v7 = vld [vmem:[%s16209_s6 + $0x4c] sm:$0xf]  ;;  %v7953_v8 = vld [vmem:[%s16209_s6 + $0x58] sm:$0xf0]  ;;  %v7927_v9 = vld [vmem:[%s16209_s6 + $0x20] sm:$0xf] }
 0x190   :  { %v1285_v32 = vpack.c.bf16 %v1284_v29, %v1284_v29  ;;  %2003 = vmatpush.bf16.msra.mxu0 %v7780_v16  ;;  %2016 = vmatpush.bf16.msra.mxu1 %v7784_v17  ;;  %v8004_v16 = vor.u32 %v10393_v24, %v8001_v15  ;;  %v7975_v17 = vld [vmem:[%s16209_s6 + $0x80] sm:$0xf]  ;;  %v10391_v29 = vld [vmem:[%s16209_s6 + $0x94] sm:$0xf0]  ;;  %v7928_v24 = vor.u32 %v10378_v10, %v7927_v9  ;;  %v7929_v15 = vld [vmem:[%s16209_s6 + $0x30] sm:$0xf0] }
 0x191   :  { %2029 = vmatpush.bf16.msra.mxu2 %v7788_v20  ;;  %2042 = vmatpush.bf16.msra.mxu3 %v7792_v25  ;;  %v10390_v20 = vld [vmem:[%s16209_s6 + $0x8c] sm:$0xf0]  ;;  %v7984_v31 = vor.u32 %v10391_v29, %v7983_v27  ;;  %v7937_v26 = vld [vmem:[%s16209_s6 + $0x38] sm:$0xf0]  ;;  %v7911_v29 = vld [vmem:[%s16209_s6] sm:$0xf] }
 0x192   :  { %1731 = vmatmul.bf16.vlgmr.msrb.gmra.mxu0 %v1285_v32  ;;  %1744 = vmatmul.bf16.vlgmr.msrb.gmra.mxu1 %v1285_v32  ;;  %v7976_v25 = vor.u32 %v10390_v20, %v7975_v17  ;;  %v10379_v17 = vld [vmem:[%s16209_s6 + $0x34] sm:$0xf0]  ;;  %v7932_v20 = vor.u32 %v10376_v11, %v7929_v15  ;;  %v7921_v60 = vld [vmem:[%s16209_s6 + $0x18] sm:$0xf0]  ;;  %v10365_v9 = vld [vmem:[%s16211_s5 + $0xcc] sm:$0xf] }
 0x193   :  { %1757 = vmatmul.bf16.vlgmr.msrb.gmra.mxu2 %v1285_v32  ;;  %1770 = vmatmul.bf16.vlgmr.msrb.gmra.mxu3 %v1285_v32  ;;  %v8145_v10 = vld [vmem:[%s16211_s5 + $0xd8] sm:$0xf0]  ;;  %v10360_v15 = vld [vmem:[%s16211_s5 + $0xa4] sm:$0xf] }
 0x194   :  { %2080 = vmatpush.bf16.msrb.mxu0 %v12584_v45  ;;  %2093 = vmatpush.bf16.msrb.mxu1 %v12587_v49 }
 0x195   :  { %2106 = vmatpush.bf16.msrb.mxu2 %v12590_v54  ;;  %2119 = vmatpush.bf16.msrb.mxu3 %v12593_v57 }
 0x1a2   :  { %2004 = vmatmul.bf16.vlgmr.msra.gmra.mxu0 %v1285_v32  ;;  %2017 = vmatmul.bf16.vlgmr.msra.gmra.mxu1 %v1285_v32 }
 0x1a3   :  { %2030 = vmatmul.bf16.vlgmr.msra.gmra.mxu2 %v1285_v32  ;;  %2043 = vmatmul.bf16.vlgmr.msra.gmra.mxu3 %v1285_v32  ;;  %v10389_v32 = vld [vmem:[%s16209_s6 + $0x8c] sm:$0xf] }
 0x1a4   :  { %2373 = vmatpush.bf16.msra.mxu0 %v8024_v38  ;;  %2386 = vmatpush.bf16.msra.mxu1 %v8028_v63  ;;  %v7967_v63 = vld [vmem:[%s16209_s6 + $0x68] sm:$0xf] }
 0x1a5   :  { %2399 = vmatpush.bf16.msra.mxu2 %v8032_v44  ;;  %2412 = vmatpush.bf16.msra.mxu3 %v8036_v48  ;;  %v10387_v44 = vld [vmem:[%s16209_s6 + $0x74] sm:$0xf0] }
 0x1a6   :  { %v7968_v48 = vor.u32 %v10387_v44, %v7967_v63  ;;  %v8151_v63 = vld [vmem:[%s16211_s5 + $0xe0] sm:$0xf] }
 0x1a8   :  { %2374 = vmatpush.bf16.msra.mxu0 %v8008_v52  ;;  %2387 = vmatpush.bf16.msra.mxu1 %v8012_v55  ;;  %v7943_v52 = vld [vmem:[%s16209_s6 + $0x40] sm:$0xf]  ;;  %v10382_v55 = vld [vmem:[%s16209_s6 + $0x4c] sm:$0xf0] }
 0x1a9   :  { %2400 = vmatpush.bf16.msra.mxu2 %v8016_v1  ;;  %2413 = vmatpush.bf16.msra.mxu3 %v8020_v5  ;;  %v7944_v61 = vor.u32 %v10382_v55, %v7943_v52  ;;  %v7951_v1 = vld [vmem:[%s16209_s6 + $0x48] sm:$0xf]  ;;  %v7948_v5 = vor.u32 %v10380_v58, %v7945_v62  ;;  %v10369_v52 = vld [vmem:[%s16211_s5 + $0xec] sm:$0xf]  ;;  %v8161_v58 = vld [vmem:[%s16211_s5 + $0xf8] sm:$0xf0] }
 0x1aa   :  { %v7952_v6 = vor.u32 %v10383_v4, %v7951_v1  ;;  %v10366_v62 = vld [vmem:[%s16211_s5 + $0xcc] sm:$0xf0]  ;;  %v8164_v1 = vor.u32 %v10369_v52, %v8161_v58  ;;  %v10352_v52 = vld [vmem:[%s16211_s5 + $0x64] sm:$0xf] }
 0x1ac   :  { %2375 = vmatpush.bf16.msra.mxu0 %v7992_v50  ;;  %2388 = vmatpush.bf16.msra.mxu1 %v7996_v59  ;;  %v7956_v50 = vor.u32 %v10381_v7, %v7953_v8  ;;  %v8143_v7 = vld [vmem:[%s16211_s5 + $0xc8] sm:$0xf] }
 0x1ad   :  { %2401 = vmatpush.bf16.msra.mxu2 %v8000_v14  ;;  %2414 = vmatpush.bf16.msra.mxu3 %v8004_v16  ;;  %v7935_v16 = vld [vmem:[%s16209_s6 + $0x28] sm:$0xf] }
 0x1ae   :  { %v7936_v21 = vor.u32 %v10379_v17, %v7935_v16  ;;  %v8121_v17 = vld [vmem:[%s16211_s5 + $0xb0] sm:$0xf0] }
 0x1b0   :  { %2376 = vmatpush.bf16.msra.mxu0 %v7976_v25  ;;  %2389 = vmatpush.bf16.msra.mxu1 %v7980_v30  ;;  %v10377_v25 = vld [vmem:[%s16209_s6 + $0x2c] sm:$0xf]  ;;  %v10374_v30 = vld [vmem:[%s16209_s6 + $0xc] sm:$0xf0] }
 0x1b1   :  { %2402 = vmatpush.bf16.msra.mxu2 %v7984_v31  ;;  %v7940_v27 = vor.u32 %v10377_v25, %v7937_v26  ;;  %v10372_v31 = vld [vmem:[%s16209_s6 + $0x4] sm:$0xf]  ;;  %v8124_v25 = vor.u32 %v10360_v15, %v8121_v17  ;;  %v8071_v15 = vld [vmem:[%s16211_s5 + $0x40] sm:$0xf] }
 0x1b2   :  { %7905 = vmatmul.msk.bf16.vlgmr.msrb.gmra.mxu0 %vm333_vm1, %v1801_v34  ;;  %7906 = vmatmul.msk.bf16.vlgmr.msrb.gmra.mxu1 %vm333_vm1, %v1801_v34  ;;  %v10348_v17 = vld [vmem:[%s16211_s5 + $0x44] sm:$0xf] }
 0x1b3   :  { %7907 = vmatmul.msk.bf16.vlgmr.msrb.gmra.mxu2 %vm333_vm1, %v1801_v34  ;;  %7908 = vmatmul.msk.bf16.vlgmr.msrb.gmra.mxu3 %vm333_vm1, %v1801_v34  ;;  %v7988_v34 = vor.u32 %v10389_v32, %v7985_v33  ;;  %v7912_v32 = vor.u32 %v10374_v30, %v7911_v29  ;;  %v7913_v33 = vld [vmem:[%s16209_s6 + $0x10] sm:$0xf0]  ;;  %v8129_v29 = vld [vmem:[%s16211_s5 + $0xb8] sm:$0xf0] }
 0x1b4   :  { %2377 = vmatpush.bf16.msra.mxu0 %v7960_v43  ;;  %2390 = vmatpush.bf16.msra.mxu1 %v7964_v18  ;;  %v7916_v36 = vor.u32 %v10372_v31, %v7913_v33  ;;  %v10373_v43 = vld [vmem:[%s16209_s6 + $0xc] sm:$0xf]  ;;  %v8153_v18 = vld [vmem:[%s16211_s5 + $0xf0] sm:$0xf0]  ;;  %v8103_v33 = vld [vmem:[%s16211_s5 + $0x80] sm:$0xf] }
 0x1b5   :  { %2415 = vmatpush.bf16.msra.mxu3 %v7988_v34  ;;  %2403 = vmatpush.bf16.msra.mxu2 %v7968_v48  ;;  %v7919_v34 = vld [vmem:[%s16209_s6 + $0x8] sm:$0xf]  ;;  %v7924_v44 = vor.u32 %v10373_v43, %v7921_v60  ;;  %v8105_v60 = vld [vmem:[%s16211_s5 + $0x90] sm:$0xf0] }
 0x1b6   :  { %v7920_v37 = vor.u32 %v10375_v35, %v7919_v34  ;;  %v10358_v34 = vld [vmem:[%s16211_s5 + $0x8c] sm:$0xf0]  ;;  %v10356_v35 = vld [vmem:[%s16211_s5 + $0x84] sm:$0xf] }
 0x1b7   :  { %v8104_v43 = vor.u32 %v10358_v34, %v8103_v33  ;;  %v8055_v34 = vld [vmem:[%s16211_s5 + $0x20] sm:$0xf] }
 0x1b8   :  { %2378 = vmatpush.bf16.msra.mxu0 %v7944_v61  ;;  %2391 = vmatpush.bf16.msra.mxu1 %v7948_v5  ;;  %v8135_v61 = vld [vmem:[%s16211_s5 + $0xc0] sm:$0xf]  ;;  %v10364_v5 = vld [vmem:[%s16211_s5 + $0xc4] sm:$0xf] }
 0x1b9   :  { %2416 = vmatpush.bf16.msra.mxu3 %v7972_v42  ;;  %2404 = vmatpush.bf16.msra.mxu2 %v7952_v6  ;;  %v10371_v42 = vld [vmem:[%s16211_s5 + $0xf4] sm:$0xf0]  ;;  %v8136_v4 = vor.u32 %v10366_v62, %v8135_v61  ;;  %v8137_v6 = vld [vmem:[%s16211_s5 + $0xd0] sm:$0xf0] }
 0x1ba   :  { %v8160_v55 = vor.u32 %v10371_v42, %v8159_v41  ;;  %v8140_v8 = vor.u32 %v10364_v5, %v8137_v6  ;;  %v8087_v41 = vld [vmem:[%s16211_s5 + $0x60] sm:$0xf]  ;;  %v10354_v42 = vld [vmem:[%s16211_s5 + $0x6c] sm:$0xf0]  ;;  %v8089_v62 = vld [vmem:[%s16211_s5 + $0x70] sm:$0xf0] }
 0x1bb   :  { %v8088_v61 = vor.u32 %v10354_v42, %v8087_v41  ;;  %v10355_v5 = vld [vmem:[%s16211_s5 + $0x74] sm:$0xf0]  ;;  %v10353_v6 = vld [vmem:[%s16211_s5 + $0x6c] sm:$0xf]  ;;  %v8065_v42 = vld [vmem:[%s16211_s5 + $0x38] sm:$0xf0] }
 0x1bc   :  { %2379 = vmatpush.bf16.msra.mxu0 %v7928_v24  ;;  %2392 = vmatpush.bf16.msra.mxu1 %v7932_v20  ;;  %v10362_v24 = vld [vmem:[%s16211_s5 + $0xac] sm:$0xf0]  ;;  %v8127_v20 = vld [vmem:[%s16211_s5 + $0xa8] sm:$0xf] }
 0x1bd   :  { %2417 = vmatpush.bf16.msra.mxu3 %v7956_v50  ;;  %2405 = vmatpush.bf16.msra.mxu2 %v7936_v21  ;;  %v10367_v50 = vld [vmem:[%s16211_s5 + $0xd4] sm:$0xf0] }
 0x1be   :  { %v8144_v11 = vor.u32 %v10367_v50, %v8143_v7  ;;  %v10363_v21 = vld [vmem:[%s16211_s5 + $0xb4] sm:$0xf0]  ;;  %v8097_v7 = vld [vmem:[%s16211_s5 + $0x78] sm:$0xf0] }
 0x1bf   :  { %v8128_v26 = vor.u32 %v10363_v21, %v8127_v20  ;;  %v8079_v20 = vld [vmem:[%s16211_s5 + $0x48] sm:$0xf]  ;;  %v10351_v21 = vld [vmem:[%s16211_s5 + $0x54] sm:$0xf0] }
 0x1c0   :  { %2380 = vmatpush.bf16.msra.mxu0 %v7912_v32  ;;  %2393 = vmatpush.bf16.msra.mxu1 %v7916_v36 }
 0x1c1   :  { %2418 = vmatpush.bf16.msra.mxu3 %v7940_v27  ;;  %2406 = vmatpush.bf16.msra.mxu2 %v7920_v37  ;;  %v10361_v27 = vld [vmem:[%s16211_s5 + $0xac] sm:$0xf] }
 0x1c2   :  { %v8132_v30 = vor.u32 %v10361_v27, %v8129_v29  ;;  %v8080_v29 = vor.u32 %v10351_v21, %v8079_v20 }
 0x1c5   :  { %2419 = vmatpush.bf16.msra.mxu3 %v7924_v44  ;;  %2611 = vmatpush.bf16.msrb.mxu2 %v8160_v55  ;;  %v10359_v44 = vld [vmem:[%s16211_s5 + $0x94] sm:$0xf0] }
 0x1c9   :  { %2624 = vmatpush.bf16.msrb.mxu3 %v8164_v1  ;;  %2612 = vmatpush.bf16.msrb.mxu2 %v8144_v11  ;;  %v8095_v1 = vld [vmem:[%s16211_s5 + $0x68] sm:$0xf] }
 0x1cd   :  { %2613 = vmatpush.bf16.msrb.mxu2 %v8128_v26 }
 0x1ef   :  { %v12672_v12 = vpop.f32.mrf.mxu0  ;;  %v12674_v53 = vpop.f32.mrf.mxu1 }
 0x1f6   :  { %v12715_v38 = vpop.f32.mrf.mxu2  ;;  %v12717_v39 = vpop.f32.mrf.mxu3 }
 0x1f7   :  { %v1522_v46 = vpop.f32.mrf.mxu0  ;;  %v1535_v22 = vpop.f32.mrf.mxu1 }
 0x1f8   :  { %v10370_v46 = vld [vmem:[%s16211_s5 + $0xec] sm:$0xf0]  ;;  %v10368_v22 = vld [vmem:[%s16211_s5 + $0xe4] sm:$0xf] }
 0x1f9   :  { %v8152_v48 = vor.u32 %v10370_v46, %v8151_v63  ;;  %v8156_v51 = vor.u32 %v10368_v22, %v8153_v18  ;;  %v8111_v63 = vld [vmem:[%s16211_s5 + $0x88] sm:$0xf]  ;;  %v8108_v46 = vor.u32 %v10356_v35, %v8105_v60  ;;  %v10346_v35 = vld [vmem:[%s16211_s5 + $0x2c] sm:$0xf0]  ;;  %v8057_v60 = vld [vmem:[%s16211_s5 + $0x30] sm:$0xf0] }
 0x1fa   :  { %v8112_v22 = vor.u32 %v10359_v44, %v8111_v63  ;;  %v8063_v63 = vld [vmem:[%s16211_s5 + $0x28] sm:$0xf] }
 0x1fb   :  { %2585 = vmatpush.bf16.msrb.mxu0 %v8152_v48  ;;  %2598 = vmatpush.bf16.msrb.mxu1 %v8156_v51 }
 0x1fc   :  { %2614 = vmatpush.bf16.msrb.mxu2 %v8112_v22 }
 0x1fe   :  { %v1548_v59 = vpop.f32.mrf.mxu2  ;;  %v1561_v14 = vpop.f32.mrf.mxu3 }
 0x1ff   :  { %v8148_v59 = vor.u32 %v10365_v9, %v8145_v10  ;;  %v8119_v14 = vld [vmem:[%s16211_s5 + $0xa0] sm:$0xf]  ;;  %2586 = vmatpush.bf16.msrb.mxu0 %v8136_v4  ;;  %2599 = vmatpush.bf16.msrb.mxu1 %v8140_v8  ;;  %v8092_v4 = vor.u32 %v10352_v52, %v8089_v62  ;;  %v8096_v9 = vor.u32 %v10355_v5, %v8095_v1  ;;  %v10342_v1 = vld [vmem:[%s16211_s5 + $0xc] sm:$0xf0] }
 0x200   :  { %v8120_v16 = vor.u32 %v10362_v24, %v8119_v14  ;;  %v8100_v10 = vor.u32 %v10353_v6, %v8097_v7  ;;  %v8039_v62 = vld [vmem:[%s16211_s5] sm:$0xf]  ;;  %v10340_v6 = vld [vmem:[%s16211_s5 + $0x4] sm:$0xf]  ;;  %v8041_v7 = vld [vmem:[%s16211_s5 + $0x10] sm:$0xf0] }
 0x201   :  { %2625 = vmatpush.bf16.msrb.mxu3 %v8148_v59  ;;  %2615 = vmatpush.bf16.msrb.mxu2 %v8096_v9  ;;  %v8040_v5 = vor.u32 %v10342_v1, %v8039_v62  ;;  %v8047_v9 = vld [vmem:[%s16211_s5 + $0x8] sm:$0xf]  ;;  %v8275_v1 = vld [vmem:[%s16206_s4 + $0xd8] sm:$0xf0] }
 0x202   :  { %v8273_v62 = vld [vmem:[%s16206_s4 + $0xc8] sm:$0xf] }
 0x203   :  { %2587 = vmatpush.bf16.msrb.mxu0 %v8120_v16  ;;  %2600 = vmatpush.bf16.msrb.mxu1 %v8124_v25  ;;  %v10350_v16 = vld [vmem:[%s16211_s5 + $0x4c] sm:$0xf0] }
 0x205   :  { %2626 = vmatpush.bf16.msrb.mxu3 %v8132_v30  ;;  %v10349_v30 = vld [vmem:[%s16211_s5 + $0x4c] sm:$0xf]  ;;  %2616 = vmatpush.bf16.msrb.mxu2 %v8080_v29  ;;  %v10434_v29 = vld [vmem:[%s16206_s4 + $0xec] sm:$0xf0] }
 0x207   :  { %2588 = vmatpush.bf16.msrb.mxu0 %v8104_v43  ;;  %2601 = vmatpush.bf16.msrb.mxu1 %v8108_v46  ;;  %v10344_v43 = vld [vmem:[%s16211_s5 + $0x24] sm:$0xf] }
 0x208   :  { %v8060_v22 = vor.u32 %v10344_v43, %v8057_v60 }
 0x20b   :  { %2589 = vmatpush.bf16.msrb.mxu0 %v8088_v61  ;;  %2602 = vmatpush.bf16.msrb.mxu1 %v8092_v4 }
 0x20f   :  { %v1732_v31 = vpop.f32.mrf.mxu0  ;;  %v1745_v32 = vpop.f32.mrf.mxu1 }
 0x210   :  { %v1733_v36 = vadd.f32 %v1732_v31, %v12672_v12  ;;  %v1746_v37 = vadd.f32 %v1745_v32, %v12674_v53  ;;  %v10357_v12 = vld [vmem:[%s16211_s5 + $0x8c] sm:$0xf]  ;;  %v8113_v53 = vld [vmem:[%s16211_s5 + $0x98] sm:$0xf0] }
 0x211   :  { %v8116_v51 = vor.u32 %v10357_v12, %v8113_v53  ;;  %v8081_v31 = vld [vmem:[%s16211_s5 + $0x58] sm:$0xf0]  ;;  %v10347_v12 = vld [vmem:[%s16211_s5 + $0x34] sm:$0xf0]  ;;  %v10345_v53 = vld [vmem:[%s16211_s5 + $0x2c] sm:$0xf] }
 0x212   :  { %v1775_v18 = vadd.f32 %v1733_v36, %v12226_v2  ;;  %v1776_v48 = vadd.f32 %v1746_v37, %v12228_v3  ;;  %v8084_v32 = vor.u32 %v10349_v30, %v8081_v31  ;;  %v8056_v37 = vor.u32 %v10346_v35, %v8055_v34  ;;  %v10432_v31 = vld [vmem:[%s16206_s4 + $0xe4] sm:$0xf]  ;;  %v10435_v35 = vld [vmem:[%s16206_s4 + $0xf4] sm:$0xf0] }
 0x213   :  { %2627 = vmatpush.bf16.msrb.mxu3 %v8116_v51  ;;  %v8064_v41 = vor.u32 %v10347_v12, %v8063_v63  ;;  %v8068_v61 = vor.u32 %v10345_v53, %v8065_v42  ;;  %v8265_v53 = vld [vmem:[%s16206_s4 + $0xc0] sm:$0xf] }
 0x214   :  { %v1779_v55 = vmul.f32 0.5, %v1775_v18  ;;  %v1783_v58 = vmul.f32 0.5, %v1776_v48 }
 0x215   :  { %2617 = vmatpush.bf16.msrb.mxu2 %v8064_v41 }
 0x216   :  { %10914 = vtanh.f32 %v1779_v55  ;;  %v1758_v8 = vpop.f32.mrf.mxu2  ;;  %v1771_v50 = vpop.f32.mrf.mxu3 }
 0x217   :  { %10916 = vtanh.f32 %v1783_v58  ;;  %v1759_v11 = vadd.f32 %v1758_v8, %v12715_v38  ;;  %v1772_v59 = vadd.f32 %v1771_v50, %v12717_v39  ;;  %v1734_v14 = vpop.f32.mrf.mxu0  ;;  %v1747_v24 = vpop.f32.mrf.mxu1  ;;  %v8072_v38 = vor.u32 %v10350_v16, %v8071_v15  ;;  %v8073_v39 = vld [vmem:[%s16211_s5 + $0x50] sm:$0xf0]  ;;  %2628 = vmatpush.bf16.msrb.mxu3 %v8100_v10  ;;  %v10343_v10 = vld [vmem:[%s16211_s5 + $0x14] sm:$0xf0]  ;;  %v8049_v15 = vld [vmem:[%s16211_s5 + $0x18] sm:$0xf0] }
 0x218   :  { %v8076_v27 = vor.u32 %v10348_v17, %v8073_v39  ;;  %v8044_v50 = vor.u32 %v10340_v6, %v8041_v7  ;;  %v8048_v24 = vor.u32 %v10343_v10, %v8047_v9  ;;  %v10424_v9 = vld [vmem:[%s16206_s4 + $0xa4] sm:$0xf] }
 0x219   :  { %v1777_v25 = vadd.f32 %v1759_v11, %v12250_v13  ;;  %v1778_v26 = vadd.f32 %v1772_v59, %v12260_v19  ;;  %2590 = vmatpush.bf16.msrb.mxu0 %v8072_v38  ;;  %v10341_v11 = vld [vmem:[%s16211_s5 + $0xc] sm:$0xf] }
 0x21a   :  { %2603 = vmatpush.bf16.msrb.mxu1 %v8076_v27  ;;  %v8052_v16 = vor.u32 %v10341_v11, %v8049_v15  ;;  %2618 = vmatpush.bf16.msrb.mxu2 %v8048_v24  ;;  %v8281_v27 = vld [vmem:[%s16206_s4 + $0xe0] sm:$0xf]  ;;  %v8251_v24 = vld [vmem:[%s16206_s4 + $0xb0] sm:$0xf0]  ;;  %v8257_v15 = vld [vmem:[%s16206_s4 + $0xa8] sm:$0xf] }
 0x21b   :  { %10918 = vtanh.f32 %v1777_v25  ;;  %v1788_v33 = vmul.f32 0.5, %v1778_v26  ;;  %2629 = vmatpush.bf16.msrb.mxu3 %v8084_v32  ;;  %v8283_v32 = vld [vmem:[%s16206_s4 + $0xf0] sm:$0xf0] }
 0x21c   :  { %v10915_v36 = vpop.eup %10914  ;;  %v8286_v12 = vor.u32 %v10432_v31, %v8283_v32  ;;  %v8254_v32 = vor.u32 %v10424_v9, %v8251_v24 }
 0x21d   :  { %v10917_v44 = vpop.eup %10916  ;;  %v1781_v46 = vmul.f32 0.5, %v10915_v36  ;;  %10920 = vtanh.f32 %v1788_v33  ;;  %2591 = vmatpush.bf16.msrb.mxu0 %v8056_v37  ;;  %v8289_v33 = vld [vmem:[%s16206_s4 + $0xe8] sm:$0xf]  ;;  %v10433_v36 = vld [vmem:[%s16206_s4 + $0xec] sm:$0xf] }
 0x21e   :  { %v1785_v18 = vmul.f32 0.5, %v10917_v44  ;;  %v1760_v48 = vpop.f32.mrf.mxu2  ;;  %v1773_v51 = vpop.f32.mrf.mxu3  ;;  %2604 = vmatpush.bf16.msrb.mxu1 %v8060_v22  ;;  %v8291_v37 = vld [vmem:[%s16206_s4 + $0xf8] sm:$0xf0]  ;;  %v8282_v22 = vor.u32 %v10434_v29, %v8281_v27  ;;  %v8290_v41 = vor.u32 %v10435_v35, %v8289_v33  ;;  %v8233_v33 = vld [vmem:[%s16206_s4 + $0x80] sm:$0xf] }
 0x21f   :  { %v1782_v52 = vadd.f32 0.5, %v1781_v46  ;;  %v2005_v55 = vpop.f32.mrf.mxu0  ;;  %v2018_v58 = vpop.f32.mrf.mxu1  ;;  %2630 = vmatpush.bf16.msrb.mxu3 %v8068_v61  ;;  %v8294_v42 = vor.u32 %v10433_v36, %v8291_v37  ;;  %v8267_v61 = vld [vmem:[%s16206_s4 + $0xd0] sm:$0xf0]  ;;  %v8241_v37 = vld [vmem:[%s16206_s4 + $0x88] sm:$0xf] }
 0x220   :  { %v1786_v4 = vadd.f32 0.5, %v1785_v18  ;;  %v10430_v18 = vld [vmem:[%s16206_s4 + $0xcc] sm:$0xf0] }
 0x221   :  { %v10919_v8 = vpop.eup %10918  ;;  %2592 = vmatpush.bf16.msrb.mxu0 %v8040_v5  ;;  %v8266_v6 = vor.u32 %v10430_v18, %v8265_v53 }
 0x222   :  { %v1792_v59 = vmul.f32 %v1786_v4, %v12365_v40  ;;  %v1793_v14 = vmul.f32 %v10919_v8, %v1782_v52  ;;  %2605 = vmatpush.bf16.msrb.mxu1 %v8044_v50  ;;  %v10428_v52 = vld [vmem:[%s16206_s4 + $0xc4] sm:$0xf]  ;;  %v8249_v8 = vld [vmem:[%s16206_s4 + $0xa0] sm:$0xf]  ;;  %v10426_v50 = vld [vmem:[%s16206_s4 + $0xac] sm:$0xf0] }
 0x223   :  { %v10921_v17 = vpop.eup %10920  ;;  %2631 = vmatpush.bf16.msrb.mxu3 %v8052_v16  ;;  %v8270_v7 = vor.u32 %v10428_v52, %v8267_v61  ;;  %v10427_v16 = vld [vmem:[%s16206_s4 + $0xb4] sm:$0xf0]  ;;  %v8219_v61 = vld [vmem:[%s16206_s4 + $0x70] sm:$0xf0] }
 0x224   :  { %v13007_v38 = vadd.f32 %v1793_v14, %v1792_v59  ;;  %v1790_v40 = vmul.f32 0.5, %v10921_v17  ;;  %v10425_v17 = vld [vmem:[%s16206_s4 + $0xac] sm:$0xf]  ;;  %v8258_v35 = vor.u32 %v10427_v16, %v8257_v15 }
 0x226   :  { %10922 = vtanh.f32 %v13007_v38  ;;  %v13010_v39 = vpop.f32.mrf.mxu2  ;;  %v13012_v20 = vpop.f32.mrf.mxu3  ;;  %v1791_v26 = vadd.f32 0.5, %v1790_v40  ;;  %v8259_v40 = vld [vmem:[%s16206_s4 + $0xb8] sm:$0xf0] }
 0x227   :  { %v2007_v21 = vpop.f32.mrf.mxu0  ;;  %v2020_v25 = vpop.f32.mrf.mxu1  ;;  %v8262_v36 = vor.u32 %v10425_v17, %v8259_v40  ;;  %v8203_v17 = vld [vmem:[%s16206_s4 + $0x50] sm:$0xf0]  ;;  %v8209_v40 = vld [vmem:[%s16206_s4 + $0x48] sm:$0xf] }
 0x22c   :  { %v10923_v30 = vpop.eup %10922 }
 0x22d   :  { %v1796_v34 = vmul.f32 %v10923_v30, %v1791_v26  ;;  %v8250_v26 = vor.u32 %v10426_v50, %v8249_v8  ;;  %v8201_v50 = vld [vmem:[%s16206_s4 + $0x40] sm:$0xf] }
 0x22e   :  { %v2033_v43 = vpop.f32.mrf.mxu2  ;;  %v2046_v60 = vpop.f32.mrf.mxu3 }
 0x22f   :  { %7775 = vst [vmem:[%s16215_s9 + $0x8] sm:$0xff] %v1796_v34  ;;  %v2082_v63 = vpop.f32.mrf.mxu0  ;;  %v2095_v44 = vpop.f32.mrf.mxu1  ;;  %v2180_v46 = vpack.c.bf16 %v1796_v34, %v1796_v34  ;;  %v10422_v34 = vld [vmem:[%s16206_s4 + $0x8c] sm:$0xf0] }
 0x230   :  { %v2083_v48 = vadd.f32 %v2082_v63, %v2005_v55  ;;  %v2096_v51 = vadd.f32 %v2095_v44, %v2018_v58  ;;  %v10431_v55 = vld [vmem:[%s16206_s4 + $0xd4] sm:$0xf0]  ;;  %v10429_v58 = vld [vmem:[%s16206_s4 + $0xcc] sm:$0xf]  ;;  %v8234_v53 = vor.u32 %v10422_v34, %v8233_v33  ;;  %v8185_v33 = vld [vmem:[%s16206_s4 + $0x20] sm:$0xf] }
 0x231   :  { %2381 = vmatmul.bf16.vlgmr.msra.gmra.mxu0 %v2180_v46  ;;  %2394 = vmatmul.bf16.vlgmr.msra.gmra.mxu1 %v2180_v46  ;;  %v8274_v59 = vor.u32 %v10431_v55, %v8273_v62  ;;  %v8278_v14 = vor.u32 %v10429_v58, %v8275_v1  ;;  %v10423_v63 = vld [vmem:[%s16206_s4 + $0x94] sm:$0xf0]  ;;  %v10421_v44 = vld [vmem:[%s16206_s4 + $0x8c] sm:$0xf]  ;;  %v8225_v62 = vld [vmem:[%s16206_s4 + $0x68] sm:$0xf] }
 0x232   :  { %v2125_v4 = vadd.f32 %v2083_v48, %v11816_v56  ;;  %v2126_v5 = vadd.f32 %v2096_v51, %v11824_v0  ;;  %2407 = vmatmul.bf16.vlgmr.msra.gmra.mxu2 %v2180_v46  ;;  %2420 = vmatmul.bf16.vlgmr.msra.gmra.mxu3 %v2180_v46  ;;  %v8243_v46 = vld [vmem:[%s16206_s4 + $0x98] sm:$0xf0]  ;;  %v10418_v48 = vld [vmem:[%s16206_s4 + $0x6c] sm:$0xf0]  ;;  %v10416_v51 = vld [vmem:[%s16206_s4 + $0x64] sm:$0xf] }
 0x233   :  { %2858 = vmatpush.bf16.msra.mxu0 %v8282_v22  ;;  %2871 = vmatpush.bf16.msra.mxu1 %v8286_v12  ;;  %v8217_v22 = vld [vmem:[%s16206_s4 + $0x60] sm:$0xf]  ;;  %v8246_v52 = vor.u32 %v10421_v44, %v8243_v46  ;;  %v10419_v55 = vld [vmem:[%s16206_s4 + $0x74] sm:$0xf0]  ;;  %v10410_v34 = vld [vmem:[%s16206_s4 + $0x2c] sm:$0xf0] }
 0x234   :  { %v2129_v10 = vmul.f32 0.5, %v2125_v4  ;;  %v2133_v11 = vmul.f32 0.5, %v2126_v5  ;;  %2884 = vmatpush.bf16.msra.mxu2 %v8290_v41  ;;  %2897 = vmatpush.bf16.msra.mxu3 %v8294_v42  ;;  %v8242_v42 = vor.u32 %v10423_v63, %v8241_v37  ;;  %v10417_v4 = vld [vmem:[%s16206_s4 + $0x6c] sm:$0xf]  ;;  %v8227_v5 = vld [vmem:[%s16206_s4 + $0x78] sm:$0xf0]  ;;  %v8226_v15 = vor.u32 %v10419_v55, %v8225_v62 }
 0x235   :  { %v8230_v16 = vor.u32 %v10417_v4, %v8227_v5  ;;  %v8187_v37 = vld [vmem:[%s16206_s4 + $0x30] sm:$0xf0]  ;;  %v10409_v63 = vld [vmem:[%s16206_s4 + $0x2c] sm:$0xf]  ;;  %v8195_v44 = vld [vmem:[%s16206_s4 + $0x38] sm:$0xf0] }
 0x236   :  { %10924 = vtanh.f32 %v2129_v10  ;;  %v2108_v21 = vpop.f32.mrf.mxu2  ;;  %v2121_v25 = vpop.f32.mrf.mxu3  ;;  %v8218_v10 = vor.u32 %v10418_v48, %v8217_v22  ;;  %v8186_v22 = vor.u32 %v10410_v34, %v8185_v33  ;;  %v10405_v62 = vld [vmem:[%s16206_s4 + $0xc] sm:$0xf]  ;;  %v8179_v55 = vld [vmem:[%s16206_s4 + $0x18] sm:$0xf0] }
 0x237   :  { %10926 = vtanh.f32 %v2133_v11  ;;  %v2109_v27 = vadd.f32 %v2108_v21, %v13010_v39  ;;  %v2122_v29 = vadd.f32 %v2121_v25, %v13012_v20  ;;  %v2084_v30 = vpop.f32.mrf.mxu0  ;;  %v2097_v31 = vpop.f32.mrf.mxu1  ;;  %2859 = vmatpush.bf16.msra.mxu0 %v8266_v6  ;;  %2872 = vmatpush.bf16.msra.mxu1 %v8270_v7  ;;  %v10420_v39 = vld [vmem:[%s16206_s4 + $0x84] sm:$0xf]  ;;  %v8235_v20 = vld [vmem:[%s16206_s4 + $0x90] sm:$0xf0]  ;;  %v8222_v11 = vor.u32 %v10416_v51, %v8219_v61  ;;  %v10415_v25 = vld [vmem:[%s16206_s4 + $0x54] sm:$0xf0] }
 0x238   :  { %2885 = vmatpush.bf16.msra.mxu2 %v8274_v59  ;;  %2898 = vmatpush.bf16.msra.mxu3 %v8278_v14  ;;  %v8238_v18 = vor.u32 %v10420_v39, %v8235_v20  ;;  %v10414_v59 = vld [vmem:[%s16206_s4 + $0x4c] sm:$0xf0]  ;;  %v10412_v14 = vld [vmem:[%s16206_s4 + $0x44] sm:$0xf]  ;;  %v8210_v39 = vor.u32 %v10415_v25, %v8209_v40  ;;  %v8198_v51 = vor.u32 %v10409_v63, %v8195_v44  ;;  %v10407_v61 = vld [vmem:[%s16206_s4 + $0x14] sm:$0xf0] }
 0x239   :  { %v2127_v43 = vadd.f32 %v2109_v27, %v11866_v23  ;;  %v2128_v60 = vadd.f32 %v2122_v29, %v11874_v28  ;;  %v8211_v27 = vld [vmem:[%s16206_s4 + $0x58] sm:$0xf0]  ;;  %v8202_v31 = vor.u32 %v10414_v59, %v8201_v50  ;;  %v10408_v20 = vld [vmem:[%s16206_s4 + $0x24] sm:$0xf]  ;;  %v8421_v59 = vld [vmem:[%s16209_s6 + $0xe8] sm:$0xf] }
 0x23a   :  { %v8397_v40 = vld [vmem:[%s16209_s6 + $0xc0] sm:$0xf]  ;;  %v10494_v25 = vld [vmem:[%s16209_s6 + $0xcc] sm:$0xf0]  ;;  %v10493_v33 = vld [vmem:[%s16209_s6 + $0xcc] sm:$0xf] }
 0x23b   :  { %10928 = vtanh.f32 %v2127_v43  ;;  %v2138_v12 = vmul.f32 0.5, %v2128_v60  ;;  %2860 = vmatpush.bf16.msra.mxu0 %v8250_v26  ;;  %2873 = vmatpush.bf16.msra.mxu1 %v8254_v32  ;;  %v10413_v26 = vld [vmem:[%s16206_s4 + $0x4c] sm:$0xf]  ;;  %v8206_v32 = vor.u32 %v10412_v14, %v8203_v17  ;;  %v8193_v43 = vld [vmem:[%s16206_s4 + $0x28] sm:$0xf] }
 0x23c   :  { %v10925_v41 = vpop.eup %10924  ;;  %2886 = vmatpush.bf16.msra.mxu2 %v8258_v35  ;;  %2899 = vmatpush.bf16.msra.mxu3 %v8262_v36  ;;  %v10411_v60 = vld [vmem:[%s16206_s4 + $0x34] sm:$0xf0]  ;;  %v8423_v17 = vld [vmem:[%s16209_s6 + $0xf8] sm:$0xf0]  ;;  %v8389_v63 = vld [vmem:[%s16209_s6 + $0xa8] sm:$0xf] }
 0x23d   :  { %v10927_v58 = vpop.eup %10926  ;;  %v2131_v1 = vmul.f32 0.5, %v10925_v41  ;;  %10930 = vtanh.f32 %v2138_v12  ;;  %v8190_v12 = vor.u32 %v10408_v20, %v8187_v37  ;;  %v8194_v48 = vor.u32 %v10411_v60, %v8193_v43  ;;  %v10404_v41 = vld [vmem:[%s16206_s4 + $0x4] sm:$0xf]  ;;  %v10499_v14 = vld [vmem:[%s16209_s6 + $0xf4] sm:$0xf0] }
 0x23e   :  { %v2135_v6 = vmul.f32 0.5, %v10927_v58  ;;  %v2110_v7 = vpop.f32.mrf.mxu2  ;;  %v2123_v8 = vpop.f32.mrf.mxu3  ;;  %v10490_v20 = vld [vmem:[%s16209_s6 + $0xac] sm:$0xf0]  ;;  %v10488_v37 = vld [vmem:[%s16209_s6 + $0xa4] sm:$0xf] }
 0x23f   :  { %v2132_v9 = vadd.f32 0.5, %v2131_v1  ;;  %2861 = vmatpush.bf16.msra.mxu0 %v8234_v53  ;;  %2874 = vmatpush.bf16.msra.mxu1 %v8238_v18  ;;  %v8169_v53 = vld [vmem:[%s16206_s4] sm:$0xf]  ;;  %v10406_v18 = vld [vmem:[%s16206_s4 + $0xc] sm:$0xf0]  ;;  %v8182_v7 = vor.u32 %v10405_v62, %v8179_v55 }
 0x240   :  { %v2136_v24 = vadd.f32 0.5, %v2135_v6  ;;  %2887 = vmatpush.bf16.msra.mxu2 %v8242_v42  ;;  %2900 = vmatpush.bf16.msra.mxu3 %v8246_v52  ;;  %v8171_v42 = vld [vmem:[%s16206_s4 + $0x10] sm:$0xf0]  ;;  %v8177_v52 = vld [vmem:[%s16206_s4 + $0x8] sm:$0xf]  ;;  %v8170_v1 = vor.u32 %v10406_v18, %v8169_v53 }
 0x241   :  { %v10929_v21 = vpop.eup %10928  ;;  %v8174_v4 = vor.u32 %v10404_v41, %v8171_v42  ;;  %v8178_v6 = vor.u32 %v10407_v61, %v8177_v52  ;;  %v8383_v60 = vld [vmem:[%s16209_s6 + $0xb0] sm:$0xf0]  ;;  %v10491_v44 = vld [vmem:[%s16209_s6 + $0xb4] sm:$0xf0]  ;;  %v10489_v18 = vld [vmem:[%s16209_s6 + $0xac] sm:$0xf] }
 0x242   :  { %v2142_v29 = vmul.f32 %v2136_v24, %v12535_v47  ;;  %v2143_v30 = vmul.f32 %v10929_v21, %v2132_v9  ;;  %v8214_v47 = vor.u32 %v10413_v26, %v8211_v27  ;;  %v8166_v9 = vld [vmem:[%s16210_s0 + $0x18] sm:$0xff]  ;;  %v10492_v26 = vld [vmem:[%s16209_s6 + $0xc4] sm:$0xf]  ;;  %v8399_v27 = vld [vmem:[%s16209_s6 + $0xd0] sm:$0xf0]  ;;  %v8390_v53 = vor.u32 %v10491_v44, %v8389_v63 }
 0x243   :  { %2862 = vmatpush.bf16.msra.mxu0 %v8218_v10  ;;  %2875 = vmatpush.bf16.msra.mxu1 %v8222_v11  ;;  %v10931_v35 = vpop.eup %10930  ;;  %v2663_v10 = vpack.c.bf16 %v8166_v9, %v8166_v9  ;;  %v8415_v11 = vld [vmem:[%s16209_s6 + $0xf0] sm:$0xf0]  ;;  %v8365_v41 = vld [vmem:[%s16209_s6 + $0x80] sm:$0xf]  ;;  %v10486_v42 = vld [vmem:[%s16209_s6 + $0x8c] sm:$0xf0] }
 0x244   :  { %v13174_v36 = vadd.f32 %v2143_v30, %v2142_v29  ;;  %2888 = vmatpush.bf16.msra.mxu2 %v8226_v15  ;;  %2901 = vmatpush.bf16.msra.mxu3 %v8230_v16  ;;  %v2140_v46 = vmul.f32 0.5, %v10931_v35  ;;  %v8422_v15 = vor.u32 %v10499_v14, %v8421_v59  ;;  %v10497_v16 = vld [vmem:[%s16209_s6 + $0xec] sm:$0xf]  ;;  %v8398_v29 = vor.u32 %v10494_v25, %v8397_v40  ;;  %v8407_v35 = vld [vmem:[%s16209_s6 + $0xd8] sm:$0xf0] }
 0x245   :  { %v8426_v21 = vor.u32 %v10497_v16, %v8423_v17  ;;  %v8402_v30 = vor.u32 %v10492_v26, %v8399_v27  ;;  %v10484_v52 = vld [vmem:[%s16209_s6 + $0x84] sm:$0xf]  ;;  %v8366_v61 = vor.u32 %v10486_v42, %v8365_v41  ;;  %v8367_v62 = vld [vmem:[%s16209_s6 + $0x90] sm:$0xf0]  ;;  %v8373_v55 = vld [vmem:[%s16209_s6 + $0x88] sm:$0xf] }
 0x246   :  { %10932 = vtanh.f32 %v13174_v36  ;;  %v2141_v58 = vadd.f32 0.5, %v2140_v46  ;;  %v10480_v9 = vld [vmem:[%s16209_s6 + $0x64] sm:$0xf]  ;;  %v10481_v16 = vld [vmem:[%s16209_s6 + $0x6c] sm:$0xf] }
 0x247   :  { %2863 = vmatpush.bf16.msra.mxu0 %v8202_v31  ;;  %2876 = vmatpush.bf16.msra.mxu1 %v8206_v32  ;;  %v8405_v31 = vld [vmem:[%s16209_s6 + $0xc8] sm:$0xf]  ;;  %v10495_v32 = vld [vmem:[%s16209_s6 + $0xd4] sm:$0xf0]  ;;  %v8359_v17 = vld [vmem:[%s16209_s6 + $0x78] sm:$0xf0] }
 0x248   :  { %2889 = vmatpush.bf16.msra.mxu2 %v8210_v39  ;;  %2902 = vmatpush.bf16.msra.mxu3 %v8214_v47  ;;  %v8406_v34 = vor.u32 %v10495_v32, %v8405_v31  ;;  %v8410_v39 = vor.u32 %v10493_v33, %v8407_v35  ;;  %v8381_v47 = vld [vmem:[%s16209_s6 + $0xa0] sm:$0xf]  ;;  %v8362_v40 = vor.u32 %v10481_v16, %v8359_v17  ;;  %v10478_v25 = vld [vmem:[%s16209_s6 + $0x4c] sm:$0xf0]  ;;  %v10476_v26 = vld [vmem:[%s16209_s6 + $0x44] sm:$0xf] }
 0x249   :  { %v8382_v43 = vor.u32 %v10490_v20, %v8381_v47  ;;  %v10479_v31 = vld [vmem:[%s16209_s6 + $0x54] sm:$0xf0]  ;;  %v8343_v35 = vld [vmem:[%s16209_s6 + $0x58] sm:$0xf0]  ;;  %v8317_v47 = vld [vmem:[%s16209_s6 + $0x20] sm:$0xf] }
 0x24a   :  { %v10474_v20 = vld [vmem:[%s16209_s6 + $0x2c] sm:$0xf0]  ;;  %v8319_v44 = vld [vmem:[%s16209_s6 + $0x30] sm:$0xf0]  ;;  %v8327_v41 = vld [vmem:[%s16209_s6 + $0x38] sm:$0xf0] }
 0x24b   :  { %2864 = vmatpush.bf16.msra.mxu0 %v8186_v22  ;;  %2877 = vmatpush.bf16.msra.mxu1 %v8190_v12  ;;  %v8386_v12 = vor.u32 %v10488_v37, %v8383_v60  ;;  %v10472_v37 = vld [vmem:[%s16209_s6 + $0x24] sm:$0xf]  ;;  %v8318_v63 = vor.u32 %v10474_v20, %v8317_v47  ;;  %v8551_v17 = vld [vmem:[%s16211_s5 + $0xf8] sm:$0xf0]  ;;  %v8509_v47 = vld [vmem:[%s16211_s5 + $0xa0] sm:$0xf] }
 0x24c   :  { %v10933_v5 = vpop.eup %10932  ;;  %2890 = vmatpush.bf16.msra.mxu2 %v8194_v48  ;;  %2903 = vmatpush.bf16.msra.mxu3 %v8198_v51  ;;  %v8391_v48 = vld [vmem:[%s16209_s6 + $0xb8] sm:$0xf0]  ;;  %v10458_v20 = vld [vmem:[%s16211_s5 + $0xac] sm:$0xf0] }
 0x24d   :  { %v2146_v8 = vmul.f32 %v10933_v5, %v2141_v58  ;;  %v8394_v51 = vor.u32 %v10489_v18, %v8391_v48  ;;  %v10487_v58 = vld [vmem:[%s16209_s6 + $0x94] sm:$0xf0]  ;;  %v10485_v5 = vld [vmem:[%s16209_s6 + $0x8c] sm:$0xf]  ;;  %v8322_v18 = vor.u32 %v10472_v37, %v8319_v44  ;;  %v10456_v37 = vld [vmem:[%s16211_s5 + $0xa4] sm:$0xf] }
 0x24e   :  { %v10459_v44 = vld [vmem:[%s16211_s5 + $0xb4] sm:$0xf0] }
 0x24f   :  { %v2147_v50 = vpack.c.bf16 %v2146_v8, %v2146_v8  ;;  %2865 = vmatpush.bf16.msra.mxu0 %v8170_v1  ;;  %2878 = vmatpush.bf16.msra.mxu1 %v8174_v4  ;;  %v8370_v1 = vor.u32 %v10484_v52, %v8367_v62  ;;  %v8374_v4 = vor.u32 %v10487_v58, %v8373_v55  ;;  %v8349_v8 = vld [vmem:[%s16209_s6 + $0x60] sm:$0xf]  ;;  %v10468_v62 = vld [vmem:[%s16209_s6 + $0x4] sm:$0xf]  ;;  %v8303_v58 = vld [vmem:[%s16209_s6 + $0x10] sm:$0xf0] }
 0x250   :  { %2891 = vmatpush.bf16.msra.mxu2 %v8178_v6  ;;  %2904 = vmatpush.bf16.msra.mxu3 %v8182_v7  ;;  %v8375_v6 = vld [vmem:[%s16209_s6 + $0x98] sm:$0xf0]  ;;  %v8301_v52 = vld [vmem:[%s16209_s6] sm:$0xf] }
 0x251   :  { %2593 = vmatmul.bf16.vlgmr.msrb.gmra.mxu0 %v2147_v50  ;;  %2606 = vmatmul.bf16.vlgmr.msrb.gmra.mxu1 %v2147_v50  ;;  %v8378_v7 = vor.u32 %v10485_v5, %v8375_v6  ;;  %v8306_v5 = vor.u32 %v10468_v62, %v8303_v58  ;;  %v10452_v62 = vld [vmem:[%s16211_s5 + $0x84] sm:$0xf] }
 0x252   :  { %2619 = vmatmul.bf16.vlgmr.msrb.gmra.mxu2 %v2147_v50  ;;  %2632 = vmatmul.bf16.vlgmr.msrb.gmra.mxu3 %v2147_v50 }
 0x253   :  { %2942 = vmatpush.bf16.msrb.mxu0 %v12584_v45  ;;  %2955 = vmatpush.bf16.msrb.mxu1 %v12587_v49  ;;  %v8413_v45 = vld [vmem:[%s16209_s6 + $0xe0] sm:$0xf]  ;;  %v10498_v49 = vld [vmem:[%s16209_s6 + $0xec] sm:$0xf0] }
 0x254   :  { %2968 = vmatpush.bf16.msrb.mxu2 %v12590_v54  ;;  %2981 = vmatpush.bf16.msrb.mxu3 %v12593_v57  ;;  %v10496_v54 = vld [vmem:[%s16209_s6 + $0xe4] sm:$0xf]  ;;  %v8414_v57 = vor.u32 %v10498_v49, %v8413_v45 }
 0x255   :  { %v8418_v24 = vor.u32 %v10496_v54, %v8415_v11  ;;  %v8351_v54 = vld [vmem:[%s16209_s6 + $0x70] sm:$0xf0]  ;;  %v10483_v11 = vld [vmem:[%s16209_s6 + $0x74] sm:$0xf0] }
 0x261   :  { %2866 = vmatmul.bf16.vlgmr.msra.gmra.mxu0 %v2147_v50  ;;  %2879 = vmatmul.bf16.vlgmr.msra.gmra.mxu1 %v2147_v50 }
 0x262   :  { %2892 = vmatmul.bf16.vlgmr.msra.gmra.mxu2 %v2147_v50  ;;  %2905 = vmatmul.bf16.vlgmr.msra.gmra.mxu3 %v2147_v50  ;;  %v10482_v50 = vld [vmem:[%s16209_s6 + $0x6c] sm:$0xf0] }
 0x263   :  { %3235 = vmatpush.bf16.msra.mxu0 %v8414_v57  ;;  %3248 = vmatpush.bf16.msra.mxu1 %v8418_v24  ;;  %v8350_v49 = vor.u32 %v10482_v50, %v8349_v8  ;;  %v8357_v57 = vld [vmem:[%s16209_s6 + $0x68] sm:$0xf]  ;;  %v8354_v24 = vor.u32 %v10480_v9, %v8351_v54  ;;  %v8311_v8 = vld [vmem:[%s16209_s6 + $0x18] sm:$0xf0]  ;;  %v8541_v50 = vld [vmem:[%s16211_s5 + $0xe0] sm:$0xf] }
 0x264   :  { %3261 = vmatpush.bf16.msra.mxu2 %v8422_v15  ;;  %3274 = vmatpush.bf16.msra.mxu3 %v8426_v21  ;;  %v8358_v15 = vor.u32 %v10483_v11, %v8357_v57  ;;  %v8333_v21 = vld [vmem:[%s16209_s6 + $0x40] sm:$0xf]  ;;  %v10464_v54 = vld [vmem:[%s16211_s5 + $0xe4] sm:$0xf]  ;;  %v8543_v57 = vld [vmem:[%s16211_s5 + $0xf0] sm:$0xf0] }
 0x265   :  { %v8334_v27 = vor.u32 %v10478_v25, %v8333_v21  ;;  %v10462_v21 = vld [vmem:[%s16211_s5 + $0xcc] sm:$0xf0] }
 0x267   :  { %3236 = vmatpush.bf16.msra.mxu0 %v8398_v29  ;;  %3249 = vmatpush.bf16.msra.mxu1 %v8402_v30  ;;  %v8335_v29 = vld [vmem:[%s16209_s6 + $0x50] sm:$0xf0]  ;;  %v8341_v30 = vld [vmem:[%s16209_s6 + $0x48] sm:$0xf] }
 0x268   :  { %3262 = vmatpush.bf16.msra.mxu2 %v8406_v34  ;;  %3275 = vmatpush.bf16.msra.mxu3 %v8410_v39  ;;  %v8338_v32 = vor.u32 %v10476_v26, %v8335_v29  ;;  %v8342_v33 = vor.u32 %v10479_v31, %v8341_v30  ;;  %v10477_v34 = vld [vmem:[%s16209_s6 + $0x4c] sm:$0xf]  ;;  %v8527_v29 = vld [vmem:[%s16211_s5 + $0xd0] sm:$0xf0]  ;;  %v8533_v30 = vld [vmem:[%s16211_s5 + $0xc8] sm:$0xf] }
 0x269   :  { %v8346_v39 = vor.u32 %v10477_v34, %v8343_v35  ;;  %v8535_v34 = vld [vmem:[%s16211_s5 + $0xd8] sm:$0xf0] }
 0x26b   :  { %3237 = vmatpush.bf16.msra.mxu0 %v8382_v43  ;;  %3250 = vmatpush.bf16.msra.mxu1 %v8386_v12  ;;  %v8325_v12 = vld [vmem:[%s16209_s6 + $0x28] sm:$0xf] }
 0x26c   :  { %3263 = vmatpush.bf16.msra.mxu2 %v8390_v53  ;;  %3276 = vmatpush.bf16.msra.mxu3 %v8394_v51  ;;  %v10475_v53 = vld [vmem:[%s16209_s6 + $0x34] sm:$0xf0]  ;;  %v10473_v51 = vld [vmem:[%s16209_s6 + $0x2c] sm:$0xf] }
 0x26d   :  { %v8326_v48 = vor.u32 %v10475_v53, %v8325_v12  ;;  %v8330_v42 = vor.u32 %v10473_v51, %v8327_v41 }
 0x26f   :  { %3238 = vmatpush.bf16.msra.mxu0 %v8366_v61  ;;  %3251 = vmatpush.bf16.msra.mxu1 %v8370_v1  ;;  %v10470_v61 = vld [vmem:[%s16209_s6 + $0xc] sm:$0xf0]  ;;  %v8309_v1 = vld [vmem:[%s16209_s6 + $0x8] sm:$0xf] }
 0x270   :  { %3264 = vmatpush.bf16.msra.mxu2 %v8374_v4  ;;  %3277 = vmatpush.bf16.msra.mxu3 %v8378_v7  ;;  %v8302_v55 = vor.u32 %v10470_v61, %v8301_v52  ;;  %v10471_v4 = vld [vmem:[%s16209_s6 + $0x14] sm:$0xf0]  ;;  %v10469_v7 = vld [vmem:[%s16209_s6 + $0xc] sm:$0xf]  ;;  %v8493_v52 = vld [vmem:[%s16211_s5 + $0x80] sm:$0xf] }
 0x271   :  { %8295 = vmatmul.msk.bf16.vlgmr.msrb.gmra.mxu0 %vm333_vm1, %v2663_v10  ;;  %8296 = vmatmul.msk.bf16.vlgmr.msrb.gmra.mxu1 %vm333_vm1, %v2663_v10  ;;  %v8310_v6 = vor.u32 %v10471_v4, %v8309_v1  ;;  %v8314_v9 = vor.u32 %v10469_v7, %v8311_v8  ;;  %v10454_v61 = vld [vmem:[%s16211_s5 + $0x8c] sm:$0xf0]  ;;  %v8495_v4 = vld [vmem:[%s16211_s5 + $0x90] sm:$0xf0] }
 0x272   :  { %8297 = vmatmul.msk.bf16.vlgmr.msrb.gmra.mxu2 %vm333_vm1, %v2663_v10  ;;  %8298 = vmatmul.msk.bf16.vlgmr.msrb.gmra.mxu3 %vm333_vm1, %v2663_v10  ;;  %v8494_v1 = vor.u32 %v10454_v61, %v8493_v52  ;;  %v8498_v7 = vor.u32 %v10452_v62, %v8495_v4  ;;  %v10440_v61 = vld [vmem:[%s16211_s5 + $0x24] sm:$0xf]  ;;  %v8447_v62 = vld [vmem:[%s16211_s5 + $0x30] sm:$0xf0] }
 0x273   :  { %3239 = vmatpush.bf16.msra.mxu0 %v8350_v49  ;;  %3252 = vmatpush.bf16.msra.mxu1 %v8354_v24  ;;  %v10466_v49 = vld [vmem:[%s16211_s5 + $0xec] sm:$0xf0]  ;;  %v10467_v24 = vld [vmem:[%s16211_s5 + $0xf4] sm:$0xf0]  ;;  %v8450_v4 = vor.u32 %v10440_v61, %v8447_v62 }
 0x274   :  { %3265 = vmatpush.bf16.msra.mxu2 %v8358_v15  ;;  %3278 = vmatpush.bf16.msra.mxu3 %v8362_v40  ;;  %v8542_v11 = vor.u32 %v10466_v49, %v8541_v50  ;;  %v10465_v15 = vld [vmem:[%s16211_s5 + $0xec] sm:$0xf]  ;;  %v8525_v40 = vld [vmem:[%s16211_s5 + $0xc0] sm:$0xf] }
 0x275   :  { %v8554_v25 = vor.u32 %v10465_v15, %v8551_v17  ;;  %v8526_v26 = vor.u32 %v10462_v21, %v8525_v40  ;;  %v8479_v15 = vld [vmem:[%s16211_s5 + $0x70] sm:$0xf0]  ;;  %v10451_v40 = vld [vmem:[%s16211_s5 + $0x74] sm:$0xf0]  ;;  %v10449_v21 = vld [vmem:[%s16211_s5 + $0x6c] sm:$0xf] }
 0x277   :  { %3240 = vmatpush.bf16.msra.mxu0 %v8334_v27  ;;  %3253 = vmatpush.bf16.msra.mxu1 %v8338_v32  ;;  %v10460_v27 = vld [vmem:[%s16211_s5 + $0xc4] sm:$0xf]  ;;  %v10463_v32 = vld [vmem:[%s16211_s5 + $0xd4] sm:$0xf0] }
 0x278   :  { %3266 = vmatpush.bf16.msra.mxu2 %v8342_v33  ;;  %3279 = vmatpush.bf16.msra.mxu3 %v8346_v39  ;;  %v8530_v31 = vor.u32 %v10460_v27, %v8527_v29  ;;  %v10461_v33 = vld [vmem:[%s16211_s5 + $0xcc] sm:$0xf]  ;;  %v8534_v35 = vor.u32 %v10463_v32, %v8533_v30 }
 0x279   :  { %v8538_v39 = vor.u32 %v10461_v33, %v8535_v34 }
 0x27b   :  { %3241 = vmatpush.bf16.msra.mxu0 %v8318_v63  ;;  %3254 = vmatpush.bf16.msra.mxu1 %v8322_v18  ;;  %v8517_v63 = vld [vmem:[%s16211_s5 + $0xa8] sm:$0xf]  ;;  %v10457_v18 = vld [vmem:[%s16211_s5 + $0xac] sm:$0xf] }
 0x27c   :  { %3267 = vmatpush.bf16.msra.mxu2 %v8326_v48  ;;  %3280 = vmatpush.bf16.msra.mxu3 %v8330_v42  ;;  %v8518_v53 = vor.u32 %v10459_v44, %v8517_v63  ;;  %v8519_v48 = vld [vmem:[%s16211_s5 + $0xb8] sm:$0xf0] }
 0x27d   :  { %v8522_v51 = vor.u32 %v10457_v18, %v8519_v48 }
 0x27f   :  { %3242 = vmatpush.bf16.msra.mxu0 %v8302_v55  ;;  %3255 = vmatpush.bf16.msra.mxu1 %v8306_v5  ;;  %v8501_v5 = vld [vmem:[%s16211_s5 + $0x88] sm:$0xf] }
 0x280   :  { %3268 = vmatpush.bf16.msra.mxu2 %v8310_v6  ;;  %3281 = vmatpush.bf16.msra.mxu3 %v8314_v9  ;;  %v10455_v6 = vld [vmem:[%s16211_s5 + $0x94] sm:$0xf0] }
 0x281   :  { %v8502_v8 = vor.u32 %v10455_v6, %v8501_v5  ;;  %v10443_v5 = vld [vmem:[%s16211_s5 + $0x34] sm:$0xf0]  ;;  %v10441_v6 = vld [vmem:[%s16211_s5 + $0x2c] sm:$0xf] }
 0x283   :  { %3447 = vmatpush.bf16.msrb.mxu0 %v8542_v11  ;;  %v10448_v11 = vld [vmem:[%s16211_s5 + $0x64] sm:$0xf] }
 0x284   :  { %3486 = vmatpush.bf16.msrb.mxu3 %v8554_v25  ;;  %v8482_v17 = vor.u32 %v10448_v11, %v8479_v15  ;;  %v8487_v25 = vld [vmem:[%s16211_s5 + $0x78] sm:$0xf0]  ;;  %v8429_v11 = vld [vmem:[%s16211_s5] sm:$0xf]  ;;  %v10436_v15 = vld [vmem:[%s16211_s5 + $0x4] sm:$0xf] }
 0x285   :  { %v8490_v30 = vor.u32 %v10449_v21, %v8487_v25  ;;  %v8437_v21 = vld [vmem:[%s16211_s5 + $0x8] sm:$0xf]  ;;  %v10439_v25 = vld [vmem:[%s16211_s5 + $0x14] sm:$0xf0] }
 0x287   :  { %3448 = vmatpush.bf16.msrb.mxu0 %v8526_v26 }
 0x288   :  { %3487 = vmatpush.bf16.msrb.mxu3 %v8538_v39  ;;  %v10446_v39 = vld [vmem:[%s16211_s5 + $0x4c] sm:$0xf0] }
 0x28c   :  { %3488 = vmatpush.bf16.msrb.mxu3 %v8522_v51  ;;  %v8445_v51 = vld [vmem:[%s16211_s5 + $0x20] sm:$0xf] }
 0x2ae   :  { %v13296_v46 = vpop.f32.mrf.mxu0  ;;  %v13298_v22 = vpop.f32.mrf.mxu1 }
 0x2b5   :  { %v13339_v10 = vpop.f32.mrf.mxu2  ;;  %v13341_v45 = vpop.f32.mrf.mxu3 }
 0x2b6   :  { %v2384_v59 = vpop.f32.mrf.mxu0  ;;  %v2397_v14 = vpop.f32.mrf.mxu1 }
 0x2b7   :  { %v8546_v59 = vor.u32 %v10464_v54, %v8543_v57  ;;  %v8549_v14 = vld [vmem:[%s16211_s5 + $0xe8] sm:$0xf]  ;;  %v8477_v54 = vld [vmem:[%s16211_s5 + $0x60] sm:$0xf]  ;;  %v10450_v57 = vld [vmem:[%s16211_s5 + $0x6c] sm:$0xf0] }
 0x2b8   :  { %v8550_v16 = vor.u32 %v10467_v24, %v8549_v14  ;;  %v8478_v24 = vor.u32 %v10450_v57, %v8477_v54 }
 0x2b9   :  { %3460 = vmatpush.bf16.msrb.mxu1 %v8546_v59 }
 0x2ba   :  { %3473 = vmatpush.bf16.msrb.mxu2 %v8550_v16  ;;  %v8485_v16 = vld [vmem:[%s16211_s5 + $0x68] sm:$0xf] }
 0x2bb   :  { %v8486_v29 = vor.u32 %v10451_v40, %v8485_v16  ;;  %v8431_v16 = vld [vmem:[%s16211_s5 + $0x10] sm:$0xf0] }
 0x2bc   :  { %v8434_v40 = vor.u32 %v10436_v15, %v8431_v16  ;;  %v10520_v15 = vld [vmem:[%s16206_s4 + $0xa4] sm:$0xf] }
 0x2bd   :  { %v2410_v43 = vpop.f32.mrf.mxu2  ;;  %v2423_v60 = vpop.f32.mrf.mxu3  ;;  %3461 = vmatpush.bf16.msrb.mxu1 %v8530_v31 }
 0x2be   :  { %v8510_v43 = vor.u32 %v10458_v20, %v8509_v47  ;;  %v8511_v60 = vld [vmem:[%s16211_s5 + $0xb0] sm:$0xf0]  ;;  %3474 = vmatpush.bf16.msrb.mxu2 %v8534_v35  ;;  %v8461_v35 = vld [vmem:[%s16211_s5 + $0x40] sm:$0xf]  ;;  %v10444_v47 = vld [vmem:[%s16211_s5 + $0x44] sm:$0xf] }
 0x2bf   :  { %v8514_v12 = vor.u32 %v10456_v37, %v8511_v60  ;;  %v8469_v20 = vld [vmem:[%s16211_s5 + $0x48] sm:$0xf]  ;;  %v10447_v37 = vld [vmem:[%s16211_s5 + $0x54] sm:$0xf0] }
 0x2c0   :  { %3449 = vmatpush.bf16.msrb.mxu0 %v8510_v43  ;;  %v8470_v44 = vor.u32 %v10447_v37, %v8469_v20  ;;  %v8671_v20 = vld [vmem:[%s16206_s4 + $0xe0] sm:$0xf]  ;;  %v10530_v37 = vld [vmem:[%s16206_s4 + $0xec] sm:$0xf0] }
 0x2c1   :  { %3462 = vmatpush.bf16.msrb.mxu1 %v8514_v12  ;;  %v10445_v12 = vld [vmem:[%s16211_s5 + $0x4c] sm:$0xf]  ;;  %v8672_v62 = vor.u32 %v10530_v37, %v8671_v20  ;;  %v8623_v37 = vld [vmem:[%s16206_s4 + $0x80] sm:$0xf] }
 0x2c2   :  { %3475 = vmatpush.bf16.msrb.mxu2 %v8518_v53  ;;  %v8471_v53 = vld [vmem:[%s16211_s5 + $0x58] sm:$0xf0] }
 0x2c3   :  { %v8474_v18 = vor.u32 %v10445_v12, %v8471_v53  ;;  %v10531_v53 = vld [vmem:[%s16206_s4 + $0xf4] sm:$0xf0] }
 0x2c4   :  { %3450 = vmatpush.bf16.msrb.mxu0 %v8494_v1 }
 0x2c5   :  { %3463 = vmatpush.bf16.msrb.mxu1 %v8498_v7 }
 0x2c6   :  { %3476 = vmatpush.bf16.msrb.mxu2 %v8502_v8 }
 0x2c8   :  { %3451 = vmatpush.bf16.msrb.mxu0 %v8478_v24 }
 0x2c9   :  { %3464 = vmatpush.bf16.msrb.mxu1 %v8482_v17 }
 0x2ca   :  { %3477 = vmatpush.bf16.msrb.mxu2 %v8486_v29 }
 0x2ce   :  { %v2594_v41 = vpop.f32.mrf.mxu0  ;;  %v2607_v42 = vpop.f32.mrf.mxu1  ;;  %3478 = vmatpush.bf16.msrb.mxu2 %v8470_v44  ;;  %v8679_v44 = vld [vmem:[%s16206_s4 + $0xe8] sm:$0xf] }
 0x2cf   :  { %v2595_v55 = vadd.f32 %v2594_v41, %v13296_v46  ;;  %v2608_v58 = vadd.f32 %v2607_v42, %v13298_v22  ;;  %v10453_v46 = vld [vmem:[%s16211_s5 + $0x8c] sm:$0xf]  ;;  %v8503_v22 = vld [vmem:[%s16211_s5 + $0x98] sm:$0xf0]  ;;  %v10442_v41 = vld [vmem:[%s16211_s5 + $0x2c] sm:$0xf0] }
 0x2d0   :  { %v8506_v49 = vor.u32 %v10453_v46, %v8503_v22  ;;  %v8446_v52 = vor.u32 %v10442_v41, %v8445_v51 }
 0x2d1   :  { %v2637_v50 = vadd.f32 %v2595_v55, %v12226_v2  ;;  %v2638_v9 = vadd.f32 %v2608_v58, %v12228_v3  ;;  %v8453_v55 = vld [vmem:[%s16211_s5 + $0x28] sm:$0xf] }
 0x2d2   :  { %3489 = vmatpush.bf16.msrb.mxu3 %v8506_v49  ;;  %v8454_v22 = vor.u32 %v10443_v5, %v8453_v55 }
 0x2d3   :  { %v2641_v59 = vmul.f32 0.5, %v2637_v50  ;;  %v2645_v14 = vmul.f32 0.5, %v2638_v9  ;;  %v8455_v50 = vld [vmem:[%s16211_s5 + $0x38] sm:$0xf0] }
 0x2d4   :  { %v8458_v57 = vor.u32 %v10441_v6, %v8455_v50  ;;  %3479 = vmatpush.bf16.msrb.mxu2 %v8454_v22  ;;  %v8680_v6 = vor.u32 %v10531_v53, %v8679_v44  ;;  %v8663_v22 = vld [vmem:[%s16206_s4 + $0xc8] sm:$0xf]  ;;  %v10527_v50 = vld [vmem:[%s16206_s4 + $0xd4] sm:$0xf0] }
 0x2d5   :  { %10934 = vtanh.f32 %v2641_v59  ;;  %v2620_v26 = vpop.f32.mrf.mxu2  ;;  %v2633_v27 = vpop.f32.mrf.mxu3  ;;  %v10438_v59 = vld [vmem:[%s16211_s5 + $0xc] sm:$0xf0]  ;;  %v8631_v44 = vld [vmem:[%s16206_s4 + $0x88] sm:$0xf] }
 0x2d6   :  { %10936 = vtanh.f32 %v2645_v14  ;;  %v2621_v31 = vadd.f32 %v2620_v26, %v13339_v10  ;;  %v2634_v32 = vadd.f32 %v2633_v27, %v13341_v45  ;;  %v2596_v33 = vpop.f32.mrf.mxu0  ;;  %v2609_v34 = vpop.f32.mrf.mxu1  ;;  %v8462_v10 = vor.u32 %v10446_v39, %v8461_v35  ;;  %v8463_v45 = vld [vmem:[%s16211_s5 + $0x50] sm:$0xf0]  ;;  %3490 = vmatpush.bf16.msrb.mxu3 %v8490_v30  ;;  %v10437_v26 = vld [vmem:[%s16211_s5 + $0xc] sm:$0xf] }
 0x2d7   :  { %v8466_v63 = vor.u32 %v10444_v47, %v8463_v45  ;;  %v8430_v24 = vor.u32 %v10438_v59, %v8429_v11  ;;  %v8438_v30 = vor.u32 %v10439_v25, %v8437_v21  ;;  %v8641_v25 = vld [vmem:[%s16206_s4 + $0xb0] sm:$0xf0] }
 0x2d8   :  { %v2639_v43 = vadd.f32 %v2621_v31, %v12250_v13  ;;  %v2640_v60 = vadd.f32 %v2634_v32, %v12260_v19  ;;  %3452 = vmatpush.bf16.msrb.mxu0 %v8462_v10  ;;  %v8439_v31 = vld [vmem:[%s16211_s5 + $0x18] sm:$0xf0]  ;;  %v8644_v20 = vor.u32 %v10520_v15, %v8641_v25  ;;  %v10508_v15 = vld [vmem:[%s16206_s4 + $0x44] sm:$0xf]  ;;  %v8599_v25 = vld [vmem:[%s16206_s4 + $0x48] sm:$0xf] }
 0x2d9   :  { %3465 = vmatpush.bf16.msrb.mxu1 %v8466_v63  ;;  %v8442_v32 = vor.u32 %v10437_v26, %v8439_v31  ;;  %3480 = vmatpush.bf16.msrb.mxu2 %v8438_v30  ;;  %v8673_v63 = vld [vmem:[%s16206_s4 + $0xf0] sm:$0xf0]  ;;  %v8647_v26 = vld [vmem:[%s16206_s4 + $0xa8] sm:$0xf]  ;;  %v8649_v30 = vld [vmem:[%s16206_s4 + $0xb8] sm:$0xf0] }
 0x2da   :  { %10938 = vtanh.f32 %v2639_v43  ;;  %v2650_v48 = vmul.f32 0.5, %v2640_v60  ;;  %3491 = vmatpush.bf16.msrb.mxu3 %v8474_v18  ;;  %v10528_v60 = vld [vmem:[%s16206_s4 + $0xe4] sm:$0xf]  ;;  %v10529_v18 = vld [vmem:[%s16206_s4 + $0xec] sm:$0xf] }
 0x2db   :  { %v10935_v42 = vpop.eup %10934  ;;  %v8676_v55 = vor.u32 %v10528_v60, %v8673_v63 }
 0x2dc   :  { %v10937_v58 = vpop.eup %10936  ;;  %v2643_v1 = vmul.f32 0.5, %v10935_v42  ;;  %10940 = vtanh.f32 %v2650_v48  ;;  %3453 = vmatpush.bf16.msrb.mxu0 %v8446_v52  ;;  %v8681_v48 = vld [vmem:[%s16206_s4 + $0xf8] sm:$0xf0] }
 0x2dd   :  { %v2647_v7 = vmul.f32 0.5, %v10937_v58  ;;  %v2622_v8 = vpop.f32.mrf.mxu2  ;;  %v2635_v46 = vpop.f32.mrf.mxu3  ;;  %3466 = vmatpush.bf16.msrb.mxu1 %v8450_v4  ;;  %v8655_v58 = vld [vmem:[%s16206_s4 + $0xc0] sm:$0xf] }
 0x2de   :  { %v2644_v9 = vadd.f32 0.5, %v2643_v1  ;;  %v2867_v49 = vpop.f32.mrf.mxu0  ;;  %v2880_v54 = vpop.f32.mrf.mxu1  ;;  %3492 = vmatpush.bf16.msrb.mxu3 %v8458_v57  ;;  %v10526_v1 = vld [vmem:[%s16206_s4 + $0xcc] sm:$0xf0]  ;;  %v10524_v8 = vld [vmem:[%s16206_s4 + $0xc4] sm:$0xf] }
 0x2df   :  { %v2648_v14 = vadd.f32 0.5, %v2647_v7  ;;  %v8684_v7 = vor.u32 %v10529_v18, %v8681_v48  ;;  %v8657_v46 = vld [vmem:[%s16206_s4 + $0xd0] sm:$0xf0]  ;;  %v8656_v11 = vor.u32 %v10526_v1, %v8655_v58  ;;  %v10519_v18 = vld [vmem:[%s16206_s4 + $0x94] sm:$0xf0] }
 0x2e0   :  { %v10939_v17 = vpop.eup %10938  ;;  %3454 = vmatpush.bf16.msrb.mxu0 %v8430_v24  ;;  %v8660_v59 = vor.u32 %v10524_v8, %v8657_v46  ;;  %v10522_v24 = vld [vmem:[%s16206_s4 + $0xac] sm:$0xf0]  ;;  %v10517_v48 = vld [vmem:[%s16206_s4 + $0x8c] sm:$0xf]  ;;  %v8632_v1 = vor.u32 %v10519_v18, %v8631_v44  ;;  %v8585_v44 = vld [vmem:[%s16206_s4 + $0x38] sm:$0xf0] }
 0x2e1   :  { %v2654_v27 = vmul.f32 %v2648_v14, %v13007_v38  ;;  %v2655_v29 = vmul.f32 %v10939_v17, %v2644_v9  ;;  %3467 = vmatpush.bf16.msrb.mxu1 %v8434_v40  ;;  %v10525_v9 = vld [vmem:[%s16206_s4 + $0xcc] sm:$0xf]  ;;  %v8639_v14 = vld [vmem:[%s16206_s4 + $0xa0] sm:$0xf]  ;;  %v8664_v40 = vor.u32 %v10527_v50, %v8663_v22  ;;  %v8617_v50 = vld [vmem:[%s16206_s4 + $0x78] sm:$0xf0] }
 0x2e2   :  { %v10941_v33 = vpop.eup %10940  ;;  %3493 = vmatpush.bf16.msrb.mxu3 %v8442_v32  ;;  %v10513_v22 = vld [vmem:[%s16206_s4 + $0x6c] sm:$0xf] }
 0x2e3   :  { %v13631_v34 = vadd.f32 %v2655_v29, %v2654_v27  ;;  %v2652_v38 = vmul.f32 0.5, %v10941_v33  ;;  %v10523_v27 = vld [vmem:[%s16206_s4 + $0xb4] sm:$0xf0]  ;;  %v10521_v29 = vld [vmem:[%s16206_s4 + $0xac] sm:$0xf]  ;;  %v8640_v33 = vor.u32 %v10522_v24, %v8639_v14 }
 0x2e4   :  { %v8648_v60 = vor.u32 %v10523_v27, %v8647_v26  ;;  %v8652_v63 = vor.u32 %v10521_v29, %v8649_v30  ;;  %v10510_v24 = vld [vmem:[%s16206_s4 + $0x4c] sm:$0xf0]  ;;  %v10511_v27 = vld [vmem:[%s16206_s4 + $0x54] sm:$0xf0]  ;;  %v10509_v29 = vld [vmem:[%s16206_s4 + $0x4c] sm:$0xf] }
 0x2e5   :  { %10942 = vtanh.f32 %v13631_v34  ;;  %v13634_v35 = vpop.f32.mrf.mxu2  ;;  %v13636_v39 = vpop.f32.mrf.mxu3  ;;  %v2653_v45 = vadd.f32 0.5, %v2652_v38  ;;  %v8601_v30 = vld [vmem:[%s16206_s4 + $0x58] sm:$0xf0]  ;;  %v3527_v18 = vld [vmem:[%s16207_s3 + $0x8] sm:$0xff] }
 0x2e6   :  { %v2869_v47 = vpop.f32.mrf.mxu0  ;;  %v2882_v10 = vpop.f32.mrf.mxu1 }
 0x2eb   :  { %v10943_v43 = vpop.eup %10942 }
 0x2ec   :  { %v2658_v12 = vmul.f32 %v10943_v43, %v2653_v45  ;;  %v10518_v43 = vld [vmem:[%s16206_s4 + $0x8c] sm:$0xf0] }
 0x2ed   :  { %v2895_v51 = vpop.f32.mrf.mxu2  ;;  %v2908_v41 = vpop.f32.mrf.mxu3 }
 0x2ee   :  { %8165 = vst [vmem:[%s16215_s9 + $0x10] sm:$0xff] %v2658_v12  ;;  %v3042_v42 = vpack.c.bf16 %v2658_v12, %v2658_v12  ;;  %v2944_v52 = vpop.f32.mrf.mxu0  ;;  %v2957_v61 = vpop.f32.mrf.mxu1  ;;  %v8633_v51 = vld [vmem:[%s16206_s4 + $0x98] sm:$0xf0]  ;;  %v8607_v41 = vld [vmem:[%s16206_s4 + $0x60] sm:$0xf] }
 0x2ef   :  { %v2945_v4 = vadd.f32 %v2944_v52, %v2867_v49  ;;  %v2958_v5 = vadd.f32 %v2957_v61, %v2880_v54  ;;  %v8665_v49 = vld [vmem:[%s16206_s4 + $0xd8] sm:$0xf0]  ;;  %v8624_v52 = vor.u32 %v10518_v43, %v8623_v37  ;;  %v8604_v43 = vor.u32 %v10509_v29, %v8601_v30  ;;  %v8803_v29 = vld [vmem:[%s16209_s6 + $0xe0] sm:$0xf]  ;;  %v10594_v30 = vld [vmem:[%s16209_s6 + $0xec] sm:$0xf0] }
 0x2f0   :  { %3243 = vmatmul.bf16.vlgmr.msra.gmra.mxu0 %v3042_v42  ;;  %3256 = vmatmul.bf16.vlgmr.msra.gmra.mxu1 %v3042_v42  ;;  %v8668_v21 = vor.u32 %v10525_v9, %v8665_v49 }
 0x2f1   :  { %v2987_v54 = vadd.f32 %v2945_v4, %v11816_v56  ;;  %v2988_v57 = vadd.f32 %v2958_v5, %v11824_v0  ;;  %3269 = vmatmul.bf16.vlgmr.msra.gmra.mxu2 %v3042_v42  ;;  %3282 = vmatmul.bf16.vlgmr.msra.gmra.mxu3 %v3042_v42  ;;  %v8636_v4 = vor.u32 %v10517_v48, %v8633_v51  ;;  %v8609_v5 = vld [vmem:[%s16206_s4 + $0x70] sm:$0xf0] }
 0x2f2   :  { %3720 = vmatpush.bf16.msra.mxu0 %v8672_v62  ;;  %3733 = vmatpush.bf16.msra.mxu1 %v8676_v55  ;;  %v10514_v62 = vld [vmem:[%s16206_s4 + $0x6c] sm:$0xf0]  ;;  %v10512_v55 = vld [vmem:[%s16206_s4 + $0x64] sm:$0xf] }
 0x2f3   :  { %v2991_v16 = vmul.f32 0.5, %v2987_v54  ;;  %v2995_v17 = vmul.f32 0.5, %v2988_v57  ;;  %3746 = vmatpush.bf16.msra.mxu2 %v8680_v6  ;;  %3759 = vmatpush.bf16.msra.mxu3 %v8684_v7  ;;  %v8615_v6 = vld [vmem:[%s16206_s4 + $0x68] sm:$0xf]  ;;  %v10515_v7 = vld [vmem:[%s16206_s4 + $0x74] sm:$0xf0]  ;;  %v8612_v14 = vor.u32 %v10512_v55, %v8609_v5 }
 0x2f4   :  { %v8591_v57 = vld [vmem:[%s16206_s4 + $0x40] sm:$0xf]  ;;  %v8561_v55 = vld [vmem:[%s16206_s4 + $0x10] sm:$0xf0] }
 0x2f5   :  { %10944 = vtanh.f32 %v2991_v16  ;;  %v2970_v31 = vpop.f32.mrf.mxu2  ;;  %v2983_v32 = vpop.f32.mrf.mxu3 }
 0x2f6   :  { %10946 = vtanh.f32 %v2995_v17  ;;  %v2971_v38 = vadd.f32 %v2970_v31, %v13634_v35  ;;  %v2984_v47 = vadd.f32 %v2983_v32, %v13636_v39  ;;  %v2946_v10 = vpop.f32.mrf.mxu0  ;;  %v2959_v45 = vpop.f32.mrf.mxu1  ;;  %3721 = vmatpush.bf16.msra.mxu0 %v8656_v11  ;;  %3734 = vmatpush.bf16.msra.mxu1 %v8660_v59  ;;  %v10516_v35 = vld [vmem:[%s16206_s4 + $0x84] sm:$0xf]  ;;  %v8625_v39 = vld [vmem:[%s16206_s4 + $0x90] sm:$0xf0]  ;;  %v8608_v59 = vor.u32 %v10514_v62, %v8607_v41 }
 0x2f7   :  { %3747 = vmatpush.bf16.msra.mxu2 %v8664_v40  ;;  %3760 = vmatpush.bf16.msra.mxu3 %v8668_v21  ;;  %v8628_v61 = vor.u32 %v10516_v35, %v8625_v39  ;;  %v8616_v17 = vor.u32 %v10515_v7, %v8615_v6  ;;  %v8620_v40 = vor.u32 %v10513_v22, %v8617_v50  ;;  %v8593_v21 = vld [vmem:[%s16206_s4 + $0x50] sm:$0xf0]  ;;  %v10506_v10 = vld [vmem:[%s16206_s4 + $0x2c] sm:$0xf0]  ;;  %v10504_v45 = vld [vmem:[%s16206_s4 + $0x24] sm:$0xf] }
 0x2f8   :  { %v2989_v12 = vadd.f32 %v2971_v38, %v11866_v23  ;;  %v2990_v53 = vadd.f32 %v2984_v47, %v11874_v28  ;;  %v8596_v38 = vor.u32 %v10508_v15, %v8593_v21  ;;  %v8575_v47 = vld [vmem:[%s16206_s4 + $0x20] sm:$0xf]  ;;  %v10507_v35 = vld [vmem:[%s16206_s4 + $0x34] sm:$0xf0]  ;;  %v10505_v39 = vld [vmem:[%s16206_s4 + $0x2c] sm:$0xf] }
 0x2f9   :  { %v8576_v51 = vor.u32 %v10506_v10, %v8575_v47  ;;  %v8588_v62 = vor.u32 %v10505_v39, %v8585_v44  ;;  %v10501_v6 = vld [vmem:[%s16206_s4 + $0xc] sm:$0xf]  ;;  %v8569_v7 = vld [vmem:[%s16206_s4 + $0x18] sm:$0xf0]  ;;  %v10595_v47 = vld [vmem:[%s16209_s6 + $0xf4] sm:$0xf0] }
 0x2fa   :  { %10948 = vtanh.f32 %v2989_v12  ;;  %v3000_v42 = vmul.f32 0.5, %v2990_v53  ;;  %3722 = vmatpush.bf16.msra.mxu0 %v8640_v33  ;;  %3735 = vmatpush.bf16.msra.mxu1 %v8644_v20  ;;  %v8592_v33 = vor.u32 %v10510_v24, %v8591_v57  ;;  %v3526_v12 = vld [vmem:[%s16207_s3] sm:$0xff]  ;;  %v8572_v57 = vor.u32 %v10501_v6, %v8569_v7  ;;  %v8789_v39 = vld [vmem:[%s16209_s6 + $0xd0] sm:$0xf0] }
 0x2fb   :  { %v10945_v58 = vpop.eup %10944  ;;  %3748 = vmatpush.bf16.msra.mxu2 %v8648_v60  ;;  %3761 = vmatpush.bf16.msra.mxu3 %v8652_v63  ;;  %v8577_v60 = vld [vmem:[%s16206_s4 + $0x30] sm:$0xf0]  ;;  %v8583_v63 = vld [vmem:[%s16206_s4 + $0x28] sm:$0xf]  ;;  %v8559_v53 = vld [vmem:[%s16206_s4] sm:$0xf]  ;;  %v3775_v5 = vunpack.c.h.b16 %v3526_v12 }
 0x2fc   :  { %v10947_v8 = vpop.eup %10946  ;;  %v2993_v46 = vmul.f32 0.5, %v10945_v58  ;;  %10950 = vtanh.f32 %v3000_v42  ;;  %v8580_v41 = vor.u32 %v10504_v45, %v8577_v60  ;;  %v10502_v42 = vld [vmem:[%s16206_s4 + $0xc] sm:$0xf0]  ;;  %v8567_v58 = vld [vmem:[%s16206_s4 + $0x8] sm:$0xf] }
 0x2fd   :  { %v2997_v9 = vmul.f32 0.5, %v10947_v8  ;;  %v2972_v49 = vpop.f32.mrf.mxu2  ;;  %v2985_v54 = vpop.f32.mrf.mxu3  ;;  %v3776_v8 = vunpack.c.l.b16 %v3527_v18  ;;  %v8560_v50 = vor.u32 %v10502_v42, %v8559_v53  ;;  %v8795_v53 = vld [vmem:[%s16209_s6 + $0xc8] sm:$0xf] }
 0x2fe   :  { %v2994_v11 = vadd.f32 0.5, %v2993_v46  ;;  %3723 = vmatpush.bf16.msra.mxu0 %v8624_v52  ;;  %3736 = vmatpush.bf16.msra.mxu1 %v8628_v61  ;;  %v10500_v52 = vld [vmem:[%s16206_s4 + $0x4] sm:$0xf]  ;;  %v8584_v61 = vor.u32 %v10507_v35, %v8583_v63  ;;  %v3777_v46 = vunpack.c.h.b16 %v3527_v18  ;;  %v10590_v63 = vld [vmem:[%s16209_s6 + $0xcc] sm:$0xf0] }
 0x2ff   :  { %v2998_v16 = vadd.f32 0.5, %v2997_v9  ;;  %3749 = vmatpush.bf16.msra.mxu2 %v8632_v1  ;;  %3762 = vmatpush.bf16.msra.mxu3 %v8636_v4  ;;  %v10503_v1 = vld [vmem:[%s16206_s4 + $0x14] sm:$0xf0]  ;;  %v3774_v4 = vunpack.c.l.b16 %v3526_v12  ;;  %v8564_v9 = vor.u32 %v10500_v52, %v8561_v55  ;;  %v3780_v24 = vpack.c.b16 %v3776_v8, %v3776_v8  ;;  %v10588_v35 = vld [vmem:[%s16209_s6 + $0xc4] sm:$0xf] }
 0x300   :  { %v10949_v26 = vpop.eup %10948  ;;  %v8568_v49 = vor.u32 %v10503_v1, %v8567_v58  ;;  %v3781_v15 = vpack.c.b16 %v3777_v46, %v3777_v46  ;;  %v8792_v12 = vor.u32 %v10588_v35, %v8789_v39  ;;  %v10591_v18 = vld [vmem:[%s16209_s6 + $0xd4] sm:$0xf0]  ;;  %v8771_v52 = vld [vmem:[%s16209_s6 + $0xa0] sm:$0xf]  ;;  %v8773_v58 = vld [vmem:[%s16209_s6 + $0xb0] sm:$0xf0] }
 0x301   :  { %v3004_v31 = vmul.f32 %v2998_v16, %v13174_v36  ;;  %v3005_v32 = vmul.f32 %v10949_v26, %v2994_v11  ;;  %v8600_v36 = vor.u32 %v10511_v27, %v8599_v25  ;;  %v3778_v11 = vpack.c.b16 %v3774_v4, %v3774_v4  ;;  %v8556_v26 = vld [vmem:[%s16210_s0 + $0x20] sm:$0xff]  ;;  %v8779_v1 = vld [vmem:[%s16209_s6 + $0xa8] sm:$0xf]  ;;  %v10587_v4 = vld [vmem:[%s16209_s6 + $0xb4] sm:$0xf0] }
 0x302   :  { %3724 = vmatpush.bf16.msra.mxu0 %v8608_v59  ;;  %3737 = vmatpush.bf16.msra.mxu1 %v8612_v14  ;;  %v10951_v20 = vpop.eup %10950  ;;  %v3779_v59 = vpack.c.b16 %v3775_v5, %v3775_v5  ;;  %v13856_v21 = vsel %vm337_vm0, %v3780_v24, 0  ;;  %v13859_v25 = vsel %vm337_vm0, %v3781_v15, 0  ;;  %v3525_v27 = vpack.c.bf16 %v8556_v26, %v8556_v26  ;;  %v10585_v46 = vld [vmem:[%s16209_s6 + $0xac] sm:$0xf]  ;;  %v8765_v26 = vld [vmem:[%s16209_s6 + $0x98] sm:$0xf0] }
 0x303   :  { %v13801_v37 = vadd.f32 %v3005_v32, %v3004_v31  ;;  %3750 = vmatpush.bf16.msra.mxu2 %v8616_v17  ;;  %3763 = vmatpush.bf16.msra.mxu3 %v8620_v40  ;;  %v3002_v48 = vmul.f32 0.5, %v10951_v20  ;;  %v13850_v17 = vsel %vm337_vm0, %v3778_v11, 0  ;;  %v10592_v31 = vld [vmem:[%s16209_s6 + $0xe4] sm:$0xf]  ;;  %v8804_v32 = vor.u32 %v10594_v30, %v8803_v29  ;;  %v10593_v20 = vld [vmem:[%s16209_s6 + $0xec] sm:$0xf] }
 0x304   :  { %v13853_v40 = vsel %vm337_vm0, %v3779_v59, 0  ;;  %v8780_v8 = vor.u32 %v10587_v4, %v8779_v1  ;;  %v8757_v11 = vld [vmem:[%s16209_s6 + $0x90] sm:$0xf0]  ;;  %v8763_v59 = vld [vmem:[%s16209_s6 + $0x88] sm:$0xf] }
 0x305   :  { %10952 = vtanh.f32 %v13801_v37  ;;  %v3003_v22 = vadd.f32 0.5, %v3002_v48  ;;  %v10589_v48 = vld [vmem:[%s16209_s6 + $0xcc] sm:$0xf]  ;;  %v8739_v29 = vld [vmem:[%s16209_s6 + $0x60] sm:$0xf] }
 0x306   :  { %3725 = vmatpush.bf16.msra.mxu0 %v8592_v33  ;;  %3738 = vmatpush.bf16.msra.mxu1 %v8596_v38  ;;  %v8805_v33 = vld [vmem:[%s16209_s6 + $0xf0] sm:$0xf0]  ;;  %v8811_v38 = vld [vmem:[%s16209_s6 + $0xe8] sm:$0xf]  ;;  %v10578_v30 = vld [vmem:[%s16209_s6 + $0x6c] sm:$0xf0] }
 0x307   :  { %3751 = vmatpush.bf16.msra.mxu2 %v8600_v36  ;;  %3764 = vmatpush.bf16.msra.mxu3 %v8604_v43  ;;  %v8808_v10 = vor.u32 %v10592_v31, %v8805_v33  ;;  %v8812_v45 = vor.u32 %v10595_v47, %v8811_v38  ;;  %v8813_v36 = vld [vmem:[%s16209_s6 + $0xf8] sm:$0xf0]  ;;  %v8787_v43 = vld [vmem:[%s16209_s6 + $0xc0] sm:$0xf]  ;;  %v10576_v31 = vld [vmem:[%s16209_s6 + $0x64] sm:$0xf]  ;;  %v8740_v38 = vor.u32 %v10578_v30, %v8739_v29 }
 0x308   :  { %v8816_v60 = vor.u32 %v10593_v20, %v8813_v36  ;;  %v8788_v44 = vor.u32 %v10590_v63, %v8787_v43  ;;  %v8741_v47 = vld [vmem:[%s16209_s6 + $0x70] sm:$0xf0]  ;;  %v10577_v63 = vld [vmem:[%s16209_s6 + $0x6c] sm:$0xf]  ;;  %v8749_v35 = vld [vmem:[%s16209_s6 + $0x78] sm:$0xf0] }
 0x309   :  { %v8744_v43 = vor.u32 %v10576_v31, %v8741_v47  ;;  %v8752_v39 = vor.u32 %v10577_v63, %v8749_v35  ;;  %v10570_v1 = vld [vmem:[%s16209_s6 + $0x2c] sm:$0xf0]  ;;  %v10568_v4 = vld [vmem:[%s16209_s6 + $0x24] sm:$0xf]  ;;  %v10567_v29 = vld [vmem:[%s16209_s6 + $0x14] sm:$0xf0] }
 0x30a   :  { %3726 = vmatpush.bf16.msra.mxu0 %v8576_v51  ;;  %3739 = vmatpush.bf16.msra.mxu1 %v8580_v41  ;;  %v8796_v51 = vor.u32 %v10591_v18, %v8795_v53  ;;  %v8797_v41 = vld [vmem:[%s16209_s6 + $0xd8] sm:$0xf0]  ;;  %v10572_v53 = vld [vmem:[%s16209_s6 + $0x44] sm:$0xf]  ;;  %v8939_v35 = vld [vmem:[%s16211_s5 + $0xe8] sm:$0xf] }
 0x30b   :  { %v10953_v54 = vpop.eup %10952  ;;  %3752 = vmatpush.bf16.msra.mxu2 %v8584_v61  ;;  %3765 = vmatpush.bf16.msra.mxu3 %v8588_v62  ;;  %v8800_v42 = vor.u32 %v10589_v48, %v8797_v41  ;;  %v10586_v61 = vld [vmem:[%s16209_s6 + $0xac] sm:$0xf0]  ;;  %v10584_v62 = vld [vmem:[%s16209_s6 + $0xa4] sm:$0xf]  ;;  %v8725_v48 = vld [vmem:[%s16209_s6 + $0x50] sm:$0xf0] }
 0x30c   :  { %v3008_v14 = vmul.f32 %v10953_v54, %v3003_v22  ;;  %v8772_v55 = vor.u32 %v10586_v61, %v8771_v52  ;;  %v8776_v7 = vor.u32 %v10584_v62, %v8773_v58  ;;  %v8781_v22 = vld [vmem:[%s16209_s6 + $0xb8] sm:$0xf0]  ;;  %v10580_v54 = vld [vmem:[%s16209_s6 + $0x84] sm:$0xf]  ;;  %v10575_v41 = vld [vmem:[%s16209_s6 + $0x54] sm:$0xf0] }
 0x30d   :  { %v8760_v24 = vor.u32 %v10580_v54, %v8757_v11  ;;  %v10573_v61 = vld [vmem:[%s16209_s6 + $0x4c] sm:$0xf]  ;;  %v8733_v62 = vld [vmem:[%s16209_s6 + $0x58] sm:$0xf0]  ;;  %v8707_v58 = vld [vmem:[%s16209_s6 + $0x20] sm:$0xf] }
 0x30e   :  { %v3009_v16 = vpack.c.bf16 %v3008_v14, %v3008_v14  ;;  %3727 = vmatpush.bf16.msra.mxu0 %v8560_v50  ;;  %3740 = vmatpush.bf16.msra.mxu1 %v8564_v9  ;;  %v8784_v50 = vor.u32 %v10585_v46, %v8781_v22  ;;  %v8755_v9 = vld [vmem:[%s16209_s6 + $0x80] sm:$0xf]  ;;  %v10583_v14 = vld [vmem:[%s16209_s6 + $0x94] sm:$0xf0]  ;;  %v8708_v46 = vor.u32 %v10570_v1, %v8707_v58  ;;  %v8709_v22 = vld [vmem:[%s16209_s6 + $0x30] sm:$0xf0] }
 0x30f   :  { %3753 = vmatpush.bf16.msra.mxu2 %v8568_v49  ;;  %3766 = vmatpush.bf16.msra.mxu3 %v8572_v57  ;;  %v10582_v49 = vld [vmem:[%s16209_s6 + $0x8c] sm:$0xf0]  ;;  %v8764_v15 = vor.u32 %v10583_v14, %v8763_v59  ;;  %v8717_v11 = vld [vmem:[%s16209_s6 + $0x38] sm:$0xf0]  ;;  %v8691_v14 = vld [vmem:[%s16209_s6] sm:$0xf] }
 0x310   :  { %3455 = vmatmul.bf16.vlgmr.msrb.gmra.mxu0 %v3009_v16  ;;  %3468 = vmatmul.bf16.vlgmr.msrb.gmra.mxu1 %v3009_v16  ;;  %v8756_v57 = vor.u32 %v10582_v49, %v8755_v9  ;;  %v10571_v9 = vld [vmem:[%s16209_s6 + $0x34] sm:$0xf0]  ;;  %v8712_v49 = vor.u32 %v10568_v4, %v8709_v22  ;;  %v8701_v47 = vld [vmem:[%s16209_s6 + $0x18] sm:$0xf0]  ;;  %v10557_v58 = vld [vmem:[%s16211_s5 + $0xcc] sm:$0xf] }
 0x311   :  { %3481 = vmatmul.bf16.vlgmr.msrb.gmra.mxu2 %v3009_v16  ;;  %3494 = vmatmul.bf16.vlgmr.msrb.gmra.mxu3 %v3009_v16  ;;  %v8925_v1 = vld [vmem:[%s16211_s5 + $0xd8] sm:$0xf0]  ;;  %v10552_v22 = vld [vmem:[%s16211_s5 + $0xa4] sm:$0xf] }
 0x312   :  { %3804 = vmatpush.bf16.msrb.mxu0 %v13850_v17  ;;  %3817 = vmatpush.bf16.msrb.mxu1 %v13853_v40 }
 0x313   :  { %3830 = vmatpush.bf16.msrb.mxu2 %v13856_v21  ;;  %3843 = vmatpush.bf16.msrb.mxu3 %v13859_v25 }
 0x320   :  { %3728 = vmatmul.bf16.vlgmr.msra.gmra.mxu0 %v3009_v16  ;;  %3741 = vmatmul.bf16.vlgmr.msra.gmra.mxu1 %v3009_v16 }
 0x321   :  { %3754 = vmatmul.bf16.vlgmr.msra.gmra.mxu2 %v3009_v16  ;;  %3767 = vmatmul.bf16.vlgmr.msra.gmra.mxu3 %v3009_v16  ;;  %v10581_v16 = vld [vmem:[%s16209_s6 + $0x8c] sm:$0xf] }
 0x322   :  { %4097 = vmatpush.bf16.msra.mxu0 %v8804_v32  ;;  %4110 = vmatpush.bf16.msra.mxu1 %v8808_v10  ;;  %v8747_v10 = vld [vmem:[%s16209_s6 + $0x68] sm:$0xf] }
 0x323   :  { %4123 = vmatpush.bf16.msra.mxu2 %v8812_v45  ;;  %4136 = vmatpush.bf16.msra.mxu3 %v8816_v60  ;;  %v10579_v45 = vld [vmem:[%s16209_s6 + $0x74] sm:$0xf0] }
 0x324   :  { %v8748_v60 = vor.u32 %v10579_v45, %v8747_v10  ;;  %v8931_v10 = vld [vmem:[%s16211_s5 + $0xe0] sm:$0xf] }
 0x326   :  { %4098 = vmatpush.bf16.msra.mxu0 %v8788_v44  ;;  %4111 = vmatpush.bf16.msra.mxu1 %v8792_v12  ;;  %v8723_v44 = vld [vmem:[%s16209_s6 + $0x40] sm:$0xf]  ;;  %v10574_v12 = vld [vmem:[%s16209_s6 + $0x4c] sm:$0xf0] }
 0x327   :  { %4124 = vmatpush.bf16.msra.mxu2 %v8796_v51  ;;  %4137 = vmatpush.bf16.msra.mxu3 %v8800_v42  ;;  %v8724_v18 = vor.u32 %v10574_v12, %v8723_v44  ;;  %v8731_v51 = vld [vmem:[%s16209_s6 + $0x48] sm:$0xf]  ;;  %v8728_v42 = vor.u32 %v10572_v53, %v8725_v48  ;;  %v10561_v44 = vld [vmem:[%s16211_s5 + $0xec] sm:$0xf]  ;;  %v8941_v53 = vld [vmem:[%s16211_s5 + $0xf8] sm:$0xf0] }
 0x328   :  { %v8732_v52 = vor.u32 %v10575_v41, %v8731_v51  ;;  %v10558_v48 = vld [vmem:[%s16211_s5 + $0xcc] sm:$0xf0]  ;;  %v8944_v51 = vor.u32 %v10561_v44, %v8941_v53  ;;  %v10544_v44 = vld [vmem:[%s16211_s5 + $0x64] sm:$0xf] }
 0x32a   :  { %4099 = vmatpush.bf16.msra.mxu0 %v8772_v55  ;;  %4112 = vmatpush.bf16.msra.mxu1 %v8776_v7  ;;  %v8736_v55 = vor.u32 %v10573_v61, %v8733_v62  ;;  %v8923_v61 = vld [vmem:[%s16211_s5 + $0xc8] sm:$0xf] }
 0x32b   :  { %4125 = vmatpush.bf16.msra.mxu2 %v8780_v8  ;;  %4138 = vmatpush.bf16.msra.mxu3 %v8784_v50  ;;  %v8715_v50 = vld [vmem:[%s16209_s6 + $0x28] sm:$0xf] }
 0x32c   :  { %v8716_v54 = vor.u32 %v10571_v9, %v8715_v50  ;;  %v8901_v9 = vld [vmem:[%s16211_s5 + $0xb0] sm:$0xf0] }
 0x32e   :  { %4100 = vmatpush.bf16.msra.mxu0 %v8756_v57  ;;  %4113 = vmatpush.bf16.msra.mxu1 %v8760_v24  ;;  %v10569_v57 = vld [vmem:[%s16209_s6 + $0x2c] sm:$0xf]  ;;  %v10566_v24 = vld [vmem:[%s16209_s6 + $0xc] sm:$0xf0] }
 0x32f   :  { %4126 = vmatpush.bf16.msra.mxu2 %v8764_v15  ;;  %v8720_v59 = vor.u32 %v10569_v57, %v8717_v11  ;;  %v10564_v15 = vld [vmem:[%s16209_s6 + $0x4] sm:$0xf]  ;;  %v8904_v57 = vor.u32 %v10552_v22, %v8901_v9  ;;  %v8851_v22 = vld [vmem:[%s16211_s5 + $0x40] sm:$0xf] }
 0x330   :  { %8685 = vmatmul.msk.bf16.vlgmr.msrb.gmra.mxu0 %vm333_vm1, %v3525_v27  ;;  %8686 = vmatmul.msk.bf16.vlgmr.msrb.gmra.mxu1 %vm333_vm1, %v3525_v27  ;;  %v10540_v9 = vld [vmem:[%s16211_s5 + $0x44] sm:$0xf] }
 0x331   :  { %8687 = vmatmul.msk.bf16.vlgmr.msrb.gmra.mxu2 %vm333_vm1, %v3525_v27  ;;  %8688 = vmatmul.msk.bf16.vlgmr.msrb.gmra.mxu3 %vm333_vm1, %v3525_v27  ;;  %v8768_v27 = vor.u32 %v10581_v16, %v8765_v26  ;;  %v8692_v16 = vor.u32 %v10566_v24, %v8691_v14  ;;  %v8693_v26 = vld [vmem:[%s16209_s6 + $0x10] sm:$0xf0]  ;;  %v8909_v14 = vld [vmem:[%s16211_s5 + $0xb8] sm:$0xf0] }
 0x332   :  { %4101 = vmatpush.bf16.msra.mxu0 %v8740_v38  ;;  %4114 = vmatpush.bf16.msra.mxu1 %v8744_v43  ;;  %v8696_v30 = vor.u32 %v10564_v15, %v8693_v26  ;;  %v10565_v38 = vld [vmem:[%s16209_s6 + $0xc] sm:$0xf]  ;;  %v8933_v43 = vld [vmem:[%s16211_s5 + $0xf0] sm:$0xf0]  ;;  %v8883_v26 = vld [vmem:[%s16211_s5 + $0x80] sm:$0xf] }
 0x333   :  { %4139 = vmatpush.bf16.msra.mxu3 %v8768_v27  ;;  %4127 = vmatpush.bf16.msra.mxu2 %v8748_v60  ;;  %v8699_v27 = vld [vmem:[%s16209_s6 + $0x8] sm:$0xf]  ;;  %v8704_v45 = vor.u32 %v10565_v38, %v8701_v47  ;;  %v8885_v47 = vld [vmem:[%s16211_s5 + $0x90] sm:$0xf0] }
 0x334   :  { %v8700_v31 = vor.u32 %v10567_v29, %v8699_v27  ;;  %v10550_v27 = vld [vmem:[%s16211_s5 + $0x8c] sm:$0xf0]  ;;  %v10548_v29 = vld [vmem:[%s16211_s5 + $0x84] sm:$0xf] }
 0x335   :  { %v8884_v38 = vor.u32 %v10550_v27, %v8883_v26  ;;  %v8835_v27 = vld [vmem:[%s16211_s5 + $0x20] sm:$0xf] }
 0x336   :  { %4102 = vmatpush.bf16.msra.mxu0 %v8724_v18  ;;  %4115 = vmatpush.bf16.msra.mxu1 %v8728_v42  ;;  %v8915_v18 = vld [vmem:[%s16211_s5 + $0xc0] sm:$0xf]  ;;  %v10556_v42 = vld [vmem:[%s16211_s5 + $0xc4] sm:$0xf] }
 0x337   :  { %4140 = vmatpush.bf16.msra.mxu3 %v8752_v39  ;;  %4128 = vmatpush.bf16.msra.mxu2 %v8732_v52  ;;  %v10563_v39 = vld [vmem:[%s16211_s5 + $0xf4] sm:$0xf0]  ;;  %v8916_v41 = vor.u32 %v10558_v48, %v8915_v18  ;;  %v8917_v52 = vld [vmem:[%s16211_s5 + $0xd0] sm:$0xf0] }
 0x338   :  { %v8940_v12 = vor.u32 %v10563_v39, %v8939_v35  ;;  %v8920_v62 = vor.u32 %v10556_v42, %v8917_v52  ;;  %v8867_v35 = vld [vmem:[%s16211_s5 + $0x60] sm:$0xf]  ;;  %v10546_v39 = vld [vmem:[%s16211_s5 + $0x6c] sm:$0xf0]  ;;  %v8869_v48 = vld [vmem:[%s16211_s5 + $0x70] sm:$0xf0] }
 0x339   :  { %v8868_v18 = vor.u32 %v10546_v39, %v8867_v35  ;;  %v10547_v42 = vld [vmem:[%s16211_s5 + $0x74] sm:$0xf0]  ;;  %v10545_v52 = vld [vmem:[%s16211_s5 + $0x6c] sm:$0xf]  ;;  %v8845_v39 = vld [vmem:[%s16211_s5 + $0x38] sm:$0xf0] }
 0x33a   :  { %4103 = vmatpush.bf16.msra.mxu0 %v8708_v46  ;;  %4116 = vmatpush.bf16.msra.mxu1 %v8712_v49  ;;  %v10554_v46 = vld [vmem:[%s16211_s5 + $0xac] sm:$0xf0]  ;;  %v8907_v49 = vld [vmem:[%s16211_s5 + $0xa8] sm:$0xf] }
 0x33b   :  { %4141 = vmatpush.bf16.msra.mxu3 %v8736_v55  ;;  %4129 = vmatpush.bf16.msra.mxu2 %v8716_v54  ;;  %v10559_v55 = vld [vmem:[%s16211_s5 + $0xd4] sm:$0xf0] }
 0x33c   :  { %v8924_v4 = vor.u32 %v10559_v55, %v8923_v61  ;;  %v10555_v54 = vld [vmem:[%s16211_s5 + $0xb4] sm:$0xf0]  ;;  %v8877_v61 = vld [vmem:[%s16211_s5 + $0x78] sm:$0xf0] }
 0x33d   :  { %v8908_v11 = vor.u32 %v10555_v54, %v8907_v49  ;;  %v8859_v49 = vld [vmem:[%s16211_s5 + $0x48] sm:$0xf]  ;;  %v10543_v54 = vld [vmem:[%s16211_s5 + $0x54] sm:$0xf0] }
 0x33e   :  { %4104 = vmatpush.bf16.msra.mxu0 %v8692_v16  ;;  %4117 = vmatpush.bf16.msra.mxu1 %v8696_v30 }
 0x33f   :  { %4142 = vmatpush.bf16.msra.mxu3 %v8720_v59  ;;  %4130 = vmatpush.bf16.msra.mxu2 %v8700_v31  ;;  %v10553_v59 = vld [vmem:[%s16211_s5 + $0xac] sm:$0xf] }
 0x340   :  { %v8912_v24 = vor.u32 %v10553_v59, %v8909_v14  ;;  %v8860_v14 = vor.u32 %v10543_v54, %v8859_v49 }
 0x343   :  { %4143 = vmatpush.bf16.msra.mxu3 %v8704_v45  ;;  %4335 = vmatpush.bf16.msrb.mxu2 %v8940_v12  ;;  %v10551_v45 = vld [vmem:[%s16211_s5 + $0x94] sm:$0xf0] }
 0x347   :  { %4348 = vmatpush.bf16.msrb.mxu3 %v8944_v51  ;;  %4336 = vmatpush.bf16.msrb.mxu2 %v8924_v4  ;;  %v8875_v51 = vld [vmem:[%s16211_s5 + $0x68] sm:$0xf] }
 0x34b   :  { %4337 = vmatpush.bf16.msrb.mxu2 %v8908_v11 }
 0x36d   :  { %v13938_v5 = vpop.f32.mrf.mxu0  ;;  %v13940_v6 = vpop.f32.mrf.mxu1 }
 0x374   :  { %v13981_v32 = vpop.f32.mrf.mxu2  ;;  %v13983_v33 = vpop.f32.mrf.mxu3 }
 0x375   :  { %v3246_v20 = vpop.f32.mrf.mxu0  ;;  %v3259_v36 = vpop.f32.mrf.mxu1 }
 0x376   :  { %v10562_v20 = vld [vmem:[%s16211_s5 + $0xec] sm:$0xf0]  ;;  %v10560_v36 = vld [vmem:[%s16211_s5 + $0xe4] sm:$0xf] }
 0x377   :  { %v8932_v60 = vor.u32 %v10562_v20, %v8931_v10  ;;  %v8936_v63 = vor.u32 %v10560_v36, %v8933_v43  ;;  %v8891_v10 = vld [vmem:[%s16211_s5 + $0x88] sm:$0xf]  ;;  %v8888_v20 = vor.u32 %v10548_v29, %v8885_v47  ;;  %v10538_v29 = vld [vmem:[%s16211_s5 + $0x2c] sm:$0xf0]  ;;  %v8837_v47 = vld [vmem:[%s16211_s5 + $0x30] sm:$0xf0] }
 0x378   :  { %v8892_v36 = vor.u32 %v10551_v45, %v8891_v10  ;;  %v8843_v10 = vld [vmem:[%s16211_s5 + $0x28] sm:$0xf] }
 0x379   :  { %4309 = vmatpush.bf16.msrb.mxu0 %v8932_v60  ;;  %4322 = vmatpush.bf16.msrb.mxu1 %v8936_v63 }
 0x37a   :  { %4338 = vmatpush.bf16.msrb.mxu2 %v8892_v36 }
 0x37c   :  { %v3272_v7 = vpop.f32.mrf.mxu2  ;;  %v3285_v8 = vpop.f32.mrf.mxu3 }
 0x37d   :  { %v8928_v7 = vor.u32 %v10557_v58, %v8925_v1  ;;  %v8899_v8 = vld [vmem:[%s16211_s5 + $0xa0] sm:$0xf]  ;;  %4310 = vmatpush.bf16.msrb.mxu0 %v8916_v41  ;;  %4323 = vmatpush.bf16.msrb.mxu1 %v8920_v62  ;;  %v8872_v41 = vor.u32 %v10544_v44, %v8869_v48  ;;  %v8876_v58 = vor.u32 %v10547_v42, %v8875_v51  ;;  %v10534_v51 = vld [vmem:[%s16211_s5 + $0xc] sm:$0xf0] }
 0x37e   :  { %v8900_v50 = vor.u32 %v10554_v46, %v8899_v8  ;;  %v8880_v1 = vor.u32 %v10545_v52, %v8877_v61  ;;  %v8819_v48 = vld [vmem:[%s16211_s5] sm:$0xf]  ;;  %v10532_v52 = vld [vmem:[%s16211_s5 + $0x4] sm:$0xf]  ;;  %v8821_v61 = vld [vmem:[%s16211_s5 + $0x10] sm:$0xf0] }
 0x37f   :  { %4349 = vmatpush.bf16.msrb.mxu3 %v8928_v7  ;;  %4339 = vmatpush.bf16.msrb.mxu2 %v8876_v58  ;;  %v8820_v42 = vor.u32 %v10534_v51, %v8819_v48  ;;  %v8827_v58 = vld [vmem:[%s16211_s5 + $0x8] sm:$0xf]  ;;  %v9055_v51 = vld [vmem:[%s16206_s4 + $0xd8] sm:$0xf0] }
 0x380   :  { %v9053_v48 = vld [vmem:[%s16206_s4 + $0xc8] sm:$0xf] }
 0x381   :  { %4311 = vmatpush.bf16.msrb.mxu0 %v8900_v50  ;;  %4324 = vmatpush.bf16.msrb.mxu1 %v8904_v57  ;;  %v10542_v50 = vld [vmem:[%s16211_s5 + $0x4c] sm:$0xf0] }
 0x383   :  { %4350 = vmatpush.bf16.msrb.mxu3 %v8912_v24  ;;  %v10541_v24 = vld [vmem:[%s16211_s5 + $0x4c] sm:$0xf]  ;;  %4340 = vmatpush.bf16.msrb.mxu2 %v8860_v14  ;;  %v10626_v14 = vld [vmem:[%s16206_s4 + $0xec] sm:$0xf0] }
 0x385   :  { %4312 = vmatpush.bf16.msrb.mxu0 %v8884_v38  ;;  %4325 = vmatpush.bf16.msrb.mxu1 %v8888_v20  ;;  %v10536_v38 = vld [vmem:[%s16211_s5 + $0x24] sm:$0xf] }
 0x386   :  { %v8840_v36 = vor.u32 %v10536_v38, %v8837_v47 }
 0x389   :  { %4313 = vmatpush.bf16.msrb.mxu0 %v8868_v18  ;;  %4326 = vmatpush.bf16.msrb.mxu1 %v8872_v41 }
 0x38d   :  { %v3456_v15 = vpop.f32.mrf.mxu0  ;;  %v3469_v16 = vpop.f32.mrf.mxu1 }
 0x38e   :  { %v3457_v30 = vadd.f32 %v3456_v15, %v13938_v5  ;;  %v3470_v31 = vadd.f32 %v3469_v16, %v13940_v6  ;;  %v10549_v5 = vld [vmem:[%s16211_s5 + $0x8c] sm:$0xf]  ;;  %v8893_v6 = vld [vmem:[%s16211_s5 + $0x98] sm:$0xf0] }
 0x38f   :  { %v8896_v63 = vor.u32 %v10549_v5, %v8893_v6  ;;  %v8861_v15 = vld [vmem:[%s16211_s5 + $0x58] sm:$0xf0]  ;;  %v10539_v5 = vld [vmem:[%s16211_s5 + $0x34] sm:$0xf0]  ;;  %v10537_v6 = vld [vmem:[%s16211_s5 + $0x2c] sm:$0xf] }
 0x390   :  { %v3499_v43 = vadd.f32 %v3457_v30, %v12226_v2  ;;  %v3500_v60 = vadd.f32 %v3470_v31, %v12228_v3  ;;  %v8864_v16 = vor.u32 %v10541_v24, %v8861_v15  ;;  %v8836_v31 = vor.u32 %v10538_v29, %v8835_v27  ;;  %v10624_v15 = vld [vmem:[%s16206_s4 + $0xe4] sm:$0xf]  ;;  %v10627_v29 = vld [vmem:[%s16206_s4 + $0xf4] sm:$0xf0] }
 0x391   :  { %4351 = vmatpush.bf16.msrb.mxu3 %v8896_v63  ;;  %v8844_v35 = vor.u32 %v10539_v5, %v8843_v10  ;;  %v8848_v18 = vor.u32 %v10537_v6, %v8845_v39  ;;  %v9045_v6 = vld [vmem:[%s16206_s4 + $0xc0] sm:$0xf] }
 0x392   :  { %v3503_v12 = vmul.f32 0.5, %v3499_v43  ;;  %v3507_v53 = vmul.f32 0.5, %v3500_v60 }
 0x393   :  { %4341 = vmatpush.bf16.msrb.mxu2 %v8844_v35 }
 0x394   :  { %10954 = vtanh.f32 %v3503_v12  ;;  %v3482_v62 = vpop.f32.mrf.mxu2  ;;  %v3495_v55 = vpop.f32.mrf.mxu3 }
 0x395   :  { %10956 = vtanh.f32 %v3507_v53  ;;  %v3483_v4 = vadd.f32 %v3482_v62, %v13981_v32  ;;  %v3496_v7 = vadd.f32 %v3495_v55, %v13983_v33  ;;  %v3458_v8 = vpop.f32.mrf.mxu0  ;;  %v3471_v46 = vpop.f32.mrf.mxu1  ;;  %v8852_v32 = vor.u32 %v10542_v50, %v8851_v22  ;;  %v8853_v33 = vld [vmem:[%s16211_s5 + $0x50] sm:$0xf0]  ;;  %4352 = vmatpush.bf16.msrb.mxu3 %v8880_v1  ;;  %v10535_v1 = vld [vmem:[%s16211_s5 + $0x14] sm:$0xf0]  ;;  %v8829_v22 = vld [vmem:[%s16211_s5 + $0x18] sm:$0xf0] }
 0x396   :  { %v8856_v59 = vor.u32 %v10540_v9, %v8853_v33  ;;  %v8824_v55 = vor.u32 %v10532_v52, %v8821_v61  ;;  %v8828_v46 = vor.u32 %v10535_v1, %v8827_v58  ;;  %v10616_v58 = vld [vmem:[%s16206_s4 + $0xa4] sm:$0xf] }
 0x397   :  { %v3501_v57 = vadd.f32 %v3483_v4, %v12250_v13  ;;  %v3502_v11 = vadd.f32 %v3496_v7, %v12260_v19  ;;  %4314 = vmatpush.bf16.msrb.mxu0 %v8852_v32  ;;  %v10533_v4 = vld [vmem:[%s16211_s5 + $0xc] sm:$0xf] }
 0x398   :  { %4327 = vmatpush.bf16.msrb.mxu1 %v8856_v59  ;;  %v8832_v50 = vor.u32 %v10533_v4, %v8829_v22  ;;  %4342 = vmatpush.bf16.msrb.mxu2 %v8828_v46  ;;  %v9061_v59 = vld [vmem:[%s16206_s4 + $0xe0] sm:$0xf]  ;;  %v9031_v46 = vld [vmem:[%s16206_s4 + $0xb0] sm:$0xf0]  ;;  %v9037_v22 = vld [vmem:[%s16206_s4 + $0xa8] sm:$0xf] }
 0x399   :  { %10958 = vtanh.f32 %v3501_v57  ;;  %v3512_v26 = vmul.f32 0.5, %v3502_v11  ;;  %4353 = vmatpush.bf16.msrb.mxu3 %v8864_v16  ;;  %v9063_v16 = vld [vmem:[%s16206_s4 + $0xf0] sm:$0xf0] }
 0x39a   :  { %v10955_v30 = vpop.eup %10954  ;;  %v9066_v5 = vor.u32 %v10624_v15, %v9063_v16  ;;  %v9034_v16 = vor.u32 %v10616_v58, %v9031_v46 }
 0x39b   :  { %v10957_v45 = vpop.eup %10956  ;;  %v3505_v20 = vmul.f32 0.5, %v10955_v30  ;;  %10960 = vtanh.f32 %v3512_v26  ;;  %4315 = vmatpush.bf16.msrb.mxu0 %v8836_v31  ;;  %v9069_v26 = vld [vmem:[%s16206_s4 + $0xe8] sm:$0xf]  ;;  %v10625_v30 = vld [vmem:[%s16206_s4 + $0xec] sm:$0xf] }
 0x39c   :  { %v3509_v43 = vmul.f32 0.5, %v10957_v45  ;;  %v3484_v60 = vpop.f32.mrf.mxu2  ;;  %v3497_v63 = vpop.f32.mrf.mxu3  ;;  %4328 = vmatpush.bf16.msrb.mxu1 %v8840_v36  ;;  %v9071_v31 = vld [vmem:[%s16206_s4 + $0xf8] sm:$0xf0]  ;;  %v9062_v36 = vor.u32 %v10626_v14, %v9061_v59  ;;  %v9070_v35 = vor.u32 %v10627_v29, %v9069_v26  ;;  %v9013_v26 = vld [vmem:[%s16206_s4 + $0x80] sm:$0xf] }
 0x39d   :  { %v3506_v44 = vadd.f32 0.5, %v3505_v20  ;;  %v3729_v12 = vpop.f32.mrf.mxu0  ;;  %v3742_v53 = vpop.f32.mrf.mxu1  ;;  %4354 = vmatpush.bf16.msrb.mxu3 %v8848_v18  ;;  %v9074_v39 = vor.u32 %v10625_v30, %v9071_v31  ;;  %v9047_v18 = vld [vmem:[%s16206_s4 + $0xd0] sm:$0xf0]  ;;  %v9021_v31 = vld [vmem:[%s16206_s4 + $0x88] sm:$0xf] }
 0x39e   :  { %v3510_v41 = vadd.f32 0.5, %v3509_v43  ;;  %v10622_v43 = vld [vmem:[%s16206_s4 + $0xcc] sm:$0xf0] }
 0x39f   :  { %v10959_v62 = vpop.eup %10958  ;;  %4316 = vmatpush.bf16.msrb.mxu0 %v8820_v42  ;;  %v9046_v52 = vor.u32 %v10622_v43, %v9045_v6 }
 0x3a0   :  { %v3516_v7 = vmul.f32 %v3510_v41, %v13631_v34  ;;  %v3517_v8 = vmul.f32 %v10959_v62, %v3506_v44  ;;  %4329 = vmatpush.bf16.msrb.mxu1 %v8824_v55  ;;  %v10620_v44 = vld [vmem:[%s16206_s4 + $0xc4] sm:$0xf]  ;;  %v9029_v62 = vld [vmem:[%s16206_s4 + $0xa0] sm:$0xf]  ;;  %v10618_v55 = vld [vmem:[%s16206_s4 + $0xac] sm:$0xf0] }
 0x3a1   :  { %v10961_v9 = vpop.eup %10960  ;;  %4355 = vmatpush.bf16.msrb.mxu3 %v8832_v50  ;;  %v9050_v61 = vor.u32 %v10620_v44, %v9047_v18  ;;  %v10619_v50 = vld [vmem:[%s16206_s4 + $0xb4] sm:$0xf0]  ;;  %v8999_v18 = vld [vmem:[%s16206_s4 + $0x70] sm:$0xf0] }
 0x3a2   :  { %v14273_v32 = vadd.f32 %v3517_v8, %v3516_v7  ;;  %v3514_v34 = vmul.f32 0.5, %v10961_v9  ;;  %v10617_v9 = vld [vmem:[%s16206_s4 + $0xac] sm:$0xf]  ;;  %v9038_v29 = vor.u32 %v10619_v50, %v9037_v22 }
 0x3a4   :  { %10962 = vtanh.f32 %v14273_v32  ;;  %v14276_v33 = vpop.f32.mrf.mxu2  ;;  %v14278_v49 = vpop.f32.mrf.mxu3  ;;  %v3515_v11 = vadd.f32 0.5, %v3514_v34  ;;  %v9039_v34 = vld [vmem:[%s16206_s4 + $0xb8] sm:$0xf0] }
 0x3a5   :  { %v3731_v54 = vpop.f32.mrf.mxu0  ;;  %v3744_v57 = vpop.f32.mrf.mxu1  ;;  %v9042_v30 = vor.u32 %v10617_v9, %v9039_v34  ;;  %v8983_v9 = vld [vmem:[%s16206_s4 + $0x50] sm:$0xf0]  ;;  %v8989_v34 = vld [vmem:[%s16206_s4 + $0x48] sm:$0xf] }
 0x3aa   :  { %v10963_v24 = vpop.eup %10962 }
 0x3ab   :  { %v3520_v27 = vmul.f32 %v10963_v24, %v3515_v11  ;;  %v9030_v11 = vor.u32 %v10618_v55, %v9029_v62  ;;  %v8981_v55 = vld [vmem:[%s16206_s4 + $0x40] sm:$0xf] }
 0x3ac   :  { %v3757_v38 = vpop.f32.mrf.mxu2  ;;  %v3770_v47 = vpop.f32.mrf.mxu3 }
 0x3ad   :  { %8555 = vst [vmem:[%s16215_s9 + $0x18] sm:$0xff] %v3520_v27  ;;  %v3904_v10 = vpack.c.bf16 %v3520_v27, %v3520_v27  ;;  %v3806_v45 = vpop.f32.mrf.mxu0  ;;  %v3819_v20 = vpop.f32.mrf.mxu1  ;;  %v10614_v27 = vld [vmem:[%s16206_s4 + $0x8c] sm:$0xf0] }
 0x3ae   :  { %v3807_v60 = vadd.f32 %v3806_v45, %v3729_v12  ;;  %v3820_v63 = vadd.f32 %v3819_v20, %v3742_v53  ;;  %v10623_v12 = vld [vmem:[%s16206_s4 + $0xd4] sm:$0xf0]  ;;  %v10621_v53 = vld [vmem:[%s16206_s4 + $0xcc] sm:$0xf]  ;;  %v9023_v20 = vld [vmem:[%s16206_s4 + $0x98] sm:$0xf0]  ;;  %v9014_v6 = vor.u32 %v10614_v27, %v9013_v26 }
 0x3af   :  { %4105 = vmatmul.bf16.vlgmr.msra.gmra.mxu0 %v3904_v10  ;;  %4118 = vmatmul.bf16.vlgmr.msra.gmra.mxu1 %v3904_v10  ;;  %v9054_v7 = vor.u32 %v10623_v12, %v9053_v48  ;;  %v9058_v8 = vor.u32 %v10621_v53, %v9055_v51  ;;  %v10613_v45 = vld [vmem:[%s16206_s4 + $0x8c] sm:$0xf]  ;;  %v9005_v48 = vld [vmem:[%s16206_s4 + $0x68] sm:$0xf]  ;;  %v10611_v12 = vld [vmem:[%s16206_s4 + $0x74] sm:$0xf0] }
 0x3b0   :  { %v3849_v41 = vadd.f32 %v3807_v60, %v11816_v56  ;;  %v3850_v42 = vadd.f32 %v3820_v63, %v11824_v0  ;;  %4131 = vmatmul.bf16.vlgmr.msra.gmra.mxu2 %v3904_v10  ;;  %4144 = vmatmul.bf16.vlgmr.msra.gmra.mxu3 %v3904_v10  ;;  %v10615_v10 = vld [vmem:[%s16206_s4 + $0x94] sm:$0xf0]  ;;  %v10610_v60 = vld [vmem:[%s16206_s4 + $0x6c] sm:$0xf0]  ;;  %v10608_v63 = vld [vmem:[%s16206_s4 + $0x64] sm:$0xf]  ;;  %v9026_v44 = vor.u32 %v10613_v45, %v9023_v20 }
 0x3b1   :  { %4582 = vmatpush.bf16.msra.mxu0 %v9062_v36  ;;  %4595 = vmatpush.bf16.msra.mxu1 %v9066_v5  ;;  %v8997_v36 = vld [vmem:[%s16206_s4 + $0x60] sm:$0xf]  ;;  %v9006_v22 = vor.u32 %v10611_v12, %v9005_v48  ;;  %v10602_v27 = vld [vmem:[%s16206_s4 + $0x2c] sm:$0xf0]  ;;  %v8975_v45 = vld [vmem:[%s16206_s4 + $0x38] sm:$0xf0] }
 0x3b2   :  { %v3853_v1 = vmul.f32 0.5, %v3849_v41  ;;  %v3857_v4 = vmul.f32 0.5, %v3850_v42  ;;  %4608 = vmatpush.bf16.msra.mxu2 %v9070_v35  ;;  %4621 = vmatpush.bf16.msra.mxu3 %v9074_v39  ;;  %v9022_v39 = vor.u32 %v10615_v10, %v9021_v31  ;;  %v10609_v41 = vld [vmem:[%s16206_s4 + $0x6c] sm:$0xf]  ;;  %v9007_v42 = vld [vmem:[%s16206_s4 + $0x78] sm:$0xf0] }
 0x3b3   :  { %v9010_v50 = vor.u32 %v10609_v41, %v9007_v42  ;;  %v8965_v26 = vld [vmem:[%s16206_s4 + $0x20] sm:$0xf]  ;;  %v8967_v31 = vld [vmem:[%s16206_s4 + $0x30] sm:$0xf0]  ;;  %v10601_v10 = vld [vmem:[%s16206_s4 + $0x2c] sm:$0xf] }
 0x3b4   :  { %10964 = vtanh.f32 %v3853_v1  ;;  %v3832_v54 = vpop.f32.mrf.mxu2  ;;  %v3845_v57 = vpop.f32.mrf.mxu3  ;;  %v8998_v1 = vor.u32 %v10610_v60, %v8997_v36  ;;  %v8966_v36 = vor.u32 %v10602_v27, %v8965_v26  ;;  %v10597_v48 = vld [vmem:[%s16206_s4 + $0xc] sm:$0xf]  ;;  %v8959_v12 = vld [vmem:[%s16206_s4 + $0x18] sm:$0xf0] }
 0x3b5   :  { %10966 = vtanh.f32 %v3857_v4  ;;  %v3833_v59 = vadd.f32 %v3832_v54, %v14276_v33  ;;  %v3846_v14 = vadd.f32 %v3845_v57, %v14278_v49  ;;  %v3808_v24 = vpop.f32.mrf.mxu0  ;;  %v3821_v15 = vpop.f32.mrf.mxu1  ;;  %4583 = vmatpush.bf16.msra.mxu0 %v9046_v52  ;;  %4596 = vmatpush.bf16.msra.mxu1 %v9050_v61  ;;  %v10612_v33 = vld [vmem:[%s16206_s4 + $0x84] sm:$0xf]  ;;  %v9015_v49 = vld [vmem:[%s16206_s4 + $0x90] sm:$0xf0]  ;;  %v9002_v4 = vor.u32 %v10608_v63, %v8999_v18  ;;  %v10607_v57 = vld [vmem:[%s16206_s4 + $0x54] sm:$0xf0] }
 0x3b6   :  { %4609 = vmatpush.bf16.msra.mxu2 %v9054_v7  ;;  %4622 = vmatpush.bf16.msra.mxu3 %v9058_v8  ;;  %v9018_v43 = vor.u32 %v10612_v33, %v9015_v49  ;;  %v10606_v7 = vld [vmem:[%s16206_s4 + $0x4c] sm:$0xf0]  ;;  %v10604_v8 = vld [vmem:[%s16206_s4 + $0x44] sm:$0xf]  ;;  %v8990_v33 = vor.u32 %v10607_v57, %v8989_v34  ;;  %v8978_v63 = vor.u32 %v10601_v10, %v8975_v45  ;;  %v10599_v18 = vld [vmem:[%s16206_s4 + $0x14] sm:$0xf0] }
 0x3b7   :  { %v3851_v38 = vadd.f32 %v3833_v59, %v11866_v23  ;;  %v3852_v47 = vadd.f32 %v3846_v14, %v11874_v28  ;;  %v8991_v59 = vld [vmem:[%s16206_s4 + $0x58] sm:$0xf0]  ;;  %v8982_v15 = vor.u32 %v10606_v7, %v8981_v55  ;;  %v10600_v49 = vld [vmem:[%s16206_s4 + $0x24] sm:$0xf]  ;;  %v9201_v7 = vld [vmem:[%s16209_s6 + $0xe8] sm:$0xf] }
 0x3b8   :  { %v9177_v34 = vld [vmem:[%s16209_s6 + $0xc0] sm:$0xf]  ;;  %v10686_v57 = vld [vmem:[%s16209_s6 + $0xcc] sm:$0xf0]  ;;  %v10685_v26 = vld [vmem:[%s16209_s6 + $0xcc] sm:$0xf] }
 0x3b9   :  { %10968 = vtanh.f32 %v3851_v38  ;;  %v3862_v5 = vmul.f32 0.5, %v3852_v47  ;;  %4584 = vmatpush.bf16.msra.mxu0 %v9030_v11  ;;  %4597 = vmatpush.bf16.msra.mxu1 %v9034_v16  ;;  %v10605_v11 = vld [vmem:[%s16206_s4 + $0x4c] sm:$0xf]  ;;  %v8986_v16 = vor.u32 %v10604_v8, %v8983_v9  ;;  %v8973_v38 = vld [vmem:[%s16206_s4 + $0x28] sm:$0xf] }
 0x3ba   :  { %v10965_v35 = vpop.eup %10964  ;;  %4610 = vmatpush.bf16.msra.mxu2 %v9038_v29  ;;  %4623 = vmatpush.bf16.msra.mxu3 %v9042_v30  ;;  %v10603_v47 = vld [vmem:[%s16206_s4 + $0x34] sm:$0xf0]  ;;  %v9203_v9 = vld [vmem:[%s16209_s6 + $0xf8] sm:$0xf0]  ;;  %v9169_v10 = vld [vmem:[%s16209_s6 + $0xa8] sm:$0xf] }
 0x3bb   :  { %v10967_v53 = vpop.eup %10966  ;;  %v3855_v51 = vmul.f32 0.5, %v10965_v35  ;;  %10970 = vtanh.f32 %v3862_v5  ;;  %v8970_v5 = vor.u32 %v10600_v49, %v8967_v31  ;;  %v8974_v60 = vor.u32 %v10603_v47, %v8973_v38  ;;  %v10596_v35 = vld [vmem:[%s16206_s4 + $0x4] sm:$0xf]  ;;  %v10691_v8 = vld [vmem:[%s16209_s6 + $0xf4] sm:$0xf0] }
 0x3bc   :  { %v3859_v52 = vmul.f32 0.5, %v10967_v53  ;;  %v3834_v61 = vpop.f32.mrf.mxu2  ;;  %v3847_v62 = vpop.f32.mrf.mxu3  ;;  %v10682_v49 = vld [vmem:[%s16209_s6 + $0xac] sm:$0xf0]  ;;  %v10680_v31 = vld [vmem:[%s16209_s6 + $0xa4] sm:$0xf] }
 0x3bd   :  { %v3856_v58 = vadd.f32 0.5, %v3855_v51  ;;  %4585 = vmatpush.bf16.msra.mxu0 %v9014_v6  ;;  %4598 = vmatpush.bf16.msra.mxu1 %v9018_v43  ;;  %v8949_v6 = vld [vmem:[%s16206_s4] sm:$0xf]  ;;  %v10598_v43 = vld [vmem:[%s16206_s4 + $0xc] sm:$0xf0]  ;;  %v8962_v61 = vor.u32 %v10597_v48, %v8959_v12 }
 0x3be   :  { %v3860_v46 = vadd.f32 0.5, %v3859_v52  ;;  %4611 = vmatpush.bf16.msra.mxu2 %v9022_v39  ;;  %4624 = vmatpush.bf16.msra.mxu3 %v9026_v44  ;;  %v8951_v39 = vld [vmem:[%s16206_s4 + $0x10] sm:$0xf0]  ;;  %v8957_v44 = vld [vmem:[%s16206_s4 + $0x8] sm:$0xf]  ;;  %v8950_v51 = vor.u32 %v10598_v43, %v8949_v6 }
 0x3bf   :  { %v10969_v54 = vpop.eup %10968  ;;  %v8954_v41 = vor.u32 %v10596_v35, %v8951_v39  ;;  %v8958_v52 = vor.u32 %v10599_v18, %v8957_v44  ;;  %v9163_v47 = vld [vmem:[%s16209_s6 + $0xb0] sm:$0xf0]  ;;  %v10683_v45 = vld [vmem:[%s16209_s6 + $0xb4] sm:$0xf0]  ;;  %v10681_v43 = vld [vmem:[%s16209_s6 + $0xac] sm:$0xf] }
 0x3c0   :  { %v3866_v14 = vmul.f32 %v3860_v46, %v13801_v37  ;;  %v3867_v24 = vmul.f32 %v10969_v54, %v3856_v58  ;;  %v8994_v37 = vor.u32 %v10605_v11, %v8991_v59  ;;  %v8946_v58 = vld [vmem:[%s16210_s0 + $0x28] sm:$0xff]  ;;  %v10684_v11 = vld [vmem:[%s16209_s6 + $0xc4] sm:$0xf]  ;;  %v9179_v59 = vld [vmem:[%s16209_s6 + $0xd0] sm:$0xf0]  ;;  %v9170_v6 = vor.u32 %v10683_v45, %v9169_v10 }
 0x3c1   :  { %4586 = vmatpush.bf16.msra.mxu0 %v8998_v1  ;;  %4599 = vmatpush.bf16.msra.mxu1 %v9002_v4  ;;  %v10971_v29 = vpop.eup %10970  ;;  %v4387_v1 = vpack.c.bf16 %v8946_v58, %v8946_v58  ;;  %v9195_v4 = vld [vmem:[%s16209_s6 + $0xf0] sm:$0xf0]  ;;  %v9145_v35 = vld [vmem:[%s16209_s6 + $0x80] sm:$0xf]  ;;  %v10678_v39 = vld [vmem:[%s16209_s6 + $0x8c] sm:$0xf0] }
 0x3c2   :  { %v14440_v30 = vadd.f32 %v3867_v24, %v3866_v14  ;;  %4612 = vmatpush.bf16.msra.mxu2 %v9006_v22  ;;  %4625 = vmatpush.bf16.msra.mxu3 %v9010_v50  ;;  %v3864_v20 = vmul.f32 0.5, %v10971_v29  ;;  %v9202_v22 = vor.u32 %v10691_v8, %v9201_v7  ;;  %v10689_v50 = vld [vmem:[%s16209_s6 + $0xec] sm:$0xf]  ;;  %v9178_v14 = vor.u32 %v10686_v57, %v9177_v34  ;;  %v9187_v29 = vld [vmem:[%s16209_s6 + $0xd8] sm:$0xf0] }
 0x3c3   :  { %v9206_v54 = vor.u32 %v10689_v50, %v9203_v9  ;;  %v9182_v24 = vor.u32 %v10684_v11, %v9179_v59  ;;  %v10676_v44 = vld [vmem:[%s16209_s6 + $0x84] sm:$0xf]  ;;  %v9146_v18 = vor.u32 %v10678_v39, %v9145_v35  ;;  %v9147_v48 = vld [vmem:[%s16209_s6 + $0x90] sm:$0xf0]  ;;  %v9153_v12 = vld [vmem:[%s16209_s6 + $0x88] sm:$0xf] }
 0x3c4   :  { %10972 = vtanh.f32 %v14440_v30  ;;  %v3865_v53 = vadd.f32 0.5, %v3864_v20  ;;  %v10672_v58 = vld [vmem:[%s16209_s6 + $0x64] sm:$0xf]  ;;  %v10673_v50 = vld [vmem:[%s16209_s6 + $0x6c] sm:$0xf] }
 0x3c5   :  { %4587 = vmatpush.bf16.msra.mxu0 %v8982_v15  ;;  %4600 = vmatpush.bf16.msra.mxu1 %v8986_v16  ;;  %v9185_v15 = vld [vmem:[%s16209_s6 + $0xc8] sm:$0xf]  ;;  %v10687_v16 = vld [vmem:[%s16209_s6 + $0xd4] sm:$0xf0]  ;;  %v9139_v9 = vld [vmem:[%s16209_s6 + $0x78] sm:$0xf0] }
 0x3c6   :  { %4613 = vmatpush.bf16.msra.mxu2 %v8990_v33  ;;  %4626 = vmatpush.bf16.msra.mxu3 %v8994_v37  ;;  %v9186_v27 = vor.u32 %v10687_v16, %v9185_v15  ;;  %v9190_v33 = vor.u32 %v10685_v26, %v9187_v29  ;;  %v9161_v37 = vld [vmem:[%s16209_s6 + $0xa0] sm:$0xf]  ;;  %v9142_v34 = vor.u32 %v10673_v50, %v9139_v9  ;;  %v10670_v57 = vld [vmem:[%s16209_s6 + $0x4c] sm:$0xf0]  ;;  %v10668_v11 = vld [vmem:[%s16209_s6 + $0x44] sm:$0xf] }
 0x3c7   :  { %v9162_v38 = vor.u32 %v10682_v49, %v9161_v37  ;;  %v10671_v15 = vld [vmem:[%s16209_s6 + $0x54] sm:$0xf0]  ;;  %v9123_v29 = vld [vmem:[%s16209_s6 + $0x58] sm:$0xf0]  ;;  %v9097_v37 = vld [vmem:[%s16209_s6 + $0x20] sm:$0xf] }
 0x3c8   :  { %v10666_v49 = vld [vmem:[%s16209_s6 + $0x2c] sm:$0xf0]  ;;  %v9099_v45 = vld [vmem:[%s16209_s6 + $0x30] sm:$0xf0]  ;;  %v9107_v35 = vld [vmem:[%s16209_s6 + $0x38] sm:$0xf0] }
 0x3c9   :  { %4588 = vmatpush.bf16.msra.mxu0 %v8966_v36  ;;  %4601 = vmatpush.bf16.msra.mxu1 %v8970_v5  ;;  %v9166_v5 = vor.u32 %v10680_v31, %v9163_v47  ;;  %v10664_v31 = vld [vmem:[%s16209_s6 + $0x24] sm:$0xf]  ;;  %v9098_v10 = vor.u32 %v10666_v49, %v9097_v37  ;;  %v9331_v9 = vld [vmem:[%s16211_s5 + $0xf8] sm:$0xf0]  ;;  %v9289_v37 = vld [vmem:[%s16211_s5 + $0xa0] sm:$0xf] }
 0x3ca   :  { %v10973_v42 = vpop.eup %10972  ;;  %4614 = vmatpush.bf16.msra.mxu2 %v8974_v60  ;;  %4627 = vmatpush.bf16.msra.mxu3 %v8978_v63  ;;  %v9171_v60 = vld [vmem:[%s16209_s6 + $0xb8] sm:$0xf0]  ;;  %v10650_v49 = vld [vmem:[%s16211_s5 + $0xac] sm:$0xf0] }
 0x3cb   :  { %v3870_v62 = vmul.f32 %v10973_v42, %v3865_v53  ;;  %v9174_v63 = vor.u32 %v10681_v43, %v9171_v60  ;;  %v10679_v53 = vld [vmem:[%s16209_s6 + $0x94] sm:$0xf0]  ;;  %v10677_v42 = vld [vmem:[%s16209_s6 + $0x8c] sm:$0xf]  ;;  %v9102_v43 = vor.u32 %v10664_v31, %v9099_v45  ;;  %v10648_v31 = vld [vmem:[%s16211_s5 + $0xa4] sm:$0xf] }
 0x3cc   :  { %v10651_v45 = vld [vmem:[%s16211_s5 + $0xb4] sm:$0xf0] }
 0x3cd   :  { %v3871_v55 = vpack.c.bf16 %v3870_v62, %v3870_v62  ;;  %4589 = vmatpush.bf16.msra.mxu0 %v8950_v51  ;;  %4602 = vmatpush.bf16.msra.mxu1 %v8954_v41  ;;  %v9150_v51 = vor.u32 %v10676_v44, %v9147_v48  ;;  %v9154_v41 = vor.u32 %v10679_v53, %v9153_v12  ;;  %v9129_v62 = vld [vmem:[%s16209_s6 + $0x60] sm:$0xf]  ;;  %v10660_v48 = vld [vmem:[%s16209_s6 + $0x4] sm:$0xf]  ;;  %v9083_v53 = vld [vmem:[%s16209_s6 + $0x10] sm:$0xf0] }
 0x3ce   :  { %4615 = vmatpush.bf16.msra.mxu2 %v8958_v52  ;;  %4628 = vmatpush.bf16.msra.mxu3 %v8962_v61  ;;  %v9155_v52 = vld [vmem:[%s16209_s6 + $0x98] sm:$0xf0]  ;;  %v9081_v44 = vld [vmem:[%s16209_s6] sm:$0xf] }
 0x3cf   :  { %4317 = vmatmul.bf16.vlgmr.msrb.gmra.mxu0 %v3871_v55  ;;  %4330 = vmatmul.bf16.vlgmr.msrb.gmra.mxu1 %v3871_v55  ;;  %v9158_v61 = vor.u32 %v10677_v42, %v9155_v52  ;;  %v9086_v42 = vor.u32 %v10660_v48, %v9083_v53  ;;  %v10644_v48 = vld [vmem:[%s16211_s5 + $0x84] sm:$0xf] }
 0x3d0   :  { %4343 = vmatmul.bf16.vlgmr.msrb.gmra.mxu2 %v3871_v55  ;;  %4356 = vmatmul.bf16.vlgmr.msrb.gmra.mxu3 %v3871_v55 }
 0x3d1   :  { %4666 = vmatpush.bf16.msrb.mxu0 %v13850_v17  ;;  %4679 = vmatpush.bf16.msrb.mxu1 %v13853_v40  ;;  %v9193_v17 = vld [vmem:[%s16209_s6 + $0xe0] sm:$0xf]  ;;  %v10690_v40 = vld [vmem:[%s16209_s6 + $0xec] sm:$0xf0] }
 0x3d2   :  { %4692 = vmatpush.bf16.msrb.mxu2 %v13856_v21  ;;  %4705 = vmatpush.bf16.msrb.mxu3 %v13859_v25  ;;  %v10688_v21 = vld [vmem:[%s16209_s6 + $0xe4] sm:$0xf]  ;;  %v9194_v25 = vor.u32 %v10690_v40, %v9193_v17 }
 0x3d3   :  { %v9198_v46 = vor.u32 %v10688_v21, %v9195_v4  ;;  %v9131_v21 = vld [vmem:[%s16209_s6 + $0x70] sm:$0xf0]  ;;  %v10675_v4 = vld [vmem:[%s16209_s6 + $0x74] sm:$0xf0] }
 0x3df   :  { %4590 = vmatmul.bf16.vlgmr.msra.gmra.mxu0 %v3871_v55  ;;  %4603 = vmatmul.bf16.vlgmr.msra.gmra.mxu1 %v3871_v55 }
 0x3e0   :  { %4616 = vmatmul.bf16.vlgmr.msra.gmra.mxu2 %v3871_v55  ;;  %4629 = vmatmul.bf16.vlgmr.msra.gmra.mxu3 %v3871_v55  ;;  %v10674_v55 = vld [vmem:[%s16209_s6 + $0x6c] sm:$0xf0] }
 0x3e1   :  { %4959 = vmatpush.bf16.msra.mxu0 %v9194_v25  ;;  %4972 = vmatpush.bf16.msra.mxu1 %v9198_v46  ;;  %v9130_v40 = vor.u32 %v10674_v55, %v9129_v62  ;;  %v9137_v25 = vld [vmem:[%s16209_s6 + $0x68] sm:$0xf]  ;;  %v9134_v46 = vor.u32 %v10672_v58, %v9131_v21  ;;  %v9091_v62 = vld [vmem:[%s16209_s6 + $0x18] sm:$0xf0]  ;;  %v9321_v55 = vld [vmem:[%s16211_s5 + $0xe0] sm:$0xf] }
 0x3e2   :  { %4985 = vmatpush.bf16.msra.mxu2 %v9202_v22  ;;  %4998 = vmatpush.bf16.msra.mxu3 %v9206_v54  ;;  %v9138_v22 = vor.u32 %v10675_v4, %v9137_v25  ;;  %v9113_v54 = vld [vmem:[%s16209_s6 + $0x40] sm:$0xf]  ;;  %v10656_v21 = vld [vmem:[%s16211_s5 + $0xe4] sm:$0xf]  ;;  %v9323_v25 = vld [vmem:[%s16211_s5 + $0xf0] sm:$0xf0] }
 0x3e3   :  { %v9114_v59 = vor.u32 %v10670_v57, %v9113_v54  ;;  %v10654_v54 = vld [vmem:[%s16211_s5 + $0xcc] sm:$0xf0] }
 0x3e5   :  { %4960 = vmatpush.bf16.msra.mxu0 %v9178_v14  ;;  %4973 = vmatpush.bf16.msra.mxu1 %v9182_v24  ;;  %v9115_v14 = vld [vmem:[%s16209_s6 + $0x50] sm:$0xf0]  ;;  %v9121_v24 = vld [vmem:[%s16209_s6 + $0x48] sm:$0xf] }
 0x3e6   :  { %4986 = vmatpush.bf16.msra.mxu2 %v9186_v27  ;;  %4999 = vmatpush.bf16.msra.mxu3 %v9190_v33  ;;  %v9118_v16 = vor.u32 %v10668_v11, %v9115_v14  ;;  %v9122_v26 = vor.u32 %v10671_v15, %v9121_v24  ;;  %v10669_v27 = vld [vmem:[%s16209_s6 + $0x4c] sm:$0xf]  ;;  %v9307_v14 = vld [vmem:[%s16211_s5 + $0xd0] sm:$0xf0]  ;;  %v9313_v24 = vld [vmem:[%s16211_s5 + $0xc8] sm:$0xf] }
 0x3e7   :  { %v9126_v33 = vor.u32 %v10669_v27, %v9123_v29  ;;  %v9315_v27 = vld [vmem:[%s16211_s5 + $0xd8] sm:$0xf0] }
 0x3e9   :  { %4961 = vmatpush.bf16.msra.mxu0 %v9162_v38  ;;  %4974 = vmatpush.bf16.msra.mxu1 %v9166_v5  ;;  %v9105_v5 = vld [vmem:[%s16209_s6 + $0x28] sm:$0xf] }
 0x3ea   :  { %4987 = vmatpush.bf16.msra.mxu2 %v9170_v6  ;;  %5000 = vmatpush.bf16.msra.mxu3 %v9174_v63  ;;  %v10667_v6 = vld [vmem:[%s16209_s6 + $0x34] sm:$0xf0]  ;;  %v10665_v63 = vld [vmem:[%s16209_s6 + $0x2c] sm:$0xf] }
 0x3eb   :  { %v9106_v60 = vor.u32 %v10667_v6, %v9105_v5  ;;  %v9110_v39 = vor.u32 %v10665_v63, %v9107_v35 }
 0x3ed   :  { %4962 = vmatpush.bf16.msra.mxu0 %v9146_v18  ;;  %4975 = vmatpush.bf16.msra.mxu1 %v9150_v51  ;;  %v10662_v18 = vld [vmem:[%s16209_s6 + $0xc] sm:$0xf0]  ;;  %v9089_v51 = vld [vmem:[%s16209_s6 + $0x8] sm:$0xf] }
 0x3ee   :  { %4988 = vmatpush.bf16.msra.mxu2 %v9154_v41  ;;  %5001 = vmatpush.bf16.msra.mxu3 %v9158_v61  ;;  %v9082_v12 = vor.u32 %v10662_v18, %v9081_v44  ;;  %v10663_v41 = vld [vmem:[%s16209_s6 + $0x14] sm:$0xf0]  ;;  %v10661_v61 = vld [vmem:[%s16209_s6 + $0xc] sm:$0xf]  ;;  %v9273_v44 = vld [vmem:[%s16211_s5 + $0x80] sm:$0xf] }
 0x3ef   :  { %9075 = vmatmul.msk.bf16.vlgmr.msrb.gmra.mxu0 %vm333_vm1, %v4387_v1  ;;  %9076 = vmatmul.msk.bf16.vlgmr.msrb.gmra.mxu1 %vm333_vm1, %v4387_v1  ;;  %v9090_v52 = vor.u32 %v10663_v41, %v9089_v51  ;;  %v9094_v58 = vor.u32 %v10661_v61, %v9091_v62  ;;  %v10646_v18 = vld [vmem:[%s16211_s5 + $0x8c] sm:$0xf0]  ;;  %v9275_v41 = vld [vmem:[%s16211_s5 + $0x90] sm:$0xf0] }
 0x3f0   :  { %9077 = vmatmul.msk.bf16.vlgmr.msrb.gmra.mxu2 %vm333_vm1, %v4387_v1  ;;  %9078 = vmatmul.msk.bf16.vlgmr.msrb.gmra.mxu3 %vm333_vm1, %v4387_v1  ;;  %v9274_v51 = vor.u32 %v10646_v18, %v9273_v44  ;;  %v9278_v61 = vor.u32 %v10644_v48, %v9275_v41  ;;  %v10632_v18 = vld [vmem:[%s16211_s5 + $0x24] sm:$0xf]  ;;  %v9227_v48 = vld [vmem:[%s16211_s5 + $0x30] sm:$0xf0] }
 0x3f1   :  { %4963 = vmatpush.bf16.msra.mxu0 %v9130_v40  ;;  %4976 = vmatpush.bf16.msra.mxu1 %v9134_v46  ;;  %v10658_v40 = vld [vmem:[%s16211_s5 + $0xec] sm:$0xf0]  ;;  %v10659_v46 = vld [vmem:[%s16211_s5 + $0xf4] sm:$0xf0]  ;;  %v9230_v41 = vor.u32 %v10632_v18, %v9227_v48 }
 0x3f2   :  { %4989 = vmatpush.bf16.msra.mxu2 %v9138_v22  ;;  %5002 = vmatpush.bf16.msra.mxu3 %v9142_v34  ;;  %v9322_v4 = vor.u32 %v10658_v40, %v9321_v55  ;;  %v10657_v22 = vld [vmem:[%s16211_s5 + $0xec] sm:$0xf]  ;;  %v9305_v34 = vld [vmem:[%s16211_s5 + $0xc0] sm:$0xf] }
 0x3f3   :  { %v9334_v57 = vor.u32 %v10657_v22, %v9331_v9  ;;  %v9306_v11 = vor.u32 %v10654_v54, %v9305_v34  ;;  %v9259_v22 = vld [vmem:[%s16211_s5 + $0x70] sm:$0xf0]  ;;  %v10643_v34 = vld [vmem:[%s16211_s5 + $0x74] sm:$0xf0]  ;;  %v10641_v54 = vld [vmem:[%s16211_s5 + $0x6c] sm:$0xf] }
 0x3f5   :  { %4964 = vmatpush.bf16.msra.mxu0 %v9114_v59  ;;  %4977 = vmatpush.bf16.msra.mxu1 %v9118_v16  ;;  %v10652_v59 = vld [vmem:[%s16211_s5 + $0xc4] sm:$0xf]  ;;  %v10655_v16 = vld [vmem:[%s16211_s5 + $0xd4] sm:$0xf0] }
 0x3f6   :  { %4990 = vmatpush.bf16.msra.mxu2 %v9122_v26  ;;  %5003 = vmatpush.bf16.msra.mxu3 %v9126_v33  ;;  %v9310_v15 = vor.u32 %v10652_v59, %v9307_v14  ;;  %v10653_v26 = vld [vmem:[%s16211_s5 + $0xcc] sm:$0xf]  ;;  %v9314_v29 = vor.u32 %v10655_v16, %v9313_v24 }
 0x3f7   :  { %v9318_v33 = vor.u32 %v10653_v26, %v9315_v27 }
 0x3f9   :  { %4965 = vmatpush.bf16.msra.mxu0 %v9098_v10  ;;  %4978 = vmatpush.bf16.msra.mxu1 %v9102_v43  ;;  %v9297_v10 = vld [vmem:[%s16211_s5 + $0xa8] sm:$0xf]  ;;  %v10649_v43 = vld [vmem:[%s16211_s5 + $0xac] sm:$0xf] }
 0x3fa   :  { %4991 = vmatpush.bf16.msra.mxu2 %v9106_v60  ;;  %5004 = vmatpush.bf16.msra.mxu3 %v9110_v39  ;;  %v9298_v6 = vor.u32 %v10651_v45, %v9297_v10  ;;  %v9299_v60 = vld [vmem:[%s16211_s5 + $0xb8] sm:$0xf0] }
 0x3fb   :  { %v9302_v63 = vor.u32 %v10649_v43, %v9299_v60 }
 0x3fd   :  { %4966 = vmatpush.bf16.msra.mxu0 %v9082_v12  ;;  %4979 = vmatpush.bf16.msra.mxu1 %v9086_v42  ;;  %v9281_v42 = vld [vmem:[%s16211_s5 + $0x88] sm:$0xf] }
 0x3fe   :  { %4992 = vmatpush.bf16.msra.mxu2 %v9090_v52  ;;  %5005 = vmatpush.bf16.msra.mxu3 %v9094_v58  ;;  %v10647_v52 = vld [vmem:[%s16211_s5 + $0x94] sm:$0xf0] }
 0x3ff   :  { %v9282_v62 = vor.u32 %v10647_v52, %v9281_v42  ;;  %v10635_v42 = vld [vmem:[%s16211_s5 + $0x34] sm:$0xf0]  ;;  %v10633_v52 = vld [vmem:[%s16211_s5 + $0x2c] sm:$0xf] }
 0x401   :  { %5171 = vmatpush.bf16.msrb.mxu0 %v9322_v4  ;;  %v10640_v4 = vld [vmem:[%s16211_s5 + $0x64] sm:$0xf] }
 0x402   :  { %5210 = vmatpush.bf16.msrb.mxu3 %v9334_v57  ;;  %v9262_v9 = vor.u32 %v10640_v4, %v9259_v22  ;;  %v9267_v57 = vld [vmem:[%s16211_s5 + $0x78] sm:$0xf0]  ;;  %v9209_v4 = vld [vmem:[%s16211_s5] sm:$0xf]  ;;  %v10628_v22 = vld [vmem:[%s16211_s5 + $0x4] sm:$0xf] }
 0x403   :  { %v9270_v24 = vor.u32 %v10641_v54, %v9267_v57  ;;  %v9217_v54 = vld [vmem:[%s16211_s5 + $0x8] sm:$0xf]  ;;  %v10631_v57 = vld [vmem:[%s16211_s5 + $0x14] sm:$0xf0] }
 0x405   :  { %5172 = vmatpush.bf16.msrb.mxu0 %v9306_v11 }
 0x406   :  { %5211 = vmatpush.bf16.msrb.mxu3 %v9318_v33  ;;  %v10638_v33 = vld [vmem:[%s16211_s5 + $0x4c] sm:$0xf0] }
 0x40a   :  { %5212 = vmatpush.bf16.msrb.mxu3 %v9302_v63  ;;  %v9225_v63 = vld [vmem:[%s16211_s5 + $0x20] sm:$0xf] }
 0x42c   :  { %v14562_v20 = vpop.f32.mrf.mxu0  ;;  %v14564_v36 = vpop.f32.mrf.mxu1 }
 0x433   :  { %v14605_v1 = vpop.f32.mrf.mxu2  ;;  %v14607_v17 = vpop.f32.mrf.mxu3 }
 0x434   :  { %v4108_v7 = vpop.f32.mrf.mxu0  ;;  %v4121_v8 = vpop.f32.mrf.mxu1 }
 0x435   :  { %v9326_v7 = vor.u32 %v10656_v21, %v9323_v25  ;;  %v9329_v8 = vld [vmem:[%s16211_s5 + $0xe8] sm:$0xf]  ;;  %v9257_v21 = vld [vmem:[%s16211_s5 + $0x60] sm:$0xf]  ;;  %v10642_v25 = vld [vmem:[%s16211_s5 + $0x6c] sm:$0xf0] }
 0x436   :  { %v9330_v50 = vor.u32 %v10659_v46, %v9329_v8  ;;  %v9258_v46 = vor.u32 %v10642_v25, %v9257_v21 }
 0x437   :  { %5184 = vmatpush.bf16.msrb.mxu1 %v9326_v7 }
 0x438   :  { %5197 = vmatpush.bf16.msrb.mxu2 %v9330_v50  ;;  %v9265_v50 = vld [vmem:[%s16211_s5 + $0x68] sm:$0xf] }
 0x439   :  { %v9266_v14 = vor.u32 %v10643_v34, %v9265_v50  ;;  %v9211_v50 = vld [vmem:[%s16211_s5 + $0x10] sm:$0xf0] }
 0x43a   :  { %v9214_v34 = vor.u32 %v10628_v22, %v9211_v50  ;;  %v10712_v22 = vld [vmem:[%s16206_s4 + $0xa4] sm:$0xf] }
 0x43b   :  { %v4134_v38 = vpop.f32.mrf.mxu2  ;;  %v4147_v47 = vpop.f32.mrf.mxu3  ;;  %5185 = vmatpush.bf16.msrb.mxu1 %v9310_v15 }
 0x43c   :  { %v9290_v38 = vor.u32 %v10650_v49, %v9289_v37  ;;  %v9291_v47 = vld [vmem:[%s16211_s5 + $0xb0] sm:$0xf0]  ;;  %5198 = vmatpush.bf16.msrb.mxu2 %v9314_v29  ;;  %v9241_v29 = vld [vmem:[%s16211_s5 + $0x40] sm:$0xf]  ;;  %v10636_v37 = vld [vmem:[%s16211_s5 + $0x44] sm:$0xf] }
 0x43d   :  { %v9294_v5 = vor.u32 %v10648_v31, %v9291_v47  ;;  %v9249_v49 = vld [vmem:[%s16211_s5 + $0x48] sm:$0xf]  ;;  %v10639_v31 = vld [vmem:[%s16211_s5 + $0x54] sm:$0xf0] }
 0x43e   :  { %5173 = vmatpush.bf16.msrb.mxu0 %v9290_v38  ;;  %v9250_v45 = vor.u32 %v10639_v31, %v9249_v49  ;;  %v9451_v49 = vld [vmem:[%s16206_s4 + $0xe0] sm:$0xf]  ;;  %v10722_v31 = vld [vmem:[%s16206_s4 + $0xec] sm:$0xf0] }
 0x43f   :  { %5186 = vmatpush.bf16.msrb.mxu1 %v9294_v5  ;;  %v10637_v5 = vld [vmem:[%s16211_s5 + $0x4c] sm:$0xf]  ;;  %v9452_v48 = vor.u32 %v10722_v31, %v9451_v49  ;;  %v9403_v31 = vld [vmem:[%s16206_s4 + $0x80] sm:$0xf] }
 0x440   :  { %5199 = vmatpush.bf16.msrb.mxu2 %v9298_v6  ;;  %v9251_v6 = vld [vmem:[%s16211_s5 + $0x58] sm:$0xf0] }
 0x441   :  { %v9254_v43 = vor.u32 %v10637_v5, %v9251_v6  ;;  %v10723_v6 = vld [vmem:[%s16206_s4 + $0xf4] sm:$0xf0] }
 0x442   :  { %5174 = vmatpush.bf16.msrb.mxu0 %v9274_v51 }
 0x443   :  { %5187 = vmatpush.bf16.msrb.mxu1 %v9278_v61 }
 0x444   :  { %5200 = vmatpush.bf16.msrb.mxu2 %v9282_v62 }
 0x446   :  { %5175 = vmatpush.bf16.msrb.mxu0 %v9258_v46 }
 0x447   :  { %5188 = vmatpush.bf16.msrb.mxu1 %v9262_v9 }
 0x448   :  { %5201 = vmatpush.bf16.msrb.mxu2 %v9266_v14 }
 0x44c   :  { %v4318_v35 = vpop.f32.mrf.mxu0  ;;  %v4331_v39 = vpop.f32.mrf.mxu1  ;;  %5202 = vmatpush.bf16.msrb.mxu2 %v9250_v45  ;;  %v9459_v45 = vld [vmem:[%s16206_s4 + $0xe8] sm:$0xf] }
 0x44d   :  { %v4319_v12 = vadd.f32 %v4318_v35, %v14562_v20  ;;  %v4332_v53 = vadd.f32 %v4331_v39, %v14564_v36  ;;  %v10645_v20 = vld [vmem:[%s16211_s5 + $0x8c] sm:$0xf]  ;;  %v9283_v36 = vld [vmem:[%s16211_s5 + $0x98] sm:$0xf0]  ;;  %v10634_v35 = vld [vmem:[%s16211_s5 + $0x2c] sm:$0xf0] }
 0x44e   :  { %v9286_v40 = vor.u32 %v10645_v20, %v9283_v36  ;;  %v9226_v44 = vor.u32 %v10634_v35, %v9225_v63 }
 0x44f   :  { %v4361_v55 = vadd.f32 %v4319_v12, %v12226_v2  ;;  %v4362_v58 = vadd.f32 %v4332_v53, %v12228_v3  ;;  %v9233_v12 = vld [vmem:[%s16211_s5 + $0x28] sm:$0xf] }
 0x450   :  { %5213 = vmatpush.bf16.msrb.mxu3 %v9286_v40  ;;  %v9234_v36 = vor.u32 %v10635_v42, %v9233_v12 }
 0x451   :  { %v4365_v7 = vmul.f32 0.5, %v4361_v55  ;;  %v4369_v8 = vmul.f32 0.5, %v4362_v58  ;;  %v9235_v55 = vld [vmem:[%s16211_s5 + $0x38] sm:$0xf0] }
 0x452   :  { %v9238_v25 = vor.u32 %v10633_v52, %v9235_v55  ;;  %5203 = vmatpush.bf16.msrb.mxu2 %v9234_v36  ;;  %v9460_v52 = vor.u32 %v10723_v6, %v9459_v45  ;;  %v9443_v36 = vld [vmem:[%s16206_s4 + $0xc8] sm:$0xf]  ;;  %v10719_v55 = vld [vmem:[%s16206_s4 + $0xd4] sm:$0xf0] }
 0x453   :  { %10974 = vtanh.f32 %v4365_v7  ;;  %v4344_v11 = vpop.f32.mrf.mxu2  ;;  %v4357_v59 = vpop.f32.mrf.mxu3  ;;  %v10630_v7 = vld [vmem:[%s16211_s5 + $0xc] sm:$0xf0]  ;;  %v9411_v45 = vld [vmem:[%s16206_s4 + $0x88] sm:$0xf] }
 0x454   :  { %10976 = vtanh.f32 %v4369_v8  ;;  %v4345_v15 = vadd.f32 %v4344_v11, %v14605_v1  ;;  %v4358_v16 = vadd.f32 %v4357_v59, %v14607_v17  ;;  %v4320_v26 = vpop.f32.mrf.mxu0  ;;  %v4333_v27 = vpop.f32.mrf.mxu1  ;;  %v9242_v1 = vor.u32 %v10638_v33, %v9241_v29  ;;  %v9243_v17 = vld [vmem:[%s16211_s5 + $0x50] sm:$0xf0]  ;;  %5214 = vmatpush.bf16.msrb.mxu3 %v9270_v24  ;;  %v10629_v11 = vld [vmem:[%s16211_s5 + $0xc] sm:$0xf] }
 0x455   :  { %v9246_v10 = vor.u32 %v10636_v37, %v9243_v17  ;;  %v9210_v46 = vor.u32 %v10630_v7, %v9209_v4  ;;  %v9218_v24 = vor.u32 %v10631_v57, %v9217_v54  ;;  %v9421_v57 = vld [vmem:[%s16206_s4 + $0xb0] sm:$0xf0] }
 0x456   :  { %v4363_v38 = vadd.f32 %v4345_v15, %v12250_v13  ;;  %v4364_v47 = vadd.f32 %v4358_v16, %v12260_v19  ;;  %5176 = vmatpush.bf16.msrb.mxu0 %v9242_v1  ;;  %v9219_v15 = vld [vmem:[%s16211_s5 + $0x18] sm:$0xf0]  ;;  %v9424_v49 = vor.u32 %v10712_v22, %v9421_v57  ;;  %v10700_v22 = vld [vmem:[%s16206_s4 + $0x44] sm:$0xf]  ;;  %v9379_v57 = vld [vmem:[%s16206_s4 + $0x48] sm:$0xf] }
 0x457   :  { %5189 = vmatpush.bf16.msrb.mxu1 %v9246_v10  ;;  %v9222_v16 = vor.u32 %v10629_v11, %v9219_v15  ;;  %5204 = vmatpush.bf16.msrb.mxu2 %v9218_v24  ;;  %v9453_v10 = vld [vmem:[%s16206_s4 + $0xf0] sm:$0xf0]  ;;  %v9427_v11 = vld [vmem:[%s16206_s4 + $0xa8] sm:$0xf]  ;;  %v9429_v24 = vld [vmem:[%s16206_s4 + $0xb8] sm:$0xf0] }
 0x458   :  { %10978 = vtanh.f32 %v4363_v38  ;;  %v4374_v60 = vmul.f32 0.5, %v4364_v47  ;;  %5215 = vmatpush.bf16.msrb.mxu3 %v9254_v43  ;;  %v10720_v47 = vld [vmem:[%s16206_s4 + $0xe4] sm:$0xf]  ;;  %v10721_v43 = vld [vmem:[%s16206_s4 + $0xec] sm:$0xf] }
 0x459   :  { %v10975_v39 = vpop.eup %10974  ;;  %v9456_v12 = vor.u32 %v10720_v47, %v9453_v10 }
 0x45a   :  { %v10977_v53 = vpop.eup %10976  ;;  %v4367_v51 = vmul.f32 0.5, %v10975_v39  ;;  %10980 = vtanh.f32 %v4374_v60  ;;  %5177 = vmatpush.bf16.msrb.mxu0 %v9226_v44  ;;  %v9461_v60 = vld [vmem:[%s16206_s4 + $0xf8] sm:$0xf0] }
 0x45b   :  { %v4371_v61 = vmul.f32 0.5, %v10977_v53  ;;  %v4346_v62 = vpop.f32.mrf.mxu2  ;;  %v4359_v20 = vpop.f32.mrf.mxu3  ;;  %5190 = vmatpush.bf16.msrb.mxu1 %v9230_v41  ;;  %v9435_v53 = vld [vmem:[%s16206_s4 + $0xc0] sm:$0xf] }
 0x45c   :  { %v4368_v58 = vadd.f32 0.5, %v4367_v51  ;;  %v4591_v40 = vpop.f32.mrf.mxu0  ;;  %v4604_v21 = vpop.f32.mrf.mxu1  ;;  %5216 = vmatpush.bf16.msrb.mxu3 %v9238_v25  ;;  %v10718_v51 = vld [vmem:[%s16206_s4 + $0xcc] sm:$0xf0]  ;;  %v10716_v62 = vld [vmem:[%s16206_s4 + $0xc4] sm:$0xf] }
 0x45d   :  { %v4372_v8 = vadd.f32 0.5, %v4371_v61  ;;  %v9464_v61 = vor.u32 %v10721_v43, %v9461_v60  ;;  %v9437_v20 = vld [vmem:[%s16206_s4 + $0xd0] sm:$0xf0]  ;;  %v9436_v4 = vor.u32 %v10718_v51, %v9435_v53  ;;  %v10711_v43 = vld [vmem:[%s16206_s4 + $0x94] sm:$0xf0] }
 0x45e   :  { %v10979_v9 = vpop.eup %10978  ;;  %5178 = vmatpush.bf16.msrb.mxu0 %v9210_v46  ;;  %v9440_v7 = vor.u32 %v10716_v62, %v9437_v20  ;;  %v10714_v46 = vld [vmem:[%s16206_s4 + $0xac] sm:$0xf0]  ;;  %v10709_v60 = vld [vmem:[%s16206_s4 + $0x8c] sm:$0xf]  ;;  %v9412_v51 = vor.u32 %v10711_v43, %v9411_v45  ;;  %v9365_v45 = vld [vmem:[%s16206_s4 + $0x38] sm:$0xf0] }
 0x45f   :  { %v4378_v59 = vmul.f32 %v4372_v8, %v14273_v32  ;;  %v4379_v14 = vmul.f32 %v10979_v9, %v4368_v58  ;;  %5191 = vmatpush.bf16.msrb.mxu1 %v9214_v34  ;;  %v10717_v58 = vld [vmem:[%s16206_s4 + $0xcc] sm:$0xf]  ;;  %v9419_v8 = vld [vmem:[%s16206_s4 + $0xa0] sm:$0xf]  ;;  %v9444_v34 = vor.u32 %v10719_v55, %v9443_v36  ;;  %v9397_v55 = vld [vmem:[%s16206_s4 + $0x78] sm:$0xf0] }
 0x460   :  { %v10981_v26 = vpop.eup %10980  ;;  %5217 = vmatpush.bf16.msrb.mxu3 %v9222_v16  ;;  %v10705_v36 = vld [vmem:[%s16206_s4 + $0x6c] sm:$0xf] }
 0x461   :  { %v14897_v27 = vadd.f32 %v4379_v14, %v4378_v59  ;;  %v4376_v32 = vmul.f32 0.5, %v10981_v26  ;;  %v10715_v59 = vld [vmem:[%s16206_s4 + $0xb4] sm:$0xf0]  ;;  %v10713_v14 = vld [vmem:[%s16206_s4 + $0xac] sm:$0xf]  ;;  %v9420_v26 = vor.u32 %v10714_v46, %v9419_v8 }
 0x462   :  { %v9428_v47 = vor.u32 %v10715_v59, %v9427_v11  ;;  %v9432_v10 = vor.u32 %v10713_v14, %v9429_v24  ;;  %v10702_v46 = vld [vmem:[%s16206_s4 + $0x4c] sm:$0xf0]  ;;  %v10703_v59 = vld [vmem:[%s16206_s4 + $0x54] sm:$0xf0]  ;;  %v10701_v14 = vld [vmem:[%s16206_s4 + $0x4c] sm:$0xf] }
 0x463   :  { %10982 = vtanh.f32 %v14897_v27  ;;  %v14900_v29 = vpop.f32.mrf.mxu2  ;;  %v14902_v33 = vpop.f32.mrf.mxu3  ;;  %v4377_v17 = vadd.f32 0.5, %v4376_v32  ;;  %v9381_v24 = vld [vmem:[%s16206_s4 + $0x58] sm:$0xf0]  ;;  %v5251_v43 = vld [vmem:[%s16207_s3 + $0x8] sm:$0xff] }
 0x464   :  { %v4593_v37 = vpop.f32.mrf.mxu0  ;;  %v4606_v1 = vpop.f32.mrf.mxu1 }
 0x469   :  { %v10983_v38 = vpop.eup %10982 }
 0x46a   :  { %v4382_v5 = vmul.f32 %v10983_v38, %v4377_v17  ;;  %v10710_v38 = vld [vmem:[%s16206_s4 + $0x8c] sm:$0xf0] }
 0x46b   :  { %v4619_v63 = vpop.f32.mrf.mxu2  ;;  %v4632_v35 = vpop.f32.mrf.mxu3 }
 0x46c   :  { %8945 = vst [vmem:[%s16215_s9 + $0x20] sm:$0xff] %v4382_v5  ;;  %v4766_v39 = vpack.c.bf16 %v4382_v5, %v4382_v5  ;;  %v4668_v44 = vpop.f32.mrf.mxu0  ;;  %v4681_v18 = vpop.f32.mrf.mxu1  ;;  %v9413_v63 = vld [vmem:[%s16206_s4 + $0x98] sm:$0xf0]  ;;  %v9387_v35 = vld [vmem:[%s16206_s4 + $0x60] sm:$0xf] }
 0x46d   :  { %v4669_v41 = vadd.f32 %v4668_v44, %v4591_v40  ;;  %v4682_v42 = vadd.f32 %v4681_v18, %v4604_v21  ;;  %v9445_v40 = vld [vmem:[%s16206_s4 + $0xd8] sm:$0xf0]  ;;  %v9404_v44 = vor.u32 %v10710_v38, %v9403_v31  ;;  %v9384_v38 = vor.u32 %v10701_v14, %v9381_v24  ;;  %v9583_v14 = vld [vmem:[%s16209_s6 + $0xe0] sm:$0xf]  ;;  %v10786_v24 = vld [vmem:[%s16209_s6 + $0xec] sm:$0xf0] }
 0x46e   :  { %4967 = vmatmul.bf16.vlgmr.msra.gmra.mxu0 %v4766_v39  ;;  %4980 = vmatmul.bf16.vlgmr.msra.gmra.mxu1 %v4766_v39  ;;  %v9448_v54 = vor.u32 %v10717_v58, %v9445_v40 }
 0x46f   :  { %v4711_v21 = vadd.f32 %v4669_v41, %v11816_v56  ;;  %v4712_v25 = vadd.f32 %v4682_v42, %v11824_v0  ;;  %4993 = vmatmul.bf16.vlgmr.msra.gmra.mxu2 %v4766_v39  ;;  %5006 = vmatmul.bf16.vlgmr.msra.gmra.mxu3 %v4766_v39  ;;  %v9416_v41 = vor.u32 %v10709_v60, %v9413_v63  ;;  %v9389_v42 = vld [vmem:[%s16206_s4 + $0x70] sm:$0xf0] }
 0x470   :  { %5444 = vmatpush.bf16.msra.mxu0 %v9452_v48  ;;  %5457 = vmatpush.bf16.msra.mxu1 %v9456_v12  ;;  %v10706_v48 = vld [vmem:[%s16206_s4 + $0x6c] sm:$0xf0]  ;;  %v10704_v12 = vld [vmem:[%s16206_s4 + $0x64] sm:$0xf] }
 0x471   :  { %v4715_v50 = vmul.f32 0.5, %v4711_v21  ;;  %v4719_v9 = vmul.f32 0.5, %v4712_v25  ;;  %5470 = vmatpush.bf16.msra.mxu2 %v9460_v52  ;;  %5483 = vmatpush.bf16.msra.mxu3 %v9464_v61  ;;  %v9395_v52 = vld [vmem:[%s16206_s4 + $0x68] sm:$0xf]  ;;  %v10707_v61 = vld [vmem:[%s16206_s4 + $0x74] sm:$0xf0]  ;;  %v9392_v8 = vor.u32 %v10704_v12, %v9389_v42 }
 0x472   :  { %v9371_v25 = vld [vmem:[%s16206_s4 + $0x40] sm:$0xf]  ;;  %v9341_v12 = vld [vmem:[%s16206_s4 + $0x10] sm:$0xf0] }
 0x473   :  { %10984 = vtanh.f32 %v4715_v50  ;;  %v4694_v15 = vpop.f32.mrf.mxu2  ;;  %v4707_v16 = vpop.f32.mrf.mxu3 }
 0x474   :  { %10986 = vtanh.f32 %v4719_v9  ;;  %v4695_v32 = vadd.f32 %v4694_v15, %v14900_v29  ;;  %v4708_v37 = vadd.f32 %v4707_v16, %v14902_v33  ;;  %v4670_v1 = vpop.f32.mrf.mxu0  ;;  %v4683_v17 = vpop.f32.mrf.mxu1  ;;  %5445 = vmatpush.bf16.msra.mxu0 %v9436_v4  ;;  %5458 = vmatpush.bf16.msra.mxu1 %v9440_v7  ;;  %v10708_v29 = vld [vmem:[%s16206_s4 + $0x84] sm:$0xf]  ;;  %v9405_v33 = vld [vmem:[%s16206_s4 + $0x90] sm:$0xf0]  ;;  %v9388_v7 = vor.u32 %v10706_v48, %v9387_v35 }
 0x475   :  { %5471 = vmatpush.bf16.msra.mxu2 %v9444_v34  ;;  %5484 = vmatpush.bf16.msra.mxu3 %v9448_v54  ;;  %v9408_v18 = vor.u32 %v10708_v29, %v9405_v33  ;;  %v9396_v9 = vor.u32 %v10707_v61, %v9395_v52  ;;  %v9400_v34 = vor.u32 %v10705_v36, %v9397_v55  ;;  %v9373_v54 = vld [vmem:[%s16206_s4 + $0x50] sm:$0xf0]  ;;  %v10698_v1 = vld [vmem:[%s16206_s4 + $0x2c] sm:$0xf0]  ;;  %v10696_v17 = vld [vmem:[%s16206_s4 + $0x24] sm:$0xf] }
 0x476   :  { %v4713_v5 = vadd.f32 %v4695_v32, %v11866_v23  ;;  %v4714_v6 = vadd.f32 %v4708_v37, %v11874_v28  ;;  %v9376_v32 = vor.u32 %v10700_v22, %v9373_v54  ;;  %v9355_v37 = vld [vmem:[%s16206_s4 + $0x20] sm:$0xf]  ;;  %v10699_v29 = vld [vmem:[%s16206_s4 + $0x34] sm:$0xf0]  ;;  %v10697_v33 = vld [vmem:[%s16206_s4 + $0x2c] sm:$0xf] }
 0x477   :  { %v9356_v63 = vor.u32 %v10698_v1, %v9355_v37  ;;  %v9368_v48 = vor.u32 %v10697_v33, %v9365_v45  ;;  %v10693_v52 = vld [vmem:[%s16206_s4 + $0xc] sm:$0xf]  ;;  %v9349_v61 = vld [vmem:[%s16206_s4 + $0x18] sm:$0xf0]  ;;  %v10787_v37 = vld [vmem:[%s16209_s6 + $0xf4] sm:$0xf0] }
 0x478   :  { %10988 = vtanh.f32 %v4713_v5  ;;  %v4724_v39 = vmul.f32 0.5, %v4714_v6  ;;  %5446 = vmatpush.bf16.msra.mxu0 %v9420_v26  ;;  %5459 = vmatpush.bf16.msra.mxu1 %v9424_v49  ;;  %v9372_v26 = vor.u32 %v10702_v46, %v9371_v25  ;;  %v5250_v5 = vld [vmem:[%s16207_s3] sm:$0xff]  ;;  %v9352_v25 = vor.u32 %v10693_v52, %v9349_v61  ;;  %v9569_v33 = vld [vmem:[%s16209_s6 + $0xd0] sm:$0xf0] }
 0x479   :  { %v10985_v53 = vpop.eup %10984  ;;  %5472 = vmatpush.bf16.msra.mxu2 %v9428_v47  ;;  %5485 = vmatpush.bf16.msra.mxu3 %v9432_v10  ;;  %v9357_v47 = vld [vmem:[%s16206_s4 + $0x30] sm:$0xf0]  ;;  %v9363_v10 = vld [vmem:[%s16206_s4 + $0x28] sm:$0xf]  ;;  %v9339_v6 = vld [vmem:[%s16206_s4] sm:$0xf]  ;;  %v5499_v42 = vunpack.c.h.b16 %v5250_v5 }
 0x47a   :  { %v10987_v62 = vpop.eup %10986  ;;  %v4717_v20 = vmul.f32 0.5, %v10985_v53  ;;  %10990 = vtanh.f32 %v4724_v39  ;;  %v9360_v35 = vor.u32 %v10696_v17, %v9357_v47  ;;  %v10694_v39 = vld [vmem:[%s16206_s4 + $0xc] sm:$0xf0]  ;;  %v9347_v53 = vld [vmem:[%s16206_s4 + $0x8] sm:$0xf] }
 0x47b   :  { %v4721_v58 = vmul.f32 0.5, %v10987_v62  ;;  %v4696_v40 = vpop.f32.mrf.mxu2  ;;  %v4709_v21 = vpop.f32.mrf.mxu3  ;;  %v5500_v62 = vunpack.c.l.b16 %v5251_v43  ;;  %v9340_v55 = vor.u32 %v10694_v39, %v9339_v6  ;;  %v9575_v6 = vld [vmem:[%s16209_s6 + $0xc8] sm:$0xf] }
 0x47c   :  { %v4718_v4 = vadd.f32 0.5, %v4717_v20  ;;  %5447 = vmatpush.bf16.msra.mxu0 %v9404_v44  ;;  %5460 = vmatpush.bf16.msra.mxu1 %v9408_v18  ;;  %v10692_v44 = vld [vmem:[%s16206_s4 + $0x4] sm:$0xf]  ;;  %v9364_v18 = vor.u32 %v10699_v29, %v9363_v10  ;;  %v5501_v20 = vunpack.c.h.b16 %v5251_v43  ;;  %v10782_v10 = vld [vmem:[%s16209_s6 + $0xcc] sm:$0xf0] }
 0x47d   :  { %v4722_v50 = vadd.f32 0.5, %v4721_v58  ;;  %5473 = vmatpush.bf16.msra.mxu2 %v9412_v51  ;;  %5486 = vmatpush.bf16.msra.mxu3 %v9416_v41  ;;  %v10695_v51 = vld [vmem:[%s16206_s4 + $0x14] sm:$0xf0]  ;;  %v5498_v41 = vunpack.c.l.b16 %v5250_v5  ;;  %v9344_v58 = vor.u32 %v10692_v44, %v9341_v12  ;;  %v5504_v46 = vpack.c.b16 %v5500_v62, %v5500_v62  ;;  %v10780_v29 = vld [vmem:[%s16209_s6 + $0xc4] sm:$0xf] }
 0x47e   :  { %v10989_v11 = vpop.eup %10988  ;;  %v9348_v40 = vor.u32 %v10695_v51, %v9347_v53  ;;  %v5505_v22 = vpack.c.b16 %v5501_v20, %v5501_v20  ;;  %v9572_v5 = vor.u32 %v10780_v29, %v9569_v33  ;;  %v10783_v43 = vld [vmem:[%s16209_s6 + $0xd4] sm:$0xf0]  ;;  %v9551_v44 = vld [vmem:[%s16209_s6 + $0xa0] sm:$0xf]  ;;  %v9553_v53 = vld [vmem:[%s16209_s6 + $0xb0] sm:$0xf0] }
 0x47f   :  { %v4728_v15 = vmul.f32 %v4722_v50, %v14440_v30  ;;  %v4729_v16 = vmul.f32 %v10989_v11, %v4718_v4  ;;  %v9380_v30 = vor.u32 %v10703_v59, %v9379_v57  ;;  %v5502_v4 = vpack.c.b16 %v5498_v41, %v5498_v41  ;;  %v9336_v11 = vld [vmem:[%s16210_s0 + $0x30] sm:$0xff]  ;;  %v9559_v51 = vld [vmem:[%s16209_s6 + $0xa8] sm:$0xf]  ;;  %v10779_v41 = vld [vmem:[%s16209_s6 + $0xb4] sm:$0xf0] }
 0x480   :  { %5448 = vmatpush.bf16.msra.mxu0 %v9388_v7  ;;  %5461 = vmatpush.bf16.msra.mxu1 %v9392_v8  ;;  %v10991_v49 = vpop.eup %10990  ;;  %v5503_v7 = vpack.c.b16 %v5499_v42, %v5499_v42  ;;  %v15122_v54 = vsel %vm337_vm0, %v5504_v46, 0  ;;  %v15125_v57 = vsel %vm337_vm0, %v5505_v22, 0  ;;  %v5249_v59 = vpack.c.bf16 %v9336_v11, %v9336_v11  ;;  %v10777_v20 = vld [vmem:[%s16209_s6 + $0xac] sm:$0xf]  ;;  %v9545_v11 = vld [vmem:[%s16209_s6 + $0x98] sm:$0xf0] }
 0x481   :  { %v15067_v31 = vadd.f32 %v4729_v16, %v4728_v15  ;;  %5474 = vmatpush.bf16.msra.mxu2 %v9396_v9  ;;  %5487 = vmatpush.bf16.msra.mxu3 %v9400_v34  ;;  %v4726_v60 = vmul.f32 0.5, %v10991_v49  ;;  %v15116_v9 = vsel %vm337_vm0, %v5502_v4, 0  ;;  %v10784_v15 = vld [vmem:[%s16209_s6 + $0xe4] sm:$0xf]  ;;  %v9584_v16 = vor.u32 %v10786_v24, %v9583_v14  ;;  %v10785_v49 = vld [vmem:[%s16209_s6 + $0xec] sm:$0xf] }
 0x482   :  { %v15119_v34 = vsel %vm337_vm0, %v5503_v7, 0  ;;  %v9560_v62 = vor.u32 %v10779_v41, %v9559_v51  ;;  %v9537_v4 = vld [vmem:[%s16209_s6 + $0x90] sm:$0xf0]  ;;  %v9543_v7 = vld [vmem:[%s16209_s6 + $0x88] sm:$0xf] }
 0x483   :  { %10992 = vtanh.f32 %v15067_v31  ;;  %v4727_v36 = vadd.f32 0.5, %v4726_v60  ;;  %v10781_v60 = vld [vmem:[%s16209_s6 + $0xcc] sm:$0xf]  ;;  %v9519_v14 = vld [vmem:[%s16209_s6 + $0x60] sm:$0xf] }
 0x484   :  { %5449 = vmatpush.bf16.msra.mxu0 %v9372_v26  ;;  %5462 = vmatpush.bf16.msra.mxu1 %v9376_v32  ;;  %v9585_v26 = vld [vmem:[%s16209_s6 + $0xf0] sm:$0xf0]  ;;  %v9591_v32 = vld [vmem:[%s16209_s6 + $0xe8] sm:$0xf]  ;;  %v10770_v24 = vld [vmem:[%s16209_s6 + $0x6c] sm:$0xf0] }
 0x485   :  { %5475 = vmatpush.bf16.msra.mxu2 %v9380_v30  ;;  %5488 = vmatpush.bf16.msra.mxu3 %v9384_v38  ;;  %v9588_v1 = vor.u32 %v10784_v15, %v9585_v26  ;;  %v9592_v17 = vor.u32 %v10787_v37, %v9591_v32  ;;  %v9593_v30 = vld [vmem:[%s16209_s6 + $0xf8] sm:$0xf0]  ;;  %v9567_v38 = vld [vmem:[%s16209_s6 + $0xc0] sm:$0xf]  ;;  %v10768_v15 = vld [vmem:[%s16209_s6 + $0x64] sm:$0xf]  ;;  %v9520_v32 = vor.u32 %v10770_v24, %v9519_v14 }
 0x486   :  { %v9596_v47 = vor.u32 %v10785_v49, %v9593_v30  ;;  %v9568_v45 = vor.u32 %v10782_v10, %v9567_v38  ;;  %v9521_v37 = vld [vmem:[%s16209_s6 + $0x70] sm:$0xf0]  ;;  %v10769_v10 = vld [vmem:[%s16209_s6 + $0x6c] sm:$0xf]  ;;  %v9529_v29 = vld [vmem:[%s16209_s6 + $0x78] sm:$0xf0] }
 0x487   :  { %v9524_v38 = vor.u32 %v10768_v15, %v9521_v37  ;;  %v9532_v33 = vor.u32 %v10769_v10, %v9529_v29  ;;  %v10762_v51 = vld [vmem:[%s16209_s6 + $0x2c] sm:$0xf0]  ;;  %v10760_v41 = vld [vmem:[%s16209_s6 + $0x24] sm:$0xf]  ;;  %v10759_v14 = vld [vmem:[%s16209_s6 + $0x14] sm:$0xf0] }
 0x488   :  { %5450 = vmatpush.bf16.msra.mxu0 %v9356_v63  ;;  %5463 = vmatpush.bf16.msra.mxu1 %v9360_v35  ;;  %v9576_v63 = vor.u32 %v10783_v43, %v9575_v6  ;;  %v9577_v35 = vld [vmem:[%s16209_s6 + $0xd8] sm:$0xf0]  ;;  %v10764_v6 = vld [vmem:[%s16209_s6 + $0x44] sm:$0xf]  ;;  %v9719_v29 = vld [vmem:[%s16211_s5 + $0xe8] sm:$0xf] }
 0x489   :  { %v10993_v21 = vpop.eup %10992  ;;  %5476 = vmatpush.bf16.msra.mxu2 %v9364_v18  ;;  %5489 = vmatpush.bf16.msra.mxu3 %v9368_v48  ;;  %v9580_v39 = vor.u32 %v10781_v60, %v9577_v35  ;;  %v10778_v18 = vld [vmem:[%s16209_s6 + $0xac] sm:$0xf0]  ;;  %v10776_v48 = vld [vmem:[%s16209_s6 + $0xa4] sm:$0xf]  ;;  %v9505_v60 = vld [vmem:[%s16209_s6 + $0x50] sm:$0xf0] }
 0x48a   :  { %v4732_v8 = vmul.f32 %v10993_v21, %v4727_v36  ;;  %v9552_v12 = vor.u32 %v10778_v18, %v9551_v44  ;;  %v9556_v61 = vor.u32 %v10776_v48, %v9553_v53  ;;  %v9561_v36 = vld [vmem:[%s16209_s6 + $0xb8] sm:$0xf0]  ;;  %v10772_v21 = vld [vmem:[%s16209_s6 + $0x84] sm:$0xf]  ;;  %v10767_v35 = vld [vmem:[%s16209_s6 + $0x54] sm:$0xf0] }
 0x48b   :  { %v9540_v46 = vor.u32 %v10772_v21, %v9537_v4  ;;  %v10765_v18 = vld [vmem:[%s16209_s6 + $0x4c] sm:$0xf]  ;;  %v9513_v48 = vld [vmem:[%s16209_s6 + $0x58] sm:$0xf0]  ;;  %v9487_v53 = vld [vmem:[%s16209_s6 + $0x20] sm:$0xf] }
 0x48c   :  { %v4733_v50 = vpack.c.bf16 %v4732_v8, %v4732_v8  ;;  %5451 = vmatpush.bf16.msra.mxu0 %v9340_v55  ;;  %5464 = vmatpush.bf16.msra.mxu1 %v9344_v58  ;;  %v9564_v55 = vor.u32 %v10777_v20, %v9561_v36  ;;  %v9535_v58 = vld [vmem:[%s16209_s6 + $0x80] sm:$0xf]  ;;  %v10775_v8 = vld [vmem:[%s16209_s6 + $0x94] sm:$0xf0]  ;;  %v9488_v20 = vor.u32 %v10762_v51, %v9487_v53  ;;  %v9489_v36 = vld [vmem:[%s16209_s6 + $0x30] sm:$0xf0] }
 0x48d   :  { %5477 = vmatpush.bf16.msra.mxu2 %v9348_v40  ;;  %5490 = vmatpush.bf16.msra.mxu3 %v9352_v25  ;;  %v10774_v40 = vld [vmem:[%s16209_s6 + $0x8c] sm:$0xf0]  ;;  %v9544_v22 = vor.u32 %v10775_v8, %v9543_v7  ;;  %v9497_v4 = vld [vmem:[%s16209_s6 + $0x38] sm:$0xf0]  ;;  %v9471_v8 = vld [vmem:[%s16209_s6] sm:$0xf] }
 0x48e   :  { %5179 = vmatmul.bf16.vlgmr.msrb.gmra.mxu0 %v4733_v50  ;;  %5192 = vmatmul.bf16.vlgmr.msrb.gmra.mxu1 %v4733_v50  ;;  %v9536_v25 = vor.u32 %v10774_v40, %v9535_v58  ;;  %v10763_v58 = vld [vmem:[%s16209_s6 + $0x34] sm:$0xf0]  ;;  %v9492_v40 = vor.u32 %v10760_v41, %v9489_v36  ;;  %v9481_v37 = vld [vmem:[%s16209_s6 + $0x18] sm:$0xf0]  ;;  %v10749_v53 = vld [vmem:[%s16211_s5 + $0xcc] sm:$0xf] }
 0x48f   :  { %5205 = vmatmul.bf16.vlgmr.msrb.gmra.mxu2 %v4733_v50  ;;  %5218 = vmatmul.bf16.vlgmr.msrb.gmra.mxu3 %v4733_v50  ;;  %v9705_v51 = vld [vmem:[%s16211_s5 + $0xd8] sm:$0xf0]  ;;  %v10744_v36 = vld [vmem:[%s16211_s5 + $0xa4] sm:$0xf] }
 0x490   :  { %5528 = vmatpush.bf16.msrb.mxu0 %v15116_v9  ;;  %5541 = vmatpush.bf16.msrb.mxu1 %v15119_v34 }
 0x491   :  { %5554 = vmatpush.bf16.msrb.mxu2 %v15122_v54  ;;  %5567 = vmatpush.bf16.msrb.mxu3 %v15125_v57 }
 0x49e   :  { %5452 = vmatmul.bf16.vlgmr.msra.gmra.mxu0 %v4733_v50  ;;  %5465 = vmatmul.bf16.vlgmr.msra.gmra.mxu1 %v4733_v50 }
 0x49f   :  { %5478 = vmatmul.bf16.vlgmr.msra.gmra.mxu2 %v4733_v50  ;;  %5491 = vmatmul.bf16.vlgmr.msra.gmra.mxu3 %v4733_v50  ;;  %v10773_v50 = vld [vmem:[%s16209_s6 + $0x8c] sm:$0xf] }
 0x4a0   :  { %5821 = vmatpush.bf16.msra.mxu0 %v9584_v16  ;;  %5834 = vmatpush.bf16.msra.mxu1 %v9588_v1  ;;  %v9527_v1 = vld [vmem:[%s16209_s6 + $0x68] sm:$0xf] }
 0x4a1   :  { %5847 = vmatpush.bf16.msra.mxu2 %v9592_v17  ;;  %5860 = vmatpush.bf16.msra.mxu3 %v9596_v47  ;;  %v10771_v17 = vld [vmem:[%s16209_s6 + $0x74] sm:$0xf0] }
 0x4a2   :  { %v9528_v47 = vor.u32 %v10771_v17, %v9527_v1  ;;  %v9711_v1 = vld [vmem:[%s16211_s5 + $0xe0] sm:$0xf] }
 0x4a4   :  { %5822 = vmatpush.bf16.msra.mxu0 %v9568_v45  ;;  %5835 = vmatpush.bf16.msra.mxu1 %v9572_v5  ;;  %v9503_v45 = vld [vmem:[%s16209_s6 + $0x40] sm:$0xf]  ;;  %v10766_v5 = vld [vmem:[%s16209_s6 + $0x4c] sm:$0xf0] }
 0x4a5   :  { %5848 = vmatpush.bf16.msra.mxu2 %v9576_v63  ;;  %5861 = vmatpush.bf16.msra.mxu3 %v9580_v39  ;;  %v9504_v43 = vor.u32 %v10766_v5, %v9503_v45  ;;  %v9511_v63 = vld [vmem:[%s16209_s6 + $0x48] sm:$0xf]  ;;  %v9508_v39 = vor.u32 %v10764_v6, %v9505_v60  ;;  %v10753_v45 = vld [vmem:[%s16211_s5 + $0xec] sm:$0xf]  ;;  %v9721_v6 = vld [vmem:[%s16211_s5 + $0xf8] sm:$0xf0] }
 0x4a6   :  { %v9512_v44 = vor.u32 %v10767_v35, %v9511_v63  ;;  %v10750_v60 = vld [vmem:[%s16211_s5 + $0xcc] sm:$0xf0]  ;;  %v9724_v63 = vor.u32 %v10753_v45, %v9721_v6  ;;  %v10736_v45 = vld [vmem:[%s16211_s5 + $0x64] sm:$0xf] }
 0x4a8   :  { %5823 = vmatpush.bf16.msra.mxu0 %v9552_v12  ;;  %5836 = vmatpush.bf16.msra.mxu1 %v9556_v61  ;;  %v9516_v12 = vor.u32 %v10765_v18, %v9513_v48  ;;  %v9703_v18 = vld [vmem:[%s16211_s5 + $0xc8] sm:$0xf] }
 0x4a9   :  { %5849 = vmatpush.bf16.msra.mxu2 %v9560_v62  ;;  %5862 = vmatpush.bf16.msra.mxu3 %v9564_v55  ;;  %v9495_v55 = vld [vmem:[%s16209_s6 + $0x28] sm:$0xf] }
 0x4aa   :  { %v9496_v21 = vor.u32 %v10763_v58, %v9495_v55  ;;  %v9681_v58 = vld [vmem:[%s16211_s5 + $0xb0] sm:$0xf0] }
 0x4ac   :  { %5824 = vmatpush.bf16.msra.mxu0 %v9536_v25  ;;  %5837 = vmatpush.bf16.msra.mxu1 %v9540_v46  ;;  %v10761_v25 = vld [vmem:[%s16209_s6 + $0x2c] sm:$0xf]  ;;  %v10758_v46 = vld [vmem:[%s16209_s6 + $0xc] sm:$0xf0] }
 0x4ad   :  { %5850 = vmatpush.bf16.msra.mxu2 %v9544_v22  ;;  %v9500_v7 = vor.u32 %v10761_v25, %v9497_v4  ;;  %v10756_v22 = vld [vmem:[%s16209_s6 + $0x4] sm:$0xf]  ;;  %v9684_v25 = vor.u32 %v10744_v36, %v9681_v58  ;;  %v9631_v36 = vld [vmem:[%s16211_s5 + $0x40] sm:$0xf] }
 0x4ae   :  { %9465 = vmatmul.msk.bf16.vlgmr.msrb.gmra.mxu0 %vm333_vm1, %v5249_v59  ;;  %9466 = vmatmul.msk.bf16.vlgmr.msrb.gmra.mxu1 %vm333_vm1, %v5249_v59  ;;  %v10732_v58 = vld [vmem:[%s16211_s5 + $0x44] sm:$0xf] }
 0x4af   :  { %9467 = vmatmul.msk.bf16.vlgmr.msrb.gmra.mxu2 %vm333_vm1, %v5249_v59  ;;  %9468 = vmatmul.msk.bf16.vlgmr.msrb.gmra.mxu3 %vm333_vm1, %v5249_v59  ;;  %v9548_v59 = vor.u32 %v10773_v50, %v9545_v11  ;;  %v9472_v50 = vor.u32 %v10758_v46, %v9471_v8  ;;  %v9473_v11 = vld [vmem:[%s16209_s6 + $0x10] sm:$0xf0]  ;;  %v9689_v8 = vld [vmem:[%s16211_s5 + $0xb8] sm:$0xf0] }
 0x4b0   :  { %5825 = vmatpush.bf16.msra.mxu0 %v9520_v32  ;;  %5838 = vmatpush.bf16.msra.mxu1 %v9524_v38  ;;  %v9476_v24 = vor.u32 %v10756_v22, %v9473_v11  ;;  %v10757_v32 = vld [vmem:[%s16209_s6 + $0xc] sm:$0xf]  ;;  %v9713_v38 = vld [vmem:[%s16211_s5 + $0xf0] sm:$0xf0]  ;;  %v9663_v11 = vld [vmem:[%s16211_s5 + $0x80] sm:$0xf] }
 0x4b1   :  { %5863 = vmatpush.bf16.msra.mxu3 %v9548_v59  ;;  %5851 = vmatpush.bf16.msra.mxu2 %v9528_v47  ;;  %v9479_v59 = vld [vmem:[%s16209_s6 + $0x8] sm:$0xf]  ;;  %v9484_v17 = vor.u32 %v10757_v32, %v9481_v37  ;;  %v9665_v37 = vld [vmem:[%s16211_s5 + $0x90] sm:$0xf0] }
 0x4b2   :  { %v9480_v15 = vor.u32 %v10759_v14, %v9479_v59  ;;  %v10742_v59 = vld [vmem:[%s16211_s5 + $0x8c] sm:$0xf0]  ;;  %v10740_v14 = vld [vmem:[%s16211_s5 + $0x84] sm:$0xf] }
 0x4b3   :  { %v9664_v32 = vor.u32 %v10742_v59, %v9663_v11  ;;  %v9615_v59 = vld [vmem:[%s16211_s5 + $0x20] sm:$0xf] }
 0x4b4   :  { %5826 = vmatpush.bf16.msra.mxu0 %v9504_v43  ;;  %5839 = vmatpush.bf16.msra.mxu1 %v9508_v39  ;;  %v9695_v43 = vld [vmem:[%s16211_s5 + $0xc0] sm:$0xf]  ;;  %v10748_v39 = vld [vmem:[%s16211_s5 + $0xc4] sm:$0xf] }
 0x4b5   :  { %5864 = vmatpush.bf16.msra.mxu3 %v9532_v33  ;;  %5852 = vmatpush.bf16.msra.mxu2 %v9512_v44  ;;  %v10755_v33 = vld [vmem:[%s16211_s5 + $0xf4] sm:$0xf0]  ;;  %v9696_v35 = vor.u32 %v10750_v60, %v9695_v43  ;;  %v9697_v44 = vld [vmem:[%s16211_s5 + $0xd0] sm:$0xf0] }
 0x4b6   :  { %v9720_v5 = vor.u32 %v10755_v33, %v9719_v29  ;;  %v9700_v48 = vor.u32 %v10748_v39, %v9697_v44  ;;  %v9647_v29 = vld [vmem:[%s16211_s5 + $0x60] sm:$0xf]  ;;  %v10738_v33 = vld [vmem:[%s16211_s5 + $0x6c] sm:$0xf0]  ;;  %v9649_v60 = vld [vmem:[%s16211_s5 + $0x70] sm:$0xf0] }
 0x4b7   :  { %v9648_v43 = vor.u32 %v10738_v33, %v9647_v29  ;;  %v10739_v39 = vld [vmem:[%s16211_s5 + $0x74] sm:$0xf0]  ;;  %v10737_v44 = vld [vmem:[%s16211_s5 + $0x6c] sm:$0xf]  ;;  %v9625_v33 = vld [vmem:[%s16211_s5 + $0x38] sm:$0xf0] }
 0x4b8   :  { %5827 = vmatpush.bf16.msra.mxu0 %v9488_v20  ;;  %5840 = vmatpush.bf16.msra.mxu1 %v9492_v40  ;;  %v10746_v20 = vld [vmem:[%s16211_s5 + $0xac] sm:$0xf0]  ;;  %v9687_v40 = vld [vmem:[%s16211_s5 + $0xa8] sm:$0xf] }
 0x4b9   :  { %5865 = vmatpush.bf16.msra.mxu3 %v9516_v12  ;;  %5853 = vmatpush.bf16.msra.mxu2 %v9496_v21  ;;  %v10751_v12 = vld [vmem:[%s16211_s5 + $0xd4] sm:$0xf0] }
 0x4ba   :  { %v9704_v41 = vor.u32 %v10751_v12, %v9703_v18  ;;  %v10747_v21 = vld [vmem:[%s16211_s5 + $0xb4] sm:$0xf0]  ;;  %v9657_v18 = vld [vmem:[%s16211_s5 + $0x78] sm:$0xf0] }
 0x4bb   :  { %v9688_v4 = vor.u32 %v10747_v21, %v9687_v40  ;;  %v9639_v40 = vld [vmem:[%s16211_s5 + $0x48] sm:$0xf]  ;;  %v10735_v21 = vld [vmem:[%s16211_s5 + $0x54] sm:$0xf0] }
 0x4bc   :  { %5828 = vmatpush.bf16.msra.mxu0 %v9472_v50  ;;  %5841 = vmatpush.bf16.msra.mxu1 %v9476_v24 }
 0x4bd   :  { %5866 = vmatpush.bf16.msra.mxu3 %v9500_v7  ;;  %5854 = vmatpush.bf16.msra.mxu2 %v9480_v15  ;;  %v10745_v7 = vld [vmem:[%s16211_s5 + $0xac] sm:$0xf] }
 0x4be   :  { %v9692_v46 = vor.u32 %v10745_v7, %v9689_v8  ;;  %v9640_v8 = vor.u32 %v10735_v21, %v9639_v40 }
 0x4c1   :  { %5867 = vmatpush.bf16.msra.mxu3 %v9484_v17  ;;  %6059 = vmatpush.bf16.msrb.mxu2 %v9720_v5  ;;  %v10743_v17 = vld [vmem:[%s16211_s5 + $0x94] sm:$0xf0] }
 0x4c5   :  { %6072 = vmatpush.bf16.msrb.mxu3 %v9724_v63  ;;  %6060 = vmatpush.bf16.msrb.mxu2 %v9704_v41  ;;  %v9655_v63 = vld [vmem:[%s16211_s5 + $0x68] sm:$0xf] }
 0x4c9   :  { %6061 = vmatpush.bf16.msrb.mxu2 %v9688_v4 }
 0x4eb   :  { %v15204_v42 = vpop.f32.mrf.mxu0  ;;  %v15206_v52 = vpop.f32.mrf.mxu1 }
 0x4f2   :  { %v15247_v16 = vpop.f32.mrf.mxu2  ;;  %v15249_v26 = vpop.f32.mrf.mxu3 }
 0x4f3   :  { %v4970_v49 = vpop.f32.mrf.mxu0  ;;  %v4983_v30 = vpop.f32.mrf.mxu1 }
 0x4f4   :  { %v10754_v49 = vld [vmem:[%s16211_s5 + $0xec] sm:$0xf0]  ;;  %v10752_v30 = vld [vmem:[%s16211_s5 + $0xe4] sm:$0xf] }
 0x4f5   :  { %v9712_v47 = vor.u32 %v10754_v49, %v9711_v1  ;;  %v9716_v10 = vor.u32 %v10752_v30, %v9713_v38  ;;  %v9671_v1 = vld [vmem:[%s16211_s5 + $0x88] sm:$0xf]  ;;  %v9668_v49 = vor.u32 %v10740_v14, %v9665_v37  ;;  %v10730_v14 = vld [vmem:[%s16211_s5 + $0x2c] sm:$0xf0]  ;;  %v9617_v37 = vld [vmem:[%s16211_s5 + $0x30] sm:$0xf0] }
 0x4f6   :  { %v9672_v30 = vor.u32 %v10743_v17, %v9671_v1  ;;  %v9623_v1 = vld [vmem:[%s16211_s5 + $0x28] sm:$0xf] }
 0x4f7   :  { %6033 = vmatpush.bf16.msrb.mxu0 %v9712_v47  ;;  %6046 = vmatpush.bf16.msrb.mxu1 %v9716_v10 }
 0x4f8   :  { %6062 = vmatpush.bf16.msrb.mxu2 %v9672_v30 }
 0x4fa   :  { %v4996_v61 = vpop.f32.mrf.mxu2  ;;  %v5009_v62 = vpop.f32.mrf.mxu3 }
 0x4fb   :  { %v9708_v61 = vor.u32 %v10749_v53, %v9705_v51  ;;  %v9679_v62 = vld [vmem:[%s16211_s5 + $0xa0] sm:$0xf]  ;;  %6034 = vmatpush.bf16.msrb.mxu0 %v9696_v35  ;;  %6047 = vmatpush.bf16.msrb.mxu1 %v9700_v48  ;;  %v9652_v35 = vor.u32 %v10736_v45, %v9649_v60  ;;  %v9656_v53 = vor.u32 %v10739_v39, %v9655_v63  ;;  %v10726_v63 = vld [vmem:[%s16211_s5 + $0xc] sm:$0xf0] }
 0x4fc   :  { %v9680_v55 = vor.u32 %v10746_v20, %v9679_v62  ;;  %v9660_v51 = vor.u32 %v10737_v44, %v9657_v18  ;;  %v9599_v60 = vld [vmem:[%s16211_s5] sm:$0xf]  ;;  %v10724_v44 = vld [vmem:[%s16211_s5 + $0x4] sm:$0xf]  ;;  %v9601_v18 = vld [vmem:[%s16211_s5 + $0x10] sm:$0xf0] }
 0x4fd   :  { %6073 = vmatpush.bf16.msrb.mxu3 %v9708_v61  ;;  %6063 = vmatpush.bf16.msrb.mxu2 %v9656_v53  ;;  %v9600_v39 = vor.u32 %v10726_v63, %v9599_v60  ;;  %v9607_v53 = vld [vmem:[%s16211_s5 + $0x8] sm:$0xf]  ;;  %v9835_v63 = vld [vmem:[%s16206_s4 + $0xd8] sm:$0xf0] }
 0x4fe   :  { %v9833_v60 = vld [vmem:[%s16206_s4 + $0xc8] sm:$0xf] }
 0x4ff   :  { %6035 = vmatpush.bf16.msrb.mxu0 %v9680_v55  ;;  %6048 = vmatpush.bf16.msrb.mxu1 %v9684_v25  ;;  %v10734_v55 = vld [vmem:[%s16211_s5 + $0x4c] sm:$0xf0] }
 0x501   :  { %6074 = vmatpush.bf16.msrb.mxu3 %v9692_v46  ;;  %v10733_v46 = vld [vmem:[%s16211_s5 + $0x4c] sm:$0xf]  ;;  %6064 = vmatpush.bf16.msrb.mxu2 %v9640_v8  ;;  %v10818_v8 = vld [vmem:[%s16206_s4 + $0xec] sm:$0xf0] }
 0x503   :  { %6036 = vmatpush.bf16.msrb.mxu0 %v9664_v32  ;;  %6049 = vmatpush.bf16.msrb.mxu1 %v9668_v49  ;;  %v10728_v32 = vld [vmem:[%s16211_s5 + $0x24] sm:$0xf] }
 0x504   :  { %v9620_v30 = vor.u32 %v10728_v32, %v9617_v37 }
 0x507   :  { %6037 = vmatpush.bf16.msrb.mxu0 %v9648_v43  ;;  %6050 = vmatpush.bf16.msrb.mxu1 %v9652_v35 }
 0x50b   :  { %v5180_v22 = vpop.f32.mrf.mxu0  ;;  %v5193_v50 = vpop.f32.mrf.mxu1 }
 0x50c   :  { %v5181_v24 = vadd.f32 %v5180_v22, %v15204_v42  ;;  %v5194_v15 = vadd.f32 %v5193_v50, %v15206_v52  ;;  %v10741_v42 = vld [vmem:[%s16211_s5 + $0x8c] sm:$0xf]  ;;  %v9673_v52 = vld [vmem:[%s16211_s5 + $0x98] sm:$0xf0] }
 0x50d   :  { %v9676_v10 = vor.u32 %v10741_v42, %v9673_v52  ;;  %v9641_v22 = vld [vmem:[%s16211_s5 + $0x58] sm:$0xf0]  ;;  %v10731_v42 = vld [vmem:[%s16211_s5 + $0x34] sm:$0xf0]  ;;  %v10729_v52 = vld [vmem:[%s16211_s5 + $0x2c] sm:$0xf] }
 0x50e   :  { %v5223_v38 = vadd.f32 %v5181_v24, %v12226_v2  ;;  %v5224_v47 = vadd.f32 %v5194_v15, %v12228_v3  ;;  %v9644_v50 = vor.u32 %v10733_v46, %v9641_v22  ;;  %v9616_v15 = vor.u32 %v10730_v14, %v9615_v59  ;;  %v10816_v22 = vld [vmem:[%s16206_s4 + $0xe4] sm:$0xf]  ;;  %v10819_v14 = vld [vmem:[%s16206_s4 + $0xf4] sm:$0xf0] }
 0x50f   :  { %6075 = vmatpush.bf16.msrb.mxu3 %v9676_v10  ;;  %v9624_v29 = vor.u32 %v10731_v42, %v9623_v1  ;;  %v9628_v43 = vor.u32 %v10729_v52, %v9625_v33  ;;  %v9825_v52 = vld [vmem:[%s16206_s4 + $0xc0] sm:$0xf] }
 0x510   :  { %v5227_v5 = vmul.f32 0.5, %v5223_v38  ;;  %v5231_v6 = vmul.f32 0.5, %v5224_v47 }
 0x511   :  { %6065 = vmatpush.bf16.msrb.mxu2 %v9624_v29 }
 0x512   :  { %10994 = vtanh.f32 %v5227_v5  ;;  %v5206_v48 = vpop.f32.mrf.mxu2  ;;  %v5219_v12 = vpop.f32.mrf.mxu3 }
 0x513   :  { %10996 = vtanh.f32 %v5231_v6  ;;  %v5207_v41 = vadd.f32 %v5206_v48, %v15247_v16  ;;  %v5220_v61 = vadd.f32 %v5219_v12, %v15249_v26  ;;  %v5182_v62 = vpop.f32.mrf.mxu0  ;;  %v5195_v20 = vpop.f32.mrf.mxu1  ;;  %v9632_v16 = vor.u32 %v10734_v55, %v9631_v36  ;;  %v9633_v26 = vld [vmem:[%s16211_s5 + $0x50] sm:$0xf0]  ;;  %6076 = vmatpush.bf16.msrb.mxu3 %v9660_v51  ;;  %v10727_v51 = vld [vmem:[%s16211_s5 + $0x14] sm:$0xf0]  ;;  %v9609_v36 = vld [vmem:[%s16211_s5 + $0x18] sm:$0xf0] }
 0x514   :  { %v9636_v7 = vor.u32 %v10732_v58, %v9633_v26  ;;  %v9604_v12 = vor.u32 %v10724_v44, %v9601_v18  ;;  %v9608_v20 = vor.u32 %v10727_v51, %v9607_v53  ;;  %v10808_v53 = vld [vmem:[%s16206_s4 + $0xa4] sm:$0xf] }
 0x515   :  { %v5225_v25 = vadd.f32 %v5207_v41, %v12250_v13  ;;  %v5226_v4 = vadd.f32 %v5220_v61, %v12260_v19  ;;  %6038 = vmatpush.bf16.msrb.mxu0 %v9632_v16  ;;  %v10725_v41 = vld [vmem:[%s16211_s5 + $0xc] sm:$0xf] }
 0x516   :  { %6051 = vmatpush.bf16.msrb.mxu1 %v9636_v7  ;;  %v9612_v55 = vor.u32 %v10725_v41, %v9609_v36  ;;  %6066 = vmatpush.bf16.msrb.mxu2 %v9608_v20  ;;  %v9841_v7 = vld [vmem:[%s16206_s4 + $0xe0] sm:$0xf]  ;;  %v9811_v20 = vld [vmem:[%s16206_s4 + $0xb0] sm:$0xf0]  ;;  %v9817_v36 = vld [vmem:[%s16206_s4 + $0xa8] sm:$0xf] }
 0x517   :  { %10998 = vtanh.f32 %v5225_v25  ;;  %v5236_v11 = vmul.f32 0.5, %v5226_v4  ;;  %6077 = vmatpush.bf16.msrb.mxu3 %v9644_v50  ;;  %v9843_v50 = vld [vmem:[%s16206_s4 + $0xf0] sm:$0xf0] }
 0x518   :  { %v10995_v24 = vpop.eup %10994  ;;  %v9846_v42 = vor.u32 %v10816_v22, %v9843_v50  ;;  %v9814_v50 = vor.u32 %v10808_v53, %v9811_v20 }
 0x519   :  { %v10997_v17 = vpop.eup %10996  ;;  %v5229_v49 = vmul.f32 0.5, %v10995_v24  ;;  %11000 = vtanh.f32 %v5236_v11  ;;  %6039 = vmatpush.bf16.msrb.mxu0 %v9616_v15  ;;  %v9849_v11 = vld [vmem:[%s16206_s4 + $0xe8] sm:$0xf]  ;;  %v10817_v24 = vld [vmem:[%s16206_s4 + $0xec] sm:$0xf] }
 0x51a   :  { %v5233_v38 = vmul.f32 0.5, %v10997_v17  ;;  %v5208_v47 = vpop.f32.mrf.mxu2  ;;  %v5221_v10 = vpop.f32.mrf.mxu3  ;;  %6052 = vmatpush.bf16.msrb.mxu1 %v9620_v30  ;;  %v9851_v15 = vld [vmem:[%s16206_s4 + $0xf8] sm:$0xf0]  ;;  %v9842_v30 = vor.u32 %v10818_v8, %v9841_v7  ;;  %v9850_v29 = vor.u32 %v10819_v14, %v9849_v11  ;;  %v9793_v11 = vld [vmem:[%s16206_s4 + $0x80] sm:$0xf] }
 0x51b   :  { %v5230_v45 = vadd.f32 0.5, %v5229_v49  ;;  %v5453_v5 = vpop.f32.mrf.mxu0  ;;  %v5466_v6 = vpop.f32.mrf.mxu1  ;;  %6078 = vmatpush.bf16.msrb.mxu3 %v9628_v43  ;;  %v9854_v33 = vor.u32 %v10817_v24, %v9851_v15  ;;  %v9827_v43 = vld [vmem:[%s16206_s4 + $0xd0] sm:$0xf0]  ;;  %v9801_v15 = vld [vmem:[%s16206_s4 + $0x88] sm:$0xf] }
 0x51c   :  { %v5234_v35 = vadd.f32 0.5, %v5233_v38  ;;  %v10814_v38 = vld [vmem:[%s16206_s4 + $0xcc] sm:$0xf0] }
 0x51d   :  { %v10999_v48 = vpop.eup %10998  ;;  %6040 = vmatpush.bf16.msrb.mxu0 %v9600_v39  ;;  %v9826_v44 = vor.u32 %v10814_v38, %v9825_v52 }
 0x51e   :  { %v5240_v61 = vmul.f32 %v5234_v35, %v14897_v27  ;;  %v5241_v62 = vmul.f32 %v10999_v48, %v5230_v45  ;;  %6053 = vmatpush.bf16.msrb.mxu1 %v9604_v12  ;;  %v10812_v45 = vld [vmem:[%s16206_s4 + $0xc4] sm:$0xf]  ;;  %v9809_v48 = vld [vmem:[%s16206_s4 + $0xa0] sm:$0xf]  ;;  %v10810_v12 = vld [vmem:[%s16206_s4 + $0xac] sm:$0xf0] }
 0x51f   :  { %v11001_v58 = vpop.eup %11000  ;;  %6079 = vmatpush.bf16.msrb.mxu3 %v9612_v55  ;;  %v9830_v18 = vor.u32 %v10812_v45, %v9827_v43  ;;  %v10811_v55 = vld [vmem:[%s16206_s4 + $0xb4] sm:$0xf0]  ;;  %v9779_v43 = vld [vmem:[%s16206_s4 + $0x70] sm:$0xf0] }
 0x520   :  { %v15539_v16 = vadd.f32 %v5241_v62, %v5240_v61  ;;  %v5238_v27 = vmul.f32 0.5, %v11001_v58  ;;  %v10809_v58 = vld [vmem:[%s16206_s4 + $0xac] sm:$0xf]  ;;  %v9818_v14 = vor.u32 %v10811_v55, %v9817_v36 }
 0x522   :  { %11002 = vtanh.f32 %v15539_v16  ;;  %v15542_v26 = vpop.f32.mrf.mxu2  ;;  %v15544_v40 = vpop.f32.mrf.mxu3  ;;  %v5239_v4 = vadd.f32 0.5, %v5238_v27  ;;  %v9819_v27 = vld [vmem:[%s16206_s4 + $0xb8] sm:$0xf0] }
 0x523   :  { %v5455_v21 = vpop.f32.mrf.mxu0  ;;  %v5468_v25 = vpop.f32.mrf.mxu1  ;;  %v9822_v24 = vor.u32 %v10809_v58, %v9819_v27  ;;  %v9763_v58 = vld [vmem:[%s16206_s4 + $0x50] sm:$0xf0]  ;;  %v9769_v27 = vld [vmem:[%s16206_s4 + $0x48] sm:$0xf] }
 0x528   :  { %v11003_v46 = vpop.eup %11002 }
 0x529   :  { %v5244_v59 = vmul.f32 %v11003_v46, %v5239_v4  ;;  %v9810_v4 = vor.u32 %v10810_v12, %v9809_v48  ;;  %v9761_v12 = vld [vmem:[%s16206_s4 + $0x40] sm:$0xf] }
 0x52a   :  { %v5481_v32 = vpop.f32.mrf.mxu2  ;;  %v5494_v37 = vpop.f32.mrf.mxu3 }
 0x52b   :  { %9335 = vst [vmem:[%s16215_s9 + $0x28] sm:$0xff] %v5244_v59  ;;  %v5628_v1 = vpack.c.bf16 %v5244_v59, %v5244_v59  ;;  %v5530_v17 = vpop.f32.mrf.mxu0  ;;  %v5543_v49 = vpop.f32.mrf.mxu1  ;;  %v10806_v59 = vld [vmem:[%s16206_s4 + $0x8c] sm:$0xf0] }
 0x52c   :  { %v5531_v47 = vadd.f32 %v5530_v17, %v5453_v5  ;;  %v5544_v10 = vadd.f32 %v5543_v49, %v5466_v6  ;;  %v10815_v5 = vld [vmem:[%s16206_s4 + $0xd4] sm:$0xf0]  ;;  %v10813_v6 = vld [vmem:[%s16206_s4 + $0xcc] sm:$0xf]  ;;  %v9803_v49 = vld [vmem:[%s16206_s4 + $0x98] sm:$0xf0]  ;;  %v9794_v52 = vor.u32 %v10806_v59, %v9793_v11 }
 0x52d   :  { %5829 = vmatmul.bf16.vlgmr.msra.gmra.mxu0 %v5628_v1  ;;  %5842 = vmatmul.bf16.vlgmr.msra.gmra.mxu1 %v5628_v1  ;;  %v9834_v61 = vor.u32 %v10815_v5, %v9833_v60  ;;  %v9838_v62 = vor.u32 %v10813_v6, %v9835_v63  ;;  %v10805_v17 = vld [vmem:[%s16206_s4 + $0x8c] sm:$0xf]  ;;  %v9785_v60 = vld [vmem:[%s16206_s4 + $0x68] sm:$0xf]  ;;  %v10803_v5 = vld [vmem:[%s16206_s4 + $0x74] sm:$0xf0] }
 0x52e   :  { %v5573_v35 = vadd.f32 %v5531_v47, %v11816_v56  ;;  %v5574_v39 = vadd.f32 %v5544_v10, %v11824_v0  ;;  %5855 = vmatmul.bf16.vlgmr.msra.gmra.mxu2 %v5628_v1  ;;  %5868 = vmatmul.bf16.vlgmr.msra.gmra.mxu3 %v5628_v1  ;;  %v10807_v1 = vld [vmem:[%s16206_s4 + $0x94] sm:$0xf0]  ;;  %v10802_v47 = vld [vmem:[%s16206_s4 + $0x6c] sm:$0xf0]  ;;  %v10800_v10 = vld [vmem:[%s16206_s4 + $0x64] sm:$0xf]  ;;  %v9806_v45 = vor.u32 %v10805_v17, %v9803_v49 }
 0x52f   :  { %6306 = vmatpush.bf16.msra.mxu0 %v9842_v30  ;;  %6319 = vmatpush.bf16.msra.mxu1 %v9846_v42  ;;  %v9777_v30 = vld [vmem:[%s16206_s4 + $0x60] sm:$0xf]  ;;  %v9786_v36 = vor.u32 %v10803_v5, %v9785_v60  ;;  %v10794_v59 = vld [vmem:[%s16206_s4 + $0x2c] sm:$0xf0]  ;;  %v9755_v17 = vld [vmem:[%s16206_s4 + $0x38] sm:$0xf0] }
 0x530   :  { %v5577_v51 = vmul.f32 0.5, %v5573_v35  ;;  %v5581_v41 = vmul.f32 0.5, %v5574_v39  ;;  %6332 = vmatpush.bf16.msra.mxu2 %v9850_v29  ;;  %6345 = vmatpush.bf16.msra.mxu3 %v9854_v33  ;;  %v9802_v33 = vor.u32 %v10807_v1, %v9801_v15  ;;  %v10801_v35 = vld [vmem:[%s16206_s4 + $0x6c] sm:$0xf]  ;;  %v9787_v39 = vld [vmem:[%s16206_s4 + $0x78] sm:$0xf0] }
 0x531   :  { %v9790_v55 = vor.u32 %v10801_v35, %v9787_v39  ;;  %v9745_v11 = vld [vmem:[%s16206_s4 + $0x20] sm:$0xf]  ;;  %v9747_v15 = vld [vmem:[%s16206_s4 + $0x30] sm:$0xf0]  ;;  %v10793_v1 = vld [vmem:[%s16206_s4 + $0x2c] sm:$0xf] }
 0x532   :  { %11004 = vtanh.f32 %v5577_v51  ;;  %v5556_v21 = vpop.f32.mrf.mxu2  ;;  %v5569_v25 = vpop.f32.mrf.mxu3  ;;  %v9778_v51 = vor.u32 %v10802_v47, %v9777_v30  ;;  %v9746_v30 = vor.u32 %v10794_v59, %v9745_v11  ;;  %v10789_v60 = vld [vmem:[%s16206_s4 + $0xc] sm:$0xf]  ;;  %v9739_v5 = vld [vmem:[%s16206_s4 + $0x18] sm:$0xf0]  ;;  %v10879_v11 = vld [vmem:[%s16209_s6 + $0xd4] sm:$0xf0] }
 0x533   :  { %11006 = vtanh.f32 %v5581_v41  ;;  %v5557_v7 = vadd.f32 %v5556_v21, %v15542_v26  ;;  %v5570_v8 = vadd.f32 %v5569_v25, %v15544_v40  ;;  %v5532_v46 = vpop.f32.mrf.mxu0  ;;  %v5545_v22 = vpop.f32.mrf.mxu1  ;;  %6307 = vmatpush.bf16.msra.mxu0 %v9826_v44  ;;  %6320 = vmatpush.bf16.msra.mxu1 %v9830_v18  ;;  %v10804_v26 = vld [vmem:[%s16206_s4 + $0x84] sm:$0xf]  ;;  %v9795_v40 = vld [vmem:[%s16206_s4 + $0x90] sm:$0xf0]  ;;  %v9782_v41 = vor.u32 %v10800_v10, %v9779_v43  ;;  %v10799_v25 = vld [vmem:[%s16206_s4 + $0x54] sm:$0xf0] }
 0x534   :  { %6333 = vmatpush.bf16.msra.mxu2 %v9834_v61  ;;  %6346 = vmatpush.bf16.msra.mxu3 %v9838_v62  ;;  %v9798_v38 = vor.u32 %v10804_v26, %v9795_v40  ;;  %v10798_v61 = vld [vmem:[%s16206_s4 + $0x4c] sm:$0xf0]  ;;  %v10796_v62 = vld [vmem:[%s16206_s4 + $0x44] sm:$0xf]  ;;  %v9770_v26 = vor.u32 %v10799_v25, %v9769_v27  ;;  %v9758_v10 = vor.u32 %v10793_v1, %v9755_v17  ;;  %v10791_v43 = vld [vmem:[%s16206_s4 + $0x14] sm:$0xf0] }
 0x535   :  { %v5575_v32 = vadd.f32 %v5557_v7, %v11866_v23  ;;  %v5576_v37 = vadd.f32 %v5570_v8, %v11874_v28  ;;  %v9771_v7 = vld [vmem:[%s16206_s4 + $0x58] sm:$0xf0]  ;;  %v9762_v22 = vor.u32 %v10798_v61, %v9761_v12  ;;  %v10792_v40 = vld [vmem:[%s16206_s4 + $0x24] sm:$0xf]  ;;  %v10881_v27 = vld [vmem:[%s16209_s6 + $0xec] sm:$0xf] }
 0x536   :  { %v9941_v17 = vld [vmem:[%s16209_s6 + $0xa0] sm:$0xf] }
 0x537   :  { %11008 = vtanh.f32 %v5575_v32  ;;  %v5586_v42 = vmul.f32 0.5, %v5576_v37  ;;  %6308 = vmatpush.bf16.msra.mxu0 %v9810_v4  ;;  %6321 = vmatpush.bf16.msra.mxu1 %v9814_v50  ;;  %v10797_v4 = vld [vmem:[%s16206_s4 + $0x4c] sm:$0xf]  ;;  %v9766_v50 = vor.u32 %v10796_v62, %v9763_v58  ;;  %v9753_v32 = vld [vmem:[%s16206_s4 + $0x28] sm:$0xf] }
 0x538   :  { %v11005_v29 = vpop.eup %11004  ;;  %6334 = vmatpush.bf16.msra.mxu2 %v9818_v14  ;;  %6347 = vmatpush.bf16.msra.mxu3 %v9822_v24  ;;  %v10795_v37 = vld [vmem:[%s16206_s4 + $0x34] sm:$0xf0]  ;;  %v9975_v62 = vld [vmem:[%s16209_s6 + $0xf0] sm:$0xf0] }
 0x539   :  { %v11007_v6 = vpop.eup %11006  ;;  %v5579_v63 = vmul.f32 0.5, %v11005_v29  ;;  %11010 = vtanh.f32 %v5586_v42  ;;  %v9750_v42 = vor.u32 %v10792_v40, %v9747_v15  ;;  %v9754_v47 = vor.u32 %v10795_v37, %v9753_v32  ;;  %v10788_v29 = vld [vmem:[%s16206_s4 + $0x4] sm:$0xf] }
 0x53a   :  { %v5583_v44 = vmul.f32 0.5, %v11007_v6  ;;  %v5558_v18 = vpop.f32.mrf.mxu2  ;;  %v5571_v48 = vpop.f32.mrf.mxu3 }
 0x53b   :  { %v5580_v53 = vadd.f32 0.5, %v5579_v63  ;;  %6309 = vmatpush.bf16.msra.mxu0 %v9794_v52  ;;  %6322 = vmatpush.bf16.msra.mxu1 %v9798_v38  ;;  %v9729_v52 = vld [vmem:[%s16206_s4] sm:$0xf]  ;;  %v10790_v38 = vld [vmem:[%s16206_s4 + $0xc] sm:$0xf0]  ;;  %v9742_v18 = vor.u32 %v10789_v60, %v9739_v5 }
 0x53c   :  { %v5584_v20 = vadd.f32 0.5, %v5583_v44  ;;  %6335 = vmatpush.bf16.msra.mxu2 %v9802_v33  ;;  %6348 = vmatpush.bf16.msra.mxu3 %v9806_v45  ;;  %v9731_v33 = vld [vmem:[%s16206_s4 + $0x10] sm:$0xf0]  ;;  %v9737_v45 = vld [vmem:[%s16206_s4 + $0x8] sm:$0xf]  ;;  %v9730_v63 = vor.u32 %v10790_v38, %v9729_v52 }
 0x53d   :  { %v11009_v21 = vpop.eup %11008  ;;  %v9734_v35 = vor.u32 %v10788_v29, %v9731_v33  ;;  %v9738_v44 = vor.u32 %v10791_v43, %v9737_v45  ;;  %v9943_v52 = vld [vmem:[%s16209_s6 + $0xb0] sm:$0xf0]  ;;  %v9949_v38 = vld [vmem:[%s16209_s6 + $0xa8] sm:$0xf]  ;;  %v10873_v33 = vld [vmem:[%s16209_s6 + $0xac] sm:$0xf] }
 0x53e   :  { %v5590_v8 = vmul.f32 %v5584_v20, %v15067_v31  ;;  %v5591_v46 = vmul.f32 %v11009_v21, %v5580_v53  ;;  %v9774_v31 = vor.u32 %v10797_v4, %v9771_v7  ;;  %v9726_v53 = vld [vmem:[%s16210_s0 + $0x38] sm:$0xff]  ;;  %v9981_v20 = vld [vmem:[%s16209_s6 + $0xe8] sm:$0xf]  ;;  %v9957_v4 = vld [vmem:[%s16209_s6 + $0xc0] sm:$0xf] }
 0x53f   :  { %6310 = vmatpush.bf16.msra.mxu0 %v9778_v51  ;;  %6323 = vmatpush.bf16.msra.mxu1 %v9782_v41  ;;  %v11011_v14 = vpop.eup %11010  ;;  %v6111_v51 = vpack.c.bf16 %v9726_v53, %v9726_v53  ;;  %v10880_v41 = vld [vmem:[%s16209_s6 + $0xe4] sm:$0xf]  ;;  %v9983_v21 = vld [vmem:[%s16209_s6 + $0xf8] sm:$0xf0]  ;;  %v10878_v7 = vld [vmem:[%s16209_s6 + $0xcc] sm:$0xf0] }
 0x540   :  { %v15706_v24 = vadd.f32 %v5591_v46, %v5590_v8  ;;  %6336 = vmatpush.bf16.msra.mxu2 %v9786_v36  ;;  %6349 = vmatpush.bf16.msra.mxu3 %v9790_v55  ;;  %v5588_v49 = vmul.f32 0.5, %v11011_v14  ;;  %v10883_v36 = vld [vmem:[%s16209_s6 + $0xf4] sm:$0xf0]  ;;  %v9978_v55 = vor.u32 %v10880_v41, %v9975_v62  ;;  %v9986_v25 = vor.u32 %v10881_v27, %v9983_v21  ;;  %v10876_v8 = vld [vmem:[%s16209_s6 + $0xc4] sm:$0xf] }
 0x541   :  { %v9982_v58 = vor.u32 %v10883_v36, %v9981_v20  ;;  %v9958_v46 = vor.u32 %v10878_v7, %v9957_v4  ;;  %v9951_v45 = vld [vmem:[%s16209_s6 + $0xb8] sm:$0xf0]  ;;  %v9925_v60 = vld [vmem:[%s16209_s6 + $0x80] sm:$0xf]  ;;  %v10870_v5 = vld [vmem:[%s16209_s6 + $0x8c] sm:$0xf0] }
 0x542   :  { %11012 = vtanh.f32 %v15706_v24  ;;  %v5589_v6 = vadd.f32 0.5, %v5588_v49  ;;  %v10874_v49 = vld [vmem:[%s16209_s6 + $0xac] sm:$0xf0]  ;;  %v9954_v43 = vor.u32 %v10873_v33, %v9951_v45  ;;  %v9935_v53 = vld [vmem:[%s16209_s6 + $0x98] sm:$0xf0] }
 0x543   :  { %6311 = vmatpush.bf16.msra.mxu0 %v9762_v22  ;;  %6324 = vmatpush.bf16.msra.mxu1 %v9766_v50  ;;  %v9959_v22 = vld [vmem:[%s16209_s6 + $0xd0] sm:$0xf0]  ;;  %v9965_v50 = vld [vmem:[%s16209_s6 + $0xc8] sm:$0xf]  ;;  %v9909_v41 = vld [vmem:[%s16209_s6 + $0x60] sm:$0xf] }
 0x544   :  { %6337 = vmatpush.bf16.msra.mxu2 %v9770_v26  ;;  %6350 = vmatpush.bf16.msra.mxu3 %v9774_v31  ;;  %v9962_v59 = vor.u32 %v10876_v8, %v9959_v22  ;;  %v9966_v14 = vor.u32 %v10879_v11, %v9965_v50  ;;  %v10877_v26 = vld [vmem:[%s16209_s6 + $0xcc] sm:$0xf]  ;;  %v9967_v31 = vld [vmem:[%s16209_s6 + $0xd8] sm:$0xf0]  ;;  %v10864_v62 = vld [vmem:[%s16209_s6 + $0x64] sm:$0xf] }
 0x545   :  { %v9970_v32 = vor.u32 %v10877_v26, %v9967_v31  ;;  %v9911_v36 = vld [vmem:[%s16209_s6 + $0x70] sm:$0xf0]  ;;  %v9919_v4 = vld [vmem:[%s16209_s6 + $0x78] sm:$0xf0]  ;;  %v9893_v8 = vld [vmem:[%s16209_s6 + $0x40] sm:$0xf] }
 0x546   :  { %v9914_v27 = vor.u32 %v10864_v62, %v9911_v36  ;;  %v10860_v22 = vld [vmem:[%s16209_s6 + $0x44] sm:$0xf]  ;;  %v9895_v11 = vld [vmem:[%s16209_s6 + $0x50] sm:$0xf0]  ;;  %v10857_v33 = vld [vmem:[%s16209_s6 + $0x2c] sm:$0xf] }
 0x547   :  { %6312 = vmatpush.bf16.msra.mxu0 %v9746_v30  ;;  %6325 = vmatpush.bf16.msra.mxu1 %v9750_v42  ;;  %v10872_v30 = vld [vmem:[%s16209_s6 + $0xa4] sm:$0xf]  ;;  %v9942_v42 = vor.u32 %v10874_v49, %v9941_v17  ;;  %v9898_v26 = vor.u32 %v10860_v22, %v9895_v11  ;;  %v9877_v17 = vld [vmem:[%s16209_s6 + $0x20] sm:$0xf]  ;;  %v10858_v49 = vld [vmem:[%s16209_s6 + $0x2c] sm:$0xf0] }
 0x548   :  { %v11013_v39 = vpop.eup %11012  ;;  %6338 = vmatpush.bf16.msra.mxu2 %v9754_v47  ;;  %6351 = vmatpush.bf16.msra.mxu3 %v9758_v10  ;;  %v10875_v47 = vld [vmem:[%s16209_s6 + $0xb4] sm:$0xf0]  ;;  %v9946_v10 = vor.u32 %v10872_v30, %v9943_v52  ;;  %v10856_v30 = vld [vmem:[%s16209_s6 + $0x24] sm:$0xf]  ;;  %v9879_v52 = vld [vmem:[%s16209_s6 + $0x30] sm:$0xf0] }
 0x549   :  { %v5594_v48 = vmul.f32 %v11013_v39, %v5589_v6  ;;  %v9950_v29 = vor.u32 %v10875_v47, %v9949_v38  ;;  %v10868_v6 = vld [vmem:[%s16209_s6 + $0x84] sm:$0xf]  ;;  %v9933_v39 = vld [vmem:[%s16209_s6 + $0x88] sm:$0xf]  ;;  %v10859_v47 = vld [vmem:[%s16209_s6 + $0x34] sm:$0xf0] }
 0x54a   :  { %v9885_v38 = vld [vmem:[%s16209_s6 + $0x28] sm:$0xf]  ;;  %v9887_v45 = vld [vmem:[%s16209_s6 + $0x38] sm:$0xf0]  ;;  %v10101_v62 = vld [vmem:[%s16211_s5 + $0xe0] sm:$0xf] }
 0x54b   :  { %v5595_v12 = vpack.c.bf16 %v5594_v48, %v5594_v48  ;;  %6313 = vmatpush.bf16.msra.mxu0 %v9730_v63  ;;  %6326 = vmatpush.bf16.msra.mxu1 %v9734_v35  ;;  %v9926_v63 = vor.u32 %v10870_v5, %v9925_v60  ;;  %v9927_v35 = vld [vmem:[%s16209_s6 + $0x90] sm:$0xf0]  ;;  %v9861_v60 = vld [vmem:[%s16209_s6] sm:$0xf]  ;;  %v10854_v5 = vld [vmem:[%s16209_s6 + $0xc] sm:$0xf0] }
 0x54c   :  { %6339 = vmatpush.bf16.msra.mxu2 %v9738_v44  ;;  %6352 = vmatpush.bf16.msra.mxu3 %v9742_v18  ;;  %v10871_v44 = vld [vmem:[%s16209_s6 + $0x94] sm:$0xf0]  ;;  %v9930_v18 = vor.u32 %v10868_v6, %v9927_v35  ;;  %v10852_v6 = vld [vmem:[%s16209_s6 + $0x4] sm:$0xf]  ;;  %v9863_v35 = vld [vmem:[%s16209_s6 + $0x10] sm:$0xf0] }
 0x54d   :  { %6041 = vmatmul.bf16.vlgmr.msrb.gmra.mxu0 %v5595_v12  ;;  %6054 = vmatmul.bf16.vlgmr.msrb.gmra.mxu1 %v5595_v12  ;;  %v9934_v48 = vor.u32 %v10871_v44, %v9933_v39  ;;  %v9869_v39 = vld [vmem:[%s16209_s6 + $0x8] sm:$0xf]  ;;  %v10855_v44 = vld [vmem:[%s16209_s6 + $0x14] sm:$0xf0]  ;;  %v10848_v36 = vld [vmem:[%s16211_s5 + $0xe4] sm:$0xf] }
 0x54e   :  { %6067 = vmatmul.bf16.vlgmr.msrb.gmra.mxu2 %v5595_v12  ;;  %6080 = vmatmul.bf16.vlgmr.msrb.gmra.mxu3 %v5595_v12  ;;  %v10085_v11 = vld [vmem:[%s16211_s5 + $0xc0] sm:$0xf] }
 0x54f   :  { %6390 = vmatpush.bf16.msrb.mxu0 %v15116_v9  ;;  %6403 = vmatpush.bf16.msrb.mxu1 %v15119_v34 }
 0x550   :  { %6416 = vmatpush.bf16.msrb.mxu2 %v15122_v54  ;;  %6429 = vmatpush.bf16.msrb.mxu3 %v15125_v57  ;;  %v9973_v54 = vld [vmem:[%s16209_s6 + $0xe0] sm:$0xf]  ;;  %v10882_v57 = vld [vmem:[%s16209_s6 + $0xec] sm:$0xf0] }
 0x551   :  { %v9974_v61 = vor.u32 %v10882_v57, %v9973_v54 }
 0x55d   :  { %6314 = vmatmul.bf16.vlgmr.msra.gmra.mxu0 %v5595_v12  ;;  %6327 = vmatmul.bf16.vlgmr.msra.gmra.mxu1 %v5595_v12 }
 0x55e   :  { %6340 = vmatmul.bf16.vlgmr.msra.gmra.mxu2 %v5595_v12  ;;  %6353 = vmatmul.bf16.vlgmr.msra.gmra.mxu3 %v5595_v12  ;;  %v10869_v12 = vld [vmem:[%s16209_s6 + $0x8c] sm:$0xf] }
 0x55f   :  { %6683 = vmatpush.bf16.msra.mxu0 %v9974_v61  ;;  %6696 = vmatpush.bf16.msra.mxu1 %v9978_v55  ;;  %v9938_v57 = vor.u32 %v10869_v12, %v9935_v53  ;;  %v10866_v61 = vld [vmem:[%s16209_s6 + $0x6c] sm:$0xf0]  ;;  %v9917_v55 = vld [vmem:[%s16209_s6 + $0x68] sm:$0xf]  ;;  %v10853_v12 = vld [vmem:[%s16209_s6 + $0xc] sm:$0xf] }
 0x560   :  { %6709 = vmatpush.bf16.msra.mxu2 %v9982_v58  ;;  %6722 = vmatpush.bf16.msra.mxu3 %v9986_v25  ;;  %v9910_v20 = vor.u32 %v10866_v61, %v9909_v41  ;;  %v10867_v58 = vld [vmem:[%s16209_s6 + $0x74] sm:$0xf0]  ;;  %v10865_v25 = vld [vmem:[%s16209_s6 + $0x6c] sm:$0xf]  ;;  %v9871_v53 = vld [vmem:[%s16209_s6 + $0x18] sm:$0xf0] }
 0x561   :  { %v9918_v21 = vor.u32 %v10867_v58, %v9917_v55  ;;  %v9922_v7 = vor.u32 %v10865_v25, %v9919_v4  ;;  %v10851_v58 = vld [vmem:[%s16211_s5 + $0xf4] sm:$0xf0] }
 0x563   :  { %6684 = vmatpush.bf16.msra.mxu0 %v9958_v46  ;;  %6697 = vmatpush.bf16.msra.mxu1 %v9962_v59  ;;  %v10862_v46 = vld [vmem:[%s16209_s6 + $0x4c] sm:$0xf0]  ;;  %v9901_v59 = vld [vmem:[%s16209_s6 + $0x48] sm:$0xf] }
 0x564   :  { %6710 = vmatpush.bf16.msra.mxu2 %v9966_v14  ;;  %6723 = vmatpush.bf16.msra.mxu3 %v9970_v32  ;;  %v9894_v50 = vor.u32 %v10862_v46, %v9893_v8  ;;  %v10863_v14 = vld [vmem:[%s16209_s6 + $0x54] sm:$0xf0]  ;;  %v10861_v32 = vld [vmem:[%s16209_s6 + $0x4c] sm:$0xf]  ;;  %v10111_v8 = vld [vmem:[%s16211_s5 + $0xf8] sm:$0xf0] }
 0x565   :  { %v9902_v31 = vor.u32 %v10863_v14, %v9901_v59  ;;  %v10846_v59 = vld [vmem:[%s16211_s5 + $0xcc] sm:$0xf0] }
 0x566   :  { %v10086_v14 = vor.u32 %v10846_v59, %v10085_v11  ;;  %v10037_v59 = vld [vmem:[%s16211_s5 + $0x60] sm:$0xf] }
 0x567   :  { %6685 = vmatpush.bf16.msra.mxu0 %v9942_v42  ;;  %6698 = vmatpush.bf16.msra.mxu1 %v9946_v10  ;;  %v9878_v42 = vor.u32 %v10858_v49, %v9877_v17  ;;  %v9882_v10 = vor.u32 %v10856_v30, %v9879_v52  ;;  %v10847_v49 = vld [vmem:[%s16211_s5 + $0xd4] sm:$0xf0]  ;;  %v10845_v30 = vld [vmem:[%s16211_s5 + $0xcc] sm:$0xf] }
 0x568   :  { %6711 = vmatpush.bf16.msra.mxu2 %v9950_v29  ;;  %6724 = vmatpush.bf16.msra.mxu3 %v9954_v43  ;;  %v9886_v29 = vor.u32 %v10859_v47, %v9885_v38  ;;  %v9890_v43 = vor.u32 %v10857_v33, %v9887_v45  ;;  %v10069_v45 = vld [vmem:[%s16211_s5 + $0xa0] sm:$0xf] }
 0x56b   :  { %6686 = vmatpush.bf16.msra.mxu0 %v9926_v63  ;;  %6699 = vmatpush.bf16.msra.mxu1 %v9930_v18  ;;  %v9862_v63 = vor.u32 %v10854_v5, %v9861_v60  ;;  %v9866_v18 = vor.u32 %v10852_v6, %v9863_v35  ;;  %v10071_v6 = vld [vmem:[%s16211_s5 + $0xb0] sm:$0xf0]  ;;  %v10843_v35 = vld [vmem:[%s16211_s5 + $0xb4] sm:$0xf0] }
 0x56c   :  { %6712 = vmatpush.bf16.msra.mxu2 %v9934_v48  ;;  %6725 = vmatpush.bf16.msra.mxu3 %v9938_v57  ;;  %v9870_v48 = vor.u32 %v10855_v44, %v9869_v39 }
 0x56d   :  { %9855 = vmatmul.msk.bf16.vlgmr.msrb.gmra.mxu0 %vm333_vm1, %v6111_v51  ;;  %9856 = vmatmul.msk.bf16.vlgmr.msrb.gmra.mxu1 %vm333_vm1, %v6111_v51 }
 0x56e   :  { %9857 = vmatmul.msk.bf16.vlgmr.msrb.gmra.mxu2 %vm333_vm1, %v6111_v51  ;;  %9858 = vmatmul.msk.bf16.vlgmr.msrb.gmra.mxu3 %vm333_vm1, %v6111_v51 }
 0x56f   :  { %6687 = vmatpush.bf16.msra.mxu0 %v9910_v20  ;;  %6700 = vmatpush.bf16.msra.mxu1 %v9914_v27  ;;  %v10850_v20 = vld [vmem:[%s16211_s5 + $0xec] sm:$0xf0] }
 0x570   :  { %6713 = vmatpush.bf16.msra.mxu2 %v9918_v21  ;;  %6726 = vmatpush.bf16.msra.mxu3 %v9922_v7  ;;  %v10102_v55 = vor.u32 %v10850_v20, %v10101_v62  ;;  %v10849_v7 = vld [vmem:[%s16211_s5 + $0xec] sm:$0xf] }
 0x571   :  { %v10114_v46 = vor.u32 %v10849_v7, %v10111_v8 }
 0x573   :  { %6688 = vmatpush.bf16.msra.mxu0 %v9894_v50  ;;  %6701 = vmatpush.bf16.msra.mxu1 %v9898_v26  ;;  %v10844_v26 = vld [vmem:[%s16211_s5 + $0xc4] sm:$0xf] }
 0x574   :  { %6714 = vmatpush.bf16.msra.mxu2 %v9902_v31  ;;  %v10087_v31 = vld [vmem:[%s16211_s5 + $0xd0] sm:$0xf0] }
 0x575   :  { %v10090_v17 = vor.u32 %v10844_v26, %v10087_v31 }
 0x577   :  { %6689 = vmatpush.bf16.msra.mxu0 %v9878_v42  ;;  %6702 = vmatpush.bf16.msra.mxu1 %v9882_v10  ;;  %v10095_v42 = vld [vmem:[%s16211_s5 + $0xd8] sm:$0xf0] }
 0x578   :  { %6715 = vmatpush.bf16.msra.mxu2 %v9886_v29  ;;  %v10098_v33 = vor.u32 %v10845_v30, %v10095_v42  ;;  %v10835_v42 = vld [vmem:[%s16211_s5 + $0x74] sm:$0xf0] }
 0x57b   :  { %6690 = vmatpush.bf16.msra.mxu0 %v9862_v63  ;;  %6703 = vmatpush.bf16.msra.mxu1 %v9866_v18  ;;  %v10077_v63 = vld [vmem:[%s16211_s5 + $0xa8] sm:$0xf]  ;;  %v10841_v18 = vld [vmem:[%s16211_s5 + $0xac] sm:$0xf] }
 0x57c   :  { %6716 = vmatpush.bf16.msra.mxu2 %v9870_v48  ;;  %v10078_v44 = vor.u32 %v10843_v35, %v10077_v63  ;;  %v10079_v48 = vld [vmem:[%s16211_s5 + $0xb8] sm:$0xf0]  ;;  %v10831_v35 = vld [vmem:[%s16211_s5 + $0x54] sm:$0xf0] }
 0x57f   :  { %6895 = vmatpush.bf16.msrb.mxu0 %v10102_v55  ;;  %v10061_v55 = vld [vmem:[%s16211_s5 + $0x88] sm:$0xf] }
 0x583   :  { %6896 = vmatpush.bf16.msrb.mxu0 %v10086_v14  ;;  %v10834_v14 = vld [vmem:[%s16211_s5 + $0x6c] sm:$0xf0] }
 0x584   :  { %v10038_v31 = vor.u32 %v10834_v14, %v10037_v59  ;;  %v9991_v59 = vld [vmem:[%s16211_s5 + $0x10] sm:$0xf0]  ;;  %v9997_v14 = vld [vmem:[%s16211_s5 + $0x8] sm:$0xf] }
 0x5aa   :  { %v15762_v9 = vpop.f32.mrf.mxu0  ;;  %v15764_v34 = vpop.f32.mrf.mxu1 }
 0x5b1   :  { %v15814_v40 = vpop.f32.mrf.mxu2  ;;  %v15816_v15 = vpop.f32.mrf.mxu3 }
 0x5b2   :  { %v5832_v37 = vpop.f32.mrf.mxu0  ;;  %v5845_v1 = vpop.f32.mrf.mxu1 }
 0x5b3   :  { %v9903_v37 = vld [vmem:[%s16209_s6 + $0x58] sm:$0xf0] }
 0x5b4   :  { %v9906_v1 = vor.u32 %v10861_v32, %v9903_v37  ;;  %v10093_v32 = vld [vmem:[%s16211_s5 + $0xc8] sm:$0xf] }
 0x5b5   :  { %v10094_v29 = vor.u32 %v10847_v49, %v10093_v32  ;;  %v10832_v32 = vld [vmem:[%s16211_s5 + $0x64] sm:$0xf] }
 0x5b6   :  { %6727 = vmatpush.bf16.msra.mxu3 %v9906_v1 }
 0x5b9   :  { %v5858_v51 = vpop.f32.mrf.mxu2  ;;  %v5871_v54 = vpop.f32.mrf.mxu3 }
 0x5ba   :  { %6728 = vmatpush.bf16.msra.mxu3 %v9890_v43  ;;  %v9874_v51 = vor.u32 %v10853_v12, %v9871_v53  ;;  %v10842_v43 = vld [vmem:[%s16211_s5 + $0xac] sm:$0xf0]  ;;  %v10082_v53 = vor.u32 %v10841_v18, %v10079_v48 }
 0x5bb   :  { %v10070_v5 = vor.u32 %v10842_v43, %v10069_v45  ;;  %v10830_v45 = vld [vmem:[%s16211_s5 + $0x4c] sm:$0xf0] }
 0x5bd   :  { %6897 = vmatpush.bf16.msrb.mxu0 %v10070_v5 }
 0x5be   :  { %6729 = vmatpush.bf16.msra.mxu3 %v9874_v51 }
 0x5c2   :  { %6934 = vmatpush.bf16.msrb.mxu3 %v10114_v46 }
 0x5c6   :  { %6935 = vmatpush.bf16.msrb.mxu3 %v10098_v33  ;;  %v10021_v33 = vld [vmem:[%s16211_s5 + $0x40] sm:$0xf] }
 0x5c7   :  { %v10022_v43 = vor.u32 %v10830_v45, %v10021_v33 }
 0x5ca   :  { %v6042_v54 = vpop.f32.mrf.mxu0  ;;  %v6055_v57 = vpop.f32.mrf.mxu1  ;;  %6936 = vmatpush.bf16.msrb.mxu3 %v10082_v53  ;;  %v10031_v53 = vld [vmem:[%s16211_s5 + $0x58] sm:$0xf0] }
 0x5cb   :  { %v6043_v41 = vadd.f32 %v6042_v54, %v15762_v9  ;;  %v6056_v61 = vadd.f32 %v6055_v57, %v15764_v34  ;;  %v10103_v9 = vld [vmem:[%s16211_s5 + $0xf0] sm:$0xf0]  ;;  %v10109_v34 = vld [vmem:[%s16211_s5 + $0xe8] sm:$0xf]  ;;  %v10053_v54 = vld [vmem:[%s16211_s5 + $0x80] sm:$0xf] }
 0x5cc   :  { %v10106_v25 = vor.u32 %v10848_v36, %v10103_v9  ;;  %v10110_v4 = vor.u32 %v10851_v58, %v10109_v34  ;;  %v10838_v57 = vld [vmem:[%s16211_s5 + $0x8c] sm:$0xf0]  ;;  %v10055_v36 = vld [vmem:[%s16211_s5 + $0x90] sm:$0xf0] }
 0x5cd   :  { %v6085_v27 = vadd.f32 %v6043_v41, %v12226_v2  ;;  %v6086_v21 = vadd.f32 %v6056_v61, %v12228_v3  ;;  %v10836_v41 = vld [vmem:[%s16211_s5 + $0x84] sm:$0xf]  ;;  %v10054_v20 = vor.u32 %v10838_v57, %v10053_v54  ;;  %v10005_v54 = vld [vmem:[%s16211_s5 + $0x20] sm:$0xf]  ;;  %v10826_v57 = vld [vmem:[%s16211_s5 + $0x2c] sm:$0xf0] }
 0x5ce   :  { %6908 = vmatpush.bf16.msrb.mxu1 %v10106_v25  ;;  %6921 = vmatpush.bf16.msrb.mxu2 %v10110_v4  ;;  %v10837_v25 = vld [vmem:[%s16211_s5 + $0x8c] sm:$0xf] }
 0x5cf   :  { %v6089_v22 = vmul.f32 0.5, %v6085_v27  ;;  %v6093_v50 = vmul.f32 0.5, %v6086_v21  ;;  %v10058_v27 = vor.u32 %v10836_v41, %v10055_v36  ;;  %v10839_v21 = vld [vmem:[%s16211_s5 + $0x94] sm:$0xf0]  ;;  %6898 = vmatpush.bf16.msrb.mxu0 %v10054_v20  ;;  %v10824_v41 = vld [vmem:[%s16211_s5 + $0x24] sm:$0xf] }
 0x5d0   :  { %v10062_v46 = vor.u32 %v10839_v21, %v10061_v55  ;;  %v10013_v20 = vld [vmem:[%s16211_s5 + $0x28] sm:$0xf]  ;;  %v10827_v36 = vld [vmem:[%s16211_s5 + $0x34] sm:$0xf0] }
 0x5d1   :  { %11014 = vtanh.f32 %v6089_v22  ;;  %v6068_v37 = vpop.f32.mrf.mxu2  ;;  %v6081_v1 = vpop.f32.mrf.mxu3  ;;  %v10063_v22 = vld [vmem:[%s16211_s5 + $0x98] sm:$0xf0] }
 0x5d2   :  { %11016 = vtanh.f32 %v6093_v50  ;;  %v6069_v52 = vadd.f32 %v6068_v37, %v15814_v40  ;;  %v6082_v38 = vadd.f32 %v6081_v1, %v15816_v15  ;;  %v6044_v47 = vpop.f32.mrf.mxu0  ;;  %v6057_v10 = vpop.f32.mrf.mxu1  ;;  %6909 = vmatpush.bf16.msrb.mxu1 %v10090_v17  ;;  %v10840_v40 = vld [vmem:[%s16211_s5 + $0xa4] sm:$0xf]  ;;  %6922 = vmatpush.bf16.msrb.mxu2 %v10094_v29  ;;  %v10066_v11 = vor.u32 %v10837_v25, %v10063_v22  ;;  %v10039_v37 = vld [vmem:[%s16211_s5 + $0x70] sm:$0xf0]  ;;  %v10045_v1 = vld [vmem:[%s16211_s5 + $0x68] sm:$0xf] }
 0x5d3   :  { %v10074_v39 = vor.u32 %v10840_v40, %v10071_v6  ;;  %v10042_v30 = vor.u32 %v10832_v32, %v10039_v37  ;;  %6899 = vmatpush.bf16.msrb.mxu0 %v10038_v31  ;;  %v10046_v47 = vor.u32 %v10835_v42, %v10045_v1  ;;  %v10828_v40 = vld [vmem:[%s16211_s5 + $0x44] sm:$0xf]  ;;  %v10821_v1 = vld [vmem:[%s16211_s5 + $0xc] sm:$0xf] }
 0x5d4   :  { %v6087_v15 = vadd.f32 %v6069_v52, %v12250_v13  ;;  %v6088_v60 = vadd.f32 %v6082_v38, %v12260_v19  ;;  %6937 = vmatpush.bf16.msrb.mxu3 %v10066_v11  ;;  %v10833_v52 = vld [vmem:[%s16211_s5 + $0x6c] sm:$0xf]  ;;  %v10047_v38 = vld [vmem:[%s16211_s5 + $0x78] sm:$0xf0]  ;;  %v10820_v22 = vld [vmem:[%s16211_s5 + $0x4] sm:$0xf] }
 0x5d5   :  { %v10050_v10 = vor.u32 %v10833_v52, %v10047_v38  ;;  %v9994_v37 = vor.u32 %v10820_v22, %v9991_v59 }
 0x5d6   :  { %11018 = vtanh.f32 %v6087_v15  ;;  %v6098_v12 = vmul.f32 0.5, %v6088_v60  ;;  %6910 = vmatpush.bf16.msrb.mxu1 %v10074_v39  ;;  %6923 = vmatpush.bf16.msrb.mxu2 %v10078_v44  ;;  %v10023_v15 = vld [vmem:[%s16211_s5 + $0x50] sm:$0xf0]  ;;  %v10029_v60 = vld [vmem:[%s16211_s5 + $0x48] sm:$0xf] }
 0x5d7   :  { %v11015_v51 = vpop.eup %11014  ;;  %v10026_v63 = vor.u32 %v10828_v40, %v10023_v15  ;;  %v10829_v39 = vld [vmem:[%s16211_s5 + $0x4c] sm:$0xf]  ;;  %6900 = vmatpush.bf16.msrb.mxu0 %v10022_v43 }
 0x5d8   :  { %v11017_v61 = vpop.eup %11016  ;;  %v6091_v62 = vmul.f32 0.5, %v11015_v51  ;;  %11020 = vtanh.f32 %v6098_v12  ;;  %6938 = vmatpush.bf16.msrb.mxu3 %v10050_v10  ;;  %v10030_v12 = vor.u32 %v10831_v35, %v10029_v60  ;;  %v10034_v51 = vor.u32 %v10829_v39, %v10031_v53 }
 0x5d9   :  { %v6095_v9 = vmul.f32 0.5, %v11017_v61  ;;  %v6070_v34 = vpop.f32.mrf.mxu2  ;;  %v6083_v58 = vpop.f32.mrf.mxu3  ;;  %v10006_v61 = vor.u32 %v10826_v57, %v10005_v54 }
 0x5da   :  { %v6092_v4 = vadd.f32 0.5, %v6091_v62  ;;  %v16063_v7 = vpop.f32.mrf.mxu0  ;;  %v16065_v8 = vpop.f32.mrf.mxu1  ;;  %6911 = vmatpush.bf16.msrb.mxu1 %v10058_v27  ;;  %6924 = vmatpush.bf16.msrb.mxu2 %v10062_v46  ;;  %v10007_v62 = vld [vmem:[%s16211_s5 + $0x30] sm:$0xf0]  ;;  %v10825_v34 = vld [vmem:[%s16211_s5 + $0x2c] sm:$0xf] }
 0x5db   :  { %v6096_v50 = vadd.f32 0.5, %v6095_v9  ;;  %v10010_v55 = vor.u32 %v10824_v41, %v10007_v62  ;;  %v10014_v9 = vor.u32 %v10827_v36, %v10013_v20  ;;  %v10015_v58 = vld [vmem:[%s16211_s5 + $0x38] sm:$0xf0]  ;;  %6901 = vmatpush.bf16.msrb.mxu0 %v10006_v61  ;;  %v10822_v46 = vld [vmem:[%s16211_s5 + $0xc] sm:$0xf0] }
 0x5dc   :  { %v11019_v26 = vpop.eup %11018  ;;  %6939 = vmatpush.bf16.msrb.mxu3 %v10034_v51  ;;  %v10018_v21 = vor.u32 %v10825_v34, %v10015_v58 }
 0x5dd   :  { %v6102_v17 = vmul.f32 %v6096_v50, %v15539_v16  ;;  %v6103_v49 = vmul.f32 %v11019_v26, %v6092_v4  ;;  %v9989_v4 = vld [vmem:[%s16211_s5] sm:$0xf]  ;;  %v10823_v26 = vld [vmem:[%s16211_s5 + $0x14] sm:$0xf0] }
 0x5de   :  { %v11021_v29 = vpop.eup %11020  ;;  %6912 = vmatpush.bf16.msrb.mxu1 %v10042_v30  ;;  %6925 = vmatpush.bf16.msrb.mxu2 %v10046_v47  ;;  %v9990_v11 = vor.u32 %v10822_v46, %v9989_v4  ;;  %v9998_v52 = vor.u32 %v10823_v26, %v9997_v14 }
 0x5df   :  { %v16095_v16 = vadd.f32 %v6103_v49, %v6102_v17  ;;  %v6100_v44 = vmul.f32 0.5, %v11021_v29  ;;  %v9999_v17 = vld [vmem:[%s16211_s5 + $0x18] sm:$0xf0] }
 0x5e0   :  { %6940 = vmatpush.bf16.msrb.mxu3 %v10018_v21  ;;  %6902 = vmatpush.bf16.msrb.mxu0 %v9990_v11  ;;  %v10002_v38 = vor.u32 %v10821_v1, %v9999_v17 }
 0x5e1   :  { %11022 = vtanh.f32 %v16095_v16  ;;  %v16113_v5 = vpop.f32.mrf.mxu2  ;;  %v16115_v6 = vpop.f32.mrf.mxu3  ;;  %v6101_v27 = vadd.f32 0.5, %v6100_v44 }
 0x5e2   :  { %v6317_v18 = vpop.f32.mrf.mxu0  ;;  %v6330_v48 = vpop.f32.mrf.mxu1  ;;  %6913 = vmatpush.bf16.msrb.mxu1 %v10026_v63  ;;  %6926 = vmatpush.bf16.msrb.mxu2 %v10030_v12 }
 0x5e4   :  { %6941 = vmatpush.bf16.msrb.mxu3 %v10002_v38 }
 0x5e6   :  { %6914 = vmatpush.bf16.msrb.mxu1 %v10010_v55  ;;  %6927 = vmatpush.bf16.msrb.mxu2 %v10014_v9 }
 0x5e7   :  { %v11023_v25 = vpop.eup %11022 }
 0x5e8   :  { %v6106_v50 = vmul.f32 %v11023_v25, %v6101_v27 }
 0x5e9   :  { %v6343_v31 = vpop.f32.mrf.mxu2  ;;  %v6356_v32 = vpop.f32.mrf.mxu3 }
 0x5ea   :  { %9725 = vst [vmem:[%s16215_s9 + $0x30] sm:$0xff] %v6106_v50  ;;  %v6490_v49 = vpack.c.bf16 %v6106_v50, %v6106_v50  ;;  %v6392_v30 = vpop.f32.mrf.mxu0  ;;  %v6405_v42 = vpop.f32.mrf.mxu1  ;;  %6915 = vmatpush.bf16.msrb.mxu1 %v9994_v37  ;;  %6928 = vmatpush.bf16.msrb.mxu2 %v9998_v52 }
 0x5eb   :  { %v6393_v47 = vadd.f32 %v6392_v30, %v16063_v7  ;;  %v6406_v10 = vadd.f32 %v6405_v42, %v16065_v8 }
 0x5ec   :  { %6691 = vmatmul.bf16.vlgmr.msra.gmra.mxu0 %v6490_v49  ;;  %6704 = vmatmul.bf16.vlgmr.msra.gmra.mxu1 %v6490_v49 }
 0x5ed   :  { %v6435_v29 = vadd.f32 %v6393_v47, %v11816_v56  ;;  %v6436_v33 = vadd.f32 %v6406_v10, %v11824_v0  ;;  %6717 = vmatmul.bf16.vlgmr.msra.gmra.mxu2 %v6490_v49  ;;  %6730 = vmatmul.bf16.vlgmr.msra.gmra.mxu3 %v6490_v49 }
 0x5ef   :  { %v6439_v45 = vmul.f32 0.5, %v6435_v29  ;;  %v6443_v43 = vmul.f32 0.5, %v6436_v33 }
 0x5f1   :  { %11024 = vtanh.f32 %v6439_v45  ;;  %v6418_v40 = vpop.f32.mrf.mxu2  ;;  %v6431_v15 = vpop.f32.mrf.mxu3 }
 0x5f2   :  { %11026 = vtanh.f32 %v6443_v43  ;;  %v6419_v7 = vadd.f32 %v6418_v40, %v16113_v5  ;;  %v6432_v8 = vadd.f32 %v6431_v15, %v16115_v6  ;;  %v6394_v60 = vpop.f32.mrf.mxu0  ;;  %v6407_v63 = vpop.f32.mrf.mxu1 }
 0x5f4   :  { %v6437_v56 = vadd.f32 %v6419_v7, %v11866_v23  ;;  %v6438_v0 = vadd.f32 %v6432_v8, %v11874_v28 }
 0x5f6   :  { %11028 = vtanh.f32 %v6437_v56  ;;  %v6448_v35 = vmul.f32 0.5, %v6438_v0 }
 0x5f7   :  { %v11025_v39 = vpop.eup %11024 }
 0x5f8   :  { %v11027_v44 = vpop.eup %11026  ;;  %v6441_v18 = vmul.f32 0.5, %v11025_v39  ;;  %11030 = vtanh.f32 %v6448_v35 }
 0x5f9   :  { %v6445_v48 = vmul.f32 0.5, %v11027_v44  ;;  %v6420_v12 = vpop.f32.mrf.mxu2  ;;  %v6433_v53 = vpop.f32.mrf.mxu3 }
 0x5fa   :  { %v6442_v51 = vadd.f32 0.5, %v6441_v18 }
 0x5fb   :  { %v6446_v54 = vadd.f32 0.5, %v6445_v48 }
 0x5fc   :  { %v11029_v5 = vpop.eup %11028 }
 0x5fd   :  { %v6452_v6 = vmul.f32 %v6446_v54, %v15706_v24  ;;  %v6453_v57 = vmul.f32 %v11029_v5, %v6442_v51 }
 0x5fe   :  { %v11031_v41 = vpop.eup %11030 }
 0x5ff   :  { %v6454_v61 = vadd.f32 %v6453_v57, %v6452_v6  ;;  %v6450_v23 = vmul.f32 0.5, %v11031_v41 }
 0x601   :  { %11032 = vtanh.f32 %v6454_v61  ;;  %6984 = vst [vmem:[%s16216_s11] sm:$0xff] %v6454_v61  ;;  %v6451_v28 = vadd.f32 0.5, %v6450_v23 }
 0x607   :  { %v11033_v62 = vpop.eup %11032 }
 0x608   :  { %v6456_v20 = vmul.f32 %v11033_v62, %v6451_v28 }
 0x60a   :  { %v6457_v36 = vpack.c.bf16 %v6456_v20, %v6456_v20  ;;  %6980 = vst [vmem:[%s16217_s10] sm:$0xff] %v6456_v20 }
 0x60c   :  { %6903 = vmatmul.bf16.vlgmr.msrb.gmra.mxu0 %v6457_v36  ;;  %6916 = vmatmul.bf16.vlgmr.msrb.gmra.mxu1 %v6457_v36 }
 0x60d   :  { %6929 = vmatmul.bf16.vlgmr.msrb.gmra.mxu2 %v6457_v36  ;;  %6942 = vmatmul.bf16.vlgmr.msrb.gmra.mxu3 %v6457_v36 }
 0x669   :  { %v6692_v24 = vpop.f32.mrf.mxu0  ;;  %v6705_v55 = vpop.f32.mrf.mxu1 }
 0x670   :  { %v6718_v9 = vpop.f32.mrf.mxu2  ;;  %v6731_v34 = vpop.f32.mrf.mxu3 }
 0x671   :  { %v6694_v58 = vpop.f32.mrf.mxu0  ;;  %v6707_v27 = vpop.f32.mrf.mxu1 }
 0x678   :  { %v6720_v21 = vpop.f32.mrf.mxu2  ;;  %v6733_v25 = vpop.f32.mrf.mxu3 }
 0x689   :  { %v6904_v4 = vpop.f32.mrf.mxu0  ;;  %v6917_v46 = vpop.f32.mrf.mxu1 }
 0x68a   :  { %v6905_v22 = vadd.f32 %v6904_v4, %v6692_v24  ;;  %v6918_v50 = vadd.f32 %v6917_v46, %v6705_v55 }
 0x68c   :  { %v6947_v11 = vadd.f32 %v6905_v22, %v12226_v2  ;;  %v6948_v59 = vadd.f32 %v6918_v50, %v12228_v3 }
 0x68e   :  { %v6951_v14 = vmul.f32 0.5, %v6947_v11  ;;  %v6955_v26 = vmul.f32 0.5, %v6948_v59 }
 0x690   :  { %11034 = vtanh.f32 %v6951_v14  ;;  %v6930_v31 = vpop.f32.mrf.mxu2  ;;  %v6943_v32 = vpop.f32.mrf.mxu3 }
 0x691   :  { %11036 = vtanh.f32 %v6955_v26  ;;  %v6931_v37 = vadd.f32 %v6930_v31, %v6718_v9  ;;  %v6944_v1 = vadd.f32 %v6943_v32, %v6731_v34  ;;  %v6906_v17 = vpop.f32.mrf.mxu0  ;;  %v6919_v49 = vpop.f32.mrf.mxu1 }
 0x693   :  { %v6949_v30 = vadd.f32 %v6931_v37, %v12250_v13  ;;  %v6950_v42 = vadd.f32 %v6944_v1, %v12260_v19 }
 0x695   :  { %11038 = vtanh.f32 %v6949_v30  ;;  %v6960_v52 = vmul.f32 0.5, %v6950_v42 }
 0x696   :  { %v11035_v38 = vpop.eup %11034 }
 0x697   :  { %v11037_v2 = vpop.eup %11036  ;;  %v6953_v47 = vmul.f32 0.5, %v11035_v38  ;;  %11040 = vtanh.f32 %v6960_v52 }
 0x698   :  { %v6957_v3 = vmul.f32 0.5, %v11037_v2  ;;  %v6932_v10 = vpop.f32.mrf.mxu2  ;;  %v6945_v29 = vpop.f32.mrf.mxu3 }
 0x699   :  { %v6954_v33 = vadd.f32 0.5, %v6953_v47 }
 0x69a   :  { %v6958_v45 = vadd.f32 0.5, %v6957_v3 }
 0x69b   :  { %v11039_v43 = vpop.eup %11038 }
 0x69c   :  { %v6964_v40 = vmul.f32 %v6958_v45, %v16095_v16  ;;  %v6965_v15 = vmul.f32 %v11039_v43, %v6954_v33 }
 0x69d   :  { %v11041_v7 = vpop.eup %11040 }
 0x69e   :  { %v6966_v8 = vadd.f32 %v6965_v15, %v6964_v40  ;;  %v6962_v13 = vmul.f32 0.5, %v11041_v7 }
 0x6a0   :  { %11042 = vtanh.f32 %v6966_v8  ;;  %6985 = vst [vmem:[%s16216_s11 + $0x8] sm:$0xff] %v6966_v8  ;;  %v6963_v19 = vadd.f32 0.5, %v6962_v13 }
 0x6a6   :  { %v11043_v60 = vpop.eup %11042 }
 0x6a7   :  { %v6968_v63 = vmul.f32 %v11043_v60, %v6963_v19 }
 0x6a9   :  { %10115 = vst [vmem:[%s16215_s9 + $0x38] sm:$0xff] %v6968_v63 }
 0x6aa   :  { %6981 = vst [vmem:[%s16217_s10 + $0x8] sm:$0xff] %v6968_v63 }

</bundles_post_ra>
